<compile_context>
chip_gen: v5e
topology: v5e:2x2
jax: 0.10.0
libtpu: 0.0.40
codegen_flags: <defaults>
</compile_context>

<pallas_src>
import jax
import jax.numpy as jnp
from jax.experimental import pallas as pl
from jax.experimental.pallas import tpu as pltpu

NUM_FEATURES = 2048  # fixed by the module: nn.Linear(in_features=2048, ...)


def _round_up(x, m):
    return ((x + m - 1) // m) * m


def _pick_batch_tile(B, C, S, vmem_budget_bytes=20 << 20):
    """Pick a batch tile so the pipelined input fits comfortably in VMEM.

    Per batch row we budget: 2x (double-buffered) bf16 input block plus one
    f32 upcast temporary used by the in-kernel reduction:
        2 * (C*S*2) + (C*S*4) = 8*C*S bytes.
    """
    per_row = 8 * C * S
    tb = max(1, vmem_budget_bytes // per_row)
    tb = min(tb, 256)  # amortizes ~0.35us/step overhead without huge blocks
    if B <= tb:
        return B
    return max(8, (tb // 8) * 8)


def _head_kernel(x_ref, w_ref, b_ref, o_ref):
    """Fused: spatial sum (pool) + fc matmul + bias + sigmoid.

    x_ref: (TB, C, S)  NCHW backbone features, spatial flattened onto lanes
    w_ref: (C, Npad)   fc weight, pre-scaled by 1/S (mean folded in), f32
    b_ref: (1, Npad)   fc bias (padded), f32
    o_ref: (TB, Npad)  sigmoid probabilities
    """
    x = x_ref[...].astype(jnp.float32)                 # f32 accumulation path
    pooled = jnp.sum(x, axis=-1)                       # (TB, C) lane reduce (XLU)
    logits = jnp.dot(pooled, w_ref[...],
                     preferred_element_type=jnp.float32)  # (TB, Npad) on MXU
    logits = logits + b_ref[...]
    o_ref[...] = jax.nn.sigmoid(logits).astype(o_ref.dtype)


def multilabel_resnet_head(feats_nchw, w, b, *, feature_dtype=jnp.bfloat16):
    """feats_nchw: (B, 2048, H, W) backbone features (PyTorch NCHW layout).
    w: (2048, num_classes) fc weight (= PyTorch weight.T), b: (num_classes,).
    Returns (B, num_classes) sigmoid probabilities = sigmoid(Linear(avgpool(x)))."""
    B, C, H, W = feats_nchw.shape
    assert C == NUM_FEATURES
    S = H * W
    N = w.shape[1]
    Npad = _round_up(N, 128)

    # Free reshape (no HBM round-trip): NCHW (B,C,H,W) -> (B,C,S).
    x = feats_nchw.reshape(B, C, S)
    if x.dtype != feature_dtype:
        x = x.astype(feature_dtype)  # bf16 halves the dominant HBM read

    # Fold 1/S mean scale into the fc weight; pad weight/bias to lane-dense Npad.
    w_s = w.astype(jnp.float32) / jnp.float32(S)
    w_p = jnp.pad(w_s, ((0, 0), (0, Npad - N)))
    b_p = jnp.pad(b.astype(jnp.float32), (0, Npad - N)).reshape(1, Npad)

    TB = _pick_batch_tile(B, C, S)
    grid = (pl.cdiv(B, TB),)

    cost = pl.CostEstimate(
        flops=2 * B * C * S + 2 * B * C * Npad,
        transcendentals=B * Npad,
        bytes_accessed=(x.size * x.dtype.itemsize
                        + w_p.size * 4 + b_p.size * 4 + B * Npad * 4),
    )

    out = pl.pallas_call(
        _head_kernel,
        out_shape=jax.ShapeDtypeStruct((B, Npad), jnp.float32),
        grid_spec=pl.GridSpec(
            grid=grid,
            in_specs=[
                pl.BlockSpec((TB, C, S), lambda i: (i, 0, 0)),   # batch-tiled
                pl.BlockSpec((C, Npad), lambda i: (0, 0)),       # VMEM-resident
                pl.BlockSpec((1, Npad), lambda i: (0, 0)),       # VMEM-resident
            ],
            out_specs=pl.BlockSpec((TB, Npad), lambda i: (i, 0)),
        ),
        compiler_params=pltpu.CompilerParams(
            dimension_semantics=("parallel",),     # 2 TCs on v7x
            vmem_limit_bytes=64 << 20,
        ),
        cost_estimate=cost,
    )(x, w_p, b_p)

    return out[:, :N]


if __name__ == "__main__":
    key = jax.random.PRNGKey(0)
    k_feat, k_w, k_b = jax.random.split(key, 3)

    # Small shapes consistent with the module: batch=2, 2048-channel backbone
    # feature map with tiny 4x4 spatial extent, num_classes=32.
    B, C, H, W = 2, NUM_FEATURES, 4, 4
    num_classes = 32

    feats = jax.random.normal(k_feat, (B, C, H, W), dtype=jnp.float32)
    # PyTorch Linear stores (out, in); initialized here directly as (in, out)=W^T.
    w = jax.random.normal(k_w, (C, num_classes), dtype=jnp.float32) * 0.02
    b = jax.random.normal(k_b, (num_classes,), dtype=jnp.float32) * 0.02

    out = multilabel_resnet_head(feats, w, b)
    out = jax.block_until_ready(out)

    # Pure-JAX reference, computed from the same bf16-cast features the kernel
    # consumes: sigmoid(Linear(global_avg_pool(features))).
    feats_bf = feats.astype(jnp.bfloat16).astype(jnp.float32)
    pooled_ref = jnp.mean(feats_bf, axis=(2, 3))
    logits_ref = jax.lax.dot_general(
        pooled_ref, w, (((1,), (0,)), ((), ())),
        precision=jax.lax.Precision.HIGHEST) + b
    ref = jax.nn.sigmoid(logits_ref)

    assert out.shape == (B, num_classes)
    assert jnp.allclose(out, ref, atol=5e-3, rtol=1e-2), (
        float(jnp.max(jnp.abs(out - ref))))

    print("KERNEL_OK")
</pallas_src>

<mosaic_0001>
module attributes {stable_mosaic.version = 11 : i64} {
  func.func @_head_kernel(%arg0: i32, %arg1: memref<2x2048x16xbf16, #tpu.memory_space<vmem>>, %arg2: memref<2048x128xf32, #tpu.memory_space<vmem>>, %arg3: memref<1x128xf32, #tpu.memory_space<vmem>>, %arg4: memref<2x128xf32, #tpu.memory_space<vmem>>) attributes {dimension_semantics = [#tpu.dimension_semantics<parallel>], iteration_bounds = array<i64: 1>, scalar_prefetch = 0 : i64, scratch_operands = 0 : i64, tpu.core_type = #tpu.core_type<tc>, window_params = [{transform_indices = @transform_0, window_bounds = array<i64: 2, 2048, 16>}, {pipeline_mode = #tpu.pipeline_mode<synchronous>, transform_indices = @transform_1, window_bounds = array<i64: 2048, 128>}, {pipeline_mode = #tpu.pipeline_mode<synchronous>, transform_indices = @transform_2, window_bounds = array<i64: 1, 128>}, {transform_indices = @transform_3, window_bounds = array<i64: 2, 128>}]} {
    %c0 = arith.constant 0 : index
    %c0_0 = arith.constant 0 : index
    %c0_1 = arith.constant 0 : index
    %0 = vector.load %arg1[%c0, %c0_0, %c0_1] : memref<2x2048x16xbf16, #tpu.memory_space<vmem>>, vector<2x2048x16xbf16>
    %1 = arith.extf %0 : vector<2x2048x16xbf16> to vector<2x2048x16xf32>
    %cst = arith.constant dense<0.000000e+00> : vector<2x2048xf32>
    %2 = vector.multi_reduction <add>, %1, %cst [2] : vector<2x2048x16xf32> to vector<2x2048xf32>
    %c0_2 = arith.constant 0 : index
    %c0_3 = arith.constant 0 : index
    %3 = vector.load %arg2[%c0_2, %c0_3] : memref<2048x128xf32, #tpu.memory_space<vmem>>, vector<2048x128xf32>
    %cst_4 = arith.constant dense<0.000000e+00> : vector<2x128xf32>
    %4 = tpu.matmul %2, %3, %cst_4 {dimension_numbers = #tpu.dot_dimension_numbers<[1], [0], [0], [1], [0, 0, 1, 1], [], []>} : vector<2x2048xf32>, vector<2048x128xf32>, vector<2x128xf32> -> vector<2x128xf32>
    %c0_5 = arith.constant 0 : index
    %c0_6 = arith.constant 0 : index
    %5 = vector.load %arg3[%c0_5, %c0_6] : memref<1x128xf32, #tpu.memory_space<vmem>>, vector<1x128xf32>
    %6 = vector.broadcast %5 : vector<1x128xf32> to vector<2x128xf32>
    %7 = arith.addf %4, %6 : vector<2x128xf32>
    %8 = arith.negf %7 : vector<2x128xf32>
    %9 = math.exp %8 : vector<2x128xf32>
    %cst_7 = arith.constant 1.000000e+00 : f32
    %10 = vector.broadcast %cst_7 : f32 to vector<2x128xf32>
    %11 = arith.addf %10, %9 : vector<2x128xf32>
    %12 = arith.divf %10, %11 : vector<2x128xf32>
    %c0_8 = arith.constant 0 : index
    %c0_9 = arith.constant 0 : index
    %13 = vector.load %arg4[%c0_8, %c0_9] : memref<2x128xf32, #tpu.memory_space<vmem>>, vector<2x128xf32>
    tpu.vector_store %arg4[%c0_8, %c0_9], %12 {strides = array<i32>} : memref<2x128xf32, #tpu.memory_space<vmem>>, vector<2x128xf32>,
    return
  }
  func.func @transform_0(%arg0: i32) -> (i32, i32, i32) {
    %c0_i32 = arith.constant 0 : i32
    %c0_i32_0 = arith.constant 0 : i32
    %c0_i32_1 = arith.constant 0 : i32
    return %arg0, %c0_i32, %c0_i32_0 : i32, i32, i32
  }
  func.func @transform_1(%arg0: i32) -> (i32, i32) {
    %c0_i32 = arith.constant 0 : i32
    %c0_i32_0 = arith.constant 0 : i32
    %c0_i32_1 = arith.constant 0 : i32
    return %c0_i32, %c0_i32_0 : i32, i32
  }
  func.func @transform_2(%arg0: i32) -> (i32, i32) {
    %c0_i32 = arith.constant 0 : i32
    %c0_i32_0 = arith.constant 0 : i32
    %c0_i32_1 = arith.constant 0 : i32
    return %c0_i32, %c0_i32_0 : i32, i32
  }
  func.func @transform_3(%arg0: i32) -> (i32, i32) {
    %c0_i32 = arith.constant 0 : i32
    %c0_i32_0 = arith.constant 0 : i32
    return %arg0, %c0_i32 : i32, i32
  }
}

</mosaic_0001>

<bundles_post_ra>
// kernel: tpu_custom_call.1
= control target key start
LH: loop header
LB: loop body
LE: loop exit
PB: predicated region body
PF: predicated region fallthrough
CT: control target
= control target key end

     0   :  { %vm1039_vm0 = vcmask 130048   ;;  %s10184_s0 = inlined_call_operand.vmem [shape: bf16[2,2048,16], index: 0, kind: input, shape index: {}]   ;;  %s10185_s1 = inlined_call_operand.vmem [shape: f32[2048,128], index: 1, kind: input, shape index: {}]   ;;  %s10186_s2 = inlined_call_operand.vmem [shape: f32[1,128], index: 2, kind: input, shape index: {}]   ;;  %s10187_s3 = inlined_call_operand.hbm [shape: f32[2,128], index: 3, kind: output, shape index: {}]  }
   0x1   :  { %v5787_v0 = vld [vmem:[%s10184_s0 + $0x10] sm:$0xff]   ;;  %v5786_v1 = vld [vmem:[%s10184_s0 + $0x8] sm:$0xff]   ;;  %v4763_v2 = vld [vmem:[%s10184_s0] sm:$0xff]  }
   0x2   :  { %v4772_v3 = vunpack.c.l.bf16 %v5787_v0  ;;  %v4768_v4 = vunpack.c.l.bf16 %v5786_v1  ;;  %v4764_v5 = vunpack.c.l.bf16 %v4763_v2 }
   0x4   :  { %v1052_v6 = vsel %vm1039_vm0, %v4772_v3, 0.0  ;;  %v1046_v7 = vsel %vm1039_vm0, %v4768_v4, 0.0  ;;  %v1040_v8 = vsel %vm1039_vm0, %v4764_v5, 0.0 }
   0x5   :  { %8 = vsyncpa [#allocation3], 0  ;;  %1053 = vadd.xlane.f32.xlu2 %v1052_v6  ;;  %1047 = vadd.xlane.f32.xlu1 %v1046_v7  ;;  %v4773_v9 = vunpack.c.h.bf16 %v5787_v0  ;;  %v4769_v10 = vunpack.c.h.bf16 %v5786_v1  ;;  %v4765_v11 = vunpack.c.h.bf16 %v4763_v2  ;;  %v5789_v15 = vld [vmem:[%s10184_s0 + $0x20] sm:$0xff]   ;;  %v5788_v16 = vld [vmem:[%s10184_s0 + $0x18] sm:$0xff]   ;;  %vm3353_vm1 = vcmask 130112   ;;  %s4752_s9 = sshll.u32 %s10187_s3, 4  ;;  %s4753_s9 = int_to_ptr.hbm [resolvable:$true] %s4752_s9 }
   0x6   :  { %1041 = vadd.xlane.f32.xlu0 %v1040_v8  ;;  %v4780_v17 = vunpack.c.l.bf16 %v5789_v15  ;;  %v4777_v18 = vunpack.c.h.bf16 %v5788_v16  ;;  %v4776_v19 = vunpack.c.l.bf16 %v5788_v16  ;;  %v5790_v23 = vld [vmem:[%s10184_s0 + $0x28] sm:$0xff]   ;;  %v4781_v26 = vunpack.c.h.bf16 %v5789_v15  ;;  %v5792_v30 = vld [vmem:[%s10184_s0 + $0x38] sm:$0xff]   ;;  %v5791_v31 = vld [vmem:[%s10184_s0 + $0x30] sm:$0xff]  }
   0x7   :  { %v1055_v12 = vsel %vm1039_vm0, %v4773_v9, 0.0  ;;  %v1049_v13 = vsel %vm1039_vm0, %v4769_v10, 0.0  ;;  %v1043_v14 = vsel %vm1039_vm0, %v4765_v11, 0.0  ;;  %v4785_v24 = vunpack.c.h.bf16 %v5790_v23  ;;  %v5793_v38 = vld [vmem:[%s10184_s0 + $0x40] sm:$0xff]   ;;  %v5795_v45 = vld [vmem:[%s10184_s0 + $0x50] sm:$0xff]   ;;  %v5794_v46 = vld [vmem:[%s10184_s0 + $0x48] sm:$0xff]  }
   0x8   :  { %v1064_v20 = vsel %vm1039_vm0, %v4780_v17, 0.0  ;;  %v1061_v21 = vsel %vm1039_vm0, %v4777_v18, 0.0  ;;  %v1058_v22 = vsel %vm1039_vm0, %v4776_v19, 0.0  ;;  %v4784_v25 = vunpack.c.l.bf16 %v5790_v23  ;;  %v5796_v53 = vld [vmem:[%s10184_s0 + $0x58] sm:$0xff]   ;;  %v5798_v60 = vld [vmem:[%s10184_s0 + $0x68] sm:$0xff]   ;;  %v5797_v61 = vld [vmem:[%s10184_s0 + $0x60] sm:$0xff]  }
   0x9   :  { %v1073_v27 = vsel %vm1039_vm0, %v4785_v24, 0.0  ;;  %v1067_v29 = vsel %vm1039_vm0, %v4781_v26, 0.0  ;;  %v4792_v32 = vunpack.c.l.bf16 %v5792_v30  ;;  %v4789_v33 = vunpack.c.h.bf16 %v5791_v31  ;;  %v5799_v4 = vld [vmem:[%s10184_s0 + $0x70] sm:$0xff]   ;;  %v5801_v11 = vld [vmem:[%s10184_s0 + $0x80] sm:$0xff]   ;;  %v5802_v19 = vld [vmem:[%s10184_s0 + $0x88] sm:$0xff]  }
   0xa   :  { %v1070_v28 = vsel %vm1039_vm0, %v4784_v25, 0.0  ;;  %v4788_v34 = vunpack.c.l.bf16 %v5791_v31  ;;  %v4797_v39 = vunpack.c.h.bf16 %v5793_v38  ;;  %v4796_v40 = vunpack.c.l.bf16 %v5793_v38  ;;  %v5804_v26 = vld [vmem:[%s10184_s0 + $0x98] sm:$0xff]  }
   0xb   :  { %v1082_v35 = vsel %vm1039_vm0, %v4792_v32, 0.0  ;;  %v1079_v36 = vsel %vm1039_vm0, %v4789_v33, 0.0  ;;  %v4793_v41 = vunpack.c.h.bf16 %v5792_v30  ;;  %v4804_v47 = vunpack.c.l.bf16 %v5795_v45 }
   0xc   :  { %v1076_v37 = vsel %vm1039_vm0, %v4788_v34, 0.0  ;;  %v1091_v42 = vsel %vm1039_vm0, %v4797_v39, 0.0  ;;  %v1088_v43 = vsel %vm1039_vm0, %v4796_v40, 0.0  ;;  %v4801_v48 = vunpack.c.h.bf16 %v5794_v46  ;;  %v5805_v34 = vld [vmem:[%s10184_s0 + $0xa0] sm:$0xff]  }
   0xd   :  { %1056 = vadd.xlane.f32.xlu2 %v1055_v12  ;;  %1050 = vadd.xlane.f32.xlu1 %v1049_v13  ;;  %v1085_v44 = vsel %vm1039_vm0, %v4793_v41, 0.0  ;;  %v4800_v49 = vunpack.c.l.bf16 %v5794_v46  ;;  %v1100_v50 = vsel %vm1039_vm0, %v4804_v47, 0.0  ;;  %v4809_v54 = vunpack.c.h.bf16 %v5796_v53  ;;  %v5800_v12 = vld [vmem:[%s10184_s0 + $0x78] sm:$0xff]   ;;  %v5807_v41 = vld [vmem:[%s10184_s0 + $0xb0] sm:$0xff]  }
   0xe   :  { %1044 = vadd.xlane.f32.xlu0 %v1043_v14  ;;  %v1097_v51 = vsel %vm1039_vm0, %v4801_v48, 0.0  ;;  %v4808_v55 = vunpack.c.l.bf16 %v5796_v53  ;;  %v4805_v56 = vunpack.c.h.bf16 %v5795_v45  ;;  %v4816_v62 = vunpack.c.l.bf16 %v5798_v60 }
   0xf   :  { %v1094_v52 = vsel %vm1039_vm0, %v4800_v49, 0.0  ;;  %v1109_v57 = vsel %vm1039_vm0, %v4809_v54, 0.0  ;;  %v4813_v63 = vunpack.c.h.bf16 %v5797_v61  ;;  %v4812_v0 = vunpack.c.l.bf16 %v5797_v61  ;;  %v5808_v49 = vld [vmem:[%s10184_s0 + $0xb8] sm:$0xff]  }
  0x10   :  { %v1106_v58 = vsel %vm1039_vm0, %v4808_v55, 0.0  ;;  %v1103_v59 = vsel %vm1039_vm0, %v4805_v56, 0.0  ;;  %v1118_v1 = vsel %vm1039_vm0, %v4816_v62, 0.0  ;;  %v4821_v5 = vunpack.c.h.bf16 %v5799_v4 }
  0x11   :  { %v1115_v2 = vsel %vm1039_vm0, %v4813_v63, 0.0  ;;  %v1112_v3 = vsel %vm1039_vm0, %v4812_v0, 0.0  ;;  %v4820_v6 = vunpack.c.l.bf16 %v5799_v4  ;;  %v4817_v7 = vunpack.c.h.bf16 %v5798_v60  ;;  %v5809_v60 = vld [vmem:[%s10184_s0 + $0xc0] sm:$0xff]  }
  0x12   :  { %v1127_v8 = vsel %vm1039_vm0, %v4821_v5, 0.0  ;;  %v4828_v13 = vunpack.c.l.bf16 %v5801_v11  ;;  %v4825_v14 = vunpack.c.h.bf16 %v5800_v12  ;;  %v4824_v15 = vunpack.c.l.bf16 %v5800_v12 }
  0x13   :  { %v1124_v9 = vsel %vm1039_vm0, %v4820_v6, 0.0  ;;  %v1121_v10 = vsel %vm1039_vm0, %v4817_v7, 0.0  ;;  %v4861_v62 = vunpack.c.h.bf16 %v5809_v60  ;;  %v4860_v63 = vunpack.c.l.bf16 %v5809_v60  ;;  %v5811_v6 = vld [vmem:[%s10184_s0 + $0xd0] sm:$0xff]  }
  0x14   :  { %v1136_v16 = vsel %vm1039_vm0, %v4828_v13, 0.0  ;;  %v1133_v17 = vsel %vm1039_vm0, %v4825_v14, 0.0  ;;  %v1130_v18 = vsel %vm1039_vm0, %v4824_v15, 0.0  ;;  %v4869_v7 = vunpack.c.h.bf16 %v5811_v6 }
  0x15   :  { %1065 = vadd.xlane.f32.xlu2 %v1064_v20  ;;  %1062 = vadd.xlane.f32.xlu1 %v1061_v21  ;;  %v4833_v20 = vunpack.c.h.bf16 %v5802_v19  ;;  %v4832_v21 = vunpack.c.l.bf16 %v5802_v19  ;;  %v1187_v4 = vsel %vm1039_vm0, %v4861_v62, 0.0  ;;  %v1184_v5 = vsel %vm1039_vm0, %v4860_v63, 0.0  ;;  %v5818_v62 = vld [vmem:[%s10184_s0 + $0x108] sm:$0xff]  }
  0x16   :  { %1059 = vadd.xlane.f32.xlu0 %v1058_v22  ;;  %v4829_v22 = vunpack.c.h.bf16 %v5801_v11  ;;  %v1199_v13 = vsel %vm1039_vm0, %v4869_v7, 0.0  ;;  %vm3357_vm2 = vcmask 195712   ;;  %vm3361_vm3 = vcmask 261312  }
  0x17   :  { %v1145_v23 = vsel %vm1039_vm0, %v4833_v20, 0.0  ;;  %v1142_v24 = vsel %vm1039_vm0, %v4832_v21, 0.0  ;;  %vm3365_vm4 = vcmask 326912   ;;  %vm3369_vm5 = vcmask 392512  }
  0x18   :  { %v1139_v25 = vsel %vm1039_vm0, %v4829_v22, 0.0  ;;  %vm3373_vm6 = vcmask 458112   ;;  %vm3377_vm7 = vcmask 523712   ;;  %vm10189_vm8 = vcmask 589312  }
  0x19   :  { %vm3385_vm9 = vcmask 654912   ;;  %vm10190_vm10 = vcmask 720512   ;;  %vm3393_vm11 = vcmask 786112   ;;  %vm10188_vm12 = vcmask 851712  }
  0x1a   :  { %vm3401_vm13 = vcmask 917312   ;;  %vm3405_vm14 = vcmask 982912   ;;  %vm3409_vm15 = vcmask 1048512  }
  0x1d   :  { %1074 = vadd.xlane.f32.xlu2 %v1073_v27  ;;  %1071 = vadd.xlane.f32.xlu1 %v1070_v28  ;;  %v5803_v27 = vld [vmem:[%s10184_s0 + $0x90] sm:$0xff]   ;;  %v4840_v28 = vunpack.c.l.bf16 %v5804_v26 }
  0x1e   :  { %1068 = vadd.xlane.f32.xlu0 %v1067_v29  ;;  %v4837_v29 = vunpack.c.h.bf16 %v5803_v27  ;;  %v4836_v30 = vunpack.c.l.bf16 %v5803_v27  ;;  %v5814_v27 = vld [vmem:[%s10184_s0 + $0xe8] sm:$0xff]  }
  0x1f   :  { %v1154_v31 = vsel %vm1039_vm0, %v4840_v28, 0.0  ;;  %v4881_v28 = vunpack.c.h.bf16 %v5814_v27 }
  0x20   :  { %v1151_v32 = vsel %vm1039_vm0, %v4837_v29, 0.0  ;;  %v1148_v33 = vsel %vm1039_vm0, %v4836_v30, 0.0  ;;  %v4880_v29 = vunpack.c.l.bf16 %v5814_v27  ;;  %v5822_v27 = vld [vmem:[%s10184_s0 + $0x128] sm:$0xff]  }
  0x25   :  { %1083 = vadd.xlane.f32.xlu2 %v1082_v35  ;;  %1080 = vadd.xlane.f32.xlu1 %v1079_v36  ;;  %v4845_v35 = vunpack.c.h.bf16 %v5805_v34  ;;  %v4844_v36 = vunpack.c.l.bf16 %v5805_v34  ;;  %v1217_v34 = vsel %vm1039_vm0, %v4881_v28, 0.0  ;;  %v5821_v28 = vld [vmem:[%s10184_s0 + $0x120] sm:$0xff]  }
  0x26   :  { %1077 = vadd.xlane.f32.xlu0 %v1076_v37  ;;  %v4841_v37 = vunpack.c.h.bf16 %v5804_v26 }
  0x27   :  { %v1163_v38 = vsel %vm1039_vm0, %v4845_v35, 0.0  ;;  %v1160_v39 = vsel %vm1039_vm0, %v4844_v36, 0.0  ;;  %v1214_v35 = vsel %vm1039_vm0, %v4880_v29, 0.0  ;;  %v4912_v29 = vunpack.c.l.bf16 %v5822_v27 }
  0x28   :  { %v1157_v40 = vsel %vm1039_vm0, %v4841_v37, 0.0  ;;  %v5816_v37 = vld [vmem:[%s10184_s0 + $0xf8] sm:$0xff]  }
  0x2d   :  { %1092 = vadd.xlane.f32.xlu2 %v1091_v42  ;;  %1089 = vadd.xlane.f32.xlu1 %v1088_v43  ;;  %v5806_v42 = vld [vmem:[%s10184_s0 + $0xa8] sm:$0xff]   ;;  %v4852_v43 = vunpack.c.l.bf16 %v5807_v41 }
  0x2e   :  { %1086 = vadd.xlane.f32.xlu0 %v1085_v44  ;;  %v4849_v44 = vunpack.c.h.bf16 %v5806_v42  ;;  %v4848_v45 = vunpack.c.l.bf16 %v5806_v42 }
  0x2f   :  { %v1172_v46 = vsel %vm1039_vm0, %v4852_v43, 0.0 }
  0x30   :  { %v1169_v47 = vsel %vm1039_vm0, %v4849_v44, 0.0  ;;  %v1166_v48 = vsel %vm1039_vm0, %v4848_v45, 0.0 }
  0x35   :  { %1101 = vadd.xlane.f32.xlu2 %v1100_v50  ;;  %1098 = vadd.xlane.f32.xlu1 %v1097_v51  ;;  %v4857_v50 = vunpack.c.h.bf16 %v5808_v49  ;;  %v4856_v51 = vunpack.c.l.bf16 %v5808_v49 }
  0x36   :  { %1095 = vadd.xlane.f32.xlu0 %v1094_v52  ;;  %v4853_v52 = vunpack.c.h.bf16 %v5807_v41 }
  0x37   :  { %v1181_v56 = vsel %vm1039_vm0, %v4857_v50, 0.0 }
  0x3d   :  { %1110 = vadd.xlane.f32.xlu2 %v1109_v57  ;;  %1107 = vadd.xlane.f32.xlu1 %v1106_v58  ;;  %v1178_v57 = vsel %vm1039_vm0, %v4856_v51, 0.0  ;;  %v1175_v58 = vsel %vm1039_vm0, %v4853_v52, 0.0  ;;  %v4889_v51 = vunpack.c.h.bf16 %v5816_v37 }
  0x3e   :  { %1104 = vadd.xlane.f32.xlu0 %v1103_v59  ;;  %v5810_v59 = vld [vmem:[%s10184_s0 + $0xc8] sm:$0xff]  }
  0x3f   :  { %v4864_v61 = vunpack.c.l.bf16 %v5810_v59  ;;  %v1229_v60 = vsel %vm1039_vm0, %v4889_v51, 0.0 }
  0x45   :  { %1119 = vadd.xlane.f32.xlu2 %v1118_v1  ;;  %1116 = vadd.xlane.f32.xlu1 %v1115_v2 }
  0x46   :  { %1113 = vadd.xlane.f32.xlu0 %v1112_v3  ;;  %v1190_v3 = vsel %vm1039_vm0, %v4864_v61, 0.0  ;;  %v5819_v61 = vld [vmem:[%s10184_s0 + $0x110] sm:$0xff]  }
  0x47   :  { %v4900_v63 = vunpack.c.l.bf16 %v5819_v61 }
  0x4d   :  { %1128 = vadd.xlane.f32.xlu2 %v1127_v8  ;;  %1125 = vadd.xlane.f32.xlu1 %v1124_v9  ;;  %v4868_v8 = vunpack.c.l.bf16 %v5811_v6  ;;  %v4865_v9 = vunpack.c.h.bf16 %v5810_v59 }
  0x4e   :  { %1122 = vadd.xlane.f32.xlu0 %v1121_v10 }
  0x4f   :  { %v1196_v14 = vsel %vm1039_vm0, %v4868_v8, 0.0  ;;  %v1193_v15 = vsel %vm1039_vm0, %v4865_v9, 0.0  ;;  %v1244_v8 = vsel %vm1039_vm0, %v4900_v63, 0.0 }
  0x55   :  { %1137 = vadd.xlane.f32.xlu2 %v1136_v16  ;;  %1134 = vadd.xlane.f32.xlu1 %v1133_v17  ;;  %v5813_v16 = vld [vmem:[%s10184_s0 + $0xe0] sm:$0xff]   ;;  %v5812_v17 = vld [vmem:[%s10184_s0 + $0xd8] sm:$0xff]  }
  0x56   :  { %1131 = vadd.xlane.f32.xlu0 %v1130_v18  ;;  %v4876_v18 = vunpack.c.l.bf16 %v5813_v16  ;;  %v4873_v19 = vunpack.c.h.bf16 %v5812_v17  ;;  %v4872_v20 = vunpack.c.l.bf16 %v5812_v17  ;;  %v4877_v30 = vunpack.c.h.bf16 %v5813_v16 }
  0x57   :  { %v4901_v17 = vunpack.c.h.bf16 %v5819_v61  ;;  %v5824_v61 = vld [vmem:[%s10184_s0 + $0x138] sm:$0xff]  }
  0x58   :  { %v1202_v26 = vsel %vm1039_vm0, %v4872_v20, 0.0  ;;  %v1211_v36 = vsel %vm1039_vm0, %v4877_v30, 0.0  ;;  %v4909_v30 = vunpack.c.h.bf16 %v5821_v28  ;;  %v4921_v63 = vunpack.c.h.bf16 %v5824_v61 }
  0x5d   :  { %1146 = vadd.xlane.f32.xlu2 %v1145_v23  ;;  %1143 = vadd.xlane.f32.xlu1 %v1142_v24  ;;  %v1208_v24 = vsel %vm1039_vm0, %v4876_v18, 0.0 }
  0x5e   :  { %1140 = vadd.xlane.f32.xlu0 %v1139_v25  ;;  %v1205_v25 = vsel %vm1039_vm0, %v4873_v19, 0.0 }
  0x65   :  { %1155 = vadd.xlane.f32.xlu2 %v1154_v31  ;;  %1152 = vadd.xlane.f32.xlu1 %v1151_v32 }
  0x66   :  { %1149 = vadd.xlane.f32.xlu0 %v1148_v33 }
  0x6d   :  { %1164 = vadd.xlane.f32.xlu2 %v1163_v38  ;;  %1161 = vadd.xlane.f32.xlu1 %v1160_v39  ;;  %v5815_v38 = vld [vmem:[%s10184_s0 + $0xf0] sm:$0xff]   ;;  %v4888_v39 = vunpack.c.l.bf16 %v5816_v37 }
  0x6e   :  { %1158 = vadd.xlane.f32.xlu0 %v1157_v40  ;;  %v4885_v40 = vunpack.c.h.bf16 %v5815_v38  ;;  %v4884_v41 = vunpack.c.l.bf16 %v5815_v38  ;;  %v1262_v38 = vsel %vm1039_vm0, %v4912_v29, 0.0 }
  0x6f   :  { %v1226_v45 = vsel %vm1039_vm0, %v4888_v39, 0.0  ;;  %v1259_v39 = vsel %vm1039_vm0, %v4909_v30, 0.0 }
  0x75   :  { %1173 = vadd.xlane.f32.xlu2 %v1172_v46  ;;  %1170 = vadd.xlane.f32.xlu1 %v1169_v47  ;;  %v1223_v46 = vsel %vm1039_vm0, %v4885_v40, 0.0  ;;  %v1220_v47 = vsel %vm1039_vm0, %v4884_v41, 0.0  ;;  %v5823_v41 = vld [vmem:[%s10184_s0 + $0x130] sm:$0xff]  }
  0x76   :  { %1167 = vadd.xlane.f32.xlu0 %v1166_v48  ;;  %v5817_v48 = vld [vmem:[%s10184_s0 + $0x100] sm:$0xff]  }
  0x77   :  { %v4893_v49 = vunpack.c.h.bf16 %v5817_v48  ;;  %v4892_v50 = vunpack.c.l.bf16 %v5817_v48 }
  0x78   :  { %v6211_v53 = vpop.xlane.xlu2 %1053  ;;  %v6213_v54 = vpop.xlane.xlu1 %1047 }
  0x79   :  { %v6215_v55 = vpop.xlane.xlu0 %1041  ;;  %v1232_v59 = vsel %vm1039_vm0, %v4892_v50, 0.0 }
  0x7d   :  { %1182 = vadd.xlane.f32.xlu2 %v1181_v56  ;;  %1179 = vadd.xlane.f32.xlu1 %v1178_v57 }
  0x7e   :  { %1176 = vadd.xlane.f32.xlu0 %v1175_v58  ;;  %v1235_v58 = vsel %vm1039_vm0, %v4893_v49, 0.0 }
  0x80   :  { %v6226_v0 = vpop.xlane.xlu2 %1056  ;;  %v6228_v1 = vpop.xlane.xlu1 %1050 }
  0x81   :  { %v6230_v2 = vpop.xlane.xlu0 %1044 }
  0x85   :  { %1191 = vadd.xlane.f32.xlu2 %v1190_v3  ;;  %1188 = vadd.xlane.f32.xlu1 %v1187_v4  ;;  %v4897_v3 = vunpack.c.h.bf16 %v5818_v62  ;;  %v4896_v4 = vunpack.c.l.bf16 %v5818_v62 }
  0x86   :  { %1185 = vadd.xlane.f32.xlu0 %v1184_v5 }
  0x87   :  { %v1241_v9 = vsel %vm1039_vm0, %v4897_v3, 0.0  ;;  %v4920_v3 = vunpack.c.l.bf16 %v5824_v61  ;;  %v5829_v61 = vld [vmem:[%s10184_s0 + $0x160] sm:$0xff]  }
  0x88   :  { %v6238_v10 = vpop.xlane.xlu2 %1065  ;;  %v6240_v11 = vpop.xlane.xlu1 %1062 }
  0x89   :  { %v6242_v12 = vpop.xlane.xlu0 %1059 }
  0x8d   :  { %1200 = vadd.xlane.f32.xlu2 %v1199_v13  ;;  %1197 = vadd.xlane.f32.xlu1 %v1196_v14  ;;  %v1238_v13 = vsel %vm1039_vm0, %v4896_v4, 0.0  ;;  %v5820_v14 = vld [vmem:[%s10184_s0 + $0x118] sm:$0xff]  }
  0x8e   :  { %1194 = vadd.xlane.f32.xlu0 %v1193_v15  ;;  %v4905_v15 = vunpack.c.h.bf16 %v5820_v14  ;;  %v4904_v16 = vunpack.c.l.bf16 %v5820_v14  ;;  %v1277_v14 = vsel %vm1039_vm0, %v4921_v63, 0.0  ;;  %v4940_v63 = vunpack.c.l.bf16 %v5829_v61 }
  0x90   :  { %v6253_v21 = vpop.xlane.xlu2 %1074  ;;  %v6255_v22 = vpop.xlane.xlu1 %1071 }
  0x91   :  { %v6257_v23 = vpop.xlane.xlu0 %1068 }
  0x95   :  { %1209 = vadd.xlane.f32.xlu2 %v1208_v24  ;;  %1206 = vadd.xlane.f32.xlu1 %v1205_v25  ;;  %v1253_v24 = vsel %vm1039_vm0, %v4905_v15, 0.0  ;;  %v1250_v25 = vsel %vm1039_vm0, %v4904_v16, 0.0  ;;  %v1274_v15 = vsel %vm1039_vm0, %v4920_v3, 0.0  ;;  %v5826_v16 = vld [vmem:[%s10184_s0 + $0x148] sm:$0xff]  }
  0x96   :  { %1203 = vadd.xlane.f32.xlu0 %v1202_v26  ;;  %v1247_v26 = vsel %vm1039_vm0, %v4901_v17, 0.0  ;;  %v4929_v17 = vunpack.c.h.bf16 %v5826_v16 }
  0x98   :  { %v6265_v31 = vpop.xlane.xlu2 %1083  ;;  %v6267_v32 = vpop.xlane.xlu1 %1080  ;;  %v1289_v29 = vsel %vm1039_vm0, %v4929_v17, 0.0  ;;  %v1304_v17 = vsel %vm1039_vm0, %v4940_v63, 0.0 }
  0x99   :  { %v6269_v33 = vpop.xlane.xlu0 %1077 }
  0x9d   :  { %1218 = vadd.xlane.f32.xlu2 %v1217_v34  ;;  %1215 = vadd.xlane.f32.xlu1 %v1214_v35  ;;  %v4908_v34 = vunpack.c.l.bf16 %v5821_v28 }
  0x9e   :  { %1212 = vadd.xlane.f32.xlu0 %v1211_v36 }
  0x9f   :  { %v1256_v40 = vsel %vm1039_vm0, %v4908_v34, 0.0 }
  0xa0   :  { %v6280_v42 = vpop.xlane.xlu2 %1092  ;;  %v6282_v43 = vpop.xlane.xlu1 %1089 }
  0xa1   :  { %v6284_v44 = vpop.xlane.xlu0 %1086 }
  0xa5   :  { %1227 = vadd.xlane.f32.xlu2 %v1226_v45  ;;  %1224 = vadd.xlane.f32.xlu1 %v1223_v46  ;;  %v4917_v45 = vunpack.c.h.bf16 %v5823_v41  ;;  %v4916_v46 = vunpack.c.l.bf16 %v5823_v41 }
  0xa6   :  { %1221 = vadd.xlane.f32.xlu0 %v1220_v47  ;;  %v4913_v47 = vunpack.c.h.bf16 %v5822_v27 }
  0xa7   :  { %v1271_v51 = vsel %vm1039_vm0, %v4917_v45, 0.0 }
  0xa8   :  { %v6292_v52 = vpop.xlane.xlu2 %1101  ;;  %v6294_v56 = vpop.xlane.xlu1 %1098 }
  0xa9   :  { %v6296_v57 = vpop.xlane.xlu0 %1095 }
  0xad   :  { %1236 = vadd.xlane.f32.xlu2 %v1235_v58  ;;  %1233 = vadd.xlane.f32.xlu1 %v1232_v59  ;;  %v1268_v58 = vsel %vm1039_vm0, %v4916_v46, 0.0  ;;  %v1265_v59 = vsel %vm1039_vm0, %v4913_v47, 0.0 }
  0xae   :  { %1230 = vadd.xlane.f32.xlu0 %v1229_v60  ;;  %v5825_v60 = vld [vmem:[%s10184_s0 + $0x140] sm:$0xff]  }
  0xaf   :  { %v4924_v62 = vunpack.c.l.bf16 %v5825_v60 }
  0xb0   :  { %v6307_v5 = vpop.xlane.xlu2 %1110  ;;  %v6309_v6 = vpop.xlane.xlu1 %1107 }
  0xb1   :  { %v6311_v7 = vpop.xlane.xlu0 %1104 }
  0xb5   :  { %1245 = vadd.xlane.f32.xlu2 %v1244_v8  ;;  %1242 = vadd.xlane.f32.xlu1 %v1241_v9 }
  0xb6   :  { %1239 = vadd.xlane.f32.xlu0 %v1238_v13  ;;  %v1280_v13 = vsel %vm1039_vm0, %v4924_v62, 0.0  ;;  %v4941_v62 = vunpack.c.h.bf16 %v5829_v61 }
  0xb8   :  { %v6319_v18 = vpop.xlane.xlu2 %1119  ;;  %v6321_v19 = vpop.xlane.xlu1 %1116 }
  0xb9   :  { %v6323_v20 = vpop.xlane.xlu0 %1113 }
  0xbd   :  { %1254 = vadd.xlane.f32.xlu2 %v1253_v24  ;;  %1251 = vadd.xlane.f32.xlu1 %v1250_v25  ;;  %v4928_v24 = vunpack.c.l.bf16 %v5826_v16  ;;  %v4925_v25 = vunpack.c.h.bf16 %v5825_v60  ;;  %v1307_v16 = vsel %vm1039_vm0, %v4941_v62, 0.0 }
  0xbe   :  { %1248 = vadd.xlane.f32.xlu0 %v1247_v26 }
  0xbf   :  { %v1286_v30 = vsel %vm1039_vm0, %v4928_v24, 0.0  ;;  %v1283_v34 = vsel %vm1039_vm0, %v4925_v25, 0.0  ;;  %v5831_v25 = vld [vmem:[%s10184_s0 + $0x170] sm:$0xff]  }
  0xc0   :  { %v6334_v35 = vpop.xlane.xlu2 %1128  ;;  %v6336_v36 = vpop.xlane.xlu1 %1125  ;;  %v4949_v63 = vunpack.c.h.bf16 %v5831_v25 }
  0xc1   :  { %v6338_v37 = vpop.xlane.xlu0 %1122 }
  0xc5   :  { %1263 = vadd.xlane.f32.xlu2 %v1262_v38  ;;  %1260 = vadd.xlane.f32.xlu1 %v1259_v39  ;;  %v5828_v38 = vld [vmem:[%s10184_s0 + $0x158] sm:$0xff]   ;;  %v5827_v39 = vld [vmem:[%s10184_s0 + $0x150] sm:$0xff]  }
  0xc6   :  { %1257 = vadd.xlane.f32.xlu0 %v1256_v40  ;;  %v4936_v40 = vunpack.c.l.bf16 %v5828_v38  ;;  %v4933_v41 = vunpack.c.h.bf16 %v5827_v39  ;;  %v4932_v45 = vunpack.c.l.bf16 %v5827_v39  ;;  %v4937_v3 = vunpack.c.h.bf16 %v5828_v38 }
  0xc8   :  { %v6346_v48 = vpop.xlane.xlu2 %1137  ;;  %v6348_v49 = vpop.xlane.xlu1 %1134  ;;  %v1292_v60 = vsel %vm1039_vm0, %v4932_v45, 0.0  ;;  %v1301_v24 = vsel %vm1039_vm0, %v4937_v3, 0.0 }
  0xc9   :  { %v6350_v50 = vpop.xlane.xlu0 %1131 }
  0xcd   :  { %1272 = vadd.xlane.f32.xlu2 %v1271_v51  ;;  %1269 = vadd.xlane.f32.xlu1 %v1268_v58  ;;  %v1298_v58 = vsel %vm1039_vm0, %v4936_v40, 0.0 }
  0xce   :  { %1266 = vadd.xlane.f32.xlu0 %v1265_v59  ;;  %v1295_v59 = vsel %vm1039_vm0, %v4933_v41, 0.0 }
  0xd0   :  { %v6361_v4 = vpop.xlane.xlu2 %1146  ;;  %v6363_v8 = vpop.xlane.xlu1 %1143 }
  0xd1   :  { %v6365_v9 = vpop.xlane.xlu0 %1140 }
  0xd5   :  { %1281 = vadd.xlane.f32.xlu2 %v1280_v13  ;;  %1278 = vadd.xlane.f32.xlu1 %v1277_v14 }
  0xd6   :  { %1275 = vadd.xlane.f32.xlu0 %v1274_v15 }
  0xd8   :  { %v6373_v26 = vpop.xlane.xlu2 %1155  ;;  %v6375_v27 = vpop.xlane.xlu1 %1152 }
  0xd9   :  { %v6377_v28 = vpop.xlane.xlu0 %1149 }
  0xdd   :  { %1290 = vadd.xlane.f32.xlu2 %v1289_v29  ;;  %1287 = vadd.xlane.f32.xlu1 %v1286_v30  ;;  %v5830_v29 = vld [vmem:[%s10184_s0 + $0x168] sm:$0xff]   ;;  %v4948_v30 = vunpack.c.l.bf16 %v5831_v25  ;;  %v5833_v25 = vld [vmem:[%s10184_s0 + $0x180] sm:$0xff]  }
  0xde   :  { %1284 = vadd.xlane.f32.xlu0 %v1283_v34  ;;  %v4945_v34 = vunpack.c.h.bf16 %v5830_v29  ;;  %v4944_v38 = vunpack.c.l.bf16 %v5830_v29 }
  0xdf   :  { %v1316_v45 = vsel %vm1039_vm0, %v4948_v30, 0.0  ;;  %v1319_v30 = vsel %vm1039_vm0, %v4949_v63, 0.0 }
  0xe0   :  { %v6388_v46 = vpop.xlane.xlu2 %1164  ;;  %v6390_v47 = vpop.xlane.xlu1 %1161 }
  0xe1   :  { %10191 = vst [vmem:[#allocation5_spill] sm:$0xff] %v6388_v46  ;;  %v6392_v51 = vpop.xlane.xlu0 %1158 }
  0xe2   :  { %10192 = vst [vmem:[#allocation6_spill] sm:$0xff] %v6390_v47 }
  0xe5   :  { %1299 = vadd.xlane.f32.xlu2 %v1298_v58  ;;  %1296 = vadd.xlane.f32.xlu1 %v1295_v59  ;;  %v1313_v58 = vsel %vm1039_vm0, %v4945_v34, 0.0  ;;  %v1310_v59 = vsel %vm1039_vm0, %v4944_v38, 0.0  ;;  %v5834_v34 = vld [vmem:[%s10184_s0 + $0x188] sm:$0xff]  }
  0xe6   :  { %1293 = vadd.xlane.f32.xlu0 %v1292_v60  ;;  %v5832_v60 = vld [vmem:[%s10184_s0 + $0x178] sm:$0xff]   ;;  %v4960_v38 = vunpack.c.l.bf16 %v5834_v34 }
  0xe7   :  { %v4953_v61 = vunpack.c.h.bf16 %v5832_v60  ;;  %v4952_v62 = vunpack.c.l.bf16 %v5832_v60 }
  0xe8   :  { %v6400_v13 = vpop.xlane.xlu2 %1173  ;;  %v6402_v14 = vpop.xlane.xlu1 %1170 }
  0xe9   :  { %10193 = vst [vmem:[#allocation7_spill] sm:$0xff] %v6400_v13  ;;  %v6404_v15 = vpop.xlane.xlu0 %1167  ;;  %v1322_v29 = vsel %vm1039_vm0, %v4952_v62, 0.0  ;;  %v1334_v62 = vsel %vm1039_vm0, %v4960_v38, 0.0 }
  0xea   :  { %10194 = vst [vmem:[#allocation8_spill] sm:$0xff] %v6402_v14 }
  0xeb   :  { %10195 = vst [vmem:[#allocation9_spill] sm:$0xff] %v6404_v15 }
  0xed   :  { %1308 = vadd.xlane.f32.xlu2 %v1307_v16  ;;  %1305 = vadd.xlane.f32.xlu1 %v1304_v17 }
  0xee   :  { %1302 = vadd.xlane.f32.xlu0 %v1301_v24  ;;  %v1325_v24 = vsel %vm1039_vm0, %v4953_v61, 0.0 }
  0xf0   :  { %v6415_v39 = vpop.xlane.xlu2 %1182  ;;  %v6417_v40 = vpop.xlane.xlu1 %1179 }
  0xf1   :  { %10196 = vst [vmem:[#allocation10_spill] sm:$0xff] %v6415_v39  ;;  %v6419_v41 = vpop.xlane.xlu0 %1176 }
  0xf2   :  { %10197 = vst [vmem:[#allocation11_spill] sm:$0xff] %v6417_v40 }
  0xf3   :  { %10198 = vst [vmem:[#allocation12_spill] sm:$0xff] %v6419_v41 }
  0xf5   :  { %1317 = vadd.xlane.f32.xlu2 %v1316_v45  ;;  %1314 = vadd.xlane.f32.xlu1 %v1313_v58  ;;  %v4957_v45 = vunpack.c.h.bf16 %v5833_v25  ;;  %v4956_v58 = vunpack.c.l.bf16 %v5833_v25  ;;  %v4961_v25 = vunpack.c.h.bf16 %v5834_v34 }
  0xf6   :  { %1311 = vadd.xlane.f32.xlu0 %v1310_v59 }
  0xf7   :  { %v1331_v63 = vsel %vm1039_vm0, %v4957_v45, 0.0 }
  0xf8   :  { %v6427_v3 = vpop.xlane.xlu2 %1191  ;;  %v6429_v16 = vpop.xlane.xlu1 %1188 }
  0xf9   :  { %10199 = vst [vmem:[#allocation13_spill] sm:$0xff] %v6427_v3  ;;  %v6431_v17 = vpop.xlane.xlu0 %1185  ;;  %v1328_v3 = vsel %vm1039_vm0, %v4956_v58, 0.0  ;;  %v1337_v58 = vsel %vm1039_vm0, %v4961_v25, 0.0 }
  0xfa   :  { %10200 = vst [vmem:[#allocation14_spill] sm:$0xff] %v6429_v16 }
  0xfb   :  { %10201 = vst [vmem:[#allocation15_spill] sm:$0xff] %v6431_v17  ;;  %v5937_v17 = vld [vmem:[%s10184_s0 + $0x4c0] sm:$0xff]  }
  0xfd   :  { %1326 = vadd.xlane.f32.xlu2 %v1325_v24  ;;  %1323 = vadd.xlane.f32.xlu1 %v1322_v29  ;;  %v5835_v24 = vld [vmem:[%s10184_s0 + $0x190] sm:$0xff]  }
  0xfe   :  { %1320 = vadd.xlane.f32.xlu0 %v1319_v30  ;;  %v4965_v29 = vunpack.c.h.bf16 %v5835_v24  ;;  %v4964_v30 = vunpack.c.l.bf16 %v5835_v24 }
 0x100   :  { %v6442_v59 = vpop.xlane.xlu2 %1200  ;;  %v6444_v60 = vpop.xlane.xlu1 %1197  ;;  %v1343_v38 = vsel %vm1039_vm0, %v4965_v29, 0.0  ;;  %v1340_v45 = vsel %vm1039_vm0, %v4964_v30, 0.0 }
 0x101   :  { %10202 = vst [vmem:[#allocation16_spill] sm:$0xff] %v6442_v59  ;;  %v6446_v61 = vpop.xlane.xlu0 %1194 }
 0x102   :  { %10203 = vst [vmem:[#allocation17_spill] sm:$0xff] %v6444_v60 }
 0x103   :  { %10204 = vst [vmem:[#allocation18_spill] sm:$0xff] %v6446_v61 }
 0x105   :  { %1335 = vadd.xlane.f32.xlu2 %v1334_v62  ;;  %1332 = vadd.xlane.f32.xlu1 %v1331_v63  ;;  %v5837_v62 = vld [vmem:[%s10184_s0 + $0x1a0] sm:$0xff]  }
 0x106   :  { %1329 = vadd.xlane.f32.xlu0 %v1328_v3  ;;  %v5836_v3 = vld [vmem:[%s10184_s0 + $0x198] sm:$0xff]   ;;  %v4972_v34 = vunpack.c.l.bf16 %v5837_v62 }
 0x107   :  { %v4969_v63 = vunpack.c.h.bf16 %v5836_v3  ;;  %v4968_v24 = vunpack.c.l.bf16 %v5836_v3  ;;  %v4973_v3 = vunpack.c.h.bf16 %v5837_v62 }
 0x108   :  { %v6454_v59 = vpop.xlane.xlu2 %1209  ;;  %v6456_v60 = vpop.xlane.xlu1 %1206  ;;  %v1352_v25 = vsel %vm1039_vm0, %v4972_v34, 0.0 }
 0x109   :  { %10205 = vst [vmem:[#allocation19_spill] sm:$0xff] %v6454_v59  ;;  %v6458_v61 = vpop.xlane.xlu0 %1203 }
 0x10a   :  { %10206 = vst [vmem:[#allocation20_spill] sm:$0xff] %v6456_v60  ;;  %v1349_v60 = vsel %vm1039_vm0, %v4969_v63, 0.0 }
 0x10b   :  { %10207 = vst [vmem:[#allocation21_spill] sm:$0xff] %v6458_v61  ;;  %v1346_v61 = vsel %vm1039_vm0, %v4968_v24, 0.0  ;;  %v1355_v24 = vsel %vm1039_vm0, %v4973_v3, 0.0 }
 0x10d   :  { %1344 = vadd.xlane.f32.xlu2 %v1343_v38  ;;  %1341 = vadd.xlane.f32.xlu1 %v1340_v45  ;;  %v5838_v38 = vld [vmem:[%s10184_s0 + $0x1a8] sm:$0xff]  }
 0x10e   :  { %1338 = vadd.xlane.f32.xlu0 %v1337_v58  ;;  %v4977_v45 = vunpack.c.h.bf16 %v5838_v38  ;;  %v4976_v58 = vunpack.c.l.bf16 %v5838_v38 }
 0x110   :  { %v6469_v59 = vpop.xlane.xlu2 %1218  ;;  %v6471_v29 = vpop.xlane.xlu1 %1215  ;;  %v1361_v34 = vsel %vm1039_vm0, %v4977_v45, 0.0  ;;  %v1358_v63 = vsel %vm1039_vm0, %v4976_v58, 0.0 }
 0x111   :  { %10208 = vst [vmem:[#allocation22_spill] sm:$0xff] %v6469_v59  ;;  %v6473_v30 = vpop.xlane.xlu0 %1212 }
 0x112   :  { %10209 = vst [vmem:[#allocation23_spill] sm:$0xff] %v6471_v29 }
 0x113   :  { %10210 = vst [vmem:[#allocation24_spill] sm:$0xff] %v6473_v30 }
 0x115   :  { %1353 = vadd.xlane.f32.xlu2 %v1352_v25  ;;  %1350 = vadd.xlane.f32.xlu1 %v1349_v60  ;;  %v5840_v60 = vld [vmem:[%s10184_s0 + $0x1b8] sm:$0xff]  }
 0x116   :  { %1347 = vadd.xlane.f32.xlu0 %v1346_v61  ;;  %v5839_v61 = vld [vmem:[%s10184_s0 + $0x1b0] sm:$0xff]   ;;  %v4984_v62 = vunpack.c.l.bf16 %v5840_v60 }
 0x117   :  { %v4981_v25 = vunpack.c.h.bf16 %v5839_v61  ;;  %v4980_v38 = vunpack.c.l.bf16 %v5839_v61  ;;  %v4985_v61 = vunpack.c.h.bf16 %v5840_v60 }
 0x118   :  { %v6481_v59 = vpop.xlane.xlu2 %1227  ;;  %v6483_v29 = vpop.xlane.xlu1 %1224  ;;  %v1370_v3 = vsel %vm1039_vm0, %v4984_v62, 0.0 }
 0x119   :  { %10211 = vst [vmem:[#allocation25_spill] sm:$0xff] %v6481_v59  ;;  %v6485_v30 = vpop.xlane.xlu0 %1221 }
 0x11a   :  { %10212 = vst [vmem:[#allocation26_spill] sm:$0xff] %v6483_v29  ;;  %v1367_v29 = vsel %vm1039_vm0, %v4981_v25, 0.0 }
 0x11b   :  { %10213 = vst [vmem:[#allocation27_spill] sm:$0xff] %v6485_v30  ;;  %v1364_v30 = vsel %vm1039_vm0, %v4980_v38, 0.0  ;;  %v1373_v38 = vsel %vm1039_vm0, %v4985_v61, 0.0 }
 0x11d   :  { %1362 = vadd.xlane.f32.xlu2 %v1361_v34  ;;  %1359 = vadd.xlane.f32.xlu1 %v1358_v63  ;;  %v5841_v34 = vld [vmem:[%s10184_s0 + $0x1c0] sm:$0xff]  }
 0x11e   :  { %1356 = vadd.xlane.f32.xlu0 %v1355_v24  ;;  %v4989_v63 = vunpack.c.h.bf16 %v5841_v34  ;;  %v4988_v24 = vunpack.c.l.bf16 %v5841_v34 }
 0x120   :  { %v6496_v59 = vpop.xlane.xlu2 %1236  ;;  %v6498_v45 = vpop.xlane.xlu1 %1233  ;;  %v1379_v62 = vsel %vm1039_vm0, %v4989_v63, 0.0  ;;  %v1376_v25 = vsel %vm1039_vm0, %v4988_v24, 0.0 }
 0x121   :  { %10214 = vst [vmem:[#allocation28_spill] sm:$0xff] %v6496_v59  ;;  %v6500_v58 = vpop.xlane.xlu0 %1230 }
 0x122   :  { %10215 = vst [vmem:[#allocation29_spill] sm:$0xff] %v6498_v45 }
 0x123   :  { %10216 = vst [vmem:[#allocation30_spill] sm:$0xff] %v6500_v58 }
 0x125   :  { %1371 = vadd.xlane.f32.xlu2 %v1370_v3  ;;  %1368 = vadd.xlane.f32.xlu1 %v1367_v29  ;;  %v5843_v29 = vld [vmem:[%s10184_s0 + $0x1d0] sm:$0xff]  }
 0x126   :  { %1365 = vadd.xlane.f32.xlu0 %v1364_v30  ;;  %v5842_v30 = vld [vmem:[%s10184_s0 + $0x1c8] sm:$0xff]   ;;  %v4996_v60 = vunpack.c.l.bf16 %v5843_v29 }
 0x127   :  { %v4993_v3 = vunpack.c.h.bf16 %v5842_v30  ;;  %v4992_v34 = vunpack.c.l.bf16 %v5842_v30  ;;  %v4997_v30 = vunpack.c.h.bf16 %v5843_v29 }
 0x128   :  { %v6508_v59 = vpop.xlane.xlu2 %1245  ;;  %v6510_v45 = vpop.xlane.xlu1 %1242  ;;  %v1388_v61 = vsel %vm1039_vm0, %v4996_v60, 0.0 }
 0x129   :  { %10217 = vst [vmem:[#allocation31_spill] sm:$0xff] %v6508_v59  ;;  %v6512_v58 = vpop.xlane.xlu0 %1239 }
 0x12a   :  { %10218 = vst [vmem:[#allocation32_spill] sm:$0xff] %v6510_v45  ;;  %v1385_v45 = vsel %vm1039_vm0, %v4993_v3, 0.0 }
 0x12b   :  { %10219 = vst [vmem:[#allocation33_spill] sm:$0xff] %v6512_v58  ;;  %v1382_v58 = vsel %vm1039_vm0, %v4992_v34, 0.0  ;;  %v1391_v34 = vsel %vm1039_vm0, %v4997_v30, 0.0 }
 0x12d   :  { %1380 = vadd.xlane.f32.xlu2 %v1379_v62  ;;  %1377 = vadd.xlane.f32.xlu1 %v1376_v25  ;;  %v5844_v62 = vld [vmem:[%s10184_s0 + $0x1d8] sm:$0xff]  }
 0x12e   :  { %1374 = vadd.xlane.f32.xlu0 %v1373_v38  ;;  %v5001_v25 = vunpack.c.h.bf16 %v5844_v62  ;;  %v5000_v38 = vunpack.c.l.bf16 %v5844_v62 }
 0x130   :  { %v6523_v59 = vpop.xlane.xlu2 %1254  ;;  %v6525_v63 = vpop.xlane.xlu1 %1251  ;;  %v1397_v60 = vsel %vm1039_vm0, %v5001_v25, 0.0  ;;  %v1394_v3 = vsel %vm1039_vm0, %v5000_v38, 0.0 }
 0x131   :  { %10220 = vst [vmem:[#allocation34_spill] sm:$0xff] %v6523_v59  ;;  %v6527_v24 = vpop.xlane.xlu0 %1248 }
 0x132   :  { %10221 = vst [vmem:[#allocation35_spill] sm:$0xff] %v6525_v63 }
 0x133   :  { %10222 = vst [vmem:[#allocation36_spill] sm:$0xff] %v6527_v24 }
 0x135   :  { %1389 = vadd.xlane.f32.xlu2 %v1388_v61  ;;  %1386 = vadd.xlane.f32.xlu1 %v1385_v45  ;;  %v5846_v45 = vld [vmem:[%s10184_s0 + $0x1e8] sm:$0xff]  }
 0x136   :  { %1383 = vadd.xlane.f32.xlu0 %v1382_v58  ;;  %v5845_v58 = vld [vmem:[%s10184_s0 + $0x1e0] sm:$0xff]   ;;  %v5008_v29 = vunpack.c.l.bf16 %v5846_v45 }
 0x137   :  { %v5005_v61 = vunpack.c.h.bf16 %v5845_v58  ;;  %v5004_v62 = vunpack.c.l.bf16 %v5845_v58  ;;  %v5009_v58 = vunpack.c.h.bf16 %v5846_v45 }
 0x138   :  { %v6535_v59 = vpop.xlane.xlu2 %1263  ;;  %v6537_v63 = vpop.xlane.xlu1 %1260  ;;  %v1406_v30 = vsel %vm1039_vm0, %v5008_v29, 0.0 }
 0x139   :  { %10223 = vst [vmem:[#allocation37_spill] sm:$0xff] %v6535_v59  ;;  %v6539_v24 = vpop.xlane.xlu0 %1257 }
 0x13a   :  { %10224 = vst [vmem:[#allocation38_spill] sm:$0xff] %v6537_v63  ;;  %v1403_v63 = vsel %vm1039_vm0, %v5005_v61, 0.0 }
 0x13b   :  { %10225 = vst [vmem:[#allocation39_spill] sm:$0xff] %v6539_v24  ;;  %v1400_v24 = vsel %vm1039_vm0, %v5004_v62, 0.0  ;;  %v1409_v62 = vsel %vm1039_vm0, %v5009_v58, 0.0 }
 0x13d   :  { %1398 = vadd.xlane.f32.xlu2 %v1397_v60  ;;  %1395 = vadd.xlane.f32.xlu1 %v1394_v3  ;;  %v5847_v60 = vld [vmem:[%s10184_s0 + $0x1f0] sm:$0xff]  }
 0x13e   :  { %1392 = vadd.xlane.f32.xlu0 %v1391_v34  ;;  %v5013_v3 = vunpack.c.h.bf16 %v5847_v60  ;;  %v5012_v34 = vunpack.c.l.bf16 %v5847_v60 }
 0x140   :  { %v6550_v59 = vpop.xlane.xlu2 %1272  ;;  %v6552_v25 = vpop.xlane.xlu1 %1269  ;;  %v1415_v29 = vsel %vm1039_vm0, %v5013_v3, 0.0  ;;  %v1412_v61 = vsel %vm1039_vm0, %v5012_v34, 0.0 }
 0x141   :  { %10226 = vst [vmem:[#allocation40_spill] sm:$0xff] %v6550_v59  ;;  %v6554_v38 = vpop.xlane.xlu0 %1266 }
 0x142   :  { %10227 = vst [vmem:[#allocation41_spill] sm:$0xff] %v6552_v25 }
 0x143   :  { %10228 = vst [vmem:[#allocation42_spill] sm:$0xff] %v6554_v38 }
 0x145   :  { %1407 = vadd.xlane.f32.xlu2 %v1406_v30  ;;  %1404 = vadd.xlane.f32.xlu1 %v1403_v63  ;;  %v5849_v63 = vld [vmem:[%s10184_s0 + $0x200] sm:$0xff]  }
 0x146   :  { %1401 = vadd.xlane.f32.xlu0 %v1400_v24  ;;  %v5848_v24 = vld [vmem:[%s10184_s0 + $0x1f8] sm:$0xff]   ;;  %v5020_v45 = vunpack.c.l.bf16 %v5849_v63 }
 0x147   :  { %v5017_v30 = vunpack.c.h.bf16 %v5848_v24  ;;  %v5016_v60 = vunpack.c.l.bf16 %v5848_v24  ;;  %v5021_v24 = vunpack.c.h.bf16 %v5849_v63 }
 0x148   :  { %v6562_v59 = vpop.xlane.xlu2 %1281  ;;  %v6564_v25 = vpop.xlane.xlu1 %1278  ;;  %v1424_v58 = vsel %vm1039_vm0, %v5020_v45, 0.0 }
 0x149   :  { %10229 = vst [vmem:[#allocation43_spill] sm:$0xff] %v6562_v59  ;;  %v6566_v38 = vpop.xlane.xlu0 %1275 }
 0x14a   :  { %10230 = vst [vmem:[#allocation44_spill] sm:$0xff] %v6564_v25  ;;  %v1421_v25 = vsel %vm1039_vm0, %v5017_v30, 0.0 }
 0x14b   :  { %10231 = vst [vmem:[#allocation45_spill] sm:$0xff] %v6566_v38  ;;  %v1418_v38 = vsel %vm1039_vm0, %v5016_v60, 0.0  ;;  %v1427_v60 = vsel %vm1039_vm0, %v5021_v24, 0.0 }
 0x14d   :  { %1416 = vadd.xlane.f32.xlu2 %v1415_v29  ;;  %1413 = vadd.xlane.f32.xlu1 %v1412_v61  ;;  %v5850_v29 = vld [vmem:[%s10184_s0 + $0x208] sm:$0xff]  }
 0x14e   :  { %1410 = vadd.xlane.f32.xlu0 %v1409_v62  ;;  %v5025_v61 = vunpack.c.h.bf16 %v5850_v29  ;;  %v5024_v62 = vunpack.c.l.bf16 %v5850_v29 }
 0x150   :  { %v6577_v59 = vpop.xlane.xlu2 %1290  ;;  %v6579_v3 = vpop.xlane.xlu1 %1287  ;;  %v1433_v45 = vsel %vm1039_vm0, %v5025_v61, 0.0  ;;  %v1430_v30 = vsel %vm1039_vm0, %v5024_v62, 0.0 }
 0x151   :  { %10232 = vst [vmem:[#allocation46_spill] sm:$0xff] %v6577_v59  ;;  %v6581_v34 = vpop.xlane.xlu0 %1284 }
 0x152   :  { %10233 = vst [vmem:[#allocation47_spill] sm:$0xff] %v6579_v3 }
 0x153   :  { %10234 = vst [vmem:[#allocation48_spill] sm:$0xff] %v6581_v34 }
 0x155   :  { %1425 = vadd.xlane.f32.xlu2 %v1424_v58  ;;  %1422 = vadd.xlane.f32.xlu1 %v1421_v25  ;;  %v5852_v25 = vld [vmem:[%s10184_s0 + $0x218] sm:$0xff]  }
 0x156   :  { %1419 = vadd.xlane.f32.xlu0 %v1418_v38  ;;  %v5851_v38 = vld [vmem:[%s10184_s0 + $0x210] sm:$0xff]   ;;  %v5032_v63 = vunpack.c.l.bf16 %v5852_v25 }
 0x157   :  { %v5029_v58 = vunpack.c.h.bf16 %v5851_v38  ;;  %v5028_v29 = vunpack.c.l.bf16 %v5851_v38  ;;  %v5033_v38 = vunpack.c.h.bf16 %v5852_v25 }
 0x158   :  { %v6589_v59 = vpop.xlane.xlu2 %1299  ;;  %v6591_v3 = vpop.xlane.xlu1 %1296  ;;  %v1442_v24 = vsel %vm1039_vm0, %v5032_v63, 0.0 }
 0x159   :  { %10235 = vst [vmem:[#allocation49_spill] sm:$0xff] %v6589_v59  ;;  %v6593_v34 = vpop.xlane.xlu0 %1293 }
 0x15a   :  { %10236 = vst [vmem:[#allocation50_spill] sm:$0xff] %v6591_v3  ;;  %v1439_v3 = vsel %vm1039_vm0, %v5029_v58, 0.0 }
 0x15b   :  { %10237 = vst [vmem:[#allocation51_spill] sm:$0xff] %v6593_v34  ;;  %v1436_v34 = vsel %vm1039_vm0, %v5028_v29, 0.0  ;;  %v1445_v29 = vsel %vm1039_vm0, %v5033_v38, 0.0 }
 0x15d   :  { %1434 = vadd.xlane.f32.xlu2 %v1433_v45  ;;  %1431 = vadd.xlane.f32.xlu1 %v1430_v30  ;;  %v5853_v45 = vld [vmem:[%s10184_s0 + $0x220] sm:$0xff]  }
 0x15e   :  { %1428 = vadd.xlane.f32.xlu0 %v1427_v60  ;;  %v5037_v30 = vunpack.c.h.bf16 %v5853_v45  ;;  %v5036_v60 = vunpack.c.l.bf16 %v5853_v45 }
 0x160   :  { %v6604_v59 = vpop.xlane.xlu2 %1308  ;;  %v6606_v61 = vpop.xlane.xlu1 %1305  ;;  %v1451_v63 = vsel %vm1039_vm0, %v5037_v30, 0.0  ;;  %v1448_v58 = vsel %vm1039_vm0, %v5036_v60, 0.0 }
 0x161   :  { %10238 = vst [vmem:[#allocation52_spill] sm:$0xff] %v6604_v59  ;;  %v6608_v62 = vpop.xlane.xlu0 %1302 }
 0x162   :  { %10239 = vst [vmem:[#allocation53_spill] sm:$0xff] %v6606_v61 }
 0x163   :  { %10240 = vst [vmem:[#allocation54_spill] sm:$0xff] %v6608_v62 }
 0x165   :  { %1443 = vadd.xlane.f32.xlu2 %v1442_v24  ;;  %1440 = vadd.xlane.f32.xlu1 %v1439_v3  ;;  %v5855_v3 = vld [vmem:[%s10184_s0 + $0x230] sm:$0xff]  }
 0x166   :  { %1437 = vadd.xlane.f32.xlu0 %v1436_v34  ;;  %v5854_v34 = vld [vmem:[%s10184_s0 + $0x228] sm:$0xff]   ;;  %v5044_v25 = vunpack.c.l.bf16 %v5855_v3 }
 0x167   :  { %v5041_v24 = vunpack.c.h.bf16 %v5854_v34  ;;  %v5040_v45 = vunpack.c.l.bf16 %v5854_v34  ;;  %v5045_v34 = vunpack.c.h.bf16 %v5855_v3 }
 0x168   :  { %v6616_v59 = vpop.xlane.xlu2 %1317  ;;  %v6618_v61 = vpop.xlane.xlu1 %1314  ;;  %v1460_v38 = vsel %vm1039_vm0, %v5044_v25, 0.0 }
 0x169   :  { %10241 = vst [vmem:[#allocation55_spill] sm:$0xff] %v6616_v59  ;;  %v6620_v62 = vpop.xlane.xlu0 %1311 }
 0x16a   :  { %10242 = vst [vmem:[#allocation56_spill] sm:$0xff] %v6618_v61  ;;  %v1457_v61 = vsel %vm1039_vm0, %v5041_v24, 0.0 }
 0x16b   :  { %10243 = vst [vmem:[#allocation57_spill] sm:$0xff] %v6620_v62  ;;  %v1454_v62 = vsel %vm1039_vm0, %v5040_v45, 0.0  ;;  %v1463_v45 = vsel %vm1039_vm0, %v5045_v34, 0.0 }
 0x16d   :  { %1452 = vadd.xlane.f32.xlu2 %v1451_v63  ;;  %1449 = vadd.xlane.f32.xlu1 %v1448_v58  ;;  %v5856_v63 = vld [vmem:[%s10184_s0 + $0x238] sm:$0xff]  }
 0x16e   :  { %1446 = vadd.xlane.f32.xlu0 %v1445_v29  ;;  %v5049_v58 = vunpack.c.h.bf16 %v5856_v63  ;;  %v5048_v29 = vunpack.c.l.bf16 %v5856_v63 }
 0x170   :  { %v6631_v59 = vpop.xlane.xlu2 %1326  ;;  %v6633_v30 = vpop.xlane.xlu1 %1323  ;;  %v1469_v25 = vsel %vm1039_vm0, %v5049_v58, 0.0  ;;  %v1466_v24 = vsel %vm1039_vm0, %v5048_v29, 0.0 }
 0x171   :  { %10244 = vst [vmem:[#allocation58_spill] sm:$0xff] %v6631_v59  ;;  %v6635_v60 = vpop.xlane.xlu0 %1320 }
 0x172   :  { %10245 = vst [vmem:[#allocation59_spill] sm:$0xff] %v6633_v30 }
 0x173   :  { %10246 = vst [vmem:[#allocation60_spill] sm:$0xff] %v6635_v60 }
 0x175   :  { %1461 = vadd.xlane.f32.xlu2 %v1460_v38  ;;  %1458 = vadd.xlane.f32.xlu1 %v1457_v61  ;;  %v5858_v61 = vld [vmem:[%s10184_s0 + $0x248] sm:$0xff]  }
 0x176   :  { %1455 = vadd.xlane.f32.xlu0 %v1454_v62  ;;  %v5857_v62 = vld [vmem:[%s10184_s0 + $0x240] sm:$0xff]   ;;  %v5056_v3 = vunpack.c.l.bf16 %v5858_v61 }
 0x177   :  { %v5053_v38 = vunpack.c.h.bf16 %v5857_v62  ;;  %v5052_v63 = vunpack.c.l.bf16 %v5857_v62  ;;  %v5057_v62 = vunpack.c.h.bf16 %v5858_v61 }
 0x178   :  { %v6643_v59 = vpop.xlane.xlu2 %1335  ;;  %v6645_v30 = vpop.xlane.xlu1 %1332  ;;  %v1478_v34 = vsel %vm1039_vm0, %v5056_v3, 0.0 }
 0x179   :  { %10247 = vst [vmem:[#allocation61_spill] sm:$0xff] %v6643_v59  ;;  %v6647_v60 = vpop.xlane.xlu0 %1329 }
 0x17a   :  { %10248 = vst [vmem:[#allocation62_spill] sm:$0xff] %v6645_v30  ;;  %v1472_v30 = vsel %vm1039_vm0, %v5052_v63, 0.0  ;;  %v1481_v63 = vsel %vm1039_vm0, %v5057_v62, 0.0 }
 0x17b   :  { %10249 = vst [vmem:[#allocation63_spill] sm:$0xff] %v6647_v60  ;;  %v1475_v60 = vsel %vm1039_vm0, %v5053_v38, 0.0 }
 0x17d   :  { %1470 = vadd.xlane.f32.xlu2 %v1469_v25  ;;  %1467 = vadd.xlane.f32.xlu1 %v1466_v24  ;;  %v5859_v25 = vld [vmem:[%s10184_s0 + $0x250] sm:$0xff]  }
 0x17e   :  { %1464 = vadd.xlane.f32.xlu0 %v1463_v45  ;;  %v5061_v24 = vunpack.c.h.bf16 %v5859_v25  ;;  %v5060_v45 = vunpack.c.l.bf16 %v5859_v25 }
 0x180   :  { %v6658_v59 = vpop.xlane.xlu2 %1344  ;;  %v6660_v58 = vpop.xlane.xlu1 %1341  ;;  %v1487_v3 = vsel %vm1039_vm0, %v5061_v24, 0.0  ;;  %v1484_v38 = vsel %vm1039_vm0, %v5060_v45, 0.0 }
 0x181   :  { %10250 = vst [vmem:[#allocation64_spill] sm:$0xff] %v6658_v59  ;;  %v6662_v29 = vpop.xlane.xlu0 %1338 }
 0x182   :  { %10251 = vst [vmem:[#allocation65_spill] sm:$0xff] %v6660_v58 }
 0x183   :  { %10252 = vst [vmem:[#allocation66_spill] sm:$0xff] %v6662_v29 }
 0x185   :  { %1479 = vadd.xlane.f32.xlu2 %v1478_v34  ;;  %1476 = vadd.xlane.f32.xlu1 %v1475_v60  ;;  %v5861_v60 = vld [vmem:[%s10184_s0 + $0x260] sm:$0xff]  }
 0x186   :  { %1473 = vadd.xlane.f32.xlu0 %v1472_v30  ;;  %v5860_v30 = vld [vmem:[%s10184_s0 + $0x258] sm:$0xff]   ;;  %v5068_v61 = vunpack.c.l.bf16 %v5861_v60 }
 0x187   :  { %v5065_v34 = vunpack.c.h.bf16 %v5860_v30  ;;  %v5064_v25 = vunpack.c.l.bf16 %v5860_v30  ;;  %v5069_v30 = vunpack.c.h.bf16 %v5861_v60 }
 0x188   :  { %v6670_v59 = vpop.xlane.xlu2 %1353  ;;  %v6672_v58 = vpop.xlane.xlu1 %1350  ;;  %v1496_v62 = vsel %vm1039_vm0, %v5068_v61, 0.0 }
 0x189   :  { %10253 = vst [vmem:[#allocation67_spill] sm:$0xff] %v6670_v59  ;;  %v6674_v29 = vpop.xlane.xlu0 %1347 }
 0x18a   :  { %10254 = vst [vmem:[#allocation68_spill] sm:$0xff] %v6672_v58  ;;  %v1493_v58 = vsel %vm1039_vm0, %v5065_v34, 0.0 }
 0x18b   :  { %10255 = vst [vmem:[#allocation69_spill] sm:$0xff] %v6674_v29  ;;  %v1490_v29 = vsel %vm1039_vm0, %v5064_v25, 0.0  ;;  %v1499_v25 = vsel %vm1039_vm0, %v5069_v30, 0.0 }
 0x18d   :  { %1488 = vadd.xlane.f32.xlu2 %v1487_v3  ;;  %1485 = vadd.xlane.f32.xlu1 %v1484_v38  ;;  %v5862_v3 = vld [vmem:[%s10184_s0 + $0x268] sm:$0xff]  }
 0x18e   :  { %1482 = vadd.xlane.f32.xlu0 %v1481_v63  ;;  %v5073_v38 = vunpack.c.h.bf16 %v5862_v3  ;;  %v5072_v63 = vunpack.c.l.bf16 %v5862_v3 }
 0x190   :  { %v6685_v59 = vpop.xlane.xlu2 %1362  ;;  %v6687_v24 = vpop.xlane.xlu1 %1359  ;;  %v1505_v61 = vsel %vm1039_vm0, %v5073_v38, 0.0  ;;  %v1502_v34 = vsel %vm1039_vm0, %v5072_v63, 0.0 }
 0x191   :  { %10256 = vst [vmem:[#allocation70_spill] sm:$0xff] %v6685_v59  ;;  %v6689_v45 = vpop.xlane.xlu0 %1356 }
 0x192   :  { %10257 = vst [vmem:[#allocation71_spill] sm:$0xff] %v6687_v24 }
 0x193   :  { %10258 = vst [vmem:[#allocation72_spill] sm:$0xff] %v6689_v45 }
 0x195   :  { %1497 = vadd.xlane.f32.xlu2 %v1496_v62  ;;  %1494 = vadd.xlane.f32.xlu1 %v1493_v58  ;;  %v5864_v58 = vld [vmem:[%s10184_s0 + $0x278] sm:$0xff]  }
 0x196   :  { %1491 = vadd.xlane.f32.xlu0 %v1490_v29  ;;  %v5863_v29 = vld [vmem:[%s10184_s0 + $0x270] sm:$0xff]   ;;  %v5080_v60 = vunpack.c.l.bf16 %v5864_v58 }
 0x197   :  { %v5077_v62 = vunpack.c.h.bf16 %v5863_v29  ;;  %v5076_v3 = vunpack.c.l.bf16 %v5863_v29  ;;  %v5081_v29 = vunpack.c.h.bf16 %v5864_v58 }
 0x198   :  { %v6697_v59 = vpop.xlane.xlu2 %1371  ;;  %v6699_v24 = vpop.xlane.xlu1 %1368  ;;  %v1514_v30 = vsel %vm1039_vm0, %v5080_v60, 0.0 }
 0x199   :  { %10259 = vst [vmem:[#allocation73_spill] sm:$0xff] %v6697_v59  ;;  %v6701_v45 = vpop.xlane.xlu0 %1365 }
 0x19a   :  { %10260 = vst [vmem:[#allocation74_spill] sm:$0xff] %v6699_v24  ;;  %v1511_v24 = vsel %vm1039_vm0, %v5077_v62, 0.0 }
 0x19b   :  { %10261 = vst [vmem:[#allocation75_spill] sm:$0xff] %v6701_v45  ;;  %v1508_v45 = vsel %vm1039_vm0, %v5076_v3, 0.0  ;;  %v1517_v3 = vsel %vm1039_vm0, %v5081_v29, 0.0 }
 0x19d   :  { %1506 = vadd.xlane.f32.xlu2 %v1505_v61  ;;  %1503 = vadd.xlane.f32.xlu1 %v1502_v34  ;;  %v5865_v61 = vld [vmem:[%s10184_s0 + $0x280] sm:$0xff]  }
 0x19e   :  { %1500 = vadd.xlane.f32.xlu0 %v1499_v25  ;;  %v5085_v34 = vunpack.c.h.bf16 %v5865_v61  ;;  %v5084_v25 = vunpack.c.l.bf16 %v5865_v61 }
 0x1a0   :  { %v6712_v59 = vpop.xlane.xlu2 %1380  ;;  %v6714_v38 = vpop.xlane.xlu1 %1377  ;;  %v1523_v60 = vsel %vm1039_vm0, %v5085_v34, 0.0  ;;  %v1520_v62 = vsel %vm1039_vm0, %v5084_v25, 0.0 }
 0x1a1   :  { %10262 = vst [vmem:[#allocation76_spill] sm:$0xff] %v6712_v59  ;;  %v6716_v63 = vpop.xlane.xlu0 %1374 }
 0x1a2   :  { %10263 = vst [vmem:[#allocation77_spill] sm:$0xff] %v6714_v38 }
 0x1a3   :  { %10264 = vst [vmem:[#allocation78_spill] sm:$0xff] %v6716_v63 }
 0x1a5   :  { %1515 = vadd.xlane.f32.xlu2 %v1514_v30  ;;  %1512 = vadd.xlane.f32.xlu1 %v1511_v24  ;;  %v5867_v24 = vld [vmem:[%s10184_s0 + $0x290] sm:$0xff]  }
 0x1a6   :  { %1509 = vadd.xlane.f32.xlu0 %v1508_v45  ;;  %v5866_v45 = vld [vmem:[%s10184_s0 + $0x288] sm:$0xff]   ;;  %v5092_v58 = vunpack.c.l.bf16 %v5867_v24 }
 0x1a7   :  { %v5089_v30 = vunpack.c.h.bf16 %v5866_v45  ;;  %v5088_v61 = vunpack.c.l.bf16 %v5866_v45  ;;  %v5093_v45 = vunpack.c.h.bf16 %v5867_v24 }
 0x1a8   :  { %v6724_v59 = vpop.xlane.xlu2 %1389  ;;  %v6726_v38 = vpop.xlane.xlu1 %1386  ;;  %v1532_v29 = vsel %vm1039_vm0, %v5092_v58, 0.0 }
 0x1a9   :  { %10265 = vst [vmem:[#allocation79_spill] sm:$0xff] %v6724_v59  ;;  %v6728_v63 = vpop.xlane.xlu0 %1383 }
 0x1aa   :  { %10266 = vst [vmem:[#allocation80_spill] sm:$0xff] %v6726_v38  ;;  %v1529_v38 = vsel %vm1039_vm0, %v5089_v30, 0.0 }
 0x1ab   :  { %10267 = vst [vmem:[#allocation81_spill] sm:$0xff] %v6728_v63  ;;  %v1526_v63 = vsel %vm1039_vm0, %v5088_v61, 0.0  ;;  %v1535_v61 = vsel %vm1039_vm0, %v5093_v45, 0.0 }
 0x1ad   :  { %1524 = vadd.xlane.f32.xlu2 %v1523_v60  ;;  %1521 = vadd.xlane.f32.xlu1 %v1520_v62  ;;  %v5868_v60 = vld [vmem:[%s10184_s0 + $0x298] sm:$0xff]  }
 0x1ae   :  { %1518 = vadd.xlane.f32.xlu0 %v1517_v3  ;;  %v5097_v62 = vunpack.c.h.bf16 %v5868_v60  ;;  %v5096_v3 = vunpack.c.l.bf16 %v5868_v60 }
 0x1b0   :  { %v6739_v59 = vpop.xlane.xlu2 %1398  ;;  %v6741_v34 = vpop.xlane.xlu1 %1395  ;;  %v1541_v58 = vsel %vm1039_vm0, %v5097_v62, 0.0  ;;  %v1538_v30 = vsel %vm1039_vm0, %v5096_v3, 0.0 }
 0x1b1   :  { %10268 = vst [vmem:[#allocation82_spill] sm:$0xff] %v6739_v59  ;;  %v6743_v25 = vpop.xlane.xlu0 %1392 }
 0x1b2   :  { %10269 = vst [vmem:[#allocation83_spill] sm:$0xff] %v6741_v34 }
 0x1b3   :  { %10270 = vst [vmem:[#allocation84_spill] sm:$0xff] %v6743_v25 }
 0x1b5   :  { %1533 = vadd.xlane.f32.xlu2 %v1532_v29  ;;  %1530 = vadd.xlane.f32.xlu1 %v1529_v38  ;;  %v5870_v38 = vld [vmem:[%s10184_s0 + $0x2a8] sm:$0xff]  }
 0x1b6   :  { %1527 = vadd.xlane.f32.xlu0 %v1526_v63  ;;  %v5869_v63 = vld [vmem:[%s10184_s0 + $0x2a0] sm:$0xff]   ;;  %v5104_v24 = vunpack.c.l.bf16 %v5870_v38 }
 0x1b7   :  { %v5101_v29 = vunpack.c.h.bf16 %v5869_v63  ;;  %v5100_v60 = vunpack.c.l.bf16 %v5869_v63  ;;  %v5105_v63 = vunpack.c.h.bf16 %v5870_v38 }
 0x1b8   :  { %v6751_v59 = vpop.xlane.xlu2 %1407  ;;  %v6753_v34 = vpop.xlane.xlu1 %1404  ;;  %v1550_v45 = vsel %vm1039_vm0, %v5104_v24, 0.0 }
 0x1b9   :  { %10271 = vst [vmem:[#allocation85_spill] sm:$0xff] %v6751_v59  ;;  %v6755_v25 = vpop.xlane.xlu0 %1401 }
 0x1ba   :  { %10272 = vst [vmem:[#allocation86_spill] sm:$0xff] %v6753_v34  ;;  %v1547_v34 = vsel %vm1039_vm0, %v5101_v29, 0.0 }
 0x1bb   :  { %10273 = vst [vmem:[#allocation87_spill] sm:$0xff] %v6755_v25  ;;  %v1544_v25 = vsel %vm1039_vm0, %v5100_v60, 0.0  ;;  %v1553_v60 = vsel %vm1039_vm0, %v5105_v63, 0.0 }
 0x1bd   :  { %1542 = vadd.xlane.f32.xlu2 %v1541_v58  ;;  %1539 = vadd.xlane.f32.xlu1 %v1538_v30  ;;  %v5871_v58 = vld [vmem:[%s10184_s0 + $0x2b0] sm:$0xff]  }
 0x1be   :  { %1536 = vadd.xlane.f32.xlu0 %v1535_v61  ;;  %v5109_v30 = vunpack.c.h.bf16 %v5871_v58  ;;  %v5108_v61 = vunpack.c.l.bf16 %v5871_v58 }
 0x1c0   :  { %v6766_v59 = vpop.xlane.xlu2 %1416  ;;  %v6768_v62 = vpop.xlane.xlu1 %1413  ;;  %v1559_v24 = vsel %vm1039_vm0, %v5109_v30, 0.0  ;;  %v1556_v29 = vsel %vm1039_vm0, %v5108_v61, 0.0 }
 0x1c1   :  { %10274 = vst [vmem:[#allocation88_spill] sm:$0xff] %v6766_v59  ;;  %v6770_v3 = vpop.xlane.xlu0 %1410 }
 0x1c2   :  { %10275 = vst [vmem:[#allocation89_spill] sm:$0xff] %v6768_v62 }
 0x1c3   :  { %10276 = vst [vmem:[#allocation90_spill] sm:$0xff] %v6770_v3 }
 0x1c5   :  { %1551 = vadd.xlane.f32.xlu2 %v1550_v45  ;;  %1548 = vadd.xlane.f32.xlu1 %v1547_v34  ;;  %v5873_v34 = vld [vmem:[%s10184_s0 + $0x2c0] sm:$0xff]  }
 0x1c6   :  { %1545 = vadd.xlane.f32.xlu0 %v1544_v25  ;;  %v5872_v25 = vld [vmem:[%s10184_s0 + $0x2b8] sm:$0xff]   ;;  %v5116_v38 = vunpack.c.l.bf16 %v5873_v34 }
 0x1c7   :  { %v5113_v45 = vunpack.c.h.bf16 %v5872_v25  ;;  %v5112_v58 = vunpack.c.l.bf16 %v5872_v25  ;;  %v5117_v25 = vunpack.c.h.bf16 %v5873_v34 }
 0x1c8   :  { %v6778_v59 = vpop.xlane.xlu2 %1425  ;;  %v6780_v62 = vpop.xlane.xlu1 %1422  ;;  %v1568_v63 = vsel %vm1039_vm0, %v5116_v38, 0.0 }
 0x1c9   :  { %10277 = vst [vmem:[#allocation91_spill] sm:$0xff] %v6778_v59  ;;  %v6782_v3 = vpop.xlane.xlu0 %1419 }
 0x1ca   :  { %10278 = vst [vmem:[#allocation92_spill] sm:$0xff] %v6780_v62  ;;  %v1565_v62 = vsel %vm1039_vm0, %v5113_v45, 0.0 }
 0x1cb   :  { %10279 = vst [vmem:[#allocation93_spill] sm:$0xff] %v6782_v3  ;;  %v1562_v3 = vsel %vm1039_vm0, %v5112_v58, 0.0  ;;  %v1571_v58 = vsel %vm1039_vm0, %v5117_v25, 0.0 }
 0x1cd   :  { %1560 = vadd.xlane.f32.xlu2 %v1559_v24  ;;  %1557 = vadd.xlane.f32.xlu1 %v1556_v29  ;;  %v5874_v24 = vld [vmem:[%s10184_s0 + $0x2c8] sm:$0xff]  }
 0x1ce   :  { %1554 = vadd.xlane.f32.xlu0 %v1553_v60  ;;  %v5121_v29 = vunpack.c.h.bf16 %v5874_v24  ;;  %v5120_v60 = vunpack.c.l.bf16 %v5874_v24 }
 0x1d0   :  { %v6793_v59 = vpop.xlane.xlu2 %1434  ;;  %v6795_v30 = vpop.xlane.xlu1 %1431  ;;  %v1577_v38 = vsel %vm1039_vm0, %v5121_v29, 0.0  ;;  %v1574_v45 = vsel %vm1039_vm0, %v5120_v60, 0.0 }
 0x1d1   :  { %10280 = vst [vmem:[#allocation94_spill] sm:$0xff] %v6793_v59  ;;  %v6797_v61 = vpop.xlane.xlu0 %1428 }
 0x1d2   :  { %10281 = vst [vmem:[#allocation95_spill] sm:$0xff] %v6795_v30 }
 0x1d3   :  { %10282 = vst [vmem:[#allocation96_spill] sm:$0xff] %v6797_v61 }
 0x1d5   :  { %1569 = vadd.xlane.f32.xlu2 %v1568_v63  ;;  %1566 = vadd.xlane.f32.xlu1 %v1565_v62  ;;  %v5876_v62 = vld [vmem:[%s10184_s0 + $0x2d8] sm:$0xff]  }
 0x1d6   :  { %1563 = vadd.xlane.f32.xlu0 %v1562_v3  ;;  %v5875_v3 = vld [vmem:[%s10184_s0 + $0x2d0] sm:$0xff]   ;;  %v5128_v34 = vunpack.c.l.bf16 %v5876_v62 }
 0x1d7   :  { %v5125_v63 = vunpack.c.h.bf16 %v5875_v3  ;;  %v5124_v24 = vunpack.c.l.bf16 %v5875_v3  ;;  %v5129_v3 = vunpack.c.h.bf16 %v5876_v62 }
 0x1d8   :  { %v6805_v59 = vpop.xlane.xlu2 %1443  ;;  %v6807_v30 = vpop.xlane.xlu1 %1440  ;;  %v1586_v25 = vsel %vm1039_vm0, %v5128_v34, 0.0 }
 0x1d9   :  { %10283 = vst [vmem:[#allocation97_spill] sm:$0xff] %v6805_v59  ;;  %v6809_v61 = vpop.xlane.xlu0 %1437 }
 0x1da   :  { %10284 = vst [vmem:[#allocation98_spill] sm:$0xff] %v6807_v30  ;;  %v1583_v30 = vsel %vm1039_vm0, %v5125_v63, 0.0 }
 0x1db   :  { %10285 = vst [vmem:[#allocation99_spill] sm:$0xff] %v6809_v61  ;;  %v1580_v61 = vsel %vm1039_vm0, %v5124_v24, 0.0  ;;  %v1589_v24 = vsel %vm1039_vm0, %v5129_v3, 0.0 }
 0x1dd   :  { %1578 = vadd.xlane.f32.xlu2 %v1577_v38  ;;  %1575 = vadd.xlane.f32.xlu1 %v1574_v45  ;;  %v5877_v38 = vld [vmem:[%s10184_s0 + $0x2e0] sm:$0xff]  }
 0x1de   :  { %1572 = vadd.xlane.f32.xlu0 %v1571_v58  ;;  %v5133_v45 = vunpack.c.h.bf16 %v5877_v38  ;;  %v5132_v58 = vunpack.c.l.bf16 %v5877_v38 }
 0x1e0   :  { %v6820_v59 = vpop.xlane.xlu2 %1452  ;;  %v6822_v29 = vpop.xlane.xlu1 %1449  ;;  %v1595_v34 = vsel %vm1039_vm0, %v5133_v45, 0.0  ;;  %v1592_v63 = vsel %vm1039_vm0, %v5132_v58, 0.0 }
 0x1e1   :  { %10286 = vst [vmem:[#allocation100_spill] sm:$0xff] %v6820_v59  ;;  %v6824_v60 = vpop.xlane.xlu0 %1446 }
 0x1e2   :  { %10287 = vst [vmem:[#allocation101_spill] sm:$0xff] %v6822_v29 }
 0x1e3   :  { %10288 = vst [vmem:[#allocation102_spill] sm:$0xff] %v6824_v60 }
 0x1e5   :  { %1587 = vadd.xlane.f32.xlu2 %v1586_v25  ;;  %1584 = vadd.xlane.f32.xlu1 %v1583_v30  ;;  %v5879_v30 = vld [vmem:[%s10184_s0 + $0x2f0] sm:$0xff]  }
 0x1e6   :  { %1581 = vadd.xlane.f32.xlu0 %v1580_v61  ;;  %v5878_v61 = vld [vmem:[%s10184_s0 + $0x2e8] sm:$0xff]   ;;  %v5140_v62 = vunpack.c.l.bf16 %v5879_v30 }
 0x1e7   :  { %v5137_v25 = vunpack.c.h.bf16 %v5878_v61  ;;  %v5136_v38 = vunpack.c.l.bf16 %v5878_v61  ;;  %v5141_v61 = vunpack.c.h.bf16 %v5879_v30 }
 0x1e8   :  { %v6832_v59 = vpop.xlane.xlu2 %1461  ;;  %v6834_v29 = vpop.xlane.xlu1 %1458  ;;  %v1604_v3 = vsel %vm1039_vm0, %v5140_v62, 0.0 }
 0x1e9   :  { %10289 = vst [vmem:[#allocation103_spill] sm:$0xff] %v6832_v59  ;;  %v6836_v60 = vpop.xlane.xlu0 %1455 }
 0x1ea   :  { %10290 = vst [vmem:[#allocation104_spill] sm:$0xff] %v6834_v29  ;;  %v1601_v29 = vsel %vm1039_vm0, %v5137_v25, 0.0 }
 0x1eb   :  { %10291 = vst [vmem:[#allocation105_spill] sm:$0xff] %v6836_v60  ;;  %v1598_v60 = vsel %vm1039_vm0, %v5136_v38, 0.0  ;;  %v1607_v38 = vsel %vm1039_vm0, %v5141_v61, 0.0 }
 0x1ed   :  { %1596 = vadd.xlane.f32.xlu2 %v1595_v34  ;;  %1593 = vadd.xlane.f32.xlu1 %v1592_v63  ;;  %v5880_v34 = vld [vmem:[%s10184_s0 + $0x2f8] sm:$0xff]  }
 0x1ee   :  { %1590 = vadd.xlane.f32.xlu0 %v1589_v24  ;;  %v5145_v63 = vunpack.c.h.bf16 %v5880_v34  ;;  %v5144_v24 = vunpack.c.l.bf16 %v5880_v34 }
 0x1f0   :  { %v6847_v59 = vpop.xlane.xlu2 %1470  ;;  %v6849_v45 = vpop.xlane.xlu1 %1467  ;;  %v1613_v62 = vsel %vm1039_vm0, %v5145_v63, 0.0  ;;  %v1610_v25 = vsel %vm1039_vm0, %v5144_v24, 0.0 }
 0x1f1   :  { %10292 = vst [vmem:[#allocation106_spill] sm:$0xff] %v6847_v59  ;;  %v6851_v58 = vpop.xlane.xlu0 %1464 }
 0x1f2   :  { %10293 = vst [vmem:[#allocation107_spill] sm:$0xff] %v6849_v45 }
 0x1f3   :  { %10294 = vst [vmem:[#allocation108_spill] sm:$0xff] %v6851_v58 }
 0x1f5   :  { %1605 = vadd.xlane.f32.xlu2 %v1604_v3  ;;  %1602 = vadd.xlane.f32.xlu1 %v1601_v29  ;;  %v5882_v29 = vld [vmem:[%s10184_s0 + $0x308] sm:$0xff]  }
 0x1f6   :  { %1599 = vadd.xlane.f32.xlu0 %v1598_v60  ;;  %v5881_v60 = vld [vmem:[%s10184_s0 + $0x300] sm:$0xff]   ;;  %v5152_v30 = vunpack.c.l.bf16 %v5882_v29 }
 0x1f7   :  { %v5149_v3 = vunpack.c.h.bf16 %v5881_v60  ;;  %v5148_v34 = vunpack.c.l.bf16 %v5881_v60  ;;  %v5153_v60 = vunpack.c.h.bf16 %v5882_v29 }
 0x1f8   :  { %v6859_v59 = vpop.xlane.xlu2 %1479  ;;  %v6861_v45 = vpop.xlane.xlu1 %1476  ;;  %v1622_v61 = vsel %vm1039_vm0, %v5152_v30, 0.0 }
 0x1f9   :  { %10295 = vst [vmem:[#allocation109_spill] sm:$0xff] %v6859_v59  ;;  %v6863_v58 = vpop.xlane.xlu0 %1473 }
 0x1fa   :  { %10296 = vst [vmem:[#allocation110_spill] sm:$0xff] %v6861_v45  ;;  %v1616_v45 = vsel %vm1039_vm0, %v5148_v34, 0.0  ;;  %v1625_v34 = vsel %vm1039_vm0, %v5153_v60, 0.0 }
 0x1fb   :  { %10297 = vst [vmem:[#allocation111_spill] sm:$0xff] %v6863_v58  ;;  %v1619_v58 = vsel %vm1039_vm0, %v5149_v3, 0.0 }
 0x1fd   :  { %1614 = vadd.xlane.f32.xlu2 %v1613_v62  ;;  %1611 = vadd.xlane.f32.xlu1 %v1610_v25  ;;  %v5883_v62 = vld [vmem:[%s10184_s0 + $0x310] sm:$0xff]  }
 0x1fe   :  { %1608 = vadd.xlane.f32.xlu0 %v1607_v38  ;;  %v5157_v25 = vunpack.c.h.bf16 %v5883_v62  ;;  %v5156_v38 = vunpack.c.l.bf16 %v5883_v62 }
 0x200   :  { %v6874_v59 = vpop.xlane.xlu2 %1488  ;;  %v6876_v63 = vpop.xlane.xlu1 %1485  ;;  %v1631_v30 = vsel %vm1039_vm0, %v5157_v25, 0.0  ;;  %v1628_v3 = vsel %vm1039_vm0, %v5156_v38, 0.0 }
 0x201   :  { %10298 = vst [vmem:[#allocation112_spill] sm:$0xff] %v6874_v59  ;;  %v6878_v24 = vpop.xlane.xlu0 %1482 }
 0x202   :  { %10299 = vst [vmem:[#allocation113_spill] sm:$0xff] %v6876_v63 }
 0x203   :  { %10300 = vst [vmem:[#allocation114_spill] sm:$0xff] %v6878_v24 }
 0x205   :  { %1623 = vadd.xlane.f32.xlu2 %v1622_v61  ;;  %1620 = vadd.xlane.f32.xlu1 %v1619_v58  ;;  %v5885_v58 = vld [vmem:[%s10184_s0 + $0x320] sm:$0xff]  }
 0x206   :  { %1617 = vadd.xlane.f32.xlu0 %v1616_v45  ;;  %v5884_v45 = vld [vmem:[%s10184_s0 + $0x318] sm:$0xff]   ;;  %v5164_v29 = vunpack.c.l.bf16 %v5885_v58 }
 0x207   :  { %v5161_v61 = vunpack.c.h.bf16 %v5884_v45  ;;  %v5160_v62 = vunpack.c.l.bf16 %v5884_v45  ;;  %v5165_v45 = vunpack.c.h.bf16 %v5885_v58 }
 0x208   :  { %v6886_v59 = vpop.xlane.xlu2 %1497  ;;  %v6888_v63 = vpop.xlane.xlu1 %1494  ;;  %v1640_v60 = vsel %vm1039_vm0, %v5164_v29, 0.0 }
 0x209   :  { %10301 = vst [vmem:[#allocation115_spill] sm:$0xff] %v6886_v59  ;;  %v6890_v24 = vpop.xlane.xlu0 %1491 }
 0x20a   :  { %10302 = vst [vmem:[#allocation116_spill] sm:$0xff] %v6888_v63  ;;  %v1637_v63 = vsel %vm1039_vm0, %v5161_v61, 0.0 }
 0x20b   :  { %10303 = vst [vmem:[#allocation117_spill] sm:$0xff] %v6890_v24  ;;  %v1634_v24 = vsel %vm1039_vm0, %v5160_v62, 0.0  ;;  %v1643_v62 = vsel %vm1039_vm0, %v5165_v45, 0.0 }
 0x20d   :  { %1632 = vadd.xlane.f32.xlu2 %v1631_v30  ;;  %1629 = vadd.xlane.f32.xlu1 %v1628_v3  ;;  %v5886_v30 = vld [vmem:[%s10184_s0 + $0x328] sm:$0xff]  }
 0x20e   :  { %1626 = vadd.xlane.f32.xlu0 %v1625_v34  ;;  %v5169_v3 = vunpack.c.h.bf16 %v5886_v30  ;;  %v5168_v34 = vunpack.c.l.bf16 %v5886_v30 }
 0x210   :  { %v6901_v59 = vpop.xlane.xlu2 %1506  ;;  %v6903_v25 = vpop.xlane.xlu1 %1503  ;;  %v1649_v29 = vsel %vm1039_vm0, %v5169_v3, 0.0  ;;  %v1646_v61 = vsel %vm1039_vm0, %v5168_v34, 0.0 }
 0x211   :  { %10304 = vst [vmem:[#allocation118_spill] sm:$0xff] %v6901_v59  ;;  %v6905_v38 = vpop.xlane.xlu0 %1500 }
 0x212   :  { %10305 = vst [vmem:[#allocation119_spill] sm:$0xff] %v6903_v25 }
 0x213   :  { %10306 = vst [vmem:[#allocation120_spill] sm:$0xff] %v6905_v38 }
 0x215   :  { %1641 = vadd.xlane.f32.xlu2 %v1640_v60  ;;  %1638 = vadd.xlane.f32.xlu1 %v1637_v63  ;;  %v5888_v63 = vld [vmem:[%s10184_s0 + $0x338] sm:$0xff]  }
 0x216   :  { %1635 = vadd.xlane.f32.xlu0 %v1634_v24  ;;  %v5887_v24 = vld [vmem:[%s10184_s0 + $0x330] sm:$0xff]   ;;  %v5176_v58 = vunpack.c.l.bf16 %v5888_v63 }
 0x217   :  { %v5173_v60 = vunpack.c.h.bf16 %v5887_v24  ;;  %v5172_v30 = vunpack.c.l.bf16 %v5887_v24  ;;  %v5177_v24 = vunpack.c.h.bf16 %v5888_v63 }
 0x218   :  { %v6913_v59 = vpop.xlane.xlu2 %1515  ;;  %v6915_v25 = vpop.xlane.xlu1 %1512  ;;  %v1658_v45 = vsel %vm1039_vm0, %v5176_v58, 0.0 }
 0x219   :  { %10307 = vst [vmem:[#allocation121_spill] sm:$0xff] %v6913_v59  ;;  %v6917_v38 = vpop.xlane.xlu0 %1509 }
 0x21a   :  { %10308 = vst [vmem:[#allocation122_spill] sm:$0xff] %v6915_v25  ;;  %v1655_v25 = vsel %vm1039_vm0, %v5173_v60, 0.0 }
 0x21b   :  { %10309 = vst [vmem:[#allocation123_spill] sm:$0xff] %v6917_v38  ;;  %v1652_v38 = vsel %vm1039_vm0, %v5172_v30, 0.0  ;;  %v1661_v30 = vsel %vm1039_vm0, %v5177_v24, 0.0 }
 0x21d   :  { %1650 = vadd.xlane.f32.xlu2 %v1649_v29  ;;  %1647 = vadd.xlane.f32.xlu1 %v1646_v61  ;;  %v5889_v29 = vld [vmem:[%s10184_s0 + $0x340] sm:$0xff]  }
 0x21e   :  { %1644 = vadd.xlane.f32.xlu0 %v1643_v62  ;;  %v5181_v61 = vunpack.c.h.bf16 %v5889_v29  ;;  %v5180_v62 = vunpack.c.l.bf16 %v5889_v29 }
 0x220   :  { %v6928_v59 = vpop.xlane.xlu2 %1524  ;;  %v6930_v3 = vpop.xlane.xlu1 %1521  ;;  %v1667_v58 = vsel %vm1039_vm0, %v5181_v61, 0.0  ;;  %v1664_v60 = vsel %vm1039_vm0, %v5180_v62, 0.0 }
 0x221   :  { %10310 = vst [vmem:[#allocation124_spill] sm:$0xff] %v6928_v59  ;;  %v6932_v34 = vpop.xlane.xlu0 %1518 }
 0x222   :  { %10311 = vst [vmem:[#allocation125_spill] sm:$0xff] %v6930_v3 }
 0x223   :  { %10312 = vst [vmem:[#allocation126_spill] sm:$0xff] %v6932_v34 }
 0x225   :  { %1659 = vadd.xlane.f32.xlu2 %v1658_v45  ;;  %1656 = vadd.xlane.f32.xlu1 %v1655_v25  ;;  %v5891_v25 = vld [vmem:[%s10184_s0 + $0x350] sm:$0xff]  }
 0x226   :  { %1653 = vadd.xlane.f32.xlu0 %v1652_v38  ;;  %v5890_v38 = vld [vmem:[%s10184_s0 + $0x348] sm:$0xff]   ;;  %v5188_v63 = vunpack.c.l.bf16 %v5891_v25 }
 0x227   :  { %v5185_v45 = vunpack.c.h.bf16 %v5890_v38  ;;  %v5184_v29 = vunpack.c.l.bf16 %v5890_v38  ;;  %v5189_v38 = vunpack.c.h.bf16 %v5891_v25 }
 0x228   :  { %v6940_v59 = vpop.xlane.xlu2 %1533  ;;  %v6942_v3 = vpop.xlane.xlu1 %1530  ;;  %v1676_v24 = vsel %vm1039_vm0, %v5188_v63, 0.0 }
 0x229   :  { %10313 = vst [vmem:[#allocation127_spill] sm:$0xff] %v6940_v59  ;;  %v6944_v34 = vpop.xlane.xlu0 %1527 }
 0x22a   :  { %10314 = vst [vmem:[#allocation128_spill] sm:$0xff] %v6942_v3  ;;  %v1673_v3 = vsel %vm1039_vm0, %v5185_v45, 0.0 }
 0x22b   :  { %10315 = vst [vmem:[#allocation129_spill] sm:$0xff] %v6944_v34  ;;  %v1670_v34 = vsel %vm1039_vm0, %v5184_v29, 0.0  ;;  %v1679_v29 = vsel %vm1039_vm0, %v5189_v38, 0.0 }
 0x22d   :  { %1668 = vadd.xlane.f32.xlu2 %v1667_v58  ;;  %1665 = vadd.xlane.f32.xlu1 %v1664_v60  ;;  %v5892_v58 = vld [vmem:[%s10184_s0 + $0x358] sm:$0xff]  }
 0x22e   :  { %1662 = vadd.xlane.f32.xlu0 %v1661_v30  ;;  %v5193_v60 = vunpack.c.h.bf16 %v5892_v58  ;;  %v5192_v30 = vunpack.c.l.bf16 %v5892_v58 }
 0x230   :  { %v6955_v59 = vpop.xlane.xlu2 %1542  ;;  %v6957_v61 = vpop.xlane.xlu1 %1539  ;;  %v1685_v63 = vsel %vm1039_vm0, %v5193_v60, 0.0  ;;  %v1682_v45 = vsel %vm1039_vm0, %v5192_v30, 0.0 }
 0x231   :  { %10316 = vst [vmem:[#allocation130_spill] sm:$0xff] %v6955_v59  ;;  %v6959_v62 = vpop.xlane.xlu0 %1536 }
 0x232   :  { %10317 = vst [vmem:[#allocation131_spill] sm:$0xff] %v6957_v61 }
 0x233   :  { %10318 = vst [vmem:[#allocation132_spill] sm:$0xff] %v6959_v62 }
 0x235   :  { %1677 = vadd.xlane.f32.xlu2 %v1676_v24  ;;  %1674 = vadd.xlane.f32.xlu1 %v1673_v3  ;;  %v5894_v3 = vld [vmem:[%s10184_s0 + $0x368] sm:$0xff]  }
 0x236   :  { %1671 = vadd.xlane.f32.xlu0 %v1670_v34  ;;  %v5893_v34 = vld [vmem:[%s10184_s0 + $0x360] sm:$0xff]   ;;  %v5200_v25 = vunpack.c.l.bf16 %v5894_v3 }
 0x237   :  { %v5197_v24 = vunpack.c.h.bf16 %v5893_v34  ;;  %v5196_v58 = vunpack.c.l.bf16 %v5893_v34  ;;  %v5201_v34 = vunpack.c.h.bf16 %v5894_v3 }
 0x238   :  { %v6967_v59 = vpop.xlane.xlu2 %1551  ;;  %v6969_v61 = vpop.xlane.xlu1 %1548  ;;  %v1694_v38 = vsel %vm1039_vm0, %v5200_v25, 0.0 }
 0x239   :  { %10319 = vst [vmem:[#allocation133_spill] sm:$0xff] %v6967_v59  ;;  %v6971_v62 = vpop.xlane.xlu0 %1545 }
 0x23a   :  { %10320 = vst [vmem:[#allocation134_spill] sm:$0xff] %v6969_v61  ;;  %v1691_v61 = vsel %vm1039_vm0, %v5197_v24, 0.0 }
 0x23b   :  { %10321 = vst [vmem:[#allocation135_spill] sm:$0xff] %v6971_v62  ;;  %v1688_v62 = vsel %vm1039_vm0, %v5196_v58, 0.0  ;;  %v1697_v58 = vsel %vm1039_vm0, %v5201_v34, 0.0 }
 0x23d   :  { %1686 = vadd.xlane.f32.xlu2 %v1685_v63  ;;  %1683 = vadd.xlane.f32.xlu1 %v1682_v45  ;;  %v5895_v63 = vld [vmem:[%s10184_s0 + $0x370] sm:$0xff]  }
 0x23e   :  { %1680 = vadd.xlane.f32.xlu0 %v1679_v29  ;;  %v5205_v45 = vunpack.c.h.bf16 %v5895_v63  ;;  %v5204_v29 = vunpack.c.l.bf16 %v5895_v63 }
 0x240   :  { %v6982_v59 = vpop.xlane.xlu2 %1560  ;;  %v6984_v60 = vpop.xlane.xlu1 %1557  ;;  %v1703_v25 = vsel %vm1039_vm0, %v5205_v45, 0.0  ;;  %v1700_v24 = vsel %vm1039_vm0, %v5204_v29, 0.0 }
 0x241   :  { %10322 = vst [vmem:[#allocation136_spill] sm:$0xff] %v6982_v59  ;;  %v6986_v30 = vpop.xlane.xlu0 %1554 }
 0x242   :  { %10323 = vst [vmem:[#allocation137_spill] sm:$0xff] %v6984_v60 }
 0x243   :  { %10324 = vst [vmem:[#allocation138_spill] sm:$0xff] %v6986_v30 }
 0x245   :  { %1695 = vadd.xlane.f32.xlu2 %v1694_v38  ;;  %1692 = vadd.xlane.f32.xlu1 %v1691_v61  ;;  %v5897_v61 = vld [vmem:[%s10184_s0 + $0x380] sm:$0xff]  }
 0x246   :  { %1689 = vadd.xlane.f32.xlu0 %v1688_v62  ;;  %v5896_v62 = vld [vmem:[%s10184_s0 + $0x378] sm:$0xff]   ;;  %v5212_v3 = vunpack.c.l.bf16 %v5897_v61 }
 0x247   :  { %v5209_v38 = vunpack.c.h.bf16 %v5896_v62  ;;  %v5208_v63 = vunpack.c.l.bf16 %v5896_v62  ;;  %v5213_v62 = vunpack.c.h.bf16 %v5897_v61 }
 0x248   :  { %v6994_v59 = vpop.xlane.xlu2 %1569  ;;  %v6996_v60 = vpop.xlane.xlu1 %1566  ;;  %v1712_v34 = vsel %vm1039_vm0, %v5212_v3, 0.0 }
 0x249   :  { %10325 = vst [vmem:[#allocation139_spill] sm:$0xff] %v6994_v59  ;;  %v6998_v30 = vpop.xlane.xlu0 %1563 }
 0x24a   :  { %10326 = vst [vmem:[#allocation140_spill] sm:$0xff] %v6996_v60  ;;  %v1709_v60 = vsel %vm1039_vm0, %v5209_v38, 0.0 }
 0x24b   :  { %10327 = vst [vmem:[#allocation141_spill] sm:$0xff] %v6998_v30  ;;  %v1706_v30 = vsel %vm1039_vm0, %v5208_v63, 0.0  ;;  %v1715_v63 = vsel %vm1039_vm0, %v5213_v62, 0.0 }
 0x24d   :  { %1704 = vadd.xlane.f32.xlu2 %v1703_v25  ;;  %1701 = vadd.xlane.f32.xlu1 %v1700_v24  ;;  %v5898_v25 = vld [vmem:[%s10184_s0 + $0x388] sm:$0xff]  }
 0x24e   :  { %1698 = vadd.xlane.f32.xlu0 %v1697_v58  ;;  %v5217_v24 = vunpack.c.h.bf16 %v5898_v25  ;;  %v5216_v58 = vunpack.c.l.bf16 %v5898_v25 }
 0x250   :  { %v7009_v59 = vpop.xlane.xlu2 %1578  ;;  %v7011_v45 = vpop.xlane.xlu1 %1575  ;;  %v1721_v3 = vsel %vm1039_vm0, %v5217_v24, 0.0  ;;  %v1718_v38 = vsel %vm1039_vm0, %v5216_v58, 0.0 }
 0x251   :  { %10328 = vst [vmem:[#allocation142_spill] sm:$0xff] %v7009_v59  ;;  %v7013_v29 = vpop.xlane.xlu0 %1572 }
 0x252   :  { %10329 = vst [vmem:[#allocation143_spill] sm:$0xff] %v7011_v45 }
 0x253   :  { %10330 = vst [vmem:[#allocation144_spill] sm:$0xff] %v7013_v29 }
 0x255   :  { %1713 = vadd.xlane.f32.xlu2 %v1712_v34  ;;  %1710 = vadd.xlane.f32.xlu1 %v1709_v60  ;;  %v5900_v60 = vld [vmem:[%s10184_s0 + $0x398] sm:$0xff]  }
 0x256   :  { %1707 = vadd.xlane.f32.xlu0 %v1706_v30  ;;  %v5899_v30 = vld [vmem:[%s10184_s0 + $0x390] sm:$0xff]   ;;  %v5224_v61 = vunpack.c.l.bf16 %v5900_v60 }
 0x257   :  { %v5221_v34 = vunpack.c.h.bf16 %v5899_v30  ;;  %v5220_v25 = vunpack.c.l.bf16 %v5899_v30  ;;  %v5225_v30 = vunpack.c.h.bf16 %v5900_v60 }
 0x258   :  { %v7021_v59 = vpop.xlane.xlu2 %1587  ;;  %v7023_v45 = vpop.xlane.xlu1 %1584  ;;  %v1730_v62 = vsel %vm1039_vm0, %v5224_v61, 0.0 }
 0x259   :  { %10331 = vst [vmem:[#allocation145_spill] sm:$0xff] %v7021_v59  ;;  %v7025_v29 = vpop.xlane.xlu0 %1581 }
 0x25a   :  { %10332 = vst [vmem:[#allocation146_spill] sm:$0xff] %v7023_v45  ;;  %v1727_v45 = vsel %vm1039_vm0, %v5221_v34, 0.0 }
 0x25b   :  { %10333 = vst [vmem:[#allocation147_spill] sm:$0xff] %v7025_v29  ;;  %v1724_v29 = vsel %vm1039_vm0, %v5220_v25, 0.0  ;;  %v1733_v25 = vsel %vm1039_vm0, %v5225_v30, 0.0 }
 0x25d   :  { %1722 = vadd.xlane.f32.xlu2 %v1721_v3  ;;  %1719 = vadd.xlane.f32.xlu1 %v1718_v38  ;;  %v5901_v3 = vld [vmem:[%s10184_s0 + $0x3a0] sm:$0xff]  }
 0x25e   :  { %1716 = vadd.xlane.f32.xlu0 %v1715_v63  ;;  %v5229_v38 = vunpack.c.h.bf16 %v5901_v3  ;;  %v5228_v63 = vunpack.c.l.bf16 %v5901_v3 }
 0x260   :  { %v7036_v59 = vpop.xlane.xlu2 %1596  ;;  %v7038_v24 = vpop.xlane.xlu1 %1593  ;;  %v1739_v61 = vsel %vm1039_vm0, %v5229_v38, 0.0  ;;  %v1736_v34 = vsel %vm1039_vm0, %v5228_v63, 0.0 }
 0x261   :  { %10334 = vst [vmem:[#allocation148_spill] sm:$0xff] %v7036_v59  ;;  %v7040_v58 = vpop.xlane.xlu0 %1590 }
 0x262   :  { %10335 = vst [vmem:[#allocation149_spill] sm:$0xff] %v7038_v24 }
 0x263   :  { %10336 = vst [vmem:[#allocation150_spill] sm:$0xff] %v7040_v58 }
 0x265   :  { %1731 = vadd.xlane.f32.xlu2 %v1730_v62  ;;  %1728 = vadd.xlane.f32.xlu1 %v1727_v45  ;;  %v5903_v45 = vld [vmem:[%s10184_s0 + $0x3b0] sm:$0xff]  }
 0x266   :  { %1725 = vadd.xlane.f32.xlu0 %v1724_v29  ;;  %v5902_v29 = vld [vmem:[%s10184_s0 + $0x3a8] sm:$0xff]   ;;  %v5236_v60 = vunpack.c.l.bf16 %v5903_v45 }
 0x267   :  { %v5233_v62 = vunpack.c.h.bf16 %v5902_v29  ;;  %v5232_v3 = vunpack.c.l.bf16 %v5902_v29  ;;  %v5237_v29 = vunpack.c.h.bf16 %v5903_v45 }
 0x268   :  { %v7048_v59 = vpop.xlane.xlu2 %1605  ;;  %v7050_v24 = vpop.xlane.xlu1 %1602  ;;  %v1748_v30 = vsel %vm1039_vm0, %v5236_v60, 0.0 }
 0x269   :  { %10337 = vst [vmem:[#allocation151_spill] sm:$0xff] %v7048_v59  ;;  %v7052_v58 = vpop.xlane.xlu0 %1599 }
 0x26a   :  { %10338 = vst [vmem:[#allocation152_spill] sm:$0xff] %v7050_v24  ;;  %v1745_v24 = vsel %vm1039_vm0, %v5233_v62, 0.0 }
 0x26b   :  { %10339 = vst [vmem:[#allocation153_spill] sm:$0xff] %v7052_v58  ;;  %v1742_v58 = vsel %vm1039_vm0, %v5232_v3, 0.0  ;;  %v1751_v3 = vsel %vm1039_vm0, %v5237_v29, 0.0 }
 0x26d   :  { %1740 = vadd.xlane.f32.xlu2 %v1739_v61  ;;  %1737 = vadd.xlane.f32.xlu1 %v1736_v34  ;;  %v5904_v61 = vld [vmem:[%s10184_s0 + $0x3b8] sm:$0xff]  }
 0x26e   :  { %1734 = vadd.xlane.f32.xlu0 %v1733_v25  ;;  %v5241_v34 = vunpack.c.h.bf16 %v5904_v61  ;;  %v5240_v25 = vunpack.c.l.bf16 %v5904_v61 }
 0x270   :  { %v7063_v59 = vpop.xlane.xlu2 %1614  ;;  %v7065_v38 = vpop.xlane.xlu1 %1611  ;;  %v1757_v60 = vsel %vm1039_vm0, %v5241_v34, 0.0  ;;  %v1754_v62 = vsel %vm1039_vm0, %v5240_v25, 0.0 }
 0x271   :  { %10340 = vst [vmem:[#allocation154_spill] sm:$0xff] %v7063_v59  ;;  %v7067_v63 = vpop.xlane.xlu0 %1608 }
 0x272   :  { %10341 = vst [vmem:[#allocation155_spill] sm:$0xff] %v7065_v38 }
 0x273   :  { %10342 = vst [vmem:[#allocation156_spill] sm:$0xff] %v7067_v63 }
 0x275   :  { %1749 = vadd.xlane.f32.xlu2 %v1748_v30  ;;  %1746 = vadd.xlane.f32.xlu1 %v1745_v24  ;;  %v5906_v24 = vld [vmem:[%s10184_s0 + $0x3c8] sm:$0xff]  }
 0x276   :  { %1743 = vadd.xlane.f32.xlu0 %v1742_v58  ;;  %v5905_v58 = vld [vmem:[%s10184_s0 + $0x3c0] sm:$0xff]   ;;  %v5248_v45 = vunpack.c.l.bf16 %v5906_v24 }
 0x277   :  { %v5245_v30 = vunpack.c.h.bf16 %v5905_v58  ;;  %v5244_v61 = vunpack.c.l.bf16 %v5905_v58  ;;  %v5249_v58 = vunpack.c.h.bf16 %v5906_v24 }
 0x278   :  { %v7075_v59 = vpop.xlane.xlu2 %1623  ;;  %v7077_v38 = vpop.xlane.xlu1 %1620  ;;  %v1766_v29 = vsel %vm1039_vm0, %v5248_v45, 0.0 }
 0x279   :  { %10343 = vst [vmem:[#allocation157_spill] sm:$0xff] %v7075_v59  ;;  %v7079_v63 = vpop.xlane.xlu0 %1617 }
 0x27a   :  { %10344 = vst [vmem:[#allocation158_spill] sm:$0xff] %v7077_v38  ;;  %v1760_v38 = vsel %vm1039_vm0, %v5244_v61, 0.0  ;;  %v1769_v61 = vsel %vm1039_vm0, %v5249_v58, 0.0 }
 0x27b   :  { %10345 = vst [vmem:[#allocation159_spill] sm:$0xff] %v7079_v63  ;;  %v1763_v63 = vsel %vm1039_vm0, %v5245_v30, 0.0 }
 0x27d   :  { %1758 = vadd.xlane.f32.xlu2 %v1757_v60  ;;  %1755 = vadd.xlane.f32.xlu1 %v1754_v62  ;;  %v5907_v60 = vld [vmem:[%s10184_s0 + $0x3d0] sm:$0xff]  }
 0x27e   :  { %1752 = vadd.xlane.f32.xlu0 %v1751_v3  ;;  %v5253_v62 = vunpack.c.h.bf16 %v5907_v60  ;;  %v5252_v3 = vunpack.c.l.bf16 %v5907_v60 }
 0x280   :  { %v7090_v59 = vpop.xlane.xlu2 %1632  ;;  %v7092_v34 = vpop.xlane.xlu1 %1629  ;;  %v1775_v45 = vsel %vm1039_vm0, %v5253_v62, 0.0  ;;  %v1772_v30 = vsel %vm1039_vm0, %v5252_v3, 0.0 }
 0x281   :  { %10346 = vst [vmem:[#allocation160_spill] sm:$0xff] %v7090_v59  ;;  %v7094_v25 = vpop.xlane.xlu0 %1626 }
 0x282   :  { %10347 = vst [vmem:[#allocation161_spill] sm:$0xff] %v7092_v34 }
 0x283   :  { %10348 = vst [vmem:[#allocation162_spill] sm:$0xff] %v7094_v25 }
 0x285   :  { %1767 = vadd.xlane.f32.xlu2 %v1766_v29  ;;  %1764 = vadd.xlane.f32.xlu1 %v1763_v63  ;;  %v5909_v63 = vld [vmem:[%s10184_s0 + $0x3e0] sm:$0xff]  }
 0x286   :  { %1761 = vadd.xlane.f32.xlu0 %v1760_v38  ;;  %v5908_v38 = vld [vmem:[%s10184_s0 + $0x3d8] sm:$0xff]   ;;  %v5260_v24 = vunpack.c.l.bf16 %v5909_v63 }
 0x287   :  { %v5257_v29 = vunpack.c.h.bf16 %v5908_v38  ;;  %v5256_v60 = vunpack.c.l.bf16 %v5908_v38  ;;  %v5261_v38 = vunpack.c.h.bf16 %v5909_v63 }
 0x288   :  { %v7102_v59 = vpop.xlane.xlu2 %1641  ;;  %v7104_v34 = vpop.xlane.xlu1 %1638  ;;  %v1784_v58 = vsel %vm1039_vm0, %v5260_v24, 0.0 }
 0x289   :  { %10349 = vst [vmem:[#allocation163_spill] sm:$0xff] %v7102_v59  ;;  %v7106_v25 = vpop.xlane.xlu0 %1635 }
 0x28a   :  { %10350 = vst [vmem:[#allocation164_spill] sm:$0xff] %v7104_v34  ;;  %v1781_v34 = vsel %vm1039_vm0, %v5257_v29, 0.0 }
 0x28b   :  { %10351 = vst [vmem:[#allocation165_spill] sm:$0xff] %v7106_v25  ;;  %v1778_v25 = vsel %vm1039_vm0, %v5256_v60, 0.0  ;;  %v1787_v60 = vsel %vm1039_vm0, %v5261_v38, 0.0 }
 0x28d   :  { %1776 = vadd.xlane.f32.xlu2 %v1775_v45  ;;  %1773 = vadd.xlane.f32.xlu1 %v1772_v30  ;;  %v5910_v45 = vld [vmem:[%s10184_s0 + $0x3e8] sm:$0xff]  }
 0x28e   :  { %1770 = vadd.xlane.f32.xlu0 %v1769_v61  ;;  %v5265_v30 = vunpack.c.h.bf16 %v5910_v45  ;;  %v5264_v61 = vunpack.c.l.bf16 %v5910_v45 }
 0x290   :  { %v7117_v59 = vpop.xlane.xlu2 %1650  ;;  %v7119_v62 = vpop.xlane.xlu1 %1647  ;;  %v1793_v24 = vsel %vm1039_vm0, %v5265_v30, 0.0  ;;  %v1790_v29 = vsel %vm1039_vm0, %v5264_v61, 0.0 }
 0x291   :  { %10352 = vst [vmem:[#allocation166_spill] sm:$0xff] %v7117_v59  ;;  %v7121_v3 = vpop.xlane.xlu0 %1644 }
 0x292   :  { %10353 = vst [vmem:[#allocation167_spill] sm:$0xff] %v7119_v62 }
 0x293   :  { %10354 = vst [vmem:[#allocation168_spill] sm:$0xff] %v7121_v3 }
 0x295   :  { %1785 = vadd.xlane.f32.xlu2 %v1784_v58  ;;  %1782 = vadd.xlane.f32.xlu1 %v1781_v34  ;;  %v5912_v34 = vld [vmem:[%s10184_s0 + $0x3f8] sm:$0xff]  }
 0x296   :  { %1779 = vadd.xlane.f32.xlu0 %v1778_v25  ;;  %v5911_v25 = vld [vmem:[%s10184_s0 + $0x3f0] sm:$0xff]   ;;  %v5272_v63 = vunpack.c.l.bf16 %v5912_v34 }
 0x297   :  { %v5269_v58 = vunpack.c.h.bf16 %v5911_v25  ;;  %v5268_v45 = vunpack.c.l.bf16 %v5911_v25  ;;  %v5273_v25 = vunpack.c.h.bf16 %v5912_v34 }
 0x298   :  { %v7129_v59 = vpop.xlane.xlu2 %1659  ;;  %v7131_v62 = vpop.xlane.xlu1 %1656  ;;  %v1802_v38 = vsel %vm1039_vm0, %v5272_v63, 0.0 }
 0x299   :  { %10355 = vst [vmem:[#allocation169_spill] sm:$0xff] %v7129_v59  ;;  %v7133_v3 = vpop.xlane.xlu0 %1653 }
 0x29a   :  { %10356 = vst [vmem:[#allocation170_spill] sm:$0xff] %v7131_v62  ;;  %v1799_v62 = vsel %vm1039_vm0, %v5269_v58, 0.0 }
 0x29b   :  { %10357 = vst [vmem:[#allocation171_spill] sm:$0xff] %v7133_v3  ;;  %v1796_v3 = vsel %vm1039_vm0, %v5268_v45, 0.0  ;;  %v1805_v45 = vsel %vm1039_vm0, %v5273_v25, 0.0 }
 0x29d   :  { %1794 = vadd.xlane.f32.xlu2 %v1793_v24  ;;  %1791 = vadd.xlane.f32.xlu1 %v1790_v29  ;;  %v5913_v24 = vld [vmem:[%s10184_s0 + $0x400] sm:$0xff]  }
 0x29e   :  { %1788 = vadd.xlane.f32.xlu0 %v1787_v60  ;;  %v5277_v29 = vunpack.c.h.bf16 %v5913_v24  ;;  %v5276_v60 = vunpack.c.l.bf16 %v5913_v24 }
 0x2a0   :  { %v7144_v59 = vpop.xlane.xlu2 %1668  ;;  %v7146_v30 = vpop.xlane.xlu1 %1665  ;;  %v1811_v63 = vsel %vm1039_vm0, %v5277_v29, 0.0  ;;  %v1808_v58 = vsel %vm1039_vm0, %v5276_v60, 0.0 }
 0x2a1   :  { %10358 = vst [vmem:[#allocation172_spill] sm:$0xff] %v7144_v59  ;;  %v7148_v61 = vpop.xlane.xlu0 %1662 }
 0x2a2   :  { %10359 = vst [vmem:[#allocation173_spill] sm:$0xff] %v7146_v30 }
 0x2a3   :  { %10360 = vst [vmem:[#allocation174_spill] sm:$0xff] %v7148_v61 }
 0x2a5   :  { %1803 = vadd.xlane.f32.xlu2 %v1802_v38  ;;  %1800 = vadd.xlane.f32.xlu1 %v1799_v62  ;;  %v5915_v62 = vld [vmem:[%s10184_s0 + $0x410] sm:$0xff]  }
 0x2a6   :  { %1797 = vadd.xlane.f32.xlu0 %v1796_v3  ;;  %v5914_v3 = vld [vmem:[%s10184_s0 + $0x408] sm:$0xff]   ;;  %v5284_v34 = vunpack.c.l.bf16 %v5915_v62 }
 0x2a7   :  { %v5281_v38 = vunpack.c.h.bf16 %v5914_v3  ;;  %v5280_v24 = vunpack.c.l.bf16 %v5914_v3  ;;  %v5285_v3 = vunpack.c.h.bf16 %v5915_v62 }
 0x2a8   :  { %v7156_v59 = vpop.xlane.xlu2 %1677  ;;  %v7158_v30 = vpop.xlane.xlu1 %1674  ;;  %v1820_v25 = vsel %vm1039_vm0, %v5284_v34, 0.0 }
 0x2a9   :  { %10361 = vst [vmem:[#allocation175_spill] sm:$0xff] %v7156_v59  ;;  %v7160_v61 = vpop.xlane.xlu0 %1671 }
 0x2aa   :  { %10362 = vst [vmem:[#allocation176_spill] sm:$0xff] %v7158_v30  ;;  %v1817_v30 = vsel %vm1039_vm0, %v5281_v38, 0.0 }
 0x2ab   :  { %10363 = vst [vmem:[#allocation177_spill] sm:$0xff] %v7160_v61  ;;  %v1814_v61 = vsel %vm1039_vm0, %v5280_v24, 0.0  ;;  %v1823_v24 = vsel %vm1039_vm0, %v5285_v3, 0.0 }
 0x2ad   :  { %1812 = vadd.xlane.f32.xlu2 %v1811_v63  ;;  %1809 = vadd.xlane.f32.xlu1 %v1808_v58  ;;  %v5916_v63 = vld [vmem:[%s10184_s0 + $0x418] sm:$0xff]  }
 0x2ae   :  { %1806 = vadd.xlane.f32.xlu0 %v1805_v45  ;;  %v5289_v58 = vunpack.c.h.bf16 %v5916_v63  ;;  %v5288_v45 = vunpack.c.l.bf16 %v5916_v63 }
 0x2b0   :  { %v7171_v59 = vpop.xlane.xlu2 %1686  ;;  %v7173_v29 = vpop.xlane.xlu1 %1683  ;;  %v1829_v34 = vsel %vm1039_vm0, %v5289_v58, 0.0  ;;  %v1826_v38 = vsel %vm1039_vm0, %v5288_v45, 0.0 }
 0x2b1   :  { %10364 = vst [vmem:[#allocation178_spill] sm:$0xff] %v7171_v59  ;;  %v7175_v60 = vpop.xlane.xlu0 %1680 }
 0x2b2   :  { %10365 = vst [vmem:[#allocation179_spill] sm:$0xff] %v7173_v29 }
 0x2b3   :  { %10366 = vst [vmem:[#allocation180_spill] sm:$0xff] %v7175_v60 }
 0x2b5   :  { %1821 = vadd.xlane.f32.xlu2 %v1820_v25  ;;  %1818 = vadd.xlane.f32.xlu1 %v1817_v30  ;;  %v5918_v30 = vld [vmem:[%s10184_s0 + $0x428] sm:$0xff]  }
 0x2b6   :  { %1815 = vadd.xlane.f32.xlu0 %v1814_v61  ;;  %v5917_v61 = vld [vmem:[%s10184_s0 + $0x420] sm:$0xff]   ;;  %v5296_v62 = vunpack.c.l.bf16 %v5918_v30 }
 0x2b7   :  { %v5293_v25 = vunpack.c.h.bf16 %v5917_v61  ;;  %v5292_v63 = vunpack.c.l.bf16 %v5917_v61  ;;  %v5297_v61 = vunpack.c.h.bf16 %v5918_v30 }
 0x2b8   :  { %v7183_v59 = vpop.xlane.xlu2 %1695  ;;  %v7185_v29 = vpop.xlane.xlu1 %1692  ;;  %v1838_v3 = vsel %vm1039_vm0, %v5296_v62, 0.0 }
 0x2b9   :  { %10367 = vst [vmem:[#allocation181_spill] sm:$0xff] %v7183_v59  ;;  %v7187_v60 = vpop.xlane.xlu0 %1689 }
 0x2ba   :  { %10368 = vst [vmem:[#allocation182_spill] sm:$0xff] %v7185_v29  ;;  %v1835_v29 = vsel %vm1039_vm0, %v5293_v25, 0.0 }
 0x2bb   :  { %10369 = vst [vmem:[#allocation183_spill] sm:$0xff] %v7187_v60  ;;  %v1832_v60 = vsel %vm1039_vm0, %v5292_v63, 0.0  ;;  %v1841_v63 = vsel %vm1039_vm0, %v5297_v61, 0.0 }
 0x2bd   :  { %1830 = vadd.xlane.f32.xlu2 %v1829_v34  ;;  %1827 = vadd.xlane.f32.xlu1 %v1826_v38  ;;  %v5919_v34 = vld [vmem:[%s10184_s0 + $0x430] sm:$0xff]  }
 0x2be   :  { %1824 = vadd.xlane.f32.xlu0 %v1823_v24  ;;  %v5301_v38 = vunpack.c.h.bf16 %v5919_v34  ;;  %v5300_v24 = vunpack.c.l.bf16 %v5919_v34 }
 0x2c0   :  { %v7198_v59 = vpop.xlane.xlu2 %1704  ;;  %v7200_v58 = vpop.xlane.xlu1 %1701  ;;  %v1847_v62 = vsel %vm1039_vm0, %v5301_v38, 0.0  ;;  %v1844_v25 = vsel %vm1039_vm0, %v5300_v24, 0.0 }
 0x2c1   :  { %10370 = vst [vmem:[#allocation184_spill] sm:$0xff] %v7198_v59  ;;  %v7202_v45 = vpop.xlane.xlu0 %1698 }
 0x2c2   :  { %10371 = vst [vmem:[#allocation185_spill] sm:$0xff] %v7200_v58 }
 0x2c3   :  { %10372 = vst [vmem:[#allocation186_spill] sm:$0xff] %v7202_v45 }
 0x2c5   :  { %1839 = vadd.xlane.f32.xlu2 %v1838_v3  ;;  %1836 = vadd.xlane.f32.xlu1 %v1835_v29  ;;  %v5921_v29 = vld [vmem:[%s10184_s0 + $0x440] sm:$0xff]  }
 0x2c6   :  { %1833 = vadd.xlane.f32.xlu0 %v1832_v60  ;;  %v5920_v60 = vld [vmem:[%s10184_s0 + $0x438] sm:$0xff]   ;;  %v5308_v30 = vunpack.c.l.bf16 %v5921_v29 }
 0x2c7   :  { %v5305_v3 = vunpack.c.h.bf16 %v5920_v60  ;;  %v5304_v34 = vunpack.c.l.bf16 %v5920_v60  ;;  %v5309_v60 = vunpack.c.h.bf16 %v5921_v29 }
 0x2c8   :  { %v7210_v59 = vpop.xlane.xlu2 %1713  ;;  %v7212_v58 = vpop.xlane.xlu1 %1710  ;;  %v1856_v61 = vsel %vm1039_vm0, %v5308_v30, 0.0 }
 0x2c9   :  { %10373 = vst [vmem:[#allocation187_spill] sm:$0xff] %v7210_v59  ;;  %v7214_v45 = vpop.xlane.xlu0 %1707  ;;  %v1850_v59 = vsel %vm1039_vm0, %v5304_v34, 0.0  ;;  %v1859_v34 = vsel %vm1039_vm0, %v5309_v60, 0.0 }
 0x2ca   :  { %10374 = vst [vmem:[#allocation188_spill] sm:$0xff] %v7212_v58 }
 0x2cb   :  { %10375 = vst [vmem:[#allocation189_spill] sm:$0xff] %v7214_v45  ;;  %v1853_v45 = vsel %vm1039_vm0, %v5305_v3, 0.0 }
 0x2cd   :  { %1848 = vadd.xlane.f32.xlu2 %v1847_v62  ;;  %1845 = vadd.xlane.f32.xlu1 %v1844_v25  ;;  %v5922_v62 = vld [vmem:[%s10184_s0 + $0x448] sm:$0xff]  }
 0x2ce   :  { %1842 = vadd.xlane.f32.xlu0 %v1841_v63  ;;  %v5313_v25 = vunpack.c.h.bf16 %v5922_v62  ;;  %v5312_v63 = vunpack.c.l.bf16 %v5922_v62 }
 0x2d0   :  { %v7225_v58 = vpop.xlane.xlu2 %1722  ;;  %v7227_v38 = vpop.xlane.xlu1 %1719  ;;  %v1865_v30 = vsel %vm1039_vm0, %v5313_v25, 0.0  ;;  %v1862_v3 = vsel %vm1039_vm0, %v5312_v63, 0.0 }
 0x2d1   :  { %10376 = vst [vmem:[#allocation190_spill] sm:$0xff] %v7225_v58  ;;  %v7229_v24 = vpop.xlane.xlu0 %1716 }
 0x2d2   :  { %10377 = vst [vmem:[#allocation191_spill] sm:$0xff] %v7227_v38 }
 0x2d3   :  { %10378 = vst [vmem:[#allocation192_spill] sm:$0xff] %v7229_v24 }
 0x2d5   :  { %1857 = vadd.xlane.f32.xlu2 %v1856_v61  ;;  %1854 = vadd.xlane.f32.xlu1 %v1853_v45  ;;  %v5924_v45 = vld [vmem:[%s10184_s0 + $0x458] sm:$0xff]  }
 0x2d6   :  { %1851 = vadd.xlane.f32.xlu0 %v1850_v59  ;;  %v5923_v59 = vld [vmem:[%s10184_s0 + $0x450] sm:$0xff]   ;;  %v5320_v29 = vunpack.c.l.bf16 %v5924_v45 }
 0x2d7   :  { %v5317_v61 = vunpack.c.h.bf16 %v5923_v59  ;;  %v5316_v62 = vunpack.c.l.bf16 %v5923_v59  ;;  %v5321_v59 = vunpack.c.h.bf16 %v5924_v45 }
 0x2d8   :  { %v7237_v58 = vpop.xlane.xlu2 %1731  ;;  %v7239_v38 = vpop.xlane.xlu1 %1728  ;;  %v1874_v60 = vsel %vm1039_vm0, %v5320_v29, 0.0 }
 0x2d9   :  { %10379 = vst [vmem:[#allocation193_spill] sm:$0xff] %v7237_v58  ;;  %v7241_v24 = vpop.xlane.xlu0 %1725 }
 0x2da   :  { %10380 = vst [vmem:[#allocation194_spill] sm:$0xff] %v7239_v38  ;;  %v1871_v38 = vsel %vm1039_vm0, %v5317_v61, 0.0 }
 0x2db   :  { %10381 = vst [vmem:[#allocation195_spill] sm:$0xff] %v7241_v24  ;;  %v1868_v24 = vsel %vm1039_vm0, %v5316_v62, 0.0  ;;  %v1877_v62 = vsel %vm1039_vm0, %v5321_v59, 0.0 }
 0x2dd   :  { %1866 = vadd.xlane.f32.xlu2 %v1865_v30  ;;  %1863 = vadd.xlane.f32.xlu1 %v1862_v3  ;;  %v5925_v30 = vld [vmem:[%s10184_s0 + $0x460] sm:$0xff]  }
 0x2de   :  { %1860 = vadd.xlane.f32.xlu0 %v1859_v34  ;;  %v5325_v3 = vunpack.c.h.bf16 %v5925_v30  ;;  %v5324_v34 = vunpack.c.l.bf16 %v5925_v30 }
 0x2e0   :  { %v7252_v58 = vpop.xlane.xlu2 %1740  ;;  %v7254_v25 = vpop.xlane.xlu1 %1737  ;;  %v1883_v29 = vsel %vm1039_vm0, %v5325_v3, 0.0  ;;  %v1880_v61 = vsel %vm1039_vm0, %v5324_v34, 0.0 }
 0x2e1   :  { %10382 = vst [vmem:[#allocation196_spill] sm:$0xff] %v7252_v58  ;;  %v7256_v63 = vpop.xlane.xlu0 %1734 }
 0x2e2   :  { %10383 = vst [vmem:[#allocation197_spill] sm:$0xff] %v7254_v25 }
 0x2e3   :  { %10384 = vst [vmem:[#allocation198_spill] sm:$0xff] %v7256_v63 }
 0x2e5   :  { %1875 = vadd.xlane.f32.xlu2 %v1874_v60  ;;  %1872 = vadd.xlane.f32.xlu1 %v1871_v38  ;;  %v5927_v38 = vld [vmem:[%s10184_s0 + $0x470] sm:$0xff]  }
 0x2e6   :  { %1869 = vadd.xlane.f32.xlu0 %v1868_v24  ;;  %v5926_v24 = vld [vmem:[%s10184_s0 + $0x468] sm:$0xff]   ;;  %v5332_v45 = vunpack.c.l.bf16 %v5927_v38 }
 0x2e7   :  { %v5329_v60 = vunpack.c.h.bf16 %v5926_v24  ;;  %v5328_v30 = vunpack.c.l.bf16 %v5926_v24  ;;  %v5333_v24 = vunpack.c.h.bf16 %v5927_v38 }
 0x2e8   :  { %v7264_v58 = vpop.xlane.xlu2 %1749  ;;  %v7266_v25 = vpop.xlane.xlu1 %1746  ;;  %v1892_v59 = vsel %vm1039_vm0, %v5332_v45, 0.0 }
 0x2e9   :  { %10385 = vst [vmem:[#allocation199_spill] sm:$0xff] %v7264_v58  ;;  %v7268_v63 = vpop.xlane.xlu0 %1743 }
 0x2ea   :  { %10386 = vst [vmem:[#allocation200_spill] sm:$0xff] %v7266_v25  ;;  %v1889_v25 = vsel %vm1039_vm0, %v5329_v60, 0.0 }
 0x2eb   :  { %10387 = vst [vmem:[#allocation201_spill] sm:$0xff] %v7268_v63  ;;  %v1886_v63 = vsel %vm1039_vm0, %v5328_v30, 0.0  ;;  %v1895_v30 = vsel %vm1039_vm0, %v5333_v24, 0.0 }
 0x2ed   :  { %1884 = vadd.xlane.f32.xlu2 %v1883_v29  ;;  %1881 = vadd.xlane.f32.xlu1 %v1880_v61  ;;  %v5928_v29 = vld [vmem:[%s10184_s0 + $0x478] sm:$0xff]  }
 0x2ee   :  { %1878 = vadd.xlane.f32.xlu0 %v1877_v62  ;;  %v5337_v61 = vunpack.c.h.bf16 %v5928_v29  ;;  %v5336_v62 = vunpack.c.l.bf16 %v5928_v29 }
 0x2f0   :  { %v7279_v58 = vpop.xlane.xlu2 %1758  ;;  %v7281_v3 = vpop.xlane.xlu1 %1755  ;;  %v1901_v45 = vsel %vm1039_vm0, %v5337_v61, 0.0  ;;  %v1898_v60 = vsel %vm1039_vm0, %v5336_v62, 0.0 }
 0x2f1   :  { %10388 = vst [vmem:[#allocation202_spill] sm:$0xff] %v7279_v58  ;;  %v7283_v34 = vpop.xlane.xlu0 %1752 }
 0x2f2   :  { %10389 = vst [vmem:[#allocation203_spill] sm:$0xff] %v7281_v3 }
 0x2f3   :  { %10390 = vst [vmem:[#allocation204_spill] sm:$0xff] %v7283_v34 }
 0x2f5   :  { %1893 = vadd.xlane.f32.xlu2 %v1892_v59  ;;  %1890 = vadd.xlane.f32.xlu1 %v1889_v25  ;;  %v5930_v25 = vld [vmem:[%s10184_s0 + $0x488] sm:$0xff]  }
 0x2f6   :  { %1887 = vadd.xlane.f32.xlu0 %v1886_v63  ;;  %v5929_v63 = vld [vmem:[%s10184_s0 + $0x480] sm:$0xff]   ;;  %v5344_v38 = vunpack.c.l.bf16 %v5930_v25 }
 0x2f7   :  { %v5341_v59 = vunpack.c.h.bf16 %v5929_v63  ;;  %v5340_v29 = vunpack.c.l.bf16 %v5929_v63  ;;  %v5345_v63 = vunpack.c.h.bf16 %v5930_v25 }
 0x2f8   :  { %v7291_v58 = vpop.xlane.xlu2 %1767  ;;  %v7293_v3 = vpop.xlane.xlu1 %1764  ;;  %v1910_v24 = vsel %vm1039_vm0, %v5344_v38, 0.0 }
 0x2f9   :  { %10391 = vst [vmem:[#allocation205_spill] sm:$0xff] %v7291_v58  ;;  %v7295_v34 = vpop.xlane.xlu0 %1761 }
 0x2fa   :  { %10392 = vst [vmem:[#allocation206_spill] sm:$0xff] %v7293_v3  ;;  %v1904_v3 = vsel %vm1039_vm0, %v5340_v29, 0.0  ;;  %v1913_v29 = vsel %vm1039_vm0, %v5345_v63, 0.0 }
 0x2fb   :  { %10393 = vst [vmem:[#allocation207_spill] sm:$0xff] %v7295_v34  ;;  %v1907_v34 = vsel %vm1039_vm0, %v5341_v59, 0.0 }
 0x2fd   :  { %1902 = vadd.xlane.f32.xlu2 %v1901_v45  ;;  %1899 = vadd.xlane.f32.xlu1 %v1898_v60  ;;  %v5931_v45 = vld [vmem:[%s10184_s0 + $0x490] sm:$0xff]  }
 0x2fe   :  { %1896 = vadd.xlane.f32.xlu0 %v1895_v30  ;;  %v5349_v60 = vunpack.c.h.bf16 %v5931_v45  ;;  %v5348_v30 = vunpack.c.l.bf16 %v5931_v45  ;;  %v2591_v45 = vld [vmem:[%s10185_s1 + $0x78] sm:$0xff] }
 0x2ff   :  { %4405 = vmatpush.msra.mxu0 %v2591_v45  ;;  %v2589_v45 = vld [vmem:[%s10185_s1 + $0x68] sm:$0xff] }
 0x300   :  { %v7306_v58 = vpop.xlane.xlu2 %1776  ;;  %v7308_v61 = vpop.xlane.xlu1 %1773  ;;  %v1919_v38 = vsel %vm1039_vm0, %v5349_v60, 0.0  ;;  %v1916_v59 = vsel %vm1039_vm0, %v5348_v30, 0.0 }
 0x301   :  { %10394 = vst [vmem:[#allocation208_spill] sm:$0xff] %v7306_v58  ;;  %v7310_v62 = vpop.xlane.xlu0 %1770 }
 0x302   :  { %10395 = vst [vmem:[#allocation209_spill] sm:$0xff] %v7308_v61 }
 0x303   :  { %10396 = vst [vmem:[#allocation210_spill] sm:$0xff] %v7310_v62 }
 0x305   :  { %1911 = vadd.xlane.f32.xlu2 %v1910_v24  ;;  %1908 = vadd.xlane.f32.xlu1 %v1907_v34  ;;  %v5933_v34 = vld [vmem:[%s10184_s0 + $0x4a0] sm:$0xff]  }
 0x306   :  { %1905 = vadd.xlane.f32.xlu0 %v1904_v3  ;;  %v5932_v3 = vld [vmem:[%s10184_s0 + $0x498] sm:$0xff]   ;;  %v5356_v25 = vunpack.c.l.bf16 %v5933_v34 }
 0x307   :  { %v5353_v24 = vunpack.c.h.bf16 %v5932_v3  ;;  %v5352_v60 = vunpack.c.l.bf16 %v5932_v3  ;;  %v5934_v3 = vld [vmem:[%s10184_s0 + $0x4a8] sm:$0xff]  }
 0x308   :  { %v7318_v58 = vpop.xlane.xlu2 %1785  ;;  %v7320_v61 = vpop.xlane.xlu1 %1782 }
 0x309   :  { %10397 = vst [vmem:[#allocation211_spill] sm:$0xff] %v7318_v58  ;;  %v7322_v62 = vpop.xlane.xlu0 %1779 }
 0x30a   :  { %10398 = vst [vmem:[#allocation212_spill] sm:$0xff] %v7320_v61  ;;  %v1922_v61 = vsel %vm1039_vm0, %v5352_v60, 0.0  ;;  %v2587_v60 = vld [vmem:[%s10185_s1 + $0x58] sm:$0xff] }
 0x30b   :  { %10399 = vst [vmem:[#allocation213_spill] sm:$0xff] %v7322_v62 }
 0x30d   :  { %1920 = vadd.xlane.f32.xlu2 %v1919_v38  ;;  %1917 = vadd.xlane.f32.xlu1 %v1916_v59  ;;  %v2590_v38 = vld [vmem:[%s10185_s1 + $0x70] sm:$0xff]  ;;  %v1928_v59 = vsel %vm1039_vm0, %v5356_v25, 0.0  ;;  %v2588_v25 = vld [vmem:[%s10185_s1 + $0x60] sm:$0xff] }
 0x30e   :  { %1914 = vadd.xlane.f32.xlu0 %v1913_v29  ;;  %v1925_v29 = vsel %vm1039_vm0, %v5353_v24, 0.0  ;;  %4406 = vmatpush.msra.mxu0 %v2590_v38  ;;  %v5361_v24 = vunpack.c.h.bf16 %v5934_v3  ;;  %v5360_v38 = vunpack.c.l.bf16 %v5934_v3 }
 0x310   :  { %v7336_v30 = vpop.xlane.xlu2 %1794  ;;  %v7338_v63 = vpop.xlane.xlu1 %1791  ;;  %4407 = vmatpush.msra.mxu0 %v2589_v45  ;;  %v1937_v3 = vsel %vm1039_vm0, %v5361_v24, 0.0  ;;  %v1934_v45 = vsel %vm1039_vm0, %v5360_v38, 0.0  ;;  %v2584_v24 = vld [vmem:[%s10185_s1 + $0x40] sm:$0xff] }
 0x311   :  { %10400 = vst [vmem:[#allocation214_spill] sm:$0xff] %v7336_v30  ;;  %v7340_v58 = vpop.xlane.xlu0 %1788  ;;  %v5357_v30 = vunpack.c.h.bf16 %v5933_v34  ;;  %v5936_v34 = vld [vmem:[%s10184_s0 + $0x4b8] sm:$0xff]  }
 0x312   :  { %10401 = vst [vmem:[#allocation215_spill] sm:$0xff] %v7338_v63  ;;  %4408 = vmatpush.msra.mxu0 %v2588_v25  ;;  %v5368_v38 = vunpack.c.l.bf16 %v5936_v34 }
 0x313   :  { %10402 = vst [vmem:[#allocation216_spill] sm:$0xff] %v7340_v58  ;;  %v1931_v25 = vsel %vm1039_vm0, %v5357_v30, 0.0 }
 0x314   :  { %4409 = vmatpush.msra.mxu0 %v2587_v60  ;;  %v5935_v60 = vld [vmem:[%s10184_s0 + $0x4b0] sm:$0xff]  }
 0x315   :  { %1929 = vadd.xlane.f32.xlu2 %v1928_v59  ;;  %1926 = vadd.xlane.f32.xlu1 %v1925_v29  ;;  %v2586_v29 = vld [vmem:[%s10185_s1 + $0x50] sm:$0xff] }
 0x316   :  { %1923 = vadd.xlane.f32.xlu0 %v1922_v61  ;;  %v3348_v61 = vlaneseq  ;;  %4410 = vmatpush.msra.mxu0 %v2586_v29  ;;  %v5365_v29 = vunpack.c.h.bf16 %v5935_v60 }
 0x318   :  { %v7360_v63 = vpop.xlane.xlu2 %1803  ;;  %v7362_v58 = vpop.xlane.xlu1 %1800  ;;  %v7384_v30 = vand.u32 127, %v3348_v61  ;;  %v2582_v61 = vld [vmem:[%s10185_s1 + $0x30] sm:$0xff] }
 0x319   :  { %10403 = vst [vmem:[#allocation217_spill] sm:$0xff] %v7360_v63  ;;  %v7364_v59 = vpop.xlane.xlu0 %1797  ;;  %v2585_v63 = vld [vmem:[%s10185_s1 + $0x48] sm:$0xff] }
 0x31a   :  { %10404 = vst [vmem:[#allocation218_spill] sm:$0xff] %v7362_v58  ;;  %4411 = vmatpush.msra.mxu0 %v2585_v63  ;;  %v2583_v58 = vld [vmem:[%s10185_s1 + $0x38] sm:$0xff]  ;;  %v7390_v62 = vadd.s32 4294967288, %v7384_v30  ;;  %v7411_v16 = vadd.s32 4294967280, %v7384_v30 }
 0x31b   :  { %10405 = vst [vmem:[#allocation219_spill] sm:$0xff] %v7364_v59  ;;  %v5364_v59 = vunpack.c.l.bf16 %v5935_v60 }
 0x31c   :  { %4412 = vmatpush.msra.mxu0 %v2584_v24  ;;  %v1943_v24 = vsel %vm1039_vm0, %v5365_v29, 0.0  ;;  %v7419_v29 = vadd.s32 4294967272, %v7384_v30 }
 0x31d   :  { %1938 = vadd.xlane.f32.xlu2 %v1937_v3  ;;  %1935 = vadd.xlane.f32.xlu1 %v1934_v45  ;;  %v1940_v60 = vsel %vm1039_vm0, %v5364_v59, 0.0  ;;  %v2580_v59 = vld [vmem:[%s10185_s1 + $0x20] sm:$0xff] }
 0x31e   :  { %1932 = vadd.xlane.f32.xlu0 %v1931_v25  ;;  %4413 = vmatpush.msra.mxu0 %v2583_v58  ;;  %v1946_v25 = vsel %vm1039_vm0, %v5368_v38, 0.0  ;;  %v2581_v58 = vld [vmem:[%s10185_s1 + $0x28] sm:$0xff]  ;;  %v3350_v38 = vperm.slane %v6215_v55, %v7384_v30  ;;  %v7428_v55 = vadd.s32 4294967264, %v7384_v30 }
 0x320   :  { %v7392_v63 = vpop.xlane.xlu2 %1812  ;;  %v1810_v3 = vpop.xlane.xlu1 %1809  ;;  %4414 = vmatpush.msra.mxu0 %v2582_v61  ;;  %v5373_v61 = vunpack.c.h.bf16 %v5937_v17  ;;  %v3364_v15 = vperm.slane %v6211_v53, %v7428_v55 }
 0x321   :  { %v7394_v45 = vpop.xlane.xlu0 %1806  ;;  %v3877_v41 = vperm.slane %v7392_v63, %v7390_v62  ;;  %v3876_v13 = vperm.slane %v1810_v3, %v7384_v30  ;;  %v7463_v3 = vadd.s32 4294967248, %v7384_v30 }
 0x322   :  { %10406 = vst [vmem:[#allocation220_spill] sm:$0xff] %v7394_v45  ;;  %v3352_v45 = vperm.slane %v6230_v2, %v7390_v62  ;;  %4415 = vmatpush.msra.mxu0 %v2581_v58  ;;  %v5372_v2 = vunpack.c.l.bf16 %v5937_v17  ;;  %v2579_v58 = vld [vmem:[%s10185_s1 + $0x18] sm:$0xff] }
 0x323   :  { %v3878_v46 = vsel %vm3353_vm1, %v3877_v41, %v3876_v13  ;;  %v3372_v53 = vperm.slane %v6242_v12, %v7463_v3  ;;  %v7491_v12 = vadd.s32 4294967232, %v7384_v30 }
 0x324   :  { %4416 = vmatpush.msra.mxu0 %v2580_v59  ;;  %v2578_v59 = vld [vmem:[%s10185_s1 + $0x10] sm:$0xff] }
 0x325   :  { %1947 = vadd.xlane.f32.xlu2 %v1946_v25  ;;  %1944 = vadd.xlane.f32.xlu1 %v1943_v24  ;;  %v5369_v25 = vunpack.c.h.bf16 %v5936_v34  ;;  %v3354_v24 = vsel %vm3353_vm1, %v3352_v45, %v3350_v38  ;;  %v3360_v34 = vperm.slane %v6228_v1, %v7419_v29  ;;  %v1955_v45 = vsel %vm1039_vm0, %v5373_v61, 0.0  ;;  %v7450_v1 = vld [vmem:[%s10184_s0 + $0x4d0] sm:$0xff]   ;;  %v5938_v61 = vld [vmem:[%s10184_s0 + $0x4c8] sm:$0xff]  }
 0x326   :  { %1941 = vadd.xlane.f32.xlu0 %v1940_v60  ;;  %4417 = vmatpush.msra.mxu0 %v2579_v58  ;;  %v3356_v60 = vperm.slane %v6213_v54, %v7411_v16  ;;  %v1952_v38 = vsel %vm1039_vm0, %v5372_v2, 0.0  ;;  %v2577_v58 = vld [vmem:[%s10185_s1 + $0x8] sm:$0xff]  ;;  %v2576_v2 = vld [vmem:[%s10185_s1] sm:$0xff] }
 0x327   :  { %v1949_v14 = vsel %vm1039_vm0, %v5369_v25, 0.0 }
 0x328   :  { %v7425_v39 = vpop.xlane.xlu2 %1821  ;;  %v1819_v40 = vpop.xlane.xlu1 %1818  ;;  %4418 = vmatpush.msra.mxu0 %v2578_v59  ;;  %v3358_v54 = vsel %vm3357_vm2, %v3356_v60, %v3354_v24  ;;  %v7459_v24 = vadd.s32 4294967256, %v7384_v30  ;;  %v5380_v60 = vunpack.c.l.bf16 %v7450_v1  ;;  %v5377_v59 = vunpack.c.h.bf16 %v5938_v61 }
 0x329   :  { %v1816_v17 = vpop.xlane.xlu0 %1815  ;;  %v3362_v25 = vsel %vm3361_vm3, %v3360_v34, %v3358_v54 }
 0x32a   :  { %v3879_v63 = vperm.slane %v1816_v17, %v7411_v16  ;;  %4419 = vmatpush.msra.mxu0 %v2577_v58  ;;  %v3881_v17 = vperm.slane %v1819_v40, %v7419_v29  ;;  %v5376_v58 = vunpack.c.l.bf16 %v5938_v61  ;;  %v3883_v40 = vperm.slane %v7425_v39, %v7428_v55 }
 0x32c   :  { %4420 = vmatpush.msra.mxu0 %v2576_v2  ;;  %v3366_v2 = vsel %vm3365_vm4, %v3364_v15, %v3362_v25  ;;  %v5940_v15 = vld [vmem:[%s10184_s0 + $0x4d8] sm:$0xff]  }
 0x32d   :  { %1956 = vadd.xlane.f32.xlu2 %v1955_v45  ;;  %1953 = vadd.xlane.f32.xlu1 %v1952_v38  ;;  %v3368_v45 = vperm.slane %v6226_v0, %v7459_v24  ;;  %v3880_v38 = vsel %vm3357_vm2, %v3879_v63, %v3878_v46  ;;  %v1964_v0 = vsel %vm1039_vm0, %v5380_v60, 0.0  ;;  %v1961_v46 = vsel %vm1039_vm0, %v5377_v59, 0.0 }
 0x32e   :  { %1950 = vadd.xlane.f32.xlu0 %v1949_v14  ;;  %v7475_v14 = vadd.s32 4294967240, %v7384_v30  ;;  %v3882_v41 = vsel %vm3361_vm3, %v3881_v17, %v3880_v38  ;;  %v1958_v63 = vsel %vm1039_vm0, %v5376_v58, 0.0  ;;  %v7498_v59 = vadd.s32 4294967224, %v7384_v30 }
 0x32f   :  { %v3370_v25 = vsel %vm3369_vm5, %v3368_v45, %v3366_v2  ;;  %v3884_v58 = vsel %vm3365_vm4, %v3883_v40, %v3882_v41  ;;  %v5385_v38 = vunpack.c.h.bf16 %v5940_v15  ;;  %v2607_v45 = vld [vmem:[%s10185_s1 + $0xf8] sm:$0xff]  ;;  %v5381_v2 = vunpack.c.h.bf16 %v7450_v1 }
 0x330   :  { %v1831_v34 = vpop.xlane.xlu2 %1830  ;;  %v1828_v54 = vpop.xlane.xlu1 %1827  ;;  %v3376_v39 = vperm.slane %v6240_v11, %v7475_v14  ;;  %v3374_v60 = vsel %vm3373_vm6, %v3372_v53, %v3370_v25  ;;  %4425 = vmatpush.msra.mxu1 %v2607_v45  ;;  %v3380_v53 = vperm.slane %v6238_v10, %v7491_v12  ;;  %v3384_v41 = vperm.slane %v6257_v23, %v7498_v59  ;;  %v7527_v23 = vld [vmem:[%s10184_s0 + $0x4e8] sm:$0xff]  }
 0x331   :  { %v1825_v13 = vpop.xlane.xlu0 %1824  ;;  %v3887_v17 = vperm.slane %v1828_v54, %v7463_v3  ;;  %v1973_v10 = vsel %vm1039_vm0, %v5385_v38, 0.0  ;;  %v2605_v38 = vld [vmem:[%s10185_s1 + $0xe8] sm:$0xff]  ;;  %v7542_v45 = vadd.s32 4294967200, %v7384_v30 }
 0x332   :  { %v3885_v61 = vperm.slane %v1825_v13, %v7459_v24  ;;  %v5384_v13 = vunpack.c.l.bf16 %v5940_v15  ;;  %v3378_v40 = vsel %vm3377_vm7, %v3376_v39, %v3374_v60  ;;  %v2606_v39 = vld [vmem:[%s10185_s1 + $0xf0] sm:$0xff]  ;;  %v1967_v60 = vsel %vm1039_vm0, %v5381_v2, 0.0 }
 0x333   :  { %4426 = vmatpush.msra.mxu1 %v2606_v39 }
 0x334   :  { %v3886_v11 = vsel %vm3369_vm5, %v3885_v61, %v3884_v58  ;;  %v1970_v25 = vsel %vm1039_vm0, %v5384_v13, 0.0  ;;  %v3382_v58 = vsel %vm10189_vm8, %v3380_v53, %v3378_v40  ;;  %v5392_v40 = vunpack.c.l.bf16 %v7527_v23 }
 0x335   :  { %1965 = vadd.xlane.f32.xlu2 %v1964_v0  ;;  %1962 = vadd.xlane.f32.xlu1 %v1961_v46  ;;  %v7511_v46 = vadd.s32 4294967216, %v7384_v30  ;;  %v3888_v1 = vsel %vm3373_vm6, %v3887_v17, %v3886_v11  ;;  %v7533_v17 = vadd.s32 4294967208, %v7384_v30 }
 0x336   :  { %1959 = vadd.xlane.f32.xlu0 %v1958_v63  ;;  %v3889_v63 = vperm.slane %v1831_v34, %v7475_v14  ;;  %v5941_v34 = vld [vmem:[%s10184_s0 + $0x4e0] sm:$0xff]   ;;  %4427 = vmatpush.msra.mxu1 %v2605_v38 }
 0x337   :  { %v3388_v13 = vperm.slane %v6255_v22, %v7511_v46  ;;  %v5389_v39 = vunpack.c.h.bf16 %v5941_v34  ;;  %v2604_v22 = vld [vmem:[%s10185_s1 + $0xe0] sm:$0xff]  ;;  %v5388_v47 = vunpack.c.l.bf16 %v5941_v34 }
 0x338   :  { %v1840_v0 = vpop.xlane.xlu2 %1839  ;;  %v1837_v54 = vpop.xlane.xlu1 %1836  ;;  %v3890_v2 = vsel %vm3377_vm7, %v3889_v63, %v3888_v1  ;;  %4428 = vmatpush.msra.mxu1 %v2604_v22  ;;  %v7587_v22 = vadd.s32 4294967176, %v7384_v30 }
 0x339   :  { %v1834_v61 = vpop.xlane.xlu0 %1833  ;;  %v3893_v11 = vperm.slane %v1837_v54, %v7498_v59  ;;  %v2603_v54 = vld [vmem:[%s10185_s1 + $0xd8] sm:$0xff]  ;;  %v3895_v63 = vperm.slane %v1840_v0, %v7511_v46  ;;  %v1982_v0 = vsel %vm1039_vm0, %v5392_v40, 0.0  ;;  %v2601_v40 = vld [vmem:[%s10185_s1 + $0xc8] sm:$0xff] }
 0x33a   :  { %v3891_v15 = vperm.slane %v1834_v61, %v7491_v12  ;;  %v3386_v61 = vsel %vm3385_vm9, %v3384_v41, %v3382_v58  ;;  %v3396_v58 = vperm.slane %v6269_v33, %v7542_v45  ;;  %4429 = vmatpush.msra.mxu1 %v2603_v54  ;;  %v7576_v33 = vadd.s32 4294967184, %v7384_v30 }
 0x33c   :  { %v3892_v53 = vsel %vm10189_vm8, %v3891_v15, %v3890_v2  ;;  %v3392_v15 = vperm.slane %v6253_v21, %v7533_v17  ;;  %v1979_v2 = vsel %vm1039_vm0, %v5389_v39, 0.0  ;;  %v2602_v21 = vld [vmem:[%s10185_s1 + $0xd0] sm:$0xff] }
 0x33d   :  { %1974 = vadd.xlane.f32.xlu2 %v1973_v10  ;;  %1971 = vadd.xlane.f32.xlu1 %v1970_v25  ;;  %v3390_v10 = vsel %vm10190_vm10, %v3388_v13, %v3386_v61  ;;  %v7560_v25 = vadd.s32 4294967192, %v7384_v30  ;;  %v1976_v13 = vsel %vm1039_vm0, %v5388_v47, 0.0 }
 0x33e   :  { %1968 = vadd.xlane.f32.xlu0 %v1967_v60  ;;  %v3894_v60 = vsel %vm3385_vm9, %v3893_v11, %v3892_v53  ;;  %v5943_v11 = vld [vmem:[%s10184_s0 + $0x4f0] sm:$0xff]   ;;  %4430 = vmatpush.msra.mxu1 %v2602_v21  ;;  %v3394_v47 = vsel %vm3393_vm11, %v3392_v15, %v3390_v10  ;;  %v5393_v10 = vunpack.c.h.bf16 %v7527_v23  ;;  %v3408_v21 = vperm.slane %v6284_v44, %v7587_v22 }
 0x33f   :  { %v3896_v53 = vsel %vm10190_vm10, %v3895_v63, %v3894_v60  ;;  %v3400_v39 = vperm.slane %v6267_v32, %v7560_v25  ;;  %v5397_v63 = vunpack.c.h.bf16 %v5943_v11  ;;  %v5396_v60 = vunpack.c.l.bf16 %v5943_v11  ;;  %v2600_v32 = vld [vmem:[%s10185_s1 + $0xc0] sm:$0xff] }
 0x340   :  { %v1849_v41 = vpop.xlane.xlu2 %1848  ;;  %v1846_v1 = vpop.xlane.xlu1 %1845  ;;  %4431 = vmatpush.msra.mxu1 %v2601_v40  ;;  %v1985_v44 = vsel %vm1039_vm0, %v5393_v10, 0.0  ;;  %v3411_v10 = vperm.slane %v6282_v43, %v7384_v30  ;;  %v2595_v43 = vld [vmem:[%s10185_s1 + $0x98] sm:$0xff] }
 0x341   :  { %v1843_v34 = vpop.xlane.xlu0 %1842  ;;  %v3899_v61 = vperm.slane %v1846_v1, %v7542_v45  ;;  %v3398_v1 = vsel %vm10188_vm12, %v3396_v58, %v3394_v47  ;;  %v3901_v15 = vperm.slane %v1849_v41, %v7560_v25  ;;  %v3404_v58 = vperm.slane %v6265_v31, %v7576_v33  ;;  %v5944_v47 = vld [vmem:[%s10184_s0 + $0x4f8] sm:$0xff]  }
 0x342   :  { %v3897_v38 = vperm.slane %v1843_v34, %v7533_v17  ;;  %v2599_v34 = vld [vmem:[%s10185_s1 + $0xb8] sm:$0xff]  ;;  %4432 = vmatpush.msra.mxu1 %v2600_v32  ;;  %v1988_v31 = vsel %vm1039_vm0, %v5396_v60, 0.0  ;;  %v3412_v60 = vperm.slane %v6280_v42, %v7390_v62  ;;  %v2596_v42 = vld [vmem:[%s10185_s1 + $0xa0] sm:$0xff] }
 0x344   :  { %v3898_v54 = vsel %vm3393_vm11, %v3897_v38, %v3896_v53  ;;  %v1991_v53 = vsel %vm1039_vm0, %v5397_v63, 0.0  ;;  %4433 = vmatpush.msra.mxu1 %v2599_v34  ;;  %v2597_v63 = vld [vmem:[%s10185_s1 + $0xa8] sm:$0xff] }
 0x345   :  { %1983 = vadd.xlane.f32.xlu2 %v1982_v0  ;;  %1980 = vadd.xlane.f32.xlu1 %v1979_v2  ;;  %v3900_v38 = vsel %vm10188_vm12, %v3899_v61, %v3898_v54  ;;  %v2598_v61 = vld [vmem:[%s10185_s1 + $0xb0] sm:$0xff]  ;;  %vm4372_vm12 = vcmask 1041409  }
 0x346   :  { %1977 = vadd.xlane.f32.xlu0 %v1976_v13  ;;  %v3402_v13 = vsel %vm3401_vm13, %v3400_v39, %v3398_v1  ;;  %v3902_v40 = vsel %vm3401_vm13, %v3901_v15, %v3900_v38  ;;  %v7619_v39 = vld [vmem:[%s10184_s0 + $0x500] sm:$0xff]   ;;  %4434 = vmatpush.msra.mxu1 %v2598_v61  ;;  %v5401_v38 = vunpack.c.h.bf16 %v5944_v47 }
 0x347   :  { %v3406_v54 = vsel %vm3405_vm14, %v3404_v58, %v3402_v13  ;;  %v5404_v58 = vunpack.c.l.bf16 %v7619_v39 }
 0x348   :  { %v7602_v0 = vpop.xlane.xlu2 %1857  ;;  %v1855_v2 = vpop.xlane.xlu1 %1854  ;;  %v3410_v32 = vsel %vm3409_vm15, %v3408_v21, %v3406_v54  ;;  %4435 = vmatpush.msra.mxu1 %v2597_v63  ;;  %v5400_v21 = vunpack.c.l.bf16 %v5944_v47  ;;  %v1997_v61 = vsel %vm1039_vm0, %v5401_v38, 0.0  ;;  %v5946_v47 = vld [vmem:[%s10184_s0 + $0x508] sm:$0xff]   ;;  %v3418_v63 = vperm.slane %v6292_v52, %v7428_v55 }
 0x349   :  { %v3905_v41 = vperm.slane %v1855_v2, %v7587_v22  ;;  %v1852_v23 = vpop.xlane.xlu0 %1851  ;;  %v3414_v2 = vperm.slane %v6296_v57, %v7411_v16  ;;  %v2594_v57 = vld [vmem:[%s10185_s1 + $0x90] sm:$0xff] }
 0x34a   :  { %v3903_v11 = vperm.slane %v1852_v23, %v7576_v33  ;;  %4436 = vmatpush.msra.mxu1 %v2596_v42 }
 0x34c   :  { %v3904_v1 = vsel %vm3405_vm14, %v3903_v11, %v3902_v40  ;;  %v3413_v11 = vsel %vm3353_vm1, %v3412_v60, %v3411_v10  ;;  %4437 = vmatpush.msra.mxu1 %v2595_v43  ;;  %v1994_v40 = vsel %vm1039_vm0, %v5400_v21, 0.0  ;;  %v2592_v10 = vld [vmem:[%s10185_s1 + $0x80] sm:$0xff] }
 0x34d   :  { %1992 = vadd.xlane.f32.xlu2 %v1991_v53  ;;  %1989 = vadd.xlane.f32.xlu1 %v1988_v31  ;;  %v3906_v15 = vsel %vm3409_vm15, %v3905_v41, %v3904_v1  ;;  %v3416_v53 = vperm.slane %v6294_v56, %v7419_v29  ;;  %v2000_v31 = vsel %vm1039_vm0, %v5404_v58, 0.0  ;;  %v3907_v56 = vperm.slane %v7602_v0, %v7384_v30  ;;  %v2593_v1 = vld [vmem:[%s10185_s1 + $0x88] sm:$0xff] }
 0x34e   :  { %1986 = vadd.xlane.f32.xlu0 %v1985_v44  ;;  %v4373_v34 = vsel %vm4372_vm12, %v3906_v15, %v3410_v32  ;;  %v3415_v44 = vsel %vm3357_vm2, %v3414_v2, %v3413_v11  ;;  %4438 = vmatpush.msra.mxu1 %v2594_v57  ;;  %v3420_v32 = vperm.slane %v6311_v7, %v7459_v24  ;;  %v5409_v15 = vunpack.c.h.bf16 %v5946_v47 }
 0x34f   :  { %4421 = vmatmul.f32.vlgmr.msra.gmra.mxu0 %v4373_v34  ;;  %v3417_v60 = vsel %vm3361_vm3, %v3416_v53, %v3415_v44  ;;  %v5408_v0 = vunpack.c.l.bf16 %v5946_v47  ;;  %v5405_v58 = vunpack.c.h.bf16 %v7619_v39  ;;  %v3422_v7 = vperm.slane %v6309_v6, %v7463_v3  ;;  %v5948_v6 = vld [vmem:[%s10184_s0 + $0x518] sm:$0xff]  }
 0x350   :  { %v1867_v41 = vpop.xlane.xlu2 %1866  ;;  %v1864_v23 = vpop.xlane.xlu1 %1863  ;;  %4439 = vmatpush.msra.mxu1 %v2593_v1  ;;  %v3419_v2 = vsel %vm3365_vm4, %v3418_v63, %v3417_v60  ;;  %v2009_v11 = vsel %vm1039_vm0, %v5409_v15, 0.0  ;;  %v5416_v47 = vunpack.c.l.bf16 %v5948_v6 }
 0x351   :  { %v1861_v13 = vpop.xlane.xlu0 %1860  ;;  %v3910_v34 = vperm.slane %v1864_v23, %v7411_v16  ;;  %v3421_v43 = vsel %vm3369_vm5, %v3420_v32, %v3419_v2  ;;  %v2006_v23 = vsel %vm1039_vm0, %v5408_v0, 0.0 }
 0x352   :  { %v3908_v54 = vperm.slane %v1861_v13, %v7390_v62  ;;  %4440 = vmatpush.msra.mxu1 %v2592_v10  ;;  %v3912_v13 = vperm.slane %v1867_v41, %v7419_v29  ;;  %v3424_v41 = vperm.slane %v6307_v5, %v7475_v14  ;;  %v3423_v57 = vsel %vm3373_vm6, %v3422_v7, %v3421_v43 }
 0x353   :  { %v3428_v5 = vperm.slane %v6321_v19, %v7498_v59  ;;  %v5949_v19 = vld [vmem:[%s10184_s0 + $0x520] sm:$0xff]  }
 0x354   :  { %v3909_v52 = vsel %vm3353_vm1, %v3908_v54, %v3907_v56  ;;  %v3426_v54 = vperm.slane %v6323_v20, %v7491_v12  ;;  %v3425_v15 = vsel %vm3377_vm7, %v3424_v41, %v3423_v57 }
 0x355   :  { %2001 = vadd.xlane.f32.xlu2 %v2000_v31  ;;  %1998 = vadd.xlane.f32.xlu1 %v1997_v61  ;;  %v3911_v39 = vsel %vm3357_vm2, %v3910_v34, %v3909_v52  ;;  %v2003_v31 = vsel %vm1039_vm0, %v5405_v58, 0.0  ;;  %v5947_v61 = vld [vmem:[%s10184_s0 + $0x510] sm:$0xff]   ;;  %v2018_v52 = vsel %vm1039_vm0, %v5416_v47, 0.0 }
 0x356   :  { %1995 = vadd.xlane.f32.xlu0 %v1994_v40  ;;  %v3913_v40 = vsel %vm3361_vm3, %v3912_v13, %v3911_v39  ;;  %v5413_v56 = vunpack.c.h.bf16 %v5947_v61  ;;  %v5412_v63 = vunpack.c.l.bf16 %v5947_v61  ;;  %v2623_v39 = vld [vmem:[%s10185_s1 + $0x178] sm:$0xff] }
 0x357   :  { %4445 = vmatpush.msra.mxu2 %v2623_v39 }
 0x358   :  { %v1876_v38 = vpop.xlane.xlu2 %1875  ;;  %v1873_v42 = vpop.xlane.xlu1 %1872  ;;  %v2015_v20 = vsel %vm1039_vm0, %v5413_v56, 0.0  ;;  %v2012_v7 = vsel %vm1039_vm0, %v5412_v63, 0.0  ;;  %v3434_v56 = vperm.slane %v6336_v36, %v7542_v45  ;;  %v5950_v36 = vld [vmem:[%s10184_s0 + $0x528] sm:$0xff]  }
 0x359   :  { %v1870_v21 = vpop.xlane.xlu0 %1869  ;;  %v3916_v44 = vperm.slane %v1873_v42, %v7459_v24  ;;  %v3918_v0 = vperm.slane %v1876_v38, %v7463_v3  ;;  %v3427_v42 = vsel %vm10189_vm8, %v3426_v54, %v3425_v15  ;;  %v3430_v38 = vperm.slane %v6319_v18, %v7511_v46  ;;  %v2622_v18 = vld [vmem:[%s10185_s1 + $0x170] sm:$0xff] }
 0x35a   :  { %v3914_v53 = vperm.slane %v1870_v21, %v7428_v55  ;;  %v3429_v43 = vsel %vm3385_vm9, %v3428_v5, %v3427_v42  ;;  %4446 = vmatpush.msra.mxu2 %v2622_v18  ;;  %v2619_v42 = vld [vmem:[%s10185_s1 + $0x158] sm:$0xff] }
 0x35c   :  { %v3915_v1 = vsel %vm3365_vm4, %v3914_v53, %v3913_v40  ;;  %v3432_v53 = vperm.slane %v6338_v37, %v7533_v17 }
 0x35d   :  { %2010 = vadd.xlane.f32.xlu2 %v2009_v11  ;;  %2007 = vadd.xlane.f32.xlu1 %v2006_v23  ;;  %v3917_v34 = vsel %vm3369_vm5, %v3916_v44, %v3915_v1  ;;  %v5421_v11 = vunpack.c.h.bf16 %v5949_v19  ;;  %v5420_v23 = vunpack.c.l.bf16 %v5949_v19  ;;  %v3431_v44 = vsel %vm10190_vm10, %v3430_v38, %v3429_v43  ;;  %v2618_v38 = vld [vmem:[%s10185_s1 + $0x150] sm:$0xff] }
 0x35e   :  { %2004 = vadd.xlane.f32.xlu0 %v2003_v31  ;;  %v3919_v21 = vsel %vm3373_vm6, %v3918_v0, %v3917_v34  ;;  %v5417_v31 = vunpack.c.h.bf16 %v5948_v6  ;;  %v2621_v6 = vld [vmem:[%s10185_s1 + $0x168] sm:$0xff]  ;;  %v3433_v63 = vsel %vm3393_vm11, %v3432_v53, %v3431_v44  ;;  %v2620_v0 = vld [vmem:[%s10185_s1 + $0x160] sm:$0xff]  ;;  %v5424_v19 = vunpack.c.l.bf16 %v5950_v36  ;;  %v5952_v44 = vld [vmem:[%s10184_s0 + $0x538] sm:$0xff]  }
 0x35f   :  { %v2027_v1 = vsel %vm1039_vm0, %v5421_v11, 0.0  ;;  %v2024_v37 = vsel %vm1039_vm0, %v5420_v23, 0.0  ;;  %4447 = vmatpush.msra.mxu2 %v2621_v6  ;;  %v5432_v6 = vunpack.c.l.bf16 %v5952_v44 }
 0x360   :  { %v1885_v60 = vpop.xlane.xlu2 %1884  ;;  %v1882_v32 = vpop.xlane.xlu1 %1881 }
 0x361   :  { %v1879_v10 = vpop.xlane.xlu0 %1878  ;;  %v3922_v2 = vperm.slane %v1882_v32, %v7491_v12  ;;  %v3924_v61 = vperm.slane %v1885_v60, %v7498_v59  ;;  %v2021_v60 = vsel %vm1039_vm0, %v5417_v31, 0.0  ;;  %v7742_v32 = vld [vmem:[%s10184_s0 + $0x530] sm:$0xff]   ;;  %4448 = vmatpush.msra.mxu2 %v2620_v0 }
 0x362   :  { %v3920_v58 = vperm.slane %v1879_v10, %v7475_v14  ;;  %v3436_v10 = vperm.slane %v6334_v35, %v7560_v25 }
 0x363   :  { %4449 = vmatpush.msra.mxu2 %v2619_v42 }
 0x364   :  { %v3921_v13 = vsel %vm3377_vm7, %v3920_v58, %v3919_v21 }
 0x365   :  { %2019 = vadd.xlane.f32.xlu2 %v2018_v52  ;;  %2016 = vadd.xlane.f32.xlu1 %v2015_v20  ;;  %v3923_v40 = vsel %vm10189_vm8, %v3922_v2, %v3921_v13  ;;  %vm10407_vm8 = vcmask 851712   ;;  %v5428_v52 = vunpack.c.l.bf16 %v7742_v32  ;;  %v5425_v20 = vunpack.c.h.bf16 %v5950_v36 }
 0x366   :  { %2013 = vadd.xlane.f32.xlu0 %v2012_v7  ;;  %v3925_v15 = vsel %vm3385_vm9, %v3924_v61, %v3923_v40  ;;  %v3435_v58 = vsel %vm10407_vm8, %v3434_v56, %v3433_v63  ;;  %v3438_v7 = vperm.slane %v6350_v50, %v7576_v33  ;;  %v3440_v13 = vperm.slane %v6348_v49, %v7587_v22  ;;  %v2617_v61 = vld [vmem:[%s10185_s1 + $0x148] sm:$0xff]  ;;  %v2615_v63 = vld [vmem:[%s10185_s1 + $0x138] sm:$0xff] }
 0x367   :  { %v3437_v50 = vsel %vm3401_vm13, %v3436_v10, %v3435_v58  ;;  %v2036_v53 = vsel %vm1039_vm0, %v5428_v52, 0.0  ;;  %v2033_v31 = vsel %vm1039_vm0, %v5425_v20, 0.0  ;;  %4450 = vmatpush.msra.mxu2 %v2618_v38  ;;  %v5429_v36 = vunpack.c.h.bf16 %v7742_v32  ;;  %v2613_v52 = vld [vmem:[%s10185_s1 + $0x128] sm:$0xff] }
 0x368   :  { %v1894_v41 = vpop.xlane.xlu2 %1893  ;;  %v1891_v57 = vpop.xlane.xlu1 %1890  ;;  %v2042_v58 = vsel %vm1039_vm0, %v5432_v6, 0.0  ;;  %v3442_v32 = vperm.slane %v6346_v48, %v7384_v30  ;;  %v3443_v20 = vperm.slane %v6365_v9, %v7390_v62  ;;  %v3445_v48 = vperm.slane %v6363_v8, %v7411_v16 }
 0x369   :  { %v1888_v47 = vpop.xlane.xlu0 %1887  ;;  %v3928_v5 = vperm.slane %v1891_v57, %v7533_v17  ;;  %v3930_v35 = vperm.slane %v1894_v41, %v7542_v45  ;;  %v2030_v41 = vsel %vm1039_vm0, %v5424_v19, 0.0  ;;  %v3439_v57 = vsel %vm3405_vm14, %v3438_v7, %v3437_v50  ;;  %4451 = vmatpush.msra.mxu2 %v2617_v61  ;;  %v5954_v7 = vld [vmem:[%s10184_s0 + $0x548] sm:$0xff]   ;;  %v2612_v19 = vld [vmem:[%s10185_s1 + $0x120] sm:$0xff] }
 0x36a   :  { %v3926_v54 = vperm.slane %v1888_v47, %v7511_v46  ;;  %v2616_v47 = vld [vmem:[%s10185_s1 + $0x140] sm:$0xff]  ;;  %v2039_v42 = vsel %vm1039_vm0, %v5429_v36, 0.0  ;;  %v5440_v9 = vunpack.c.l.bf16 %v5954_v7  ;;  %v5441_v36 = vunpack.c.h.bf16 %v5954_v7 }
 0x36b   :  { %4452 = vmatpush.msra.mxu2 %v2616_v47 }
 0x36c   :  { %v3927_v34 = vsel %vm10190_vm10, %v3926_v54, %v3925_v15  ;;  %v3441_v54 = vsel %vm3409_vm15, %v3440_v13, %v3439_v57  ;;  %v2610_v13 = vld [vmem:[%s10185_s1 + $0x110] sm:$0xff]  ;;  %v2054_v61 = vsel %vm1039_vm0, %v5440_v9, 0.0  ;;  %v2057_v7 = vsel %vm1039_vm0, %v5441_v36, 0.0 }
 0x36d   :  { %2028 = vadd.xlane.f32.xlu2 %v2027_v1  ;;  %2025 = vadd.xlane.f32.xlu1 %v2024_v37  ;;  %v3929_v2 = vsel %vm3393_vm11, %v3928_v5, %v3927_v34  ;;  %v5433_v37 = vunpack.c.h.bf16 %v5952_v44  ;;  %v2614_v5 = vld [vmem:[%s10185_s1 + $0x130] sm:$0xff] }
 0x36e   :  { %2022 = vadd.xlane.f32.xlu0 %v2021_v60  ;;  %v3931_v49 = vsel %vm10407_vm8, %v3930_v35, %v3929_v2  ;;  %4453 = vmatpush.msra.mxu2 %v2615_v63  ;;  %v5953_v35 = vld [vmem:[%s10184_s0 + $0x540] sm:$0xff]   ;;  %v2611_v2 = vld [vmem:[%s10185_s1 + $0x118] sm:$0xff]  ;;  %vm10410_vm8 = vcmask 589312  }
 0x36f   :  { %v2045_v34 = vsel %vm1039_vm0, %v5433_v37, 0.0  ;;  %v5437_v38 = vunpack.c.h.bf16 %v5953_v35 }
 0x370   :  { %v1903_v21 = vpop.xlane.xlu2 %1902  ;;  %v1900_v43 = vpop.xlane.xlu1 %1899  ;;  %4454 = vmatpush.msra.mxu2 %v2614_v5  ;;  %v3453_v5 = vperm.slane %v6373_v26, %v7463_v3 }
 0x371   :  { %v3934_v11 = vperm.slane %v1900_v43, %v7576_v33  ;;  %v1897_v23 = vpop.xlane.xlu0 %1896  ;;  %v3936_v39 = vperm.slane %v1903_v21, %v7587_v22  ;;  %v3444_v21 = vsel %vm3353_vm1, %v3443_v20, %v3442_v32  ;;  %v5436_v43 = vunpack.c.l.bf16 %v5953_v35  ;;  %v7870_v35 = vld [vmem:[%s10184_s0 + $0x560] sm:$0xff]  }
 0x372   :  { %v3932_v18 = vperm.slane %v1897_v23, %v7560_v25  ;;  %4455 = vmatpush.msra.mxu2 %v2613_v52 }
 0x373   :  { %v2048_v44 = vsel %vm1039_vm0, %v5436_v43, 0.0  ;;  %v5452_v43 = vunpack.c.l.bf16 %v7870_v35 }
 0x374   :  { %v3933_v40 = vsel %vm3401_vm13, %v3932_v18, %v3931_v49  ;;  %4456 = vmatpush.msra.mxu2 %v2612_v19  ;;  %v2051_v49 = vsel %vm1039_vm0, %v5437_v38, 0.0 }
 0x375   :  { %2037 = vadd.xlane.f32.xlu2 %v2036_v53  ;;  %2034 = vadd.xlane.f32.xlu1 %v2033_v31  ;;  %v3935_v56 = vsel %vm3405_vm14, %v3934_v11, %v3933_v40  ;;  %v3446_v53 = vsel %vm3357_vm2, %v3445_v48, %v3444_v21  ;;  %v3449_v31 = vperm.slane %v6377_v28, %v7428_v55  ;;  %v2608_v28 = vld [vmem:[%s10185_s1 + $0x100] sm:$0xff]  ;;  %v10408_v48 = vld [vmem:[#allocation6_spill] sm:$0xff] }
 0x376   :  { %2031 = vadd.xlane.f32.xlu0 %v2030_v41  ;;  %v3937_v1 = vsel %vm3409_vm15, %v3936_v39, %v3935_v56  ;;  %4457 = vmatpush.msra.mxu2 %v2611_v2  ;;  %v3447_v39 = vperm.slane %v6361_v4, %v7419_v29  ;;  %v2609_v41 = vld [vmem:[%s10185_s1 + $0x108] sm:$0xff]  ;;  %v5955_v4 = vld [vmem:[%s10184_s0 + $0x550] sm:$0xff]   ;;  %v3451_v56 = vperm.slane %v6375_v27, %v7459_v24 }
 0x377   :  { %v4374_v60 = vsel %vm4372_vm12, %v3937_v1, %v3441_v54  ;;  %v5445_v37 = vunpack.c.h.bf16 %v5955_v4  ;;  %v5444_v6 = vunpack.c.l.bf16 %v5955_v4  ;;  %v3457_v9 = vperm.slane %v10408_v48, %v7491_v12  ;;  %v2634_v48 = vld [vmem:[%s10185_s1 + $0x1d0] sm:$0xff] }
 0x378   :  { %4441 = vmatmul.f32.vlgmr.msra.gmra.mxu1 %v4374_v60  ;;  %v1912_v15 = vpop.xlane.xlu2 %1911  ;;  %v1909_v0 = vpop.xlane.xlu1 %1908  ;;  %4458 = vmatpush.msra.mxu2 %v2610_v13  ;;  %v3448_v54 = vsel %vm3361_vm3, %v3447_v39, %v3446_v53 }
 0x379   :  { %v1906_v10 = vpop.xlane.xlu0 %1905  ;;  %v3939_v11 = vperm.slane %v1909_v0, %v7390_v62  ;;  %v3941_v57 = vperm.slane %v1912_v15, %v7411_v16  ;;  %v3450_v1 = vsel %vm3365_vm4, %v3449_v31, %v3448_v54  ;;  %v2063_v32 = vsel %vm1039_vm0, %v5445_v37, 0.0  ;;  %v5958_v54 = vld [vmem:[%s10184_s0 + $0x568] sm:$0xff]  }
 0x37a   :  { %v3938_v23 = vperm.slane %v1906_v10, %v7384_v30  ;;  %4459 = vmatpush.msra.mxu2 %v2609_v41  ;;  %v3452_v10 = vsel %vm3369_vm5, %v3451_v56, %v3450_v1  ;;  %v2060_v20 = vsel %vm1039_vm0, %v5444_v6, 0.0  ;;  %v2637_v1 = vld [vmem:[%s10185_s1 + $0x1e8] sm:$0xff]  ;;  %v10412_v6 = vld [vmem:[#allocation8_spill] sm:$0xff] }
 0x37b   :  { %v3454_v19 = vsel %vm3373_vm6, %v3453_v5, %v3452_v10  ;;  %v2636_v5 = vld [vmem:[%s10185_s1 + $0x1e0] sm:$0xff]  ;;  %v5456_v10 = vunpack.c.l.bf16 %v5958_v54 }
 0x37c   :  { %v3940_v40 = vsel %vm3353_vm1, %v3939_v11, %v3938_v23  ;;  %4460 = vmatpush.msra.mxu2 %v2608_v28  ;;  %v2639_v11 = vld [vmem:[%s10185_s1 + $0x1f8] sm:$0xff] }
 0x37d   :  { %2046 = vadd.xlane.f32.xlu2 %v2045_v34  ;;  %2043 = vadd.xlane.f32.xlu1 %v2042_v58  ;;  %v3942_v60 = vsel %vm3357_vm2, %v3941_v57, %v3940_v40  ;;  %v3455_v34 = vperm.slane %v6392_v51, %v7475_v14  ;;  %v5956_v51 = vld [vmem:[%s10184_s0 + $0x558] sm:$0xff]   ;;  %v2072_v40 = vsel %vm1039_vm0, %v5452_v43, 0.0 }
 0x37e   :  { %2040 = vadd.xlane.f32.xlu0 %v2039_v42  ;;  %v5449_v13 = vunpack.c.h.bf16 %v5956_v51  ;;  %4465 = vmatpush.msra.mxu3 %v2639_v11  ;;  %v5959_v11 = vld [vmem:[%s10184_s0 + $0x570] sm:$0xff]  }
 0x37f   :  { %v3456_v38 = vsel %vm3377_vm7, %v3455_v34, %v3454_v19  ;;  %v2635_v34 = vld [vmem:[%s10185_s1 + $0x1d8] sm:$0xff] }
 0x380   :  { %v1921_v8 = vpop.xlane.xlu2 %1920  ;;  %v1918_v50 = vpop.xlane.xlu1 %1917  ;;  %v3458_v31 = vsel %vm10410_vm8, %v3457_v9, %v3456_v38  ;;  %v10414_v9 = vld [vmem:[#allocation12_spill] sm:$0xff] }
 0x381   :  { %v1915_v18 = vpop.xlane.xlu0 %1914  ;;  %v3945_v63 = vperm.slane %v1918_v50, %v7428_v55  ;;  %v3947_v52 = vperm.slane %v1921_v8, %v7459_v24  ;;  %v5448_v8 = vunpack.c.l.bf16 %v5956_v51  ;;  %v10409_v50 = vld [vmem:[#allocation5_spill] sm:$0xff] }
 0x382   :  { %v3943_v47 = vperm.slane %v1915_v18, %v7419_v29  ;;  %v3459_v39 = vperm.slane %v10409_v50, %v7498_v59 }
 0x383   :  { %v2066_v56 = vsel %vm1039_vm0, %v5448_v8, 0.0 }
 0x384   :  { %v3944_v27 = vsel %vm3361_vm3, %v3943_v47, %v3942_v60  ;;  %v2069_v47 = vsel %vm1039_vm0, %v5449_v13, 0.0  ;;  %v3460_v37 = vsel %vm3385_vm9, %v3459_v39, %v3458_v31  ;;  %v7937_v13 = vld [vmem:[%s10184_s0 + $0x578] sm:$0xff]  }
 0x385   :  { %2055 = vadd.xlane.f32.xlu2 %v2054_v61  ;;  %2052 = vadd.xlane.f32.xlu1 %v2051_v49  ;;  %v3946_v42 = vsel %vm3365_vm4, %v3945_v63, %v3944_v27  ;;  %v10411_v61 = vld [vmem:[#allocation9_spill] sm:$0xff]  ;;  %v3463_v63 = vperm.slane %v10412_v6, %v7533_v17  ;;  %v10415_v39 = vld [vmem:[#allocation11_spill] sm:$0xff] }
 0x386   :  { %2049 = vadd.xlane.f32.xlu0 %v2048_v44  ;;  %v3948_v21 = vsel %vm3369_vm5, %v3947_v52, %v3946_v42  ;;  %v3461_v49 = vperm.slane %v10411_v61, %v7511_v46  ;;  %v2638_v44 = vld [vmem:[%s10185_s1 + $0x1f0] sm:$0xff]  ;;  %v2632_v61 = vld [vmem:[%s10185_s1 + $0x1c0] sm:$0xff] }
 0x387   :  { %4466 = vmatpush.msra.mxu3 %v2638_v44  ;;  %v10413_v42 = vld [vmem:[#allocation7_spill] sm:$0xff] }
 0x388   :  { %v1930_v15 = vpop.xlane.xlu2 %1929  ;;  %v1927_v0 = vpop.xlane.xlu1 %1926  ;;  %v3462_v27 = vsel %vm10190_vm10, %v3461_v49, %v3460_v37  ;;  %v2631_v44 = vld [vmem:[%s10185_s1 + $0x1b8] sm:$0xff] }
 0x389   :  { %v1924_v58 = vpop.xlane.xlu0 %1923  ;;  %v3951_v2 = vperm.slane %v1927_v0, %v7475_v14  ;;  %v3953_v41 = vperm.slane %v1930_v15, %v7491_v12  ;;  %4467 = vmatpush.msra.mxu3 %v2637_v1  ;;  %v5457_v0 = vunpack.c.h.bf16 %v5958_v54 }
 0x38a   :  { %v3949_v26 = vperm.slane %v1924_v58, %v7463_v3  ;;  %v5453_v58 = vunpack.c.h.bf16 %v7870_v35  ;;  %v3467_v35 = vperm.slane %v10414_v9, %v7560_v25  ;;  %v5465_v9 = vunpack.c.h.bf16 %v7937_v13 }
 0x38b   :  { %4468 = vmatpush.msra.mxu3 %v2636_v5 }
 0x38c   :  { %v3950_v23 = vsel %vm3373_vm6, %v3949_v26, %v3948_v21  ;;  %v3465_v26 = vperm.slane %v10413_v42, %v7542_v45  ;;  %v2078_v21 = vsel %vm1039_vm0, %v5456_v10, 0.0  ;;  %v2075_v43 = vsel %vm1039_vm0, %v5453_v58, 0.0  ;;  %v2629_v10 = vld [vmem:[%s10185_s1 + $0x1a8] sm:$0xff] }
 0x38d   :  { %2064 = vadd.xlane.f32.xlu2 %v2063_v32  ;;  %2061 = vadd.xlane.f32.xlu1 %v2060_v20  ;;  %v3952_v4 = vsel %vm3377_vm7, %v3951_v2, %v3950_v23  ;;  %v2081_v2 = vsel %vm1039_vm0, %v5457_v0, 0.0  ;;  %v2633_v23 = vld [vmem:[%s10185_s1 + $0x1c8] sm:$0xff]  ;;  %v5961_v0 = vld [vmem:[%s10184_s0 + $0x580] sm:$0xff]  }
 0x38e   :  { %2058 = vadd.xlane.f32.xlu0 %v2057_v7  ;;  %v3954_v36 = vsel %vm10410_vm8, %v3953_v41, %v3952_v4  ;;  %4469 = vmatpush.msra.mxu3 %v2635_v34  ;;  %v3464_v7 = vsel %vm3393_vm11, %v3463_v63, %v3462_v27  ;;  %vm10416_vm8 = vcmask 851712   ;;  %v5464_v41 = vunpack.c.l.bf16 %v7937_v13  ;;  %v2630_v63 = vld [vmem:[%s10185_s1 + $0x1b0] sm:$0xff] }
 0x390   :  { %v1939_v18 = vpop.xlane.xlu2 %1938  ;;  %v1936_v53 = vpop.xlane.xlu1 %1935  ;;  %4470 = vmatpush.msra.mxu3 %v2634_v48  ;;  %v2627_v48 = vld [vmem:[%s10185_s1 + $0x198] sm:$0xff] }
 0x391   :  { %v1933_v57 = vpop.xlane.xlu0 %1932  ;;  %v3957_v60 = vperm.slane %v1936_v53, %v7511_v46  ;;  %v3959_v52 = vperm.slane %v1939_v18, %v7533_v17  ;;  %v3469_v18 = vperm.slane %v10415_v39, %v7576_v33  ;;  %v3466_v53 = vsel %vm10416_vm8, %v3465_v26, %v3464_v7  ;;  %v10420_v26 = vld [vmem:[#allocation15_spill] sm:$0xff] }
 0x392   :  { %v3955_v28 = vperm.slane %v1933_v57, %v7498_v59  ;;  %4471 = vmatpush.msra.mxu3 %v2633_v23  ;;  %v3468_v49 = vsel %vm3401_vm13, %v3467_v35, %v3466_v53  ;;  %v5461_v57 = vunpack.c.h.bf16 %v5959_v11  ;;  %v3473_v7 = vperm.slane %v10420_v26, %v7384_v30 }
 0x393   :  { %v3470_v6 = vsel %vm3405_vm14, %v3469_v18, %v3468_v49  ;;  %v5962_v49 = vld [vmem:[%s10184_s0 + $0x588] sm:$0xff]  }
 0x394   :  { %v3956_v15 = vsel %vm3385_vm9, %v3955_v28, %v3954_v36  ;;  %4472 = vmatpush.msra.mxu3 %v2632_v61  ;;  %v5460_v28 = vunpack.c.l.bf16 %v5959_v11  ;;  %v2090_v36 = vsel %vm1039_vm0, %v5464_v41, 0.0  ;;  %v2087_v5 = vsel %vm1039_vm0, %v5461_v57, 0.0  ;;  %v2626_v11 = vld [vmem:[%s10185_s1 + $0x190] sm:$0xff]  ;;  %v2625_v41 = vld [vmem:[%s10185_s1 + $0x188] sm:$0xff] }
 0x395   :  { %2073 = vadd.xlane.f32.xlu2 %v2072_v40  ;;  %2070 = vadd.xlane.f32.xlu1 %v2069_v47  ;;  %v3958_v51 = vsel %vm10190_vm10, %v3957_v60, %v3956_v15  ;;  %vm10417_vm10 = vmmov %vm10416_vm8  ;;  %v10418_v40 = vld [vmem:[#allocation10_spill] sm:$0xff] }
 0x396   :  { %2067 = vadd.xlane.f32.xlu0 %v2066_v56  ;;  %v3960_v50 = vsel %vm3393_vm11, %v3959_v52, %v3958_v51  ;;  %v3471_v47 = vperm.slane %v10418_v40, %v7587_v22  ;;  %4473 = vmatpush.msra.mxu3 %v2631_v44  ;;  %v2084_v27 = vsel %vm1039_vm0, %v5460_v28, 0.0  ;;  %v5469_v51 = vunpack.c.h.bf16 %v5961_v0  ;;  %v5963_v61 = vld [vmem:[%s10184_s0 + $0x590] sm:$0xff]   ;;  %v10423_v44 = vld [vmem:[#allocation17_spill] sm:$0xff] }
 0x397   :  { %v2624_v40 = vld [vmem:[%s10185_s1 + $0x180] sm:$0xff] }
 0x398   :  { %v1948_v32 = vpop.xlane.xlu2 %1947  ;;  %v1945_v20 = vpop.xlane.xlu1 %1944  ;;  %4474 = vmatpush.msra.mxu3 %v2630_v63  ;;  %v3472_v34 = vsel %vm3409_vm15, %v3471_v47, %v3470_v6  ;;  %v2099_v39 = vsel %vm1039_vm0, %v5469_v51, 0.0  ;;  %v5472_v6 = vunpack.c.l.bf16 %v5962_v49  ;;  %v10424_v63 = vld [vmem:[#allocation16_spill] sm:$0xff] }
 0x399   :  { %v1942_v19 = vpop.xlane.xlu0 %1941  ;;  %v3963_v8 = vperm.slane %v1945_v20, %v7560_v25  ;;  %v3965_v4 = vperm.slane %v1948_v32, %v7576_v33  ;;  %v2628_v32 = vld [vmem:[%s10185_s1 + $0x1a0] sm:$0xff]  ;;  %v10419_v20 = vld [vmem:[#allocation14_spill] sm:$0xff] }
 0x39a   :  { %v3961_v38 = vperm.slane %v1942_v19, %v7542_v45  ;;  %4475 = vmatpush.msra.mxu3 %v2629_v10  ;;  %v3474_v42 = vperm.slane %v10419_v20, %v7390_v62  ;;  %v5468_v19 = vunpack.c.l.bf16 %v5961_v0  ;;  %v10425_v0 = vld [vmem:[#allocation21_spill] sm:$0xff]  ;;  %v2102_v26 = vsel %vm1039_vm0, %v5472_v6, 0.0 }
 0x39b   :  { %v3484_v10 = vperm.slane %v10425_v0, %v7463_v3  ;;  %v2652_v0 = vld [vmem:[%s10185_s1 + $0x260] sm:$0xff] }
 0x39c   :  { %v3962_v31 = vsel %vm10417_vm10, %v3961_v38, %v3960_v50  ;;  %4476 = vmatpush.msra.mxu3 %v2628_v32  ;;  %v3475_v23 = vsel %vm3353_vm1, %v3474_v42, %v3473_v7  ;;  %v2096_v13 = vsel %vm1039_vm0, %v5468_v19, 0.0  ;;  %v5964_v7 = vld [vmem:[%s10184_s0 + $0x598] sm:$0xff]   ;;  %vm10429_vm10 = vcmask 589312  }
 0x39d   :  { %2082 = vadd.xlane.f32.xlu2 %v2081_v2  ;;  %2079 = vadd.xlane.f32.xlu1 %v2078_v21  ;;  %v3964_v1 = vsel %vm3401_vm13, %v3963_v8, %v3962_v31  ;;  %v10421_v2 = vld [vmem:[#allocation13_spill] sm:$0xff]  ;;  %v10422_v8 = vld [vmem:[#allocation18_spill] sm:$0xff]  ;;  %v2093_v31 = vsel %vm1039_vm0, %v5465_v9, 0.0  ;;  %v10426_v19 = vld [vmem:[#allocation20_spill] sm:$0xff] }
 0x39e   :  { %2076 = vadd.xlane.f32.xlu0 %v2075_v43  ;;  %v3966_v15 = vsel %vm3405_vm14, %v3965_v4, %v3964_v1  ;;  %v3476_v21 = vperm.slane %v10421_v2, %v7411_v16  ;;  %4477 = vmatpush.msra.mxu3 %v2627_v48  ;;  %v3478_v50 = vperm.slane %v10422_v8, %v7419_v29  ;;  %v5481_v2 = vunpack.c.h.bf16 %v5964_v7  ;;  %v10427_v8 = vld [vmem:[#allocation19_spill] sm:$0xff]  ;;  %vm10431_vm8 = vmmov %vm10429_vm10 }
 0x39f   :  { %v3480_v4 = vperm.slane %v10423_v44, %v7428_v55  ;;  %v3486_v48 = vperm.slane %v10426_v19, %v7475_v14  ;;  %v10434_v19 = vld [vmem:[#allocation27_spill] sm:$0xff] }
 0x3a0   :  { %v1957_v56 = vpop.xlane.xlu2 %1956  ;;  %v1954_v54 = vpop.xlane.xlu1 %1953  ;;  %4478 = vmatpush.msra.mxu3 %v2626_v11  ;;  %v3477_v28 = vsel %vm3357_vm2, %v3476_v21, %v3475_v23  ;;  %v5480_v21 = vunpack.c.l.bf16 %v5964_v7  ;;  %v5477_v23 = vunpack.c.h.bf16 %v5963_v61 }
 0x3a1   :  { %v1951_v37 = vpop.xlane.xlu0 %1950  ;;  %v3970_v18 = vperm.slane %v1957_v56, %v7390_v62  ;;  %v3969_v53 = vperm.slane %v1954_v54, %v7384_v30  ;;  %v3479_v47 = vsel %vm3361_vm3, %v3478_v50, %v3477_v28  ;;  %v5476_v56 = vunpack.c.l.bf16 %v5963_v61  ;;  %v2654_v28 = vld [vmem:[%s10185_s1 + $0x270] sm:$0xff] }
 0x3a2   :  { %v3967_v60 = vperm.slane %v1951_v37, %v7587_v22  ;;  %v5473_v54 = vunpack.c.h.bf16 %v5962_v49  ;;  %4479 = vmatpush.msra.mxu3 %v2625_v41  ;;  %v3488_v50 = vperm.slane %v10427_v8, %v7491_v12  ;;  %v2117_v61 = vsel %vm1039_vm0, %v5481_v2, 0.0  ;;  %v2650_v2 = vld [vmem:[%s10185_s1 + $0x250] sm:$0xff]  ;;  %v2649_v8 = vld [vmem:[%s10185_s1 + $0x248] sm:$0xff] }
 0x3a3   :  { %v3971_v1 = vsel %vm3353_vm1, %v3970_v18, %v3969_v53  ;;  %v10428_v53 = vld [vmem:[#allocation24_spill] sm:$0xff] }
 0x3a4   :  { %v3968_v58 = vsel %vm3409_vm15, %v3967_v60, %v3966_v15  ;;  %v3482_v60 = vperm.slane %v10424_v63, %v7459_v24  ;;  %4480 = vmatpush.msra.mxu3 %v2624_v40  ;;  %v3481_v15 = vsel %vm3365_vm4, %v3480_v4, %v3479_v47  ;;  %v2105_v32 = vsel %vm1039_vm0, %v5473_v54, 0.0  ;;  %v8066_v47 = vld [vmem:[%s10184_s0 + $0x5a8] sm:$0xff]  }
 0x3a5   :  { %2091 = vadd.xlane.f32.xlu2 %v2090_v36  ;;  %2088 = vadd.xlane.f32.xlu1 %v2087_v5  ;;  %v4375_v52 = vsel %vm4372_vm12, %v3968_v58, %v3472_v34  ;;  %v2114_v4 = vsel %vm1039_vm0, %v5480_v21, 0.0  ;;  %v2111_v40 = vsel %vm1039_vm0, %v5477_v23, 0.0 }
 0x3a6   :  { %2085 = vadd.xlane.f32.xlu0 %v2084_v27  ;;  %4461 = vmatmul.f32.vlgmr.msra.gmra.mxu2 %v4375_v52  ;;  %v2108_v52 = vsel %vm1039_vm0, %v5476_v56, 0.0  ;;  %v3483_v51 = vsel %vm3369_vm5, %v3482_v60, %v3481_v15  ;;  %v5965_v56 = vld [vmem:[%s10184_s0 + $0x5a0] sm:$0xff]  }
 0x3a7   :  { %v3485_v9 = vsel %vm3373_vm6, %v3484_v10, %v3483_v51  ;;  %v5485_v15 = vunpack.c.h.bf16 %v5965_v56  ;;  %v5484_v10 = vunpack.c.l.bf16 %v5965_v56 }
 0x3a8   :  { %v1966_v35 = vpop.xlane.xlu2 %1965  ;;  %v1963_v38 = vpop.xlane.xlu1 %1962  ;;  %v3487_v18 = vsel %vm3377_vm7, %v3486_v48, %v3485_v9  ;;  %v3496_v48 = vperm.slane %v10434_v19, %v7542_v45 }
 0x3a9   :  { %v1960_v43 = vpop.xlane.xlu0 %1959  ;;  %v3974_v37 = vperm.slane %v1963_v38, %v7419_v29  ;;  %v3976_v58 = vperm.slane %v1966_v35, %v7428_v55  ;;  %v3489_v54 = vsel %vm10429_vm10, %v3488_v50, %v3487_v18  ;;  %vm10433_vm10 = vcmask 720512   ;;  %v10436_v50 = vld [vmem:[#allocation26_spill] sm:$0xff] }
 0x3aa   :  { %v3972_v57 = vperm.slane %v1960_v43, %v7411_v16  ;;  %v2655_v43 = vld [vmem:[%s10185_s1 + $0x278] sm:$0xff]  ;;  %v2120_v21 = vsel %vm1039_vm0, %v5484_v10, 0.0  ;;  %v8143_v10 = vld [vmem:[%s10184_s0 + $0x5c0] sm:$0xff]  }
 0x3ab   :  { %4485 = vmatpush.msrb.mxu0 %v2655_v43  ;;  %v5967_v43 = vld [vmem:[%s10184_s0 + $0x5b0] sm:$0xff]  }
 0x3ac   :  { %v3973_v36 = vsel %vm3357_vm2, %v3972_v57, %v3971_v1  ;;  %v2653_v1 = vld [vmem:[%s10185_s1 + $0x268] sm:$0xff] }
 0x3ad   :  { %2100 = vadd.xlane.f32.xlu2 %v2099_v39  ;;  %2097 = vadd.xlane.f32.xlu1 %v2096_v13  ;;  %v3975_v20 = vsel %vm3361_vm3, %v3974_v37, %v3973_v36  ;;  %v10430_v37 = vld [vmem:[#allocation23_spill] sm:$0xff] }
 0x3ae   :  { %2094 = vadd.xlane.f32.xlu0 %v2093_v31  ;;  %v3977_v38 = vsel %vm3365_vm4, %v3976_v58, %v3975_v20  ;;  %v3490_v31 = vperm.slane %v10428_v53, %v7498_v59  ;;  %4486 = vmatpush.msrb.mxu0 %v2654_v28  ;;  %v3492_v6 = vperm.slane %v10430_v37, %v7511_v46  ;;  %v10432_v20 = vld [vmem:[#allocation22_spill] sm:$0xff] }
 0x3b0   :  { %v1975_v5 = vpop.xlane.xlu2 %1974  ;;  %v1972_v27 = vpop.xlane.xlu1 %1971  ;;  %v3491_v36 = vsel %vm3385_vm9, %v3490_v31, %v3489_v54  ;;  %4487 = vmatpush.msrb.mxu0 %v2653_v1  ;;  %v5493_v31 = vunpack.c.h.bf16 %v5967_v43  ;;  %v10440_v1 = vld [vmem:[#allocation30_spill] sm:$0xff] }
 0x3b1   :  { %v1969_v34 = vpop.xlane.xlu0 %1968  ;;  %v3980_v35 = vperm.slane %v1972_v27, %v7463_v3  ;;  %v3982_v49 = vperm.slane %v1975_v5, %v7475_v14  ;;  %v5488_v27 = vunpack.c.l.bf16 %v8066_v47  ;;  %v3502_v37 = vperm.slane %v10440_v1, %v7587_v22 }
 0x3b2   :  { %v3978_v42 = vperm.slane %v1969_v34, %v7459_v24  ;;  %v2651_v34 = vld [vmem:[%s10185_s1 + $0x258] sm:$0xff]  ;;  %4488 = vmatpush.msrb.mxu0 %v2652_v0 }
 0x3b4   :  { %v3979_v11 = vsel %vm3369_vm5, %v3978_v42, %v3977_v38  ;;  %v3494_v42 = vperm.slane %v10432_v20, %v7533_v17  ;;  %v2123_v38 = vsel %vm1039_vm0, %v5485_v15, 0.0  ;;  %4489 = vmatpush.msrb.mxu0 %v2651_v34  ;;  %v5968_v34 = vld [vmem:[%s10184_s0 + $0x5b8] sm:$0xff]  }
 0x3b5   :  { %2109 = vadd.xlane.f32.xlu2 %v2108_v52  ;;  %2106 = vadd.xlane.f32.xlu1 %v2105_v32  ;;  %v3981_v57 = vsel %vm3373_vm6, %v3980_v35, %v3979_v11  ;;  %v2126_v35 = vsel %vm1039_vm0, %v5488_v27, 0.0  ;;  %v2646_v27 = vld [vmem:[%s10185_s1 + $0x230] sm:$0xff]  ;;  %v10441_v20 = vld [vmem:[#allocation28_spill] sm:$0xff] }
 0x3b6   :  { %2103 = vadd.xlane.f32.xlu0 %v2102_v26  ;;  %v3983_v60 = vsel %vm3377_vm7, %v3982_v49, %v3981_v57  ;;  %v3493_v26 = vsel %vm10433_vm10, %v3492_v6, %v3491_v36  ;;  %4490 = vmatpush.msrb.mxu0 %v2650_v2  ;;  %v5492_v49 = vunpack.c.l.bf16 %v5967_v43  ;;  %v2135_v36 = vsel %vm1039_vm0, %v5493_v31, 0.0  ;;  %v10443_v2 = vld [vmem:[#allocation33_spill] sm:$0xff] }
 0x3b7   :  { %v5496_v43 = vunpack.c.l.bf16 %v5968_v34 }
 0x3b8   :  { %v1984_v39 = vpop.xlane.xlu2 %1983  ;;  %v1981_v13 = vpop.xlane.xlu1 %1980  ;;  %4491 = vmatpush.msrb.mxu0 %v2649_v8 }
 0x3b9   :  { %v1978_v41 = vpop.xlane.xlu0 %1977  ;;  %v3986_v63 = vperm.slane %v1981_v13, %v7498_v59  ;;  %v3988_v58 = vperm.slane %v1984_v39, %v7511_v46  ;;  %v3498_v39 = vperm.slane %v10436_v50, %v7560_v25  ;;  %v3495_v13 = vsel %vm3393_vm11, %v3494_v42, %v3493_v26 }
 0x3ba   :  { %v3984_v44 = vperm.slane %v1978_v41, %v7491_v12  ;;  %v2648_v41 = vld [vmem:[%s10185_s1 + $0x240] sm:$0xff]  ;;  %v3505_v42 = vperm.slane %v10441_v20, %v7390_v62 }
 0x3bb   :  { %4492 = vmatpush.msrb.mxu0 %v2648_v41 }
 0x3bc   :  { %v3985_v5 = vsel %vm10431_vm8, %v3984_v44, %v3983_v60  ;;  %vm10435_vm8 = vmmov %vm10433_vm10  ;;  %vm10437_vm10 = vcmask 851712   ;;  %v5489_v44 = vunpack.c.h.bf16 %v8066_v47 }
 0x3bd   :  { %2118 = vadd.xlane.f32.xlu2 %v2117_v61  ;;  %2115 = vadd.xlane.f32.xlu1 %v2114_v4  ;;  %v3987_v7 = vsel %vm3385_vm9, %v3986_v63, %v3985_v5  ;;  %v3497_v53 = vsel %vm10437_vm10, %v3496_v48, %v3495_v13  ;;  %v2647_v61 = vld [vmem:[%s10185_s1 + $0x238] sm:$0xff]  ;;  %v10438_v4 = vld [vmem:[#allocation25_spill] sm:$0xff]  ;;  %v2132_v5 = vsel %vm1039_vm0, %v5492_v49, 0.0  ;;  %v2642_v49 = vld [vmem:[%s10185_s1 + $0x210] sm:$0xff] }
 0x3be   :  { %2112 = vadd.xlane.f32.xlu0 %v2111_v40  ;;  %v3989_v23 = vsel %vm10435_vm8, %v3988_v58, %v3987_v7  ;;  %v3500_v28 = vperm.slane %v10438_v4, %v7576_v33  ;;  %vm10439_vm8 = vmmov %vm10437_vm10  ;;  %v3499_v47 = vsel %vm3401_vm13, %v3498_v39, %v3497_v53  ;;  %4493 = vmatpush.msrb.mxu0 %v2647_v61  ;;  %v2129_v15 = vsel %vm1039_vm0, %v5489_v44, 0.0  ;;  %v10444_v13 = vld [vmem:[#allocation32_spill] sm:$0xff]  ;;  %v5970_v44 = vld [vmem:[%s10184_s0 + $0x5c8] sm:$0xff]  }
 0x3bf   :  { %vm10451_vm10 = vcmask 589312  }
 0x3c0   :  { %v1993_v52 = vpop.xlane.xlu2 %1992  ;;  %v1990_v32 = vpop.xlane.xlu1 %1989  ;;  %v3501_v58 = vsel %vm3405_vm14, %v3500_v28, %v3499_v47  ;;  %4494 = vmatpush.msrb.mxu0 %v2646_v27  ;;  %v2641_v28 = vld [vmem:[%s10185_s1 + $0x208] sm:$0xff]  ;;  %v2640_v47 = vld [vmem:[%s10185_s1 + $0x200] sm:$0xff] }
 0x3c1   :  { %v1987_v51 = vpop.xlane.xlu0 %1986  ;;  %v3992_v11 = vperm.slane %v1990_v32, %v7542_v45  ;;  %v3994_v57 = vperm.slane %v1993_v52, %v7560_v25  ;;  %v2645_v32 = vld [vmem:[%s10185_s1 + $0x228] sm:$0xff]  ;;  %v3503_v26 = vsel %vm3409_vm15, %v3502_v37, %v3501_v58  ;;  %v10446_v37 = vld [vmem:[#allocation36_spill] sm:$0xff] }
 0x3c2   :  { %v3990_v9 = vperm.slane %v1987_v51, %v7533_v17  ;;  %v10442_v51 = vld [vmem:[#allocation29_spill] sm:$0xff]  ;;  %4495 = vmatpush.msrb.mxu0 %v2645_v32 }
 0x3c3   :  { %v3504_v19 = vperm.slane %v10442_v51, %v7384_v30 }
 0x3c4   :  { %v3991_v18 = vsel %vm3393_vm11, %v3990_v9, %v3989_v23  ;;  %v5500_v9 = vunpack.c.l.bf16 %v8143_v10 }
 0x3c5   :  { %2127 = vadd.xlane.f32.xlu2 %v2126_v35  ;;  %2124 = vadd.xlane.f32.xlu1 %v2123_v38  ;;  %v3993_v40 = vsel %vm10439_vm8, %v3992_v11, %v3991_v18  ;;  %v5497_v35 = vunpack.c.h.bf16 %v5968_v34  ;;  %v2644_v38 = vld [vmem:[%s10185_s1 + $0x220] sm:$0xff]  ;;  %v2643_v11 = vld [vmem:[%s10185_s1 + $0x218] sm:$0xff]  ;;  %v3506_v39 = vsel %vm3353_vm1, %v3505_v42, %v3504_v19  ;;  %v3509_v18 = vperm.slane %v10444_v13, %v7419_v29 }
 0x3c6   :  { %2121 = vadd.xlane.f32.xlu0 %v2120_v21  ;;  %v3995_v0 = vsel %vm3401_vm13, %v3994_v57, %v3993_v40  ;;  %v3507_v21 = vperm.slane %v10443_v2, %v7411_v16  ;;  %4496 = vmatpush.msrb.mxu0 %v2644_v38  ;;  %v2144_v53 = vsel %vm1039_vm0, %v5500_v9, 0.0  ;;  %v2138_v57 = vsel %vm1039_vm0, %v5496_v43, 0.0  ;;  %v10445_v40 = vld [vmem:[#allocation31_spill] sm:$0xff]  ;;  %v10448_v9 = vld [vmem:[#allocation34_spill] sm:$0xff] }
 0x3c7   :  { %v2141_v31 = vsel %vm1039_vm0, %v5497_v35, 0.0  ;;  %v5972_v19 = vld [vmem:[%s10184_s0 + $0x5d8] sm:$0xff]   ;;  %v3517_v35 = vperm.slane %v10448_v9, %v7475_v14  ;;  %vm10454_vm8 = vcmask 720512  }
 0x3c8   :  { %v8126_v56 = vpop.xlane.xlu2 %2001  ;;  %v1999_v54 = vpop.xlane.xlu1 %1998  ;;  %4497 = vmatpush.msrb.mxu0 %v2643_v11  ;;  %v3508_v41 = vsel %vm3357_vm2, %v3507_v21, %v3506_v39  ;;  %v5512_v43 = vunpack.c.l.bf16 %v5972_v19 }
 0x3c9   :  { %v3998_v6 = vperm.slane %v1999_v54, %v7587_v22  ;;  %v1996_v63 = vpop.xlane.xlu0 %1995  ;;  %v4000_v61 = vperm.slane %v8126_v56, %v7384_v30  ;;  %v3511_v54 = vperm.slane %v10445_v40, %v7428_v55  ;;  %v3510_v1 = vsel %vm3361_vm3, %v3509_v18, %v3508_v41 }
 0x3ca   :  { %v3996_v60 = vperm.slane %v1996_v63, %v7576_v33  ;;  %4498 = vmatpush.msrb.mxu0 %v2642_v49  ;;  %v5505_v63 = vunpack.c.h.bf16 %v5970_v44  ;;  %v5504_v56 = vunpack.c.l.bf16 %v5970_v44 }
 0x3cb   :  { %v3512_v58 = vsel %vm3365_vm4, %v3511_v54, %v3510_v1  ;;  %v5973_v1 = vld [vmem:[%s10184_s0 + $0x5e0] sm:$0xff]  }
 0x3cc   :  { %v3997_v52 = vsel %vm3405_vm14, %v3996_v60, %v3995_v0  ;;  %4499 = vmatpush.msrb.mxu0 %v2641_v28  ;;  %v10447_v0 = vld [vmem:[#allocation35_spill] sm:$0xff]  ;;  %v2153_v42 = vsel %vm1039_vm0, %v5505_v63, 0.0 }
 0x3cd   :  { %2136 = vadd.xlane.f32.xlu2 %v2135_v36  ;;  %2133 = vadd.xlane.f32.xlu1 %v2132_v5  ;;  %v3999_v7 = vsel %vm3409_vm15, %v3998_v6, %v3997_v52  ;;  %v3513_v6 = vperm.slane %v10446_v37, %v7459_v24  ;;  %v5501_v36 = vunpack.c.h.bf16 %v8143_v10  ;;  %v3515_v34 = vperm.slane %v10447_v0, %v7463_v3  ;;  %v10452_v37 = vld [vmem:[#allocation37_spill] sm:$0xff]  ;;  %v10453_v0 = vld [vmem:[#allocation42_spill] sm:$0xff] }
 0x3ce   :  { %2130 = vadd.xlane.f32.xlu0 %v2129_v15  ;;  %v4376_v48 = vsel %vm4372_vm12, %v3999_v7, %v3503_v26  ;;  %4500 = vmatpush.msrb.mxu0 %v2640_v47  ;;  %v2150_v26 = vsel %vm1039_vm0, %v5504_v56, 0.0 }
 0x3cf   :  { %4481 = vmatmul.f32.vlgmr.msra.gmra.mxu3 %v4376_v48  ;;  %v3514_v32 = vsel %vm3369_vm5, %v3513_v6, %v3512_v58  ;;  %v2147_v51 = vsel %vm1039_vm0, %v5501_v36, 0.0  ;;  %v5971_v48 = vld [vmem:[%s10184_s0 + $0x5d0] sm:$0xff]   ;;  %v3523_v6 = vperm.slane %v10452_v37, %v7511_v46  ;;  %v5517_v36 = vunpack.c.h.bf16 %v5973_v1 }
 0x3d0   :  { %v2011_v23 = vpop.xlane.xlu2 %2010  ;;  %v2008_v8 = vpop.xlane.xlu1 %2007  ;;  %v3516_v38 = vsel %vm3373_vm6, %v3515_v34, %v3514_v32  ;;  %v5509_v11 = vunpack.c.h.bf16 %v5971_v48  ;;  %v5508_v39 = vunpack.c.l.bf16 %v5971_v48  ;;  %v3525_v34 = vperm.slane %v10453_v0, %v7533_v17 }
 0x3d1   :  { %v2005_v50 = vpop.xlane.xlu0 %2004  ;;  %v4003_v60 = vperm.slane %v2008_v8, %v7411_v16  ;;  %v4005_v20 = vperm.slane %v2011_v23, %v7419_v29  ;;  %v10449_v23 = vld [vmem:[#allocation39_spill] sm:$0xff]  ;;  %v3518_v49 = vsel %vm3377_vm7, %v3517_v35, %v3516_v38  ;;  %v5513_v58 = vunpack.c.h.bf16 %v5972_v19  ;;  %v2669_v35 = vld [vmem:[%s10185_s1 + $0x2e8] sm:$0xff] }
 0x3d2   :  { %v4001_v4 = vperm.slane %v2005_v50, %v7390_v62  ;;  %v3519_v8 = vperm.slane %v10449_v23, %v7491_v12  ;;  %v2159_v28 = vsel %vm1039_vm0, %v5509_v11, 0.0  ;;  %v2156_v54 = vsel %vm1039_vm0, %v5508_v39, 0.0 }
 0x3d3   :  { %v2171_v9 = vsel %vm1039_vm0, %v5517_v36, 0.0 }
 0x3d4   :  { %v4002_v5 = vsel %vm3353_vm1, %v4001_v4, %v4000_v61  ;;  %v2162_v4 = vsel %vm1039_vm0, %v5512_v43, 0.0  ;;  %v3520_v40 = vsel %vm10451_vm10, %v3519_v8, %v3518_v49  ;;  %v5974_v43 = vld [vmem:[%s10184_s0 + $0x5e8] sm:$0xff]   ;;  %v2668_v8 = vld [vmem:[%s10185_s1 + $0x2e0] sm:$0xff]  ;;  %v2667_v49 = vld [vmem:[%s10185_s1 + $0x2d8] sm:$0xff] }
 0x3d5   :  { %2145 = vadd.xlane.f32.xlu2 %v2144_v53  ;;  %2142 = vadd.xlane.f32.xlu1 %v2141_v31  ;;  %v4004_v10 = vsel %vm3357_vm2, %v4003_v60, %v4002_v5  ;;  %v10450_v53 = vld [vmem:[#allocation38_spill] sm:$0xff]  ;;  %v5516_v5 = vunpack.c.l.bf16 %v5973_v1  ;;  %v10459_v1 = vld [vmem:[#allocation44_spill] sm:$0xff] }
 0x3d6   :  { %2139 = vadd.xlane.f32.xlu0 %v2138_v57  ;;  %v4006_v21 = vsel %vm3361_vm3, %v4005_v20, %v4004_v10  ;;  %v3521_v31 = vperm.slane %v10450_v53, %v7498_v59  ;;  %v3533_v37 = vperm.slane %v10459_v1, %v7587_v22 }
 0x3d7   :  { %v2168_v19 = vsel %vm1039_vm0, %v5516_v5, 0.0 }
 0x3d8   :  { %v2020_v27 = vpop.xlane.xlu2 %2019  ;;  %v2017_v15 = vpop.xlane.xlu1 %2016  ;;  %v3522_v47 = vsel %vm3385_vm9, %v3521_v31, %v3520_v40  ;;  %v5521_v31 = vunpack.c.h.bf16 %v5974_v43 }
 0x3d9   :  { %v2014_v52 = vpop.xlane.xlu0 %2013  ;;  %v4009_v2 = vperm.slane %v2017_v15, %v7459_v24  ;;  %v4011_v41 = vperm.slane %v2020_v27, %v7463_v3  ;;  %v2671_v27 = vld [vmem:[%s10185_s1 + $0x2f8] sm:$0xff]  ;;  %v2670_v15 = vld [vmem:[%s10185_s1 + $0x2f0] sm:$0xff] }
 0x3da   :  { %v4007_v7 = vperm.slane %v2014_v52, %v7428_v55  ;;  %4505 = vmatpush.msrb.mxu1 %v2671_v27  ;;  %v2177_v5 = vsel %vm1039_vm0, %v5521_v31, 0.0  ;;  %v2665_v27 = vld [vmem:[%s10185_s1 + $0x2c8] sm:$0xff]  ;;  %v2660_v31 = vld [vmem:[%s10185_s1 + $0x2a0] sm:$0xff] }
 0x3dc   :  { %v4008_v50 = vsel %vm3365_vm4, %v4007_v7, %v4006_v21  ;;  %4506 = vmatpush.msrb.mxu1 %v2670_v15  ;;  %v10455_v7 = vld [vmem:[#allocation41_spill] sm:$0xff]  ;;  %v8266_v21 = vld [vmem:[%s10184_s0 + $0x5f0] sm:$0xff]  }
 0x3dd   :  { %2154 = vadd.xlane.f32.xlu2 %v2153_v42  ;;  %2151 = vadd.xlane.f32.xlu1 %v2150_v26  ;;  %v4010_v44 = vsel %vm3369_vm5, %v4009_v2, %v4008_v50  ;;  %v3524_v42 = vsel %vm10454_vm8, %v3523_v6, %v3522_v47  ;;  %v2165_v2 = vsel %vm1039_vm0, %v5513_v58, 0.0  ;;  %v10456_v50 = vld [vmem:[#allocation40_spill] sm:$0xff]  ;;  %v5524_v53 = vunpack.c.l.bf16 %v8266_v21 }
 0x3de   :  { %2148 = vadd.xlane.f32.xlu0 %v2147_v51  ;;  %v4012_v56 = vsel %vm3373_vm6, %v4011_v41, %v4010_v44  ;;  %v3527_v51 = vperm.slane %v10455_v7, %v7542_v45  ;;  %v3526_v38 = vsel %vm3393_vm11, %v3525_v34, %v3524_v42  ;;  %4507 = vmatpush.msrb.mxu1 %v2669_v35  ;;  %v10458_v41 = vld [vmem:[#allocation45_spill] sm:$0xff]  ;;  %v5976_v58 = vld [vmem:[%s10184_s0 + $0x5f8] sm:$0xff]  }
 0x3df   :  { %v3529_v39 = vperm.slane %v10456_v50, %v7560_v25  ;;  %v2180_v36 = vsel %vm1039_vm0, %v5524_v53, 0.0  ;;  %v5528_v7 = vunpack.c.l.bf16 %v5976_v58  ;;  %v10462_v50 = vld [vmem:[#allocation48_spill] sm:$0xff] }
 0x3e0   :  { %v2029_v13 = vpop.xlane.xlu2 %2028  ;;  %v2026_v18 = vpop.xlane.xlu1 %2025  ;;  %4508 = vmatpush.msrb.mxu1 %v2668_v8  ;;  %v5977_v53 = vld [vmem:[%s10184_s0 + $0x600] sm:$0xff]  }
 0x3e1   :  { %v2023_v57 = vpop.xlane.xlu0 %2022  ;;  %v4015_v63 = vperm.slane %v2026_v18, %v7491_v12  ;;  %v4017_v52 = vperm.slane %v2029_v13, %v7498_v59 }
 0x3e2   :  { %v4013_v61 = vperm.slane %v2023_v57, %v7475_v14  ;;  %v3531_v57 = vperm.slane %v10458_v41, %v7576_v33  ;;  %4509 = vmatpush.msrb.mxu1 %v2667_v49  ;;  %v10463_v49 = vld [vmem:[#allocation47_spill] sm:$0xff] }
 0x3e3   :  { %v3538_v41 = vperm.slane %v10463_v49, %v7411_v16 }
 0x3e4   :  { %v4014_v60 = vsel %vm3377_vm7, %v4013_v61, %v4012_v56  ;;  %v5520_v61 = vunpack.c.l.bf16 %v5974_v43 }
 0x3e5   :  { %2163 = vadd.xlane.f32.xlu2 %v2162_v4  ;;  %2160 = vadd.xlane.f32.xlu1 %v2159_v28  ;;  %v4016_v26 = vsel %vm10451_vm10, %v4015_v63, %v4014_v60  ;;  %vm10457_vm10 = vcmask 851712   ;;  %v2666_v4 = vld [vmem:[%s10185_s1 + $0x2d0] sm:$0xff] }
 0x3e6   :  { %2157 = vadd.xlane.f32.xlu0 %v2156_v54  ;;  %v4018_v23 = vsel %vm3385_vm9, %v4017_v52, %v4016_v26  ;;  %v3528_v18 = vsel %vm10457_vm10, %v3527_v51, %v3526_v38  ;;  %4510 = vmatpush.msrb.mxu1 %v2666_v4  ;;  %v2174_v0 = vsel %vm1039_vm0, %v5520_v61, 0.0  ;;  %v2663_v51 = vld [vmem:[%s10185_s1 + $0x2b8] sm:$0xff] }
 0x3e7   :  { %v3530_v56 = vsel %vm3401_vm13, %v3529_v39, %v3528_v18  ;;  %v3536_v39 = vperm.slane %v10462_v50, %v7390_v62  ;;  %v5978_v18 = vld [vmem:[%s10184_s0 + $0x608] sm:$0xff]   ;;  %v2659_v61 = vld [vmem:[%s10185_s1 + $0x298] sm:$0xff] }
 0x3e8   :  { %v2038_v32 = vpop.xlane.xlu2 %2037  ;;  %v2035_v20 = vpop.xlane.xlu1 %2034  ;;  %v3532_v34 = vsel %vm3405_vm14, %v3531_v57, %v3530_v56  ;;  %4511 = vmatpush.msrb.mxu1 %v2665_v27  ;;  %v5536_v57 = vunpack.c.l.bf16 %v5978_v18  ;;  %v10468_v50 = vld [vmem:[#allocation54_spill] sm:$0xff] }
 0x3e9   :  { %v2032_v10 = vpop.xlane.xlu0 %2031  ;;  %v4021_v11 = vperm.slane %v2035_v20, %v7533_v17  ;;  %v4023_v44 = vperm.slane %v2038_v32, %v7542_v45  ;;  %v2664_v32 = vld [vmem:[%s10185_s1 + $0x2c0] sm:$0xff]  ;;  %v3534_v42 = vsel %vm3409_vm15, %v3533_v37, %v3532_v34 }
 0x3ea   :  { %v4019_v48 = vperm.slane %v2032_v10, %v7511_v46  ;;  %v5529_v10 = vunpack.c.h.bf16 %v5976_v58  ;;  %4512 = vmatpush.msrb.mxu1 %v2664_v32  ;;  %v2198_v27 = vsel %vm1039_vm0, %v5536_v57, 0.0  ;;  %v2656_v32 = vld [vmem:[%s10185_s1 + $0x280] sm:$0xff] }
 0x3ec   :  { %v4020_v13 = vsel %vm10454_vm8, %v4019_v48, %v4018_v23  ;;  %vm10460_vm8 = vmmov %vm10457_vm10  ;;  %4513 = vmatpush.msrb.mxu1 %v2663_v51  ;;  %v2189_v43 = vsel %vm1039_vm0, %v5529_v10, 0.0  ;;  %v2661_v23 = vld [vmem:[%s10185_s1 + $0x2a8] sm:$0xff]  ;;  %vm10471_vm10 = vcmask 589312  }
 0x3ed   :  { %2172 = vadd.xlane.f32.xlu2 %v2171_v9  ;;  %2169 = vadd.xlane.f32.xlu1 %v2168_v19  ;;  %v4022_v28 = vsel %vm3393_vm11, %v4021_v11, %v4020_v13  ;;  %v5525_v9 = vunpack.c.h.bf16 %v8266_v21  ;;  %v2662_v19 = vld [vmem:[%s10185_s1 + $0x2b0] sm:$0xff]  ;;  %v2186_v11 = vsel %vm1039_vm0, %v5528_v7, 0.0 }
 0x3ee   :  { %2166 = vadd.xlane.f32.xlu0 %v2165_v2  ;;  %v4024_v15 = vsel %vm10460_vm8, %v4023_v44, %v4022_v28  ;;  %4514 = vmatpush.msrb.mxu1 %v2662_v19  ;;  %v10461_v21 = vld [vmem:[#allocation43_spill] sm:$0xff]  ;;  %v5533_v44 = vunpack.c.h.bf16 %v5977_v53  ;;  %v5532_v28 = vunpack.c.l.bf16 %v5977_v53  ;;  %vm10474_vm8 = vmmov %vm10471_vm10 }
 0x3ef   :  { %v3535_v8 = vperm.slane %v10461_v21, %v7384_v30  ;;  %v2183_v13 = vsel %vm1039_vm0, %v5525_v9, 0.0 }
 0x3f0   :  { %v2047_v40 = vpop.xlane.xlu2 %2046  ;;  %v2044_v54 = vpop.xlane.xlu1 %2043  ;;  %4515 = vmatpush.msrb.mxu1 %v2661_v23  ;;  %v2192_v58 = vsel %vm1039_vm0, %v5532_v28, 0.0  ;;  %v10469_v28 = vld [vmem:[#allocation53_spill] sm:$0xff] }
 0x3f1   :  { %v4027_v6 = vperm.slane %v2044_v54, %v7576_v33  ;;  %v2041_v63 = vpop.xlane.xlu0 %2040  ;;  %v4029_v47 = vperm.slane %v2047_v40, %v7587_v22  ;;  %v3537_v4 = vsel %vm3353_vm1, %v3536_v39, %v3535_v8  ;;  %v2658_v40 = vld [vmem:[%s10185_s1 + $0x290] sm:$0xff]  ;;  %v3548_v39 = vperm.slane %v10468_v50, %v7475_v14 }
 0x3f2   :  { %v4025_v60 = vperm.slane %v2041_v63, %v7560_v25  ;;  %4516 = vmatpush.msrb.mxu1 %v2660_v31  ;;  %v10464_v63 = vld [vmem:[#allocation46_spill] sm:$0xff] }
 0x3f3   :  { %v3540_v56 = vperm.slane %v10464_v63, %v7419_v29 }
 0x3f4   :  { %v4026_v52 = vsel %vm3401_vm13, %v4025_v60, %v4024_v15  ;;  %4517 = vmatpush.msrb.mxu1 %v2659_v61  ;;  %v3539_v60 = vsel %vm3357_vm2, %v3538_v41, %v3537_v4  ;;  %v2195_v15 = vsel %vm1039_vm0, %v5533_v44, 0.0  ;;  %v8394_v44 = vld [vmem:[%s10184_s0 + $0x620] sm:$0xff]   ;;  %v5980_v61 = vld [vmem:[%s10184_s0 + $0x618] sm:$0xff]  }
 0x3f5   :  { %2181 = vadd.xlane.f32.xlu2 %v2180_v36  ;;  %2178 = vadd.xlane.f32.xlu1 %v2177_v5  ;;  %v4028_v20 = vsel %vm3405_vm14, %v4027_v6, %v4026_v52  ;;  %v10465_v36 = vld [vmem:[#allocation51_spill] sm:$0xff]  ;;  %v3541_v7 = vsel %vm3361_vm3, %v3540_v56, %v3539_v60  ;;  %v5545_v63 = vunpack.c.h.bf16 %v5980_v61  ;;  %v5544_v60 = vunpack.c.l.bf16 %v5980_v61 }
 0x3f6   :  { %2175 = vadd.xlane.f32.xlu0 %v2174_v0  ;;  %v4030_v26 = vsel %vm3409_vm15, %v4029_v47, %v4028_v20  ;;  %v3542_v5 = vperm.slane %v10465_v36, %v7428_v55  ;;  %4518 = vmatpush.msrb.mxu1 %v2658_v40  ;;  %v2657_v0 = vld [vmem:[%s10185_s1 + $0x288] sm:$0xff]  ;;  %v5979_v52 = vld [vmem:[%s10184_s0 + $0x610] sm:$0xff]   ;;  %v3550_v40 = vperm.slane %v10469_v28, %v7491_v12  ;;  %v2687_v56 = vld [vmem:[%s10185_s1 + $0x378] sm:$0xff] }
 0x3f7   :  { %v4377_v48 = vsel %vm4372_vm12, %v4030_v26, %v3534_v42  ;;  %v10466_v26 = vld [vmem:[#allocation50_spill] sm:$0xff]  ;;  %v5540_v9 = vunpack.c.l.bf16 %v5979_v52  ;;  %4525 = vmatpush.msrb.mxu2 %v2687_v56  ;;  %v10470_v36 = vld [vmem:[#allocation52_spill] sm:$0xff] }
 0x3f8   :  { %4501 = vmatmul.f32.vlgmr.msrb.gmra.mxu0 %v4377_v48  ;;  %v2056_v35 = vpop.xlane.xlu2 %2055  ;;  %v2053_v38 = vpop.xlane.xlu1 %2052  ;;  %4519 = vmatpush.msrb.mxu1 %v2657_v0  ;;  %v3544_v10 = vperm.slane %v10466_v26, %v7459_v24  ;;  %v3543_v51 = vsel %vm3365_vm4, %v3542_v5, %v3541_v7  ;;  %v5541_v48 = vunpack.c.h.bf16 %v5979_v52  ;;  %v3552_v5 = vperm.slane %v10470_v36, %v7498_v59  ;;  %v2682_v28 = vld [vmem:[%s10185_s1 + $0x350] sm:$0xff] }
 0x3f9   :  { %v2050_v2 = vpop.xlane.xlu0 %2049  ;;  %v4032_v54 = vperm.slane %v2053_v38, %v7390_v62  ;;  %v4034_v34 = vperm.slane %v2056_v35, %v7411_v16  ;;  %v5537_v38 = vunpack.c.h.bf16 %v5978_v18  ;;  %v2204_v49 = vsel %vm1039_vm0, %v5540_v9, 0.0  ;;  %v2685_v9 = vld [vmem:[%s10185_s1 + $0x368] sm:$0xff]  ;;  %v5983_v56 = vld [vmem:[%s10184_s0 + $0x630] sm:$0xff]  }
 0x3fa   :  { %v4031_v1 = vperm.slane %v2050_v2, %v7384_v30  ;;  %4520 = vmatpush.msrb.mxu1 %v2656_v32  ;;  %v10467_v2 = vld [vmem:[#allocation49_spill] sm:$0xff]  ;;  %v3545_v8 = vsel %vm3369_vm5, %v3544_v10, %v3543_v51  ;;  %v2207_v31 = vsel %vm1039_vm0, %v5541_v48, 0.0  ;;  %v2213_v7 = vsel %vm1039_vm0, %v5545_v63, 0.0  ;;  %v8461_v63 = vld [vmem:[%s10184_s0 + $0x638] sm:$0xff]  }
 0x3fb   :  { %v2201_v57 = vsel %vm1039_vm0, %v5537_v38, 0.0  ;;  %v2210_v51 = vsel %vm1039_vm0, %v5544_v60, 0.0  ;;  %v5982_v48 = vld [vmem:[%s10184_s0 + $0x628] sm:$0xff]  }
 0x3fc   :  { %v4033_v20 = vsel %vm3353_vm1, %v4032_v54, %v4031_v1  ;;  %v5552_v50 = vunpack.c.l.bf16 %v5982_v48 }
 0x3fd   :  { %2190 = vadd.xlane.f32.xlu2 %v2189_v43  ;;  %2187 = vadd.xlane.f32.xlu1 %v2186_v11  ;;  %v4035_v35 = vsel %vm3357_vm2, %v4034_v34, %v4033_v20  ;;  %v3546_v43 = vperm.slane %v10467_v2, %v7463_v3  ;;  %v10472_v34 = vld [vmem:[#allocation57_spill] sm:$0xff]  ;;  %v2686_v20 = vld [vmem:[%s10185_s1 + $0x370] sm:$0xff] }
 0x3fe   :  { %2184 = vadd.xlane.f32.xlu0 %v2183_v13  ;;  %4526 = vmatpush.msrb.mxu2 %v2686_v20  ;;  %v2679_v20 = vld [vmem:[%s10185_s1 + $0x338] sm:$0xff] }
 0x3ff   :  { %v3547_v4 = vsel %vm3373_vm6, %v3546_v43, %v3545_v8  ;;  %v5553_v8 = vunpack.c.h.bf16 %v5982_v48 }
 0x400   :  { %v2065_v37 = vpop.xlane.xlu2 %2064  ;;  %v2062_v6 = vpop.xlane.xlu1 %2061  ;;  %v3549_v54 = vsel %vm3377_vm7, %v3548_v39, %v3547_v4  ;;  %4527 = vmatpush.msrb.mxu2 %v2685_v9  ;;  %v2683_v39 = vld [vmem:[%s10185_s1 + $0x358] sm:$0xff] }
 0x401   :  { %v2059_v47 = vpop.xlane.xlu0 %2058  ;;  %v4038_v19 = vperm.slane %v2062_v6, %v7428_v55  ;;  %v4040_v53 = vperm.slane %v2065_v37, %v7459_v24  ;;  %v5548_v6 = vunpack.c.l.bf16 %v8394_v44  ;;  %v3551_v0 = vsel %vm10471_vm10, %v3550_v40, %v3549_v54  ;;  %v10478_v40 = vld [vmem:[#allocation60_spill] sm:$0xff] }
 0x402   :  { %v4036_v42 = vperm.slane %v2059_v47, %v7419_v29  ;;  %vm10475_vm10 = vcmask 720512  }
 0x403   :  { %v2216_v10 = vsel %vm1039_vm0, %v5548_v6, 0.0 }
 0x404   :  { %v4037_v11 = vsel %vm3361_vm3, %v4036_v42, %v4035_v35  ;;  %v10473_v35 = vld [vmem:[#allocation56_spill] sm:$0xff] }
 0x405   :  { %2199 = vadd.xlane.f32.xlu2 %v2198_v27  ;;  %2196 = vadd.xlane.f32.xlu1 %v2195_v15  ;;  %v4039_v18 = vsel %vm3365_vm4, %v4038_v19, %v4037_v11  ;;  %v3553_v19 = vsel %vm3385_vm9, %v3552_v5, %v3551_v0  ;;  %v3556_v38 = vperm.slane %v10473_v35, %v7533_v17  ;;  %v2684_v11 = vld [vmem:[%s10185_s1 + $0x360] sm:$0xff]  ;;  %v10479_v5 = vld [vmem:[#allocation59_spill] sm:$0xff] }
 0x406   :  { %2193 = vadd.xlane.f32.xlu0 %v2192_v58  ;;  %v4041_v37 = vsel %vm3369_vm5, %v4040_v53, %v4039_v18  ;;  %v3554_v58 = vperm.slane %v10472_v34, %v7511_v46  ;;  %4528 = vmatpush.msrb.mxu2 %v2684_v11  ;;  %v10476_v18 = vld [vmem:[#allocation55_spill] sm:$0xff]  ;;  %v2680_v34 = vld [vmem:[%s10185_s1 + $0x340] sm:$0xff] }
 0x408   :  { %v2074_v23 = vpop.xlane.xlu2 %2073  ;;  %v2071_v21 = vpop.xlane.xlu1 %2070  ;;  %4529 = vmatpush.msrb.mxu2 %v2683_v39 }
 0x409   :  { %v2068_v13 = vpop.xlane.xlu0 %2067  ;;  %v4044_v1 = vperm.slane %v2071_v21, %v7475_v14  ;;  %v4046_v52 = vperm.slane %v2074_v23, %v7491_v12  ;;  %v3555_v23 = vsel %vm10475_vm10, %v3554_v58, %v3553_v19 }
 0x40a   :  { %v4042_v41 = vperm.slane %v2068_v13, %v7463_v3  ;;  %v5549_v13 = vunpack.c.h.bf16 %v8394_v44  ;;  %v3560_v44 = vperm.slane %v10478_v40, %v7560_v25  ;;  %4530 = vmatpush.msrb.mxu2 %v2682_v28  ;;  %v2675_v28 = vld [vmem:[%s10185_s1 + $0x318] sm:$0xff]  ;;  %v5561_v40 = vunpack.c.h.bf16 %v8461_v63 }
 0x40c   :  { %v4043_v47 = vsel %vm3373_vm6, %v4042_v41, %v4041_v37  ;;  %v3558_v41 = vperm.slane %v10476_v18, %v7542_v45  ;;  %v2222_v37 = vsel %vm1039_vm0, %v5552_v50, 0.0  ;;  %v2219_v6 = vsel %vm1039_vm0, %v5549_v13, 0.0  ;;  %v2677_v50 = vld [vmem:[%s10185_s1 + $0x328] sm:$0xff] }
 0x40d   :  { %2208 = vadd.xlane.f32.xlu2 %v2207_v31  ;;  %2205 = vadd.xlane.f32.xlu1 %v2204_v49  ;;  %v4045_v42 = vsel %vm3377_vm7, %v4044_v1, %v4043_v47  ;;  %v2225_v1 = vsel %vm1039_vm0, %v5553_v8, 0.0  ;;  %v2681_v47 = vld [vmem:[%s10185_s1 + $0x348] sm:$0xff]  ;;  %v5985_v8 = vld [vmem:[%s10184_s0 + $0x640] sm:$0xff]  }
 0x40e   :  { %2202 = vadd.xlane.f32.xlu0 %v2201_v57  ;;  %v4047_v43 = vsel %vm10474_vm8, %v4046_v52, %v4045_v42  ;;  %v3557_v57 = vsel %vm3393_vm11, %v3556_v38, %v3555_v23  ;;  %vm10477_vm8 = vmmov %vm10475_vm10  ;;  %4531 = vmatpush.msrb.mxu2 %v2681_v47  ;;  %vm10480_vm10 = vcmask 851712   ;;  %v5560_v52 = vunpack.c.l.bf16 %v8461_v63  ;;  %v2678_v38 = vld [vmem:[%s10185_s1 + $0x330] sm:$0xff] }
 0x410   :  { %v2083_v27 = vpop.xlane.xlu2 %2082  ;;  %v2080_v15 = vpop.xlane.xlu1 %2079  ;;  %4532 = vmatpush.msrb.mxu2 %v2680_v34  ;;  %v5987_v34 = vld [vmem:[%s10184_s0 + $0x650] sm:$0xff]  }
 0x411   :  { %v2077_v32 = vpop.xlane.xlu0 %2076  ;;  %v4050_v2 = vperm.slane %v2080_v15, %v7511_v46  ;;  %v4052_v53 = vperm.slane %v2083_v27, %v7533_v17  ;;  %v3562_v27 = vperm.slane %v10479_v5, %v7576_v33  ;;  %v3559_v15 = vsel %vm10480_vm10, %v3558_v41, %v3557_v57  ;;  %v10484_v41 = vld [vmem:[#allocation63_spill] sm:$0xff] }
 0x412   :  { %v4048_v26 = vperm.slane %v2077_v32, %v7498_v59  ;;  %v3561_v58 = vsel %vm3401_vm13, %v3560_v44, %v3559_v15  ;;  %v5557_v32 = vunpack.c.h.bf16 %v5983_v56  ;;  %4533 = vmatpush.msrb.mxu2 %v2679_v20  ;;  %v3566_v57 = vperm.slane %v10484_v41, %v7384_v30  ;;  %v10487_v20 = vld [vmem:[#allocation65_spill] sm:$0xff] }
 0x413   :  { %v3563_v35 = vsel %vm3405_vm14, %v3562_v27, %v3561_v58  ;;  %v5986_v58 = vld [vmem:[%s10184_s0 + $0x648] sm:$0xff]  }
 0x414   :  { %v4049_v21 = vsel %vm3385_vm9, %v4048_v26, %v4047_v43  ;;  %v5556_v26 = vunpack.c.l.bf16 %v5983_v56  ;;  %v2234_v43 = vsel %vm1039_vm0, %v5560_v52, 0.0  ;;  %v2231_v11 = vsel %vm1039_vm0, %v5557_v32, 0.0  ;;  %4534 = vmatpush.msrb.mxu2 %v2678_v38  ;;  %v2674_v56 = vld [vmem:[%s10185_s1 + $0x310] sm:$0xff]  ;;  %v2673_v52 = vld [vmem:[%s10185_s1 + $0x308] sm:$0xff]  ;;  %v10488_v38 = vld [vmem:[#allocation64_spill] sm:$0xff] }
 0x415   :  { %2217 = vadd.xlane.f32.xlu2 %v2216_v10  ;;  %2214 = vadd.xlane.f32.xlu1 %v2213_v7  ;;  %v4051_v61 = vsel %vm10477_vm8, %v4050_v2, %v4049_v21  ;;  %vm10481_vm8 = vmmov %vm10480_vm10  ;;  %v10482_v10 = vld [vmem:[#allocation58_spill] sm:$0xff]  ;;  %vm10493_vm10 = vcmask 589312  }
 0x416   :  { %2211 = vadd.xlane.f32.xlu0 %v2210_v51  ;;  %v4053_v36 = vsel %vm3393_vm11, %v4052_v53, %v4051_v61  ;;  %v3564_v7 = vperm.slane %v10482_v10, %v7587_v22  ;;  %v2228_v23 = vsel %vm1039_vm0, %v5556_v26, 0.0  ;;  %4535 = vmatpush.msrb.mxu2 %v2677_v50  ;;  %v5565_v61 = vunpack.c.h.bf16 %v5985_v8  ;;  %v2672_v10 = vld [vmem:[%s10185_s1 + $0x300] sm:$0xff] }
 0x418   :  { %v2092_v31 = vpop.xlane.xlu2 %2091  ;;  %v2089_v49 = vpop.xlane.xlu1 %2088  ;;  %v3565_v39 = vsel %vm3409_vm15, %v3564_v7, %v3563_v35  ;;  %v2243_v5 = vsel %vm1039_vm0, %v5565_v61, 0.0  ;;  %v5568_v35 = vunpack.c.l.bf16 %v5986_v58 }
 0x419   :  { %v2086_v4 = vpop.xlane.xlu0 %2085  ;;  %v4056_v60 = vperm.slane %v2089_v49, %v7560_v25  ;;  %v4058_v42 = vperm.slane %v2092_v31, %v7576_v33  ;;  %v2676_v31 = vld [vmem:[%s10185_s1 + $0x320] sm:$0xff]  ;;  %v10483_v49 = vld [vmem:[#allocation62_spill] sm:$0xff] }
 0x41a   :  { %v4054_v54 = vperm.slane %v2086_v4, %v7542_v45  ;;  %v3567_v18 = vperm.slane %v10483_v49, %v7390_v62  ;;  %v5564_v4 = vunpack.c.l.bf16 %v5985_v8  ;;  %4536 = vmatpush.msrb.mxu2 %v2676_v31  ;;  %v10489_v8 = vld [vmem:[#allocation69_spill] sm:$0xff]  ;;  %v2246_v41 = vsel %vm1039_vm0, %v5568_v35, 0.0 }
 0x41b   :  { %v3577_v50 = vperm.slane %v10489_v8, %v7463_v3  ;;  %v2700_v8 = vld [vmem:[%s10185_s1 + $0x3e0] sm:$0xff] }
 0x41c   :  { %v4055_v0 = vsel %vm10481_vm8, %v4054_v54, %v4053_v36  ;;  %4537 = vmatpush.msrb.mxu2 %v2675_v28  ;;  %v3568_v47 = vsel %vm3353_vm1, %v3567_v18, %v3566_v57  ;;  %v2240_v63 = vsel %vm1039_vm0, %v5564_v4, 0.0  ;;  %v5988_v57 = vld [vmem:[%s10184_s0 + $0x658] sm:$0xff]   ;;  %vm10495_vm8 = vmmov %vm10493_vm10 }
 0x41d   :  { %2226 = vadd.xlane.f32.xlu2 %v2225_v1  ;;  %2223 = vadd.xlane.f32.xlu1 %v2222_v37  ;;  %v4057_v9 = vsel %vm3401_vm13, %v4056_v60, %v4055_v0  ;;  %v10485_v1 = vld [vmem:[#allocation61_spill] sm:$0xff]  ;;  %v10486_v60 = vld [vmem:[#allocation66_spill] sm:$0xff]  ;;  %v2237_v0 = vsel %vm1039_vm0, %v5561_v40, 0.0  ;;  %v10490_v4 = vld [vmem:[#allocation68_spill] sm:$0xff] }
 0x41e   :  { %2220 = vadd.xlane.f32.xlu0 %v2219_v6  ;;  %v4059_v21 = vsel %vm3405_vm14, %v4058_v42, %v4057_v9  ;;  %v3569_v37 = vperm.slane %v10485_v1, %v7411_v16  ;;  %v3571_v36 = vperm.slane %v10486_v60, %v7419_v29  ;;  %4538 = vmatpush.msrb.mxu2 %v2674_v56  ;;  %v5577_v1 = vunpack.c.h.bf16 %v5988_v57  ;;  %v10491_v60 = vld [vmem:[#allocation67_spill] sm:$0xff] }
 0x41f   :  { %v3573_v42 = vperm.slane %v10487_v20, %v7428_v55  ;;  %v3579_v28 = vperm.slane %v10490_v4, %v7475_v14  ;;  %v10498_v4 = vld [vmem:[#allocation75_spill] sm:$0xff] }
 0x420   :  { %v2101_v51 = vpop.xlane.xlu2 %2100  ;;  %v2098_v48 = vpop.xlane.xlu1 %2097  ;;  %v3570_v26 = vsel %vm3357_vm2, %v3569_v37, %v3568_v47  ;;  %4539 = vmatpush.msrb.mxu2 %v2673_v52  ;;  %v5576_v37 = vunpack.c.l.bf16 %v5988_v57  ;;  %v5573_v47 = vunpack.c.h.bf16 %v5987_v34 }
 0x421   :  { %v2095_v19 = vpop.xlane.xlu0 %2094  ;;  %v4063_v27 = vperm.slane %v2101_v51, %v7390_v62  ;;  %v4062_v15 = vperm.slane %v2098_v48, %v7384_v30  ;;  %v3572_v7 = vsel %vm3361_vm3, %v3571_v36, %v3570_v26  ;;  %v5572_v51 = vunpack.c.l.bf16 %v5987_v34  ;;  %v2702_v26 = vld [vmem:[%s10185_s1 + $0x3f0] sm:$0xff] }
 0x422   :  { %v4060_v2 = vperm.slane %v2095_v19, %v7587_v22  ;;  %v5569_v48 = vunpack.c.h.bf16 %v5986_v58  ;;  %4540 = vmatpush.msrb.mxu2 %v2672_v10  ;;  %v3581_v36 = vperm.slane %v10491_v60, %v7491_v12  ;;  %v2261_v34 = vsel %vm1039_vm0, %v5577_v1, 0.0  ;;  %v2698_v1 = vld [vmem:[%s10185_s1 + $0x3d0] sm:$0xff]  ;;  %v2697_v60 = vld [vmem:[%s10185_s1 + $0x3c8] sm:$0xff] }
 0x423   :  { %v4064_v9 = vsel %vm3353_vm1, %v4063_v27, %v4062_v15  ;;  %v10492_v15 = vld [vmem:[#allocation72_spill] sm:$0xff]  ;;  %v2255_v10 = vsel %vm1039_vm0, %v5573_v47, 0.0 }
 0x424   :  { %v4061_v13 = vsel %vm3409_vm15, %v4060_v2, %v4059_v21  ;;  %v3575_v2 = vperm.slane %v10488_v38, %v7459_v24  ;;  %v3574_v21 = vsel %vm3365_vm4, %v3573_v42, %v3572_v7  ;;  %v2249_v31 = vsel %vm1039_vm0, %v5569_v48, 0.0  ;;  %v8590_v7 = vld [vmem:[%s10184_s0 + $0x668] sm:$0xff]  }
 0x425   :  { %2235 = vadd.xlane.f32.xlu2 %v2234_v43  ;;  %2232 = vadd.xlane.f32.xlu1 %v2231_v11  ;;  %v4378_v53 = vsel %vm4372_vm12, %v4061_v13, %v3565_v39  ;;  %v2258_v42 = vsel %vm1039_vm0, %v5576_v37, 0.0 }
 0x426   :  { %2229 = vadd.xlane.f32.xlu0 %v2228_v23  ;;  %4521 = vmatmul.f32.vlgmr.msrb.gmra.mxu1 %v4378_v53  ;;  %v2252_v53 = vsel %vm1039_vm0, %v5572_v51, 0.0  ;;  %v3576_v61 = vsel %vm3369_vm5, %v3575_v2, %v3574_v21  ;;  %v5989_v51 = vld [vmem:[%s10184_s0 + $0x660] sm:$0xff]  }
 0x427   :  { %v3578_v40 = vsel %vm3373_vm6, %v3577_v50, %v3576_v61  ;;  %v5581_v21 = vunpack.c.h.bf16 %v5989_v51  ;;  %v5580_v50 = vunpack.c.l.bf16 %v5989_v51 }
 0x428   :  { %v2110_v44 = vpop.xlane.xlu2 %2109  ;;  %v2107_v54 = vpop.xlane.xlu1 %2106  ;;  %v3580_v27 = vsel %vm3377_vm7, %v3579_v28, %v3578_v40  ;;  %v3589_v28 = vperm.slane %v10498_v4, %v7542_v45 }
 0x429   :  { %v2104_v6 = vpop.xlane.xlu0 %2103  ;;  %v4067_v19 = vperm.slane %v2107_v54, %v7419_v29  ;;  %v4069_v13 = vperm.slane %v2110_v44, %v7428_v55  ;;  %v3582_v48 = vsel %vm10493_vm10, %v3581_v36, %v3580_v27  ;;  %vm10497_vm10 = vcmask 720512   ;;  %v10500_v36 = vld [vmem:[#allocation74_spill] sm:$0xff] }
 0x42a   :  { %v4065_v32 = vperm.slane %v2104_v6, %v7411_v16  ;;  %v2703_v6 = vld [vmem:[%s10185_s1 + $0x3f8] sm:$0xff]  ;;  %v2264_v37 = vsel %vm1039_vm0, %v5580_v50, 0.0  ;;  %v8667_v50 = vld [vmem:[%s10184_s0 + $0x680] sm:$0xff]  }
 0x42b   :  { %4545 = vmatpush.msrb.mxu3 %v2703_v6  ;;  %v5991_v6 = vld [vmem:[%s10184_s0 + $0x670] sm:$0xff]  }
 0x42c   :  { %v4066_v43 = vsel %vm3357_vm2, %v4065_v32, %v4064_v9  ;;  %v2701_v9 = vld [vmem:[%s10185_s1 + $0x3e8] sm:$0xff] }
 0x42d   :  { %2244 = vadd.xlane.f32.xlu2 %v2243_v5  ;;  %2241 = vadd.xlane.f32.xlu1 %v2240_v63  ;;  %v4068_v49 = vsel %vm3361_vm3, %v4067_v19, %v4066_v43  ;;  %v10494_v19 = vld [vmem:[#allocation71_spill] sm:$0xff] }
 0x42e   :  { %2238 = vadd.xlane.f32.xlu0 %v2237_v0  ;;  %v4070_v54 = vsel %vm3365_vm4, %v4069_v13, %v4068_v49  ;;  %v3583_v0 = vperm.slane %v10492_v15, %v7498_v59  ;;  %4546 = vmatpush.msrb.mxu3 %v2702_v26  ;;  %v3585_v35 = vperm.slane %v10494_v19, %v7511_v46  ;;  %v10496_v49 = vld [vmem:[#allocation70_spill] sm:$0xff] }
 0x430   :  { %v2119_v11 = vpop.xlane.xlu2 %2118  ;;  %v2116_v23 = vpop.xlane.xlu1 %2115  ;;  %v3584_v43 = vsel %vm3385_vm9, %v3583_v0, %v3582_v48  ;;  %4547 = vmatpush.msrb.mxu3 %v2701_v9  ;;  %v5589_v0 = vunpack.c.h.bf16 %v5991_v6  ;;  %v10504_v9 = vld [vmem:[#allocation78_spill] sm:$0xff] }
 0x431   :  { %v2113_v39 = vpop.xlane.xlu0 %2112  ;;  %v4073_v44 = vperm.slane %v2116_v23, %v7463_v3  ;;  %v4075_v58 = vperm.slane %v2119_v11, %v7475_v14  ;;  %v5584_v23 = vunpack.c.l.bf16 %v8590_v7  ;;  %v3595_v19 = vperm.slane %v10504_v9, %v7587_v22 }
 0x432   :  { %v4071_v18 = vperm.slane %v2113_v39, %v7459_v24  ;;  %v2699_v39 = vld [vmem:[%s10185_s1 + $0x3d8] sm:$0xff]  ;;  %4548 = vmatpush.msrb.mxu3 %v2700_v8 }
 0x434   :  { %v4072_v56 = vsel %vm3369_vm5, %v4071_v18, %v4070_v54  ;;  %v3587_v18 = vperm.slane %v10496_v49, %v7533_v17  ;;  %v2267_v54 = vsel %vm1039_vm0, %v5581_v21, 0.0  ;;  %4549 = vmatpush.msrb.mxu3 %v2699_v39  ;;  %v5992_v39 = vld [vmem:[%s10184_s0 + $0x678] sm:$0xff]  }
 0x435   :  { %2253 = vadd.xlane.f32.xlu2 %v2252_v53  ;;  %2250 = vadd.xlane.f32.xlu1 %v2249_v31  ;;  %v4074_v32 = vsel %vm3373_vm6, %v4073_v44, %v4072_v56  ;;  %v2270_v44 = vsel %vm1039_vm0, %v5584_v23, 0.0  ;;  %v2694_v23 = vld [vmem:[%s10185_s1 + $0x3b0] sm:$0xff]  ;;  %v10505_v49 = vld [vmem:[#allocation76_spill] sm:$0xff] }
 0x436   :  { %2247 = vadd.xlane.f32.xlu0 %v2246_v41  ;;  %v4076_v2 = vsel %vm3377_vm7, %v4075_v58, %v4074_v32  ;;  %v3586_v41 = vsel %vm10497_vm10, %v3585_v35, %v3584_v43  ;;  %4550 = vmatpush.msrb.mxu3 %v2698_v1  ;;  %v5588_v58 = vunpack.c.l.bf16 %v5991_v6  ;;  %v2279_v43 = vsel %vm1039_vm0, %v5589_v0, 0.0  ;;  %v10507_v1 = vld [vmem:[#allocation81_spill] sm:$0xff] }
 0x437   :  { %v5592_v6 = vunpack.c.l.bf16 %v5992_v39 }
 0x438   :  { %v2128_v5 = vpop.xlane.xlu2 %2127  ;;  %v2125_v63 = vpop.xlane.xlu1 %2124  ;;  %4551 = vmatpush.msrb.mxu3 %v2697_v60 }
 0x439   :  { %v2122_v52 = vpop.xlane.xlu0 %2121  ;;  %v4079_v38 = vperm.slane %v2125_v63, %v7498_v59  ;;  %v4081_v13 = vperm.slane %v2128_v5, %v7511_v46  ;;  %v3591_v5 = vperm.slane %v10500_v36, %v7560_v25  ;;  %v3588_v63 = vsel %vm3393_vm11, %v3587_v18, %v3586_v41 }
 0x43a   :  { %v4077_v20 = vperm.slane %v2122_v52, %v7491_v12  ;;  %v2696_v52 = vld [vmem:[%s10185_s1 + $0x3c0] sm:$0xff]  ;;  %v3598_v18 = vperm.slane %v10505_v49, %v7390_v62 }
 0x43b   :  { %4552 = vmatpush.msrb.mxu3 %v2696_v52 }
 0x43c   :  { %v4078_v11 = vsel %vm10495_vm8, %v4077_v20, %v4076_v2  ;;  %vm10499_vm8 = vmmov %vm10497_vm10  ;;  %vm10501_vm10 = vcmask 851712   ;;  %v5585_v20 = vunpack.c.h.bf16 %v8590_v7 }
 0x43d   :  { %2262 = vadd.xlane.f32.xlu2 %v2261_v34  ;;  %2259 = vadd.xlane.f32.xlu1 %v2258_v42  ;;  %v4080_v57 = vsel %vm3385_vm9, %v4079_v38, %v4078_v11  ;;  %v3590_v15 = vsel %vm10501_vm10, %v3589_v28, %v3588_v63  ;;  %v2695_v34 = vld [vmem:[%s10185_s1 + $0x3b8] sm:$0xff]  ;;  %v10502_v42 = vld [vmem:[#allocation73_spill] sm:$0xff]  ;;  %v2276_v11 = vsel %vm1039_vm0, %v5588_v58, 0.0  ;;  %v2690_v58 = vld [vmem:[%s10185_s1 + $0x390] sm:$0xff] }
 0x43e   :  { %2256 = vadd.xlane.f32.xlu0 %v2255_v10  ;;  %v4082_v47 = vsel %vm10499_vm8, %v4081_v13, %v4080_v57  ;;  %v3593_v26 = vperm.slane %v10502_v42, %v7576_v33  ;;  %vm10503_vm8 = vmmov %vm10501_vm10  ;;  %v3592_v7 = vsel %vm3401_vm13, %v3591_v5, %v3590_v15  ;;  %4553 = vmatpush.msrb.mxu3 %v2695_v34  ;;  %v2273_v8 = vsel %vm1039_vm0, %v5585_v20, 0.0  ;;  %v10508_v63 = vld [vmem:[#allocation80_spill] sm:$0xff]  ;;  %v5994_v20 = vld [vmem:[%s10184_s0 + $0x688] sm:$0xff]  }
 0x43f   :  { %vm10515_vm10 = vcmask 589312  }
 0x440   :  { %v2137_v53 = vpop.xlane.xlu2 %2136  ;;  %v2134_v31 = vpop.xlane.xlu1 %2133  ;;  %4554 = vmatpush.msrb.mxu3 %v2694_v23 }
 0x441   :  { %v2131_v61 = vpop.xlane.xlu0 %2130  ;;  %v4085_v56 = vperm.slane %v2134_v31, %v7542_v45  ;;  %v4087_v32 = vperm.slane %v2137_v53, %v7560_v25  ;;  %v3594_v53 = vsel %vm3405_vm14, %v3593_v26, %v3592_v7  ;;  %v2693_v31 = vld [vmem:[%s10185_s1 + $0x3a8] sm:$0xff]  ;;  %v2688_v7 = vld [vmem:[%s10185_s1 + $0x380] sm:$0xff] }
 0x442   :  { %v4083_v40 = vperm.slane %v2131_v61, %v7533_v17  ;;  %v3596_v41 = vsel %vm3409_vm15, %v3595_v19, %v3594_v53  ;;  %v10506_v61 = vld [vmem:[#allocation77_spill] sm:$0xff]  ;;  %4555 = vmatpush.msrb.mxu3 %v2693_v31  ;;  %v10510_v19 = vld [vmem:[#allocation84_spill] sm:$0xff] }
 0x443   :  { %v3597_v4 = vperm.slane %v10506_v61, %v7384_v30  ;;  %v2689_v26 = vld [vmem:[%s10185_s1 + $0x388] sm:$0xff] }
 0x444   :  { %v4084_v27 = vsel %vm3393_vm11, %v4083_v40, %v4082_v47  ;;  %v5596_v40 = vunpack.c.l.bf16 %v8667_v50 }
 0x445   :  { %2271 = vadd.xlane.f32.xlu2 %v2270_v44  ;;  %2268 = vadd.xlane.f32.xlu1 %v2267_v54  ;;  %v4086_v10 = vsel %vm10503_vm8, %v4085_v56, %v4084_v27  ;;  %v5593_v44 = vunpack.c.h.bf16 %v5992_v39  ;;  %v2692_v54 = vld [vmem:[%s10185_s1 + $0x3a0] sm:$0xff]  ;;  %v2691_v56 = vld [vmem:[%s10185_s1 + $0x398] sm:$0xff]  ;;  %v3599_v5 = vsel %vm3353_vm1, %v3598_v18, %v3597_v4  ;;  %v3602_v27 = vperm.slane %v10508_v63, %v7419_v29 }
 0x446   :  { %2265 = vadd.xlane.f32.xlu0 %v2264_v37  ;;  %v4088_v21 = vsel %vm3401_vm13, %v4087_v32, %v4086_v10  ;;  %v3600_v37 = vperm.slane %v10507_v1, %v7411_v16  ;;  %4556 = vmatpush.msrb.mxu3 %v2692_v54  ;;  %v2288_v15 = vsel %vm1039_vm0, %v5596_v40, 0.0  ;;  %v2282_v32 = vsel %vm1039_vm0, %v5592_v6, 0.0  ;;  %v10509_v10 = vld [vmem:[#allocation79_spill] sm:$0xff]  ;;  %v10512_v40 = vld [vmem:[#allocation82_spill] sm:$0xff] }
 0x447   :  { %v2285_v0 = vsel %vm1039_vm0, %v5593_v44, 0.0  ;;  %v5996_v4 = vld [vmem:[%s10184_s0 + $0x698] sm:$0xff]   ;;  %v3610_v44 = vperm.slane %v10512_v40, %v7475_v14  ;;  %vm10518_vm8 = vcmask 720512  }
 0x448   :  { %v8650_v51 = vpop.xlane.xlu2 %2145  ;;  %v2143_v48 = vpop.xlane.xlu1 %2142  ;;  %4557 = vmatpush.msrb.mxu3 %v2691_v56  ;;  %v3601_v52 = vsel %vm3357_vm2, %v3600_v37, %v3599_v5  ;;  %v5608_v6 = vunpack.c.l.bf16 %v5996_v4 }
 0x449   :  { %v4091_v35 = vperm.slane %v2143_v48, %v7587_v22  ;;  %v2140_v38 = vpop.xlane.xlu0 %2139  ;;  %v4093_v34 = vperm.slane %v8650_v51, %v7384_v30  ;;  %v3604_v48 = vperm.slane %v10509_v10, %v7428_v55  ;;  %v3603_v9 = vsel %vm3361_vm3, %v3602_v27, %v3601_v52 }
 0x44a   :  { %v4089_v2 = vperm.slane %v2140_v38, %v7576_v33  ;;  %4558 = vmatpush.msrb.mxu3 %v2690_v58  ;;  %v5601_v38 = vunpack.c.h.bf16 %v5994_v20  ;;  %v5600_v51 = vunpack.c.l.bf16 %v5994_v20 }
 0x44c   :  { %v4090_v13 = vsel %vm3405_vm14, %v4089_v2, %v4088_v21  ;;  %4559 = vmatpush.msrb.mxu3 %v2689_v26  ;;  %v2297_v18 = vsel %vm1039_vm0, %v5601_v38, 0.0 }
 0x44d   :  { %2280 = vadd.xlane.f32.xlu2 %v2279_v43  ;;  %2277 = vadd.xlane.f32.xlu1 %v2276_v11  ;;  %v4092_v57 = vsel %vm3409_vm15, %v4091_v35, %v4090_v13  ;;  %v3606_v35 = vperm.slane %v10510_v19, %v7459_v24  ;;  %v5597_v43 = vunpack.c.h.bf16 %v8667_v50  ;;  %v3605_v13 = vsel %vm3365_vm4, %v3604_v48, %v3603_v9  ;;  %v5997_v9 = vld [vmem:[%s10184_s0 + $0x6a0] sm:$0xff]  }
 0x44e   :  { %2274 = vadd.xlane.f32.xlu0 %v2273_v8  ;;  %v4379_v28 = vsel %vm4372_vm12, %v4092_v57, %v3596_v41  ;;  %4560 = vmatpush.msrb.mxu3 %v2688_v7  ;;  %v10511_v8 = vld [vmem:[#allocation83_spill] sm:$0xff]  ;;  %v2294_v41 = vsel %vm1039_vm0, %v5600_v51, 0.0  ;;  %v10516_v19 = vld [vmem:[#allocation85_spill] sm:$0xff] }
 0x44f   :  { %4541 = vmatmul.f32.vlgmr.msrb.gmra.mxu2 %v4379_v28  ;;  %v3608_v39 = vperm.slane %v10511_v8, %v7463_v3  ;;  %v3607_v31 = vsel %vm3369_vm5, %v3606_v35, %v3605_v13  ;;  %v2291_v61 = vsel %vm1039_vm0, %v5597_v43, 0.0  ;;  %v5995_v28 = vld [vmem:[%s10184_s0 + $0x690] sm:$0xff]   ;;  %v3616_v35 = vperm.slane %v10516_v19, %v7511_v46 }
 0x450   :  { %v2155_v47 = vpop.xlane.xlu2 %2154  ;;  %v2152_v60 = vpop.xlane.xlu1 %2151  ;;  %v5605_v56 = vunpack.c.h.bf16 %v5995_v28  ;;  %v5604_v5 = vunpack.c.l.bf16 %v5995_v28  ;;  %v5613_v43 = vunpack.c.h.bf16 %v5997_v9 }
 0x451   :  { %v2149_v36 = vpop.xlane.xlu0 %2148  ;;  %v4096_v2 = vperm.slane %v2152_v60, %v7411_v16  ;;  %v4098_v49 = vperm.slane %v2155_v47, %v7419_v29  ;;  %v3609_v54 = vsel %vm3373_vm6, %v3608_v39, %v3607_v31  ;;  %v10513_v47 = vld [vmem:[#allocation87_spill] sm:$0xff]  ;;  %v5609_v39 = vunpack.c.h.bf16 %v5996_v4 }
 0x452   :  { %v4094_v42 = vperm.slane %v2149_v36, %v7390_v62  ;;  %v3612_v60 = vperm.slane %v10513_v47, %v7491_v12  ;;  %v3611_v58 = vsel %vm3377_vm7, %v3610_v44, %v3609_v54  ;;  %v2303_v26 = vsel %vm1039_vm0, %v5605_v56, 0.0  ;;  %v2717_v44 = vld [vmem:[%s10185_s1 + $0x468] sm:$0xff] }
 0x453   :  { %v2300_v48 = vsel %vm1039_vm0, %v5604_v5, 0.0  ;;  %v2315_v28 = vsel %vm1039_vm0, %v5613_v43, 0.0 }
 0x454   :  { %v4095_v11 = vsel %vm3353_vm1, %v4094_v42, %v4093_v34  ;;  %v2306_v42 = vsel %vm1039_vm0, %v5608_v6, 0.0  ;;  %v3613_v10 = vsel %vm10515_vm10, %v3612_v60, %v3611_v58  ;;  %v5998_v6 = vld [vmem:[%s10184_s0 + $0x6a8] sm:$0xff]   ;;  %v2716_v60 = vld [vmem:[%s10185_s1 + $0x460] sm:$0xff]  ;;  %v2715_v58 = vld [vmem:[%s10185_s1 + $0x458] sm:$0xff] }
 0x455   :  { %2289 = vadd.xlane.f32.xlu2 %v2288_v15  ;;  %2286 = vadd.xlane.f32.xlu1 %v2285_v0  ;;  %v4097_v50 = vsel %vm3357_vm2, %v4096_v2, %v4095_v11  ;;  %v10514_v15 = vld [vmem:[#allocation86_spill] sm:$0xff]  ;;  %v5612_v11 = vunpack.c.l.bf16 %v5997_v9  ;;  %v10523_v9 = vld [vmem:[#allocation92_spill] sm:$0xff] }
 0x456   :  { %2283 = vadd.xlane.f32.xlu0 %v2282_v32  ;;  %v4099_v37 = vsel %vm3361_vm3, %v4098_v49, %v4097_v50  ;;  %v3614_v0 = vperm.slane %v10514_v15, %v7498_v59  ;;  %v2718_v49 = vld [vmem:[%s10185_s1 + $0x470] sm:$0xff]  ;;  %v3626_v19 = vperm.slane %v10523_v9, %v7587_v22 }
 0x457   :  { %v2312_v40 = vsel %vm1039_vm0, %v5612_v11, 0.0 }
 0x458   :  { %v2164_v23 = vpop.xlane.xlu2 %2163  ;;  %v2161_v21 = vpop.xlane.xlu1 %2160  ;;  %v3615_v7 = vsel %vm3385_vm9, %v3614_v0, %v3613_v10  ;;  %v5617_v0 = vunpack.c.h.bf16 %v5998_v6 }
 0x459   :  { %v2158_v53 = vpop.xlane.xlu0 %2157  ;;  %v4102_v1 = vperm.slane %v2161_v21, %v7459_v24  ;;  %v4104_v52 = vperm.slane %v2164_v23, %v7463_v3  ;;  %v2719_v23 = vld [vmem:[%s10185_s1 + $0x478] sm:$0xff]  ;;  %v10517_v21 = vld [vmem:[#allocation90_spill] sm:$0xff] }
 0x45a   :  { %v4100_v57 = vperm.slane %v2158_v53, %v7428_v55  ;;  %v3618_v8 = vperm.slane %v10517_v21, %v7533_v17  ;;  %4565 = vmatpush.msra.mxu0 %v2719_v23  ;;  %v2321_v11 = vsel %vm1039_vm0, %v5617_v0, 0.0  ;;  %v2713_v23 = vld [vmem:[%s10185_s1 + $0x448] sm:$0xff]  ;;  %v2708_v0 = vld [vmem:[%s10185_s1 + $0x420] sm:$0xff] }
 0x45c   :  { %v4101_v36 = vsel %vm3365_vm4, %v4100_v57, %v4099_v37  ;;  %4566 = vmatpush.msra.mxu0 %v2718_v49  ;;  %v10519_v57 = vld [vmem:[#allocation89_spill] sm:$0xff]  ;;  %v8790_v37 = vld [vmem:[%s10184_s0 + $0x6b0] sm:$0xff]  }
 0x45d   :  { %2298 = vadd.xlane.f32.xlu2 %v2297_v18  ;;  %2295 = vadd.xlane.f32.xlu1 %v2294_v41  ;;  %v4103_v20 = vsel %vm3369_vm5, %v4102_v1, %v4101_v36  ;;  %v3617_v18 = vsel %vm10518_vm8, %v3616_v35, %v3615_v7  ;;  %v2309_v1 = vsel %vm1039_vm0, %v5609_v39, 0.0  ;;  %v10520_v36 = vld [vmem:[#allocation88_spill] sm:$0xff]  ;;  %v5620_v15 = vunpack.c.l.bf16 %v8790_v37 }
 0x45e   :  { %2292 = vadd.xlane.f32.xlu0 %v2291_v61  ;;  %v4105_v51 = vsel %vm3373_vm6, %v4104_v52, %v4103_v20  ;;  %v3620_v61 = vperm.slane %v10519_v57, %v7542_v45  ;;  %v3619_v54 = vsel %vm3393_vm11, %v3618_v8, %v3617_v18  ;;  %4567 = vmatpush.msra.mxu0 %v2717_v44  ;;  %v10522_v52 = vld [vmem:[#allocation93_spill] sm:$0xff] }
 0x45f   :  { %v3622_v5 = vperm.slane %v10520_v36, %v7560_v25  ;;  %v2324_v43 = vsel %vm1039_vm0, %v5620_v15, 0.0  ;;  %v10526_v36 = vld [vmem:[#allocation96_spill] sm:$0xff] }
 0x460   :  { %v2173_v63 = vpop.xlane.xlu2 %2172  ;;  %v2170_v27 = vpop.xlane.xlu1 %2169  ;;  %4568 = vmatpush.msra.mxu0 %v2716_v60  ;;  %v6001_v15 = vld [vmem:[%s10184_s0 + $0x6c0] sm:$0xff]  }
 0x461   :  { %v2167_v32 = vpop.xlane.xlu0 %2166  ;;  %v4108_v38 = vperm.slane %v2170_v27, %v7491_v12  ;;  %v4110_v13 = vperm.slane %v2173_v63, %v7498_v59 }
 0x462   :  { %v4106_v34 = vperm.slane %v2167_v32, %v7475_v14  ;;  %v3624_v32 = vperm.slane %v10522_v52, %v7576_v33  ;;  %4569 = vmatpush.msra.mxu0 %v2715_v58  ;;  %v10527_v58 = vld [vmem:[#allocation95_spill] sm:$0xff] }
 0x463   :  { %v3631_v52 = vperm.slane %v10527_v58, %v7411_v16 }
 0x464   :  { %v4107_v2 = vsel %vm3377_vm7, %v4106_v34, %v4105_v51  ;;  %v5616_v34 = vunpack.c.l.bf16 %v5998_v6 }
 0x465   :  { %2307 = vadd.xlane.f32.xlu2 %v2306_v42  ;;  %2304 = vadd.xlane.f32.xlu1 %v2303_v26  ;;  %v4109_v41 = vsel %vm10515_vm10, %v4108_v38, %v4107_v2  ;;  %vm10521_vm10 = vcmask 851712  }
 0x466   :  { %2301 = vadd.xlane.f32.xlu0 %v2300_v48  ;;  %v4111_v47 = vsel %vm3385_vm9, %v4110_v13, %v4109_v41  ;;  %v3621_v27 = vsel %vm10521_vm10, %v3620_v61, %v3619_v54  ;;  %v2714_v48 = vld [vmem:[%s10185_s1 + $0x450] sm:$0xff]  ;;  %v2318_v8 = vsel %vm1039_vm0, %v5616_v34, 0.0  ;;  %v6000_v13 = vld [vmem:[%s10184_s0 + $0x6b8] sm:$0xff]  }
 0x467   :  { %v3623_v51 = vsel %vm3401_vm13, %v3622_v5, %v3621_v27  ;;  %4570 = vmatpush.msra.mxu0 %v2714_v48  ;;  %v5624_v57 = vunpack.c.l.bf16 %v6000_v13  ;;  %v2711_v61 = vld [vmem:[%s10185_s1 + $0x438] sm:$0xff]  ;;  %v2710_v54 = vld [vmem:[%s10185_s1 + $0x430] sm:$0xff]  ;;  %v3629_v5 = vperm.slane %v10526_v36, %v7390_v62  ;;  %v6002_v27 = vld [vmem:[%s10184_s0 + $0x6c8] sm:$0xff]  }
 0x468   :  { %v2182_v53 = vpop.xlane.xlu2 %2181  ;;  %v2179_v31 = vpop.xlane.xlu1 %2178  ;;  %v3625_v39 = vsel %vm3405_vm14, %v3624_v32, %v3623_v51  ;;  %v5632_v32 = vunpack.c.l.bf16 %v6002_v27  ;;  %v2707_v34 = vld [vmem:[%s10185_s1 + $0x418] sm:$0xff]  ;;  %v10532_v36 = vld [vmem:[#allocation102_spill] sm:$0xff] }
 0x469   :  { %v2176_v50 = vpop.xlane.xlu0 %2175  ;;  %v4114_v56 = vperm.slane %v2179_v31, %v7533_v17  ;;  %v4116_v20 = vperm.slane %v2182_v53, %v7542_v45  ;;  %4571 = vmatpush.msra.mxu0 %v2713_v23  ;;  %v2712_v31 = vld [vmem:[%s10185_s1 + $0x440] sm:$0xff]  ;;  %v3627_v18 = vsel %vm3409_vm15, %v3626_v19, %v3625_v39 }
 0x46a   :  { %v4112_v4 = vperm.slane %v2176_v50, %v7511_v46  ;;  %v5625_v50 = vunpack.c.h.bf16 %v6000_v13  ;;  %v2342_v23 = vsel %vm1039_vm0, %v5632_v32, 0.0 }
 0x46b   :  { %4572 = vmatpush.msra.mxu0 %v2712_v31 }
 0x46c   :  { %v4113_v63 = vsel %vm10518_vm8, %v4112_v4, %v4111_v47  ;;  %vm10524_vm8 = vmmov %vm10521_vm10  ;;  %v2333_v6 = vsel %vm1039_vm0, %v5625_v50, 0.0  ;;  %v2709_v47 = vld [vmem:[%s10185_s1 + $0x428] sm:$0xff]  ;;  %vm10535_vm10 = vcmask 589312  }
 0x46d   :  { %2316 = vadd.xlane.f32.xlu2 %v2315_v28  ;;  %2313 = vadd.xlane.f32.xlu1 %v2312_v40  ;;  %v4115_v42 = vsel %vm3393_vm11, %v4114_v56, %v4113_v63  ;;  %v5621_v28 = vunpack.c.h.bf16 %v8790_v37  ;;  %v2330_v56 = vsel %vm1039_vm0, %v5624_v57, 0.0  ;;  %v10525_v37 = vld [vmem:[#allocation91_spill] sm:$0xff] }
 0x46e   :  { %2310 = vadd.xlane.f32.xlu0 %v2309_v1  ;;  %v4117_v21 = vsel %vm10524_vm8, %v4116_v20, %v4115_v42  ;;  %4573 = vmatpush.msra.mxu0 %v2711_v61  ;;  %v3628_v60 = vperm.slane %v10525_v37, %v7384_v30  ;;  %v5629_v20 = vunpack.c.h.bf16 %v6001_v15  ;;  %vm10538_vm8 = vmmov %vm10535_vm10 }
 0x46f   :  { %v2327_v63 = vsel %vm1039_vm0, %v5621_v28, 0.0 }
 0x470   :  { %v2191_v26 = vpop.xlane.xlu2 %2190  ;;  %v2188_v10 = vpop.xlane.xlu1 %2187  ;;  %4574 = vmatpush.msra.mxu0 %v2710_v54  ;;  %v3630_v42 = vsel %vm3353_vm1, %v3629_v5, %v3628_v60  ;;  %v5633_v54 = vunpack.c.h.bf16 %v6002_v27  ;;  %v3641_v5 = vperm.slane %v10532_v36, %v7475_v14 }
 0x471   :  { %v4120_v35 = vperm.slane %v2188_v10, %v7576_v33  ;;  %v2185_v38 = vpop.xlane.xlu0 %2184  ;;  %v4122_v7 = vperm.slane %v2191_v26, %v7587_v22  ;;  %v5628_v26 = vunpack.c.l.bf16 %v6001_v15 }
 0x472   :  { %v4118_v2 = vperm.slane %v2185_v38, %v7560_v25  ;;  %4575 = vmatpush.msra.mxu0 %v2709_v47  ;;  %v10528_v38 = vld [vmem:[#allocation94_spill] sm:$0xff]  ;;  %v2345_v32 = vsel %vm1039_vm0, %v5633_v54, 0.0  ;;  %v10537_v54 = vld [vmem:[#allocation104_spill] sm:$0xff] }
 0x473   :  { %v3633_v51 = vperm.slane %v10528_v38, %v7419_v29  ;;  %v2336_v13 = vsel %vm1039_vm0, %v5628_v26, 0.0  ;;  %v10533_v26 = vld [vmem:[#allocation101_spill] sm:$0xff] }
 0x474   :  { %v4119_v53 = vsel %vm3401_vm13, %v4118_v2, %v4117_v21  ;;  %4576 = vmatpush.msra.mxu0 %v2708_v0  ;;  %v3632_v2 = vsel %vm3357_vm2, %v3631_v52, %v3630_v42  ;;  %v2339_v21 = vsel %vm1039_vm0, %v5629_v20, 0.0  ;;  %v8918_v20 = vld [vmem:[%s10184_s0 + $0x780] sm:$0xff]  }
 0x475   :  { %2325 = vadd.xlane.f32.xlu2 %v2324_v43  ;;  %2322 = vadd.xlane.f32.xlu1 %v2321_v11  ;;  %v4121_v49 = vsel %vm3405_vm14, %v4120_v35, %v4119_v53  ;;  %v2706_v35 = vld [vmem:[%s10185_s1 + $0x410] sm:$0xff]  ;;  %v3634_v57 = vsel %vm3361_vm3, %v3633_v51, %v3632_v2  ;;  %v2735_v51 = vld [vmem:[%s10185_s1 + $0x4f8] sm:$0xff] }
 0x476   :  { %2319 = vadd.xlane.f32.xlu0 %v2318_v8  ;;  %v4123_v41 = vsel %vm3409_vm15, %v4122_v7, %v4121_v49  ;;  %4577 = vmatpush.msra.mxu0 %v2707_v34  ;;  %v10529_v43 = vld [vmem:[#allocation99_spill] sm:$0xff]  ;;  %v2705_v8 = vld [vmem:[%s10185_s1 + $0x408] sm:$0xff] }
 0x477   :  { %v4380_v4 = vsel %vm4372_vm12, %v4123_v41, %v3627_v18  ;;  %v3635_v11 = vperm.slane %v10529_v43, %v7428_v55  ;;  %v6003_v53 = vld [vmem:[%s10184_s0 + $0x6d0] sm:$0xff]   ;;  %v2704_v18 = vld [vmem:[%s10185_s1 + $0x400] sm:$0xff]  ;;  %v6004_v34 = vld [vmem:[%s10184_s0 + $0x6d8] sm:$0xff]   ;;  %4585 = vmatpush.msra.mxu1 %v2735_v51 }
 0x478   :  { %4561 = vmatmul.f32.vlgmr.msrb.gmra.mxu3 %v4380_v4  ;;  %v2200_v40 = vpop.xlane.xlu2 %2199  ;;  %v2197_v44 = vpop.xlane.xlu1 %2196  ;;  %4578 = vmatpush.msra.mxu0 %v2706_v35  ;;  %v10530_v41 = vld [vmem:[#allocation98_spill] sm:$0xff]  ;;  %v5637_v4 = vunpack.c.h.bf16 %v6003_v53  ;;  %v5636_v28 = vunpack.c.l.bf16 %v6003_v53  ;;  %v5724_v35 = vunpack.c.l.bf16 %v8918_v20  ;;  %v5641_v38 = vunpack.c.h.bf16 %v6004_v34  ;;  %v10534_v43 = vld [vmem:[#allocation100_spill] sm:$0xff] }
 0x479   :  { %v2194_v1 = vpop.xlane.xlu0 %2193  ;;  %v4125_v10 = vperm.slane %v2197_v44, %v7390_v62  ;;  %v4127_v39 = vperm.slane %v2200_v40, %v7411_v16  ;;  %v3637_v50 = vperm.slane %v10530_v41, %v7459_v24  ;;  %v3636_v61 = vsel %vm3365_vm4, %v3635_v11, %v3634_v57  ;;  %v6009_v51 = vld [vmem:[%s10184_s0 + $0x700] sm:$0xff]  }
 0x47a   :  { %v4124_v48 = vperm.slane %v2194_v1, %v7384_v30  ;;  %4579 = vmatpush.msra.mxu0 %v2705_v8  ;;  %v10531_v1 = vld [vmem:[#allocation97_spill] sm:$0xff]  ;;  %v2351_v0 = vsel %vm1039_vm0, %v5637_v4, 0.0  ;;  %v2348_v58 = vsel %vm1039_vm0, %v5636_v28, 0.0  ;;  %v5640_v2 = vunpack.c.l.bf16 %v6004_v34 }
 0x47b   :  { %v3638_v60 = vsel %vm3369_vm5, %v3637_v50, %v3636_v61  ;;  %v3645_v11 = vperm.slane %v10534_v43, %v7498_v59  ;;  %v2480_v50 = vsel %vm1039_vm0, %v5724_v35, 0.0  ;;  %v2357_v57 = vsel %vm1039_vm0, %v5641_v38, 0.0  ;;  %v8951_v4 = vld [vmem:[%s10184_s0 + $0x788] sm:$0xff]   ;;  %v8956_v28 = vld [vmem:[%s10184_s0 + $0x6e0] sm:$0xff]  }
 0x47c   :  { %v4126_v31 = vsel %vm3353_vm1, %v4125_v10, %v4124_v48  ;;  %4580 = vmatpush.msra.mxu0 %v2704_v18  ;;  %v3643_v10 = vperm.slane %v10533_v26, %v7491_v12  ;;  %v2354_v61 = vsel %vm1039_vm0, %v5640_v2, 0.0  ;;  %v5728_v36 = vunpack.c.l.bf16 %v8951_v4 }
 0x47d   :  { %2334 = vadd.xlane.f32.xlu2 %v2333_v6  ;;  %2331 = vadd.xlane.f32.xlu1 %v2330_v56  ;;  %v4128_v44 = vsel %vm3357_vm2, %v4127_v39, %v4126_v31  ;;  %v3639_v6 = vperm.slane %v10531_v1, %v7463_v3  ;;  %v10536_v39 = vld [vmem:[#allocation105_spill] sm:$0xff]  ;;  %v3649_v1 = vperm.slane %v10537_v54, %v7533_v17 }
 0x47e   :  { %2328 = vadd.xlane.f32.xlu0 %v2327_v63 }
 0x47f   :  { %v3640_v42 = vsel %vm3373_vm6, %v3639_v6, %v3638_v60 }
 0x480   :  { %v2209_v9 = vpop.xlane.xlu2 %2208  ;;  %v2206_v19 = vpop.xlane.xlu1 %2205  ;;  %v3642_v48 = vsel %vm3377_vm7, %v3641_v5, %v3640_v42  ;;  %v5644_v5 = vunpack.c.l.bf16 %v8956_v28 }
 0x481   :  { %v2203_v7 = vpop.xlane.xlu0 %2202  ;;  %v4131_v40 = vperm.slane %v2206_v19, %v7428_v55  ;;  %v4133_v15 = vperm.slane %v2209_v9, %v7459_v24  ;;  %v3644_v8 = vsel %vm10535_vm10, %v3643_v10, %v3642_v48  ;;  %vm10539_vm10 = vcmask 720512   ;;  %v2730_v10 = vld [vmem:[%s10185_s1 + $0x4d0] sm:$0xff]  ;;  %v10542_v48 = vld [vmem:[#allocation108_spill] sm:$0xff] }
 0x482   :  { %v4129_v49 = vperm.slane %v2203_v7, %v7419_v29  ;;  %v2360_v35 = vsel %vm1039_vm0, %v5644_v5, 0.0  ;;  %v2725_v5 = vld [vmem:[%s10185_s1 + $0x4a8] sm:$0xff] }
 0x484   :  { %v4130_v56 = vsel %vm3361_vm3, %v4129_v49, %v4128_v44  ;;  %v2734_v49 = vld [vmem:[%s10185_s1 + $0x4f0] sm:$0xff]  ;;  %v3646_v44 = vsel %vm3385_vm9, %v3645_v11, %v3644_v8 }
 0x485   :  { %2343 = vadd.xlane.f32.xlu2 %v2342_v23  ;;  %2340 = vadd.xlane.f32.xlu1 %v2339_v21  ;;  %v4132_v27 = vsel %vm3365_vm4, %v4131_v40, %v4130_v56  ;;  %v2733_v40 = vld [vmem:[%s10185_s1 + $0x4e8] sm:$0xff]  ;;  %v10543_v11 = vld [vmem:[#allocation107_spill] sm:$0xff] }
 0x486   :  { %2337 = vadd.xlane.f32.xlu0 %v2336_v13  ;;  %v4134_v19 = vsel %vm3369_vm5, %v4133_v15, %v4132_v27  ;;  %v3647_v13 = vperm.slane %v10536_v39, %v7511_v46  ;;  %4586 = vmatpush.msra.mxu1 %v2734_v49  ;;  %v5725_v15 = vunpack.c.h.bf16 %v8918_v20  ;;  %v3653_v20 = vperm.slane %v10542_v48, %v7560_v25  ;;  %v2728_v39 = vld [vmem:[%s10185_s1 + $0x4c0] sm:$0xff]  ;;  %v2727_v49 = vld [vmem:[%s10185_s1 + $0x4b8] sm:$0xff] }
 0x487   :  { %v5729_v48 = vunpack.c.h.bf16 %v8951_v4 }
 0x488   :  { %v2218_v47 = vpop.xlane.xlu2 %2217  ;;  %v2215_v37 = vpop.xlane.xlu1 %2214  ;;  %4587 = vmatpush.msra.mxu1 %v2733_v40  ;;  %v2483_v38 = vsel %vm1039_vm0, %v5725_v15, 0.0 }
 0x489   :  { %v2212_v63 = vpop.xlane.xlu0 %2211  ;;  %v4137_v9 = vperm.slane %v2215_v37, %v7475_v14  ;;  %v4139_v53 = vperm.slane %v2218_v47, %v7491_v12  ;;  %v2732_v47 = vld [vmem:[%s10185_s1 + $0x4e0] sm:$0xff]  ;;  %v3648_v37 = vsel %vm10539_vm10, %v3647_v13, %v3646_v44 }
 0x48a   :  { %v4135_v52 = vperm.slane %v2212_v63, %v7463_v3  ;;  %4588 = vmatpush.msra.mxu1 %v2732_v47  ;;  %v2731_v63 = vld [vmem:[%s10185_s1 + $0x4d8] sm:$0xff]  ;;  %v3650_v34 = vsel %vm3393_vm11, %v3649_v1, %v3648_v37 }
 0x48c   :  { %v4136_v7 = vsel %vm3373_vm6, %v4135_v52, %v4134_v19  ;;  %4589 = vmatpush.msra.mxu1 %v2731_v63  ;;  %v10540_v52 = vld [vmem:[#allocation103_spill] sm:$0xff]  ;;  %v2486_v19 = vsel %vm1039_vm0, %v5728_v36, 0.0  ;;  %v6033_v36 = vld [vmem:[%s10184_s0 + $0x7c0] sm:$0xff]  }
 0x48d   :  { %2352 = vadd.xlane.f32.xlu2 %v2351_v0  ;;  %2349 = vadd.xlane.f32.xlu1 %v2348_v58  ;;  %v4138_v18 = vsel %vm3377_vm7, %v4137_v9, %v4136_v7  ;;  %v2729_v7 = vld [vmem:[%s10185_s1 + $0x4c8] sm:$0xff] }
 0x48e   :  { %2346 = vadd.xlane.f32.xlu0 %v2345_v32  ;;  %v4140_v56 = vsel %vm10538_vm8, %v4139_v53, %v4138_v18  ;;  %v3651_v32 = vperm.slane %v10540_v52, %v7542_v45  ;;  %vm10541_vm8 = vmmov %vm10539_vm10  ;;  %4590 = vmatpush.msra.mxu1 %v2730_v10  ;;  %vm10544_vm10 = vcmask 851712   ;;  %v5661_v53 = vunpack.c.h.bf16 %v6009_v51  ;;  %v2723_v10 = vld [vmem:[%s10185_s1 + $0x498] sm:$0xff] }
 0x490   :  { %v2227_v23 = vpop.xlane.xlu2 %2226  ;;  %v2224_v21 = vpop.xlane.xlu1 %2223  ;;  %4591 = vmatpush.msra.mxu1 %v2729_v7  ;;  %v2387_v47 = vsel %vm1039_vm0, %v5661_v53, 0.0  ;;  %v2721_v53 = vld [vmem:[%s10185_s1 + $0x488] sm:$0xff] }
 0x491   :  { %v2221_v31 = vpop.xlane.xlu0 %2220  ;;  %v4143_v6 = vperm.slane %v2224_v21, %v7511_v46  ;;  %v4145_v0 = vperm.slane %v2227_v23, %v7533_v17  ;;  %v3655_v23 = vperm.slane %v10543_v11, %v7576_v33  ;;  %v3652_v21 = vsel %vm10544_vm10, %v3651_v32, %v3650_v34  ;;  %v10548_v32 = vld [vmem:[#allocation111_spill] sm:$0xff] }
 0x492   :  { %v4141_v41 = vperm.slane %v2221_v31, %v7498_v59  ;;  %v3654_v13 = vsel %vm3401_vm13, %v3653_v20, %v3652_v21  ;;  %v5660_v31 = vunpack.c.l.bf16 %v6009_v51  ;;  %4592 = vmatpush.msra.mxu1 %v2728_v39  ;;  %v3659_v34 = vperm.slane %v10548_v32, %v7384_v30  ;;  %v2722_v51 = vld [vmem:[%s10185_s1 + $0x490] sm:$0xff] }
 0x493   :  { %v3656_v1 = vsel %vm3405_vm14, %v3655_v23, %v3654_v13  ;;  %v9060_v39 = vld [vmem:[%s10184_s0 + $0x790] sm:$0xff]   ;;  %v6010_v13 = vld [vmem:[%s10184_s0 + $0x708] sm:$0xff]  }
 0x494   :  { %v4142_v60 = vsel %vm3385_vm9, %v4141_v41, %v4140_v56  ;;  %v5645_v41 = vunpack.c.h.bf16 %v8956_v28  ;;  %4593 = vmatpush.msra.mxu1 %v2727_v49  ;;  %v2384_v28 = vsel %vm1039_vm0, %v5660_v31, 0.0  ;;  %v6006_v49 = vld [vmem:[%s10184_s0 + $0x6e8] sm:$0xff]  }
 0x495   :  { %2481 = vadd.xlane.f32.xlu2 %v2480_v50  ;;  %2358 = vadd.xlane.f32.xlu1 %v2357_v57  ;;  %v4144_v42 = vsel %vm10541_vm8, %v4143_v6, %v4142_v60  ;;  %vm10545_vm8 = vmmov %vm10544_vm10  ;;  %v10546_v50 = vld [vmem:[#allocation106_spill] sm:$0xff]  ;;  %vm10557_vm10 = vcmask 589312  }
 0x496   :  { %2355 = vadd.xlane.f32.xlu0 %v2354_v61  ;;  %v4146_v43 = vsel %vm3393_vm11, %v4145_v0, %v4144_v42  ;;  %v3657_v57 = vperm.slane %v10546_v50, %v7587_v22  ;;  %v2726_v6 = vld [vmem:[%s10185_s1 + $0x4b0] sm:$0xff]  ;;  %v2363_v60 = vsel %vm1039_vm0, %v5645_v41, 0.0  ;;  %v5757_v42 = vunpack.c.h.bf16 %v6033_v36 }
 0x497   :  { %4594 = vmatpush.msra.mxu1 %v2726_v6  ;;  %v5648_v6 = vunpack.c.l.bf16 %v6006_v49 }
 0x498   :  { %v2236_v58 = vpop.xlane.xlu2 %2235  ;;  %v2233_v27 = vpop.xlane.xlu1 %2232  ;;  %v3658_v15 = vsel %vm3409_vm15, %v3657_v57, %v3656_v1  ;;  %v2531_v11 = vsel %vm1039_vm0, %v5757_v42, 0.0  ;;  %v2720_v57 = vld [vmem:[%s10185_s1 + $0x480] sm:$0xff] }
 0x499   :  { %v2230_v26 = vpop.xlane.xlu0 %2229  ;;  %v4149_v2 = vperm.slane %v2233_v27, %v7560_v25  ;;  %v4151_v18 = vperm.slane %v2236_v58, %v7576_v33  ;;  %4595 = vmatpush.msra.mxu1 %v2725_v5  ;;  %v2724_v58 = vld [vmem:[%s10185_s1 + $0x4a0] sm:$0xff]  ;;  %v10547_v27 = vld [vmem:[#allocation110_spill] sm:$0xff] }
 0x49a   :  { %v4147_v9 = vperm.slane %v2230_v26, %v7542_v45  ;;  %v3660_v52 = vperm.slane %v10547_v27, %v7390_v62  ;;  %v5756_v26 = vunpack.c.l.bf16 %v6033_v36  ;;  %v10553_v5 = vld [vmem:[#allocation117_spill] sm:$0xff] }
 0x49b   :  { %4596 = vmatpush.msra.mxu1 %v2724_v58 }
 0x49c   :  { %v4148_v8 = vsel %vm10545_vm8, %v4147_v9, %v4146_v43  ;;  %v3661_v7 = vsel %vm3353_vm1, %v3660_v52, %v3659_v34  ;;  %v2528_v4 = vsel %vm1039_vm0, %v5756_v26, 0.0  ;;  %v2366_v34 = vsel %vm1039_vm0, %v5648_v6, 0.0  ;;  %v9098_v26 = vld [vmem:[%s10184_s0 + $0x7c8] sm:$0xff]   ;;  %vm10559_vm8 = vmmov %vm10557_vm10 }
 0x49d   :  { %2487 = vadd.xlane.f32.xlu2 %v2486_v19  ;;  %2361 = vadd.xlane.f32.xlu1 %v2360_v35  ;;  %v4150_v61 = vsel %vm3401_vm13, %v4149_v2, %v4148_v8  ;;  %v10549_v19 = vld [vmem:[#allocation109_spill] sm:$0xff]  ;;  %v10550_v2 = vld [vmem:[#allocation114_spill] sm:$0xff]  ;;  %v2489_v8 = vsel %vm1039_vm0, %v5729_v48, 0.0 }
 0x49e   :  { %2484 = vadd.xlane.f32.xlu0 %v2483_v38  ;;  %v4152_v37 = vsel %vm3405_vm14, %v4151_v18, %v4150_v61  ;;  %v3662_v35 = vperm.slane %v10549_v19, %v7411_v16  ;;  %4597 = vmatpush.msra.mxu1 %v2723_v10  ;;  %v3664_v43 = vperm.slane %v10550_v2, %v7419_v29  ;;  %v10551_v18 = vld [vmem:[#allocation113_spill] sm:$0xff]  ;;  %v10554_v10 = vld [vmem:[#allocation116_spill] sm:$0xff]  ;;  %v10555_v2 = vld [vmem:[#allocation115_spill] sm:$0xff] }
 0x49f   :  { %v3666_v41 = vperm.slane %v10551_v18, %v7428_v55  ;;  %v3672_v48 = vperm.slane %v10554_v10, %v7475_v14  ;;  %v10562_v10 = vld [vmem:[#allocation123_spill] sm:$0xff] }
 0x4a0   :  { %v2245_v40 = vpop.xlane.xlu2 %2244  ;;  %v2242_v44 = vpop.xlane.xlu1 %2241  ;;  %4598 = vmatpush.msra.mxu1 %v2722_v51  ;;  %v3663_v50 = vsel %vm3357_vm2, %v3662_v35, %v3661_v7  ;;  %v5665_v35 = vunpack.c.h.bf16 %v6010_v13  ;;  %v5760_v7 = vunpack.c.l.bf16 %v9098_v26 }
 0x4a1   :  { %v2239_v54 = vpop.xlane.xlu0 %2238  ;;  %v4156_v23 = vperm.slane %v2245_v40, %v7390_v62  ;;  %v4155_v21 = vperm.slane %v2242_v44, %v7384_v30  ;;  %v3665_v61 = vsel %vm3361_vm3, %v3664_v43, %v3663_v50  ;;  %v5732_v40 = vunpack.c.l.bf16 %v9060_v39 }
 0x4a2   :  { %v4153_v56 = vperm.slane %v2239_v54, %v7587_v22  ;;  %v5664_v44 = vunpack.c.l.bf16 %v6010_v13  ;;  %4599 = vmatpush.msra.mxu1 %v2721_v53  ;;  %v3667_v36 = vsel %vm3365_vm4, %v3666_v41, %v3665_v61  ;;  %v3674_v43 = vperm.slane %v10555_v2, %v7491_v12 }
 0x4a3   :  { %v4157_v54 = vsel %vm3353_vm1, %v4156_v23, %v4155_v21  ;;  %v2492_v58 = vsel %vm1039_vm0, %v5732_v40, 0.0  ;;  %v2751_v23 = vld [vmem:[%s10185_s1 + $0x578] sm:$0xff]  ;;  %v2393_v41 = vsel %vm1039_vm0, %v5665_v35, 0.0  ;;  %v2534_v61 = vsel %vm1039_vm0, %v5760_v7, 0.0  ;;  %v6017_v40 = vld [vmem:[%s10184_s0 + $0x740] sm:$0xff]   ;;  %v2746_v35 = vld [vmem:[%s10185_s1 + $0x550] sm:$0xff] }
 0x4a4   :  { %v4154_v63 = vsel %vm3409_vm15, %v4153_v56, %v4152_v37  ;;  %v10552_v56 = vld [vmem:[#allocation112_spill] sm:$0xff]  ;;  %4600 = vmatpush.msra.mxu1 %v2720_v57  ;;  %v2390_v27 = vsel %vm1039_vm0, %v5664_v44, 0.0  ;;  %4605 = vmatpush.msra.mxu2 %v2751_v23  ;;  %v2750_v57 = vld [vmem:[%s10185_s1 + $0x570] sm:$0xff] }
 0x4a5   :  { %2388 = vadd.xlane.f32.xlu2 %v2387_v47  ;;  %2385 = vadd.xlane.f32.xlu1 %v2384_v28  ;;  %v4381_v0 = vsel %vm4372_vm12, %v4154_v63, %v3658_v15  ;;  %v3668_v47 = vperm.slane %v10552_v56, %v7459_v24  ;;  %v3670_v63 = vperm.slane %v10553_v5, %v7463_v3  ;;  %v2748_v5 = vld [vmem:[%s10185_s1 + $0x560] sm:$0xff]  ;;  %v9166_v7 = vld [vmem:[%s10184_s0 + $0x6f0] sm:$0xff]  }
 0x4a6   :  { %2364 = vadd.xlane.f32.xlu0 %v2363_v60  ;;  %4581 = vmatmul.f32.vlgmr.msra.gmra.mxu0 %v4381_v0 }
 0x4a7   :  { %v3669_v42 = vsel %vm3369_vm5, %v3668_v47, %v3667_v36  ;;  %4606 = vmatpush.msra.mxu2 %v2750_v57  ;;  %v5693_v36 = vunpack.c.h.bf16 %v6017_v40 }
 0x4a8   :  { %v2254_v20 = vpop.xlane.xlu2 %2253  ;;  %v2251_v9 = vpop.xlane.xlu1 %2250 }
 0x4a9   :  { %v2248_v38 = vpop.xlane.xlu0 %2247  ;;  %v4160_v1 = vperm.slane %v2251_v9, %v7419_v29  ;;  %v4162_v0 = vperm.slane %v2254_v20, %v7428_v55  ;;  %v3671_v20 = vsel %vm3373_vm6, %v3670_v63, %v3669_v42  ;;  %v5692_v63 = vunpack.c.l.bf16 %v6017_v40 }
 0x4aa   :  { %v4158_v31 = vperm.slane %v2248_v38, %v7411_v16  ;;  %v5649_v38 = vunpack.c.h.bf16 %v6006_v49  ;;  %v3673_v21 = vsel %vm3377_vm7, %v3672_v48, %v3671_v20  ;;  %v3682_v48 = vperm.slane %v10562_v10, %v7542_v45 }
 0x4ab   :  { %v3675_v44 = vsel %vm10557_vm10, %v3674_v43, %v3673_v21  ;;  %vm10561_vm10 = vcmask 720512  }
 0x4ac   :  { %v4159_v28 = vsel %vm3357_vm2, %v4158_v31, %v4157_v54  ;;  %v2369_v50 = vsel %vm1039_vm0, %v5649_v38, 0.0  ;;  %v2749_v54 = vld [vmem:[%s10185_s1 + $0x568] sm:$0xff]  ;;  %v2432_v38 = vsel %vm1039_vm0, %v5692_v63, 0.0 }
 0x4ad   :  { %2532 = vadd.xlane.f32.xlu2 %v2531_v11  ;;  %2529 = vadd.xlane.f32.xlu1 %v2528_v4  ;;  %v4161_v52 = vsel %vm3361_vm3, %v4160_v1, %v4159_v28  ;;  %v10558_v1 = vld [vmem:[#allocation119_spill] sm:$0xff] }
 0x4ae   :  { %2490 = vadd.xlane.f32.xlu0 %v2489_v8  ;;  %v4163_v19 = vsel %vm3365_vm4, %v4162_v0, %v4161_v52  ;;  %v10556_v8 = vld [vmem:[#allocation120_spill] sm:$0xff]  ;;  %v3678_v6 = vperm.slane %v10558_v1, %v7511_v46  ;;  %4607 = vmatpush.msra.mxu2 %v2749_v54  ;;  %v10560_v52 = vld [vmem:[#allocation118_spill] sm:$0xff] }
 0x4af   :  { %v3676_v53 = vperm.slane %v10556_v8, %v7498_v59  ;;  %v2743_v54 = vld [vmem:[%s10185_s1 + $0x538] sm:$0xff] }
 0x4b0   :  { %v2263_v37 = vpop.xlane.xlu2 %2262  ;;  %v2260_v60 = vpop.xlane.xlu1 %2259  ;;  %4608 = vmatpush.msra.mxu2 %v2748_v5 }
 0x4b1   :  { %v2257_v15 = vpop.xlane.xlu0 %2256  ;;  %v4166_v9 = vperm.slane %v2260_v60, %v7463_v3  ;;  %v4168_v13 = vperm.slane %v2263_v37, %v7475_v14  ;;  %v3677_v28 = vsel %vm3385_vm9, %v3676_v53, %v3675_v44  ;;  %v5733_v60 = vunpack.c.h.bf16 %v9060_v39 }
 0x4b2   :  { %v4164_v32 = vperm.slane %v2257_v15, %v7459_v24  ;;  %v3679_v39 = vsel %vm10561_vm10, %v3678_v6, %v3677_v28  ;;  %v10568_v6 = vld [vmem:[#allocation126_spill] sm:$0xff] }
 0x4b4   :  { %v4165_v51 = vsel %vm3369_vm5, %v4164_v32, %v4163_v19  ;;  %v3680_v32 = vperm.slane %v10560_v52, %v7533_v17  ;;  %v2435_v19 = vsel %vm1039_vm0, %v5693_v36, 0.0  ;;  %v2742_v36 = vld [vmem:[%s10185_s1 + $0x530] sm:$0xff]  ;;  %v6018_v52 = vld [vmem:[%s10184_s0 + $0x748] sm:$0xff]  }
 0x4b5   :  { %2493 = vadd.xlane.f32.xlu2 %v2492_v58  ;;  %2391 = vadd.xlane.f32.xlu1 %v2390_v27  ;;  %v4167_v49 = vsel %vm3373_vm6, %v4166_v9, %v4165_v51  ;;  %v2747_v27 = vld [vmem:[%s10185_s1 + $0x558] sm:$0xff]  ;;  %v2495_v9 = vsel %vm1039_vm0, %v5733_v60, 0.0  ;;  %v9161_v51 = vld [vmem:[%s10184_s0 + $0x710] sm:$0xff]  }
 0x4b6   :  { %2367 = vadd.xlane.f32.xlu0 %v2366_v34  ;;  %v4169_v47 = vsel %vm3377_vm7, %v4168_v13, %v4167_v49  ;;  %4609 = vmatpush.msra.mxu2 %v2747_v27  ;;  %v3681_v21 = vsel %vm3393_vm11, %v3680_v32, %v3679_v39  ;;  %v5668_v13 = vunpack.c.l.bf16 %v9161_v51  ;;  %v2744_v49 = vld [vmem:[%s10185_s1 + $0x540] sm:$0xff]  ;;  %v2741_v32 = vld [vmem:[%s10185_s1 + $0x528] sm:$0xff] }
 0x4b7   :  { %v10569_v39 = vld [vmem:[#allocation124_spill] sm:$0xff] }
 0x4b8   :  { %v2272_v11 = vpop.xlane.xlu2 %2271  ;;  %v2269_v4 = vpop.xlane.xlu1 %2268  ;;  %4610 = vmatpush.msra.mxu2 %v2746_v35 }
 0x4b9   :  { %v2266_v31 = vpop.xlane.xlu0 %2265  ;;  %v4172_v56 = vperm.slane %v2269_v4, %v7498_v59  ;;  %v4174_v15 = vperm.slane %v2272_v11, %v7511_v46  ;;  %v2745_v11 = vld [vmem:[%s10185_s1 + $0x548] sm:$0xff] }
 0x4ba   :  { %v4170_v18 = vperm.slane %v2266_v31, %v7491_v12  ;;  %v10564_v4 = vld [vmem:[#allocation122_spill] sm:$0xff]  ;;  %v5652_v31 = vunpack.c.l.bf16 %v9166_v7  ;;  %4611 = vmatpush.msra.mxu2 %v2745_v11  ;;  %v5696_v11 = vunpack.c.l.bf16 %v6018_v52 }
 0x4bb   :  { %v3684_v23 = vperm.slane %v10564_v4, %v7560_v25 }
 0x4bc   :  { %v4171_v37 = vsel %vm10559_vm8, %v4170_v18, %v4169_v47  ;;  %vm10563_vm8 = vmmov %vm10561_vm10  ;;  %vm10565_vm10 = vcmask 851712   ;;  %4612 = vmatpush.msra.mxu2 %v2744_v49  ;;  %v2372_v60 = vsel %vm1039_vm0, %v5652_v31, 0.0 }
 0x4bd   :  { %2394 = vadd.xlane.f32.xlu2 %v2393_v41  ;;  %2370 = vadd.xlane.f32.xlu1 %v2369_v50  ;;  %v4173_v34 = vsel %vm3385_vm9, %v4172_v56, %v4171_v37  ;;  %v3683_v53 = vsel %vm10565_vm10, %v3682_v48, %v3681_v21  ;;  %v5761_v41 = vunpack.c.h.bf16 %v9098_v26  ;;  %v10566_v50 = vld [vmem:[#allocation121_spill] sm:$0xff]  ;;  %v3688_v56 = vperm.slane %v10568_v6, %v7587_v22  ;;  %v2739_v21 = vld [vmem:[%s10185_s1 + $0x518] sm:$0xff] }
 0x4be   :  { %2535 = vadd.xlane.f32.xlu0 %v2534_v61  ;;  %v4175_v43 = vsel %vm10563_vm8, %v4174_v15, %v4173_v34  ;;  %v3686_v57 = vperm.slane %v10566_v50, %v7576_v33  ;;  %vm10567_vm8 = vmmov %vm10565_vm10  ;;  %v3685_v1 = vsel %vm3401_vm13, %v3684_v23, %v3683_v53  ;;  %v2396_v37 = vsel %vm1039_vm0, %v5668_v13, 0.0  ;;  %4613 = vmatpush.msra.mxu2 %v2743_v54  ;;  %v9208_v15 = vld [vmem:[%s10184_s0 + $0x7d0] sm:$0xff]   ;;  %v10570_v48 = vld [vmem:[#allocation125_spill] sm:$0xff] }
 0x4bf   :  { %v2537_v63 = vsel %vm1039_vm0, %v5761_v41, 0.0  ;;  %v3691_v34 = vperm.slane %v10569_v39, %v7390_v62  ;;  %v10572_v13 = vld [vmem:[#allocation128_spill] sm:$0xff]  ;;  %v2738_v41 = vld [vmem:[%s10185_s1 + $0x510] sm:$0xff]  ;;  %v2737_v54 = vld [vmem:[%s10185_s1 + $0x508] sm:$0xff]  ;;  %vm10579_vm10 = vcmask 589312  }
 0x4c0   :  { %v2281_v0 = vpop.xlane.xlu2 %2280  ;;  %v2278_v58 = vpop.xlane.xlu1 %2277  ;;  %v3687_v27 = vsel %vm3405_vm14, %v3686_v57, %v3685_v1  ;;  %4614 = vmatpush.msra.mxu2 %v2742_v36  ;;  %v3695_v31 = vperm.slane %v10572_v13, %v7419_v29  ;;  %v2438_v57 = vsel %vm1039_vm0, %v5696_v11, 0.0  ;;  %v10573_v1 = vld [vmem:[#allocation127_spill] sm:$0xff]  ;;  %v5653_v36 = vunpack.c.h.bf16 %v9166_v7 }
 0x4c1   :  { %v2275_v42 = vpop.xlane.xlu0 %2274  ;;  %v4178_v2 = vperm.slane %v2278_v58, %v7542_v45  ;;  %v4180_v18 = vperm.slane %v2281_v0, %v7560_v25  ;;  %v9213_v0 = vld [vmem:[%s10184_s0 + $0x798] sm:$0xff]   ;;  %v3697_v6 = vperm.slane %v10573_v1, %v7428_v55 }
 0x4c2   :  { %v4176_v20 = vperm.slane %v2275_v42, %v7533_v17  ;;  %v3689_v42 = vsel %vm3409_vm15, %v3688_v56, %v3687_v27  ;;  %v5736_v35 = vunpack.c.l.bf16 %v9213_v0  ;;  %4615 = vmatpush.msra.mxu2 %v2741_v32  ;;  %v10575_v27 = vld [vmem:[#allocation131_spill] sm:$0xff] }
 0x4c3   :  { %v3701_v32 = vperm.slane %v10575_v27, %v7463_v3 }
 0x4c4   :  { %v4177_v8 = vsel %vm3393_vm11, %v4176_v20, %v4175_v43  ;;  %v3690_v20 = vperm.slane %v10570_v48, %v7384_v30 }
 0x4c5   :  { %2496 = vadd.xlane.f32.xlu2 %v2495_v9  ;;  %2436 = vadd.xlane.f32.xlu1 %v2435_v19  ;;  %v4179_v61 = vsel %vm10567_vm8, %v4178_v2, %v4177_v8  ;;  %v5764_v19 = vunpack.c.l.bf16 %v9208_v15  ;;  %v10571_v2 = vld [vmem:[#allocation129_spill] sm:$0xff]  ;;  %vm10582_vm8 = vcmask 720512  }
 0x4c6   :  { %2433 = vadd.xlane.f32.xlu0 %v2432_v38  ;;  %v4181_v5 = vsel %vm3401_vm13, %v4180_v18, %v4179_v61  ;;  %v2740_v38 = vld [vmem:[%s10185_s1 + $0x520] sm:$0xff]  ;;  %v3693_v43 = vperm.slane %v10571_v2, %v7411_v16  ;;  %v3692_v53 = vsel %vm3353_vm1, %v3691_v34, %v3690_v20  ;;  %v2498_v18 = vsel %vm1039_vm0, %v5736_v35, 0.0 }
 0x4c7   :  { %4616 = vmatpush.msra.mxu2 %v2740_v38  ;;  %v2540_v49 = vsel %vm1039_vm0, %v5764_v19, 0.0  ;;  %v2375_v20 = vsel %vm1039_vm0, %v5653_v36, 0.0  ;;  %v10576_v19 = vld [vmem:[#allocation130_spill] sm:$0xff] }
 0x4c8   :  { %v9188_v40 = vpop.xlane.xlu2 %2289  ;;  %v2287_v44 = vpop.xlane.xlu1 %2286  ;;  %v3694_v50 = vsel %vm3357_vm2, %v3693_v43, %v3692_v53  ;;  %v3703_v35 = vperm.slane %v10576_v19, %v7475_v14  ;;  %v5737_v53 = vunpack.c.h.bf16 %v9213_v0 }
 0x4c9   :  { %v4184_v26 = vperm.slane %v2287_v44, %v7587_v22  ;;  %v2284_v47 = vpop.xlane.xlu0 %2283  ;;  %4617 = vmatpush.msra.mxu2 %v2739_v21  ;;  %v4186_v61 = vperm.slane %v9188_v40, %v7384_v30  ;;  %v3696_v56 = vsel %vm3361_vm3, %v3695_v31, %v3694_v50  ;;  %v5669_v40 = vunpack.c.h.bf16 %v9161_v51 }
 0x4ca   :  { %v4182_v28 = vperm.slane %v2284_v47, %v7576_v33  ;;  %v2501_v1 = vsel %vm1039_vm0, %v5737_v53, 0.0 }
 0x4cb   :  { %4618 = vmatpush.msra.mxu2 %v2738_v41 }
 0x4cc   :  { %v4183_v58 = vsel %vm3405_vm14, %v4182_v28, %v4181_v5  ;;  %v5697_v28 = vunpack.c.h.bf16 %v6018_v52  ;;  %v3698_v52 = vsel %vm3365_vm4, %v3697_v6, %v3696_v56  ;;  %v9307_v6 = vld [vmem:[%s10184_s0 + $0x7a0] sm:$0xff]   ;;  %v9312_v56 = vld [vmem:[%s10184_s0 + $0x750] sm:$0xff]  }
 0x4cd   :  { %2397 = vadd.xlane.f32.xlu2 %v2396_v37  ;;  %2373 = vadd.xlane.f32.xlu1 %v2372_v60  ;;  %v4185_v10 = vsel %vm3409_vm15, %v4184_v26, %v4183_v58  ;;  %v10574_v26 = vld [vmem:[#allocation132_spill] sm:$0xff] }
 0x4ce   :  { %2538 = vadd.xlane.f32.xlu0 %v2537_v63  ;;  %v4382_v9 = vsel %vm4372_vm12, %v4185_v10, %v3689_v42  ;;  %v3699_v47 = vperm.slane %v10574_v26, %v7459_v24  ;;  %4619 = vmatpush.msra.mxu2 %v2737_v54  ;;  %v2736_v37 = vld [vmem:[%s10185_s1 + $0x500] sm:$0xff]  ;;  %v2441_v42 = vsel %vm1039_vm0, %v5697_v28, 0.0  ;;  %v2399_v10 = vsel %vm1039_vm0, %v5669_v40, 0.0  ;;  %v6012_v26 = vld [vmem:[%s10184_s0 + $0x718] sm:$0xff]  }
 0x4cf   :  { %4601 = vmatmul.f32.vlgmr.msra.gmra.mxu1 %v4382_v9  ;;  %v9281_v9 = vld [vmem:[%s10184_s0 + $0x6f8] sm:$0xff]  }
 0x4d0   :  { %v2299_v4 = vpop.xlane.xlu2 %2298  ;;  %v2296_v23 = vpop.xlane.xlu1 %2295  ;;  %4620 = vmatpush.msra.mxu2 %v2736_v37  ;;  %v3700_v39 = vsel %vm3369_vm5, %v3699_v47, %v3698_v52  ;;  %v5656_v11 = vunpack.c.l.bf16 %v9281_v9  ;;  %v10580_v47 = vld [vmem:[#allocation133_spill] sm:$0xff] }
 0x4d1   :  { %v2293_v8 = vpop.xlane.xlu0 %2292  ;;  %v4189_v60 = vperm.slane %v2296_v23, %v7411_v16  ;;  %v4191_v34 = vperm.slane %v2299_v4, %v7419_v29  ;;  %v3702_v38 = vsel %vm3373_vm6, %v3701_v32, %v3700_v39  ;;  %v5765_v4 = vunpack.c.h.bf16 %v9208_v15  ;;  %v10577_v23 = vld [vmem:[#allocation135_spill] sm:$0xff] }
 0x4d2   :  { %v4187_v44 = vperm.slane %v2293_v8, %v7390_v62  ;;  %v3705_v21 = vperm.slane %v10577_v23, %v7491_v12  ;;  %v3704_v41 = vsel %vm3377_vm7, %v3703_v35, %v3702_v38  ;;  %v3709_v28 = vperm.slane %v10580_v47, %v7511_v46  ;;  %v10584_v23 = vld [vmem:[#allocation136_spill] sm:$0xff] }
 0x4d3   :  { %v2543_v54 = vsel %vm1039_vm0, %v5765_v4, 0.0  ;;  %v5672_v32 = vunpack.c.l.bf16 %v6012_v26  ;;  %v6036_v4 = vld [vmem:[%s10184_s0 + $0x7d8] sm:$0xff]  }
 0x4d4   :  { %v4188_v5 = vsel %vm3353_vm1, %v4187_v44, %v4186_v61  ;;  %v2378_v44 = vsel %vm1039_vm0, %v5656_v11, 0.0  ;;  %v3706_v0 = vsel %vm10579_vm10, %v3705_v21, %v3704_v41  ;;  %v3715_v21 = vperm.slane %v10584_v23, %v7560_v25 }
 0x4d5   :  { %2541 = vadd.xlane.f32.xlu2 %v2540_v49  ;;  %2499 = vadd.xlane.f32.xlu1 %v2498_v18  ;;  %v4190_v7 = vsel %vm3357_vm2, %v4189_v60, %v4188_v5  ;;  %v10578_v49 = vld [vmem:[#allocation134_spill] sm:$0xff]  ;;  %v5740_v5 = vunpack.c.l.bf16 %v9307_v6 }
 0x4d6   :  { %2439 = vadd.xlane.f32.xlu0 %v2438_v57  ;;  %v4192_v43 = vsel %vm3361_vm3, %v4191_v34, %v4190_v7  ;;  %v3707_v18 = vperm.slane %v10578_v49, %v7498_v59  ;;  %v10583_v7 = vld [vmem:[#allocation137_spill] sm:$0xff] }
 0x4d7   :  { %v2504_v19 = vsel %vm1039_vm0, %v5740_v5, 0.0  ;;  %v10586_v49 = vld [vmem:[#allocation141_spill] sm:$0xff] }
 0x4d8   :  { %v2308_v63 = vpop.xlane.xlu2 %2307  ;;  %v2305_v58 = vpop.xlane.xlu1 %2304  ;;  %v3708_v60 = vsel %vm3385_vm9, %v3707_v18, %v3706_v0  ;;  %v3717_v18 = vperm.slane %v10586_v49, %v7576_v33 }
 0x4d9   :  { %v2302_v51 = vpop.xlane.xlu0 %2301  ;;  %v4195_v2 = vperm.slane %v2305_v58, %v7459_v24  ;;  %v4197_v50 = vperm.slane %v2308_v63, %v7463_v3  ;;  %v5700_v63 = vunpack.c.l.bf16 %v9312_v56  ;;  %v10581_v58 = vld [vmem:[#allocation138_spill] sm:$0xff]  ;;  %v3710_v34 = vsel %vm10582_vm8, %v3709_v28, %v3708_v60 }
 0x4da   :  { %v4193_v48 = vperm.slane %v2302_v51, %v7428_v55  ;;  %v3711_v27 = vperm.slane %v10581_v58, %v7533_v17 }
 0x4db   :  { %v2444_v35 = vsel %vm1039_vm0, %v5700_v63, 0.0 }
 0x4dc   :  { %v4194_v8 = vsel %vm3365_vm4, %v4193_v48, %v4192_v43  ;;  %v3713_v48 = vperm.slane %v10583_v7, %v7542_v45  ;;  %v3712_v38 = vsel %vm3393_vm11, %v3711_v27, %v3710_v34 }
 0x4dd   :  { %2442 = vadd.xlane.f32.xlu2 %v2441_v42  ;;  %2400 = vadd.xlane.f32.xlu1 %v2399_v10  ;;  %v4196_v61 = vsel %vm3369_vm5, %v4195_v2, %v4194_v8  ;;  %v2402_v2 = vsel %vm1039_vm0, %v5672_v32, 0.0  ;;  %v5769_v32 = vunpack.c.h.bf16 %v6036_v4 }
 0x4de   :  { %2376 = vadd.xlane.f32.xlu0 %v2375_v20  ;;  %v4198_v37 = vsel %vm3373_vm6, %v4197_v50, %v4196_v61  ;;  %v5768_v50 = vunpack.c.l.bf16 %v6036_v4 }
 0x4e0   :  { %v2317_v13 = vpop.xlane.xlu2 %2316  ;;  %v2314_v31 = vpop.xlane.xlu1 %2313 }
 0x4e1   :  { %v2311_v57 = vpop.xlane.xlu0 %2310  ;;  %v4201_v40 = vperm.slane %v2314_v31, %v7491_v12  ;;  %v4203_v52 = vperm.slane %v2317_v13, %v7498_v59  ;;  %v5673_v13 = vunpack.c.h.bf16 %v6012_v26  ;;  %v5657_v31 = vunpack.c.h.bf16 %v9281_v9 }
 0x4e2   :  { %v4199_v15 = vperm.slane %v2311_v57, %v7475_v14 }
 0x4e3   :  { %v2405_v28 = vsel %vm1039_vm0, %v5673_v13, 0.0 }
 0x4e4   :  { %v4200_v36 = vsel %vm3377_vm7, %v4199_v15, %v4198_v37 }
 0x4e5   :  { %2379 = vadd.xlane.f32.xlu2 %v2378_v44  ;;  %2544 = vadd.xlane.f32.xlu1 %v2543_v54  ;;  %v4202_v42 = vsel %vm10579_vm10, %v4201_v40, %v4200_v36  ;;  %vm10585_vm10 = vcmask 851712   ;;  %v10587_v44 = vld [vmem:[#allocation140_spill] sm:$0xff]  ;;  %v2381_v40 = vsel %vm1039_vm0, %v5657_v31, 0.0  ;;  %v2546_v36 = vsel %vm1039_vm0, %v5768_v50, 0.0 }
 0x4e6   :  { %2502 = vadd.xlane.f32.xlu0 %v2501_v1  ;;  %v4204_v11 = vsel %vm3385_vm9, %v4203_v52, %v4202_v42  ;;  %v3714_v53 = vsel %vm10585_vm10, %v3713_v48, %v3712_v38  ;;  %v3719_v54 = vperm.slane %v10587_v44, %v7587_v22  ;;  %v5741_v52 = vunpack.c.h.bf16 %v9307_v6  ;;  %v6020_v38 = vld [vmem:[%s10184_s0 + $0x758] sm:$0xff]  }
 0x4e7   :  { %v3716_v0 = vsel %vm3401_vm13, %v3715_v21, %v3714_v53  ;;  %v5704_v23 = vunpack.c.l.bf16 %v6020_v38 }
 0x4e8   :  { %v2326_v51 = vpop.xlane.xlu2 %2325  ;;  %v2323_v39 = vpop.xlane.xlu1 %2322  ;;  %v3718_v37 = vsel %vm3405_vm14, %v3717_v18, %v3716_v0  ;;  %v5705_v0 = vunpack.c.h.bf16 %v6020_v38 }
 0x4e9   :  { %v2320_v10 = vpop.xlane.xlu0 %2319  ;;  %v4207_v43 = vperm.slane %v2323_v39, %v7533_v17  ;;  %v4209_v41 = vperm.slane %v2326_v51, %v7542_v45  ;;  %v3720_v58 = vsel %vm3409_vm15, %v3719_v54, %v3718_v37  ;;  %v5701_v39 = vunpack.c.h.bf16 %v9312_v56  ;;  %v6030_v56 = vld [vmem:[%s10184_s0 + $0x7a8] sm:$0xff]  }
 0x4ea   :  { %v4205_v20 = vperm.slane %v2320_v10, %v7511_v46  ;;  %v5744_v4 = vunpack.c.l.bf16 %v6030_v56  ;;  %v2450_v50 = vsel %vm1039_vm0, %v5704_v23, 0.0 }
 0x4eb   :  { %v2447_v6 = vsel %vm1039_vm0, %v5701_v39, 0.0 }
 0x4ec   :  { %v4206_v8 = vsel %vm10582_vm8, %v4205_v20, %v4204_v11  ;;  %vm10588_vm8 = vmmov %vm10585_vm10  ;;  %vm10589_vm10 = vcmask 589312  }
 0x4ed   :  { %2505 = vadd.xlane.f32.xlu2 %v2504_v19  ;;  %2445 = vadd.xlane.f32.xlu1 %v2444_v35  ;;  %v4208_v57 = vsel %vm3393_vm11, %v4207_v43, %v4206_v8  ;;  %v2549_v19 = vsel %vm1039_vm0, %v5769_v32, 0.0  ;;  %v2507_v35 = vsel %vm1039_vm0, %v5741_v52, 0.0  ;;  %v6013_v43 = vld [vmem:[%s10184_s0 + $0x720] sm:$0xff]  }
 0x4ee   :  { %2403 = vadd.xlane.f32.xlu0 %v2402_v2  ;;  %v4210_v60 = vsel %vm10588_vm8, %v4209_v41, %v4208_v57  ;;  %v5676_v21 = vunpack.c.l.bf16 %v6013_v43  ;;  %v2510_v41 = vsel %vm1039_vm0, %v5744_v4, 0.0  ;;  %vm10600_vm8 = vmmov %vm10589_vm10 }
 0x4f0   :  { %v2335_v61 = vpop.xlane.xlu2 %2334  ;;  %v2332_v15 = vpop.xlane.xlu1 %2331  ;;  %v2408_v57 = vsel %vm1039_vm0, %v5676_v21, 0.0 }
 0x4f1   :  { %v4213_v1 = vperm.slane %v2332_v15, %v7576_v33  ;;  %v2329_v26 = vpop.xlane.xlu0 %2328  ;;  %v4215_v9 = vperm.slane %v2335_v61, %v7587_v22  ;;  %v6037_v15 = vld [vmem:[%s10184_s0 + $0x7e0] sm:$0xff]  }
 0x4f2   :  { %v4211_v47 = vperm.slane %v2329_v26, %v7560_v25  ;;  %v5772_v26 = vunpack.c.l.bf16 %v6037_v15  ;;  %v5773_v52 = vunpack.c.h.bf16 %v6037_v15 }
 0x4f4   :  { %v4212_v5 = vsel %vm3401_vm13, %v4211_v47, %v4210_v60  ;;  %v2453_v60 = vsel %vm1039_vm0, %v5705_v0, 0.0 }
 0x4f5   :  { %v4214_v63 = vsel %vm3405_vm14, %v4213_v1, %v4212_v5  ;;  %2406 = vadd.xlane.f32.xlu2 %v2405_v28  ;;  %2382 = vadd.xlane.f32.xlu1 %v2381_v40  ;;  %v5677_v1 = vunpack.c.h.bf16 %v6013_v43  ;;  %v2552_v5 = vsel %vm1039_vm0, %v5772_v26, 0.0 }
 0x4f6   :  { %2547 = vadd.xlane.f32.xlu0 %v2546_v36  ;;  %v4216_v27 = vsel %vm3409_vm15, %v4215_v9, %v4214_v63  ;;  %v6014_v63 = vld [vmem:[%s10184_s0 + $0x728] sm:$0xff]  }
 0x4f7   :  { %v4383_v51 = vsel %vm4372_vm12, %v4216_v27, %v3720_v58  ;;  %v2411_v36 = vsel %vm1039_vm0, %v5677_v1, 0.0  ;;  %v5680_v32 = vunpack.c.l.bf16 %v6014_v63  ;;  %v5681_v1 = vunpack.c.h.bf16 %v6014_v63  ;;  %v9447_v63 = vld [vmem:[%s10184_s0 + $0x768] sm:$0xff]  }
 0x4f8   :  { %4621 = vmatmul.f32.vlgmr.msra.gmra.mxu2 %v4383_v51  ;;  %v2344_v34 = vpop.xlane.xlu2 %2343  ;;  %v2341_v42 = vpop.xlane.xlu1 %2340  ;;  %v5745_v51 = vunpack.c.h.bf16 %v6030_v56  ;;  %v6038_v56 = vld [vmem:[%s10184_s0 + $0x7e8] sm:$0xff]  }
 0x4f9   :  { %v4220_v10 = vperm.slane %v2344_v34, %v7411_v16  ;;  %v4218_v7 = vperm.slane %v2341_v42, %v7390_v62  ;;  %v2338_v48 = vpop.xlane.xlu0 %2337  ;;  %v5776_v23 = vunpack.c.l.bf16 %v6038_v56 }
 0x4fa   :  { %v4217_v20 = vperm.slane %v2338_v48, %v7384_v30  ;;  %v2513_v38 = vsel %vm1039_vm0, %v5745_v51, 0.0 }
 0x4fc   :  { %v4219_v2 = vsel %vm3353_vm1, %v4218_v7, %v4217_v20 }
 0x4fd   :  { %2550 = vadd.xlane.f32.xlu2 %v2549_v19  ;;  %2508 = vadd.xlane.f32.xlu1 %v2507_v35  ;;  %v4221_v11 = vsel %vm3357_vm2, %v4220_v10, %v4219_v2  ;;  %v2414_v19 = vsel %vm1039_vm0, %v5680_v32, 0.0  ;;  %v2555_v35 = vsel %vm1039_vm0, %v5773_v52, 0.0  ;;  %v6031_v2 = vld [vmem:[%s10184_s0 + $0x7b0] sm:$0xff]   ;;  %v5712_v52 = vunpack.c.l.bf16 %v9447_v63 }
 0x4fe   :  { %2448 = vadd.xlane.f32.xlu0 %v2447_v6  ;;  %v5748_v21 = vunpack.c.l.bf16 %v6031_v2 }
 0x500   :  { %v2353_v8 = vpop.xlane.xlu2 %2352  ;;  %v2350_v53 = vpop.xlane.xlu1 %2349 }
 0x501   :  { %v4224_v13 = vperm.slane %v2350_v53, %v7428_v55  ;;  %v2347_v31 = vpop.xlane.xlu0 %2346  ;;  %v4226_v49 = vperm.slane %v2353_v8, %v7459_v24 }
 0x502   :  { %v4222_v18 = vperm.slane %v2347_v31, %v7419_v29 }
 0x504   :  { %v4223_v61 = vsel %vm3361_vm3, %v4222_v18, %v4221_v11  ;;  %v6021_v11 = vld [vmem:[%s10184_s0 + $0x760] sm:$0xff]  }
 0x505   :  { %v4225_v44 = vsel %vm3365_vm4, %v4224_v13, %v4223_v61  ;;  %2511 = vadd.xlane.f32.xlu2 %v2510_v41  ;;  %2451 = vadd.xlane.f32.xlu1 %v2450_v50  ;;  %v5708_v8 = vunpack.c.l.bf16 %v6021_v11  ;;  %v2558_v50 = vsel %vm1039_vm0, %v5776_v23, 0.0  ;;  %v5709_v0 = vunpack.c.h.bf16 %v6021_v11 }
 0x506   :  { %2409 = vadd.xlane.f32.xlu0 %v2408_v57  ;;  %v4227_v54 = vsel %vm3369_vm5, %v4226_v49, %v4225_v44  ;;  %v2516_v57 = vsel %vm1039_vm0, %v5748_v21, 0.0 }
 0x507   :  { %v2456_v15 = vsel %vm1039_vm0, %v5708_v8, 0.0 }
 0x508   :  { %v2482_v9 = vpop.xlane.xlu2 %2481  ;;  %v2359_v47 = vpop.xlane.xlu1 %2358 }
 0x509   :  { %v4230_v28 = vperm.slane %v2359_v47, %v7475_v14  ;;  %v2356_v40 = vpop.xlane.xlu0 %2355  ;;  %v4310_v39 = vperm.slane %v2482_v9, %v7384_v30 }
 0x50a   :  { %v4228_v37 = vperm.slane %v2356_v40, %v7463_v3 }
 0x50c   :  { %v4229_v58 = vsel %vm3373_vm6, %v4228_v37, %v4227_v54  ;;  %v5749_v54 = vunpack.c.h.bf16 %v6031_v2  ;;  %v6032_v2 = vld [vmem:[%s10184_s0 + $0x7b8] sm:$0xff]  }
 0x50d   :  { %2454 = vadd.xlane.f32.xlu2 %v2453_v60  ;;  %2412 = vadd.xlane.f32.xlu1 %v2411_v36  ;;  %v4231_v27 = vsel %vm3377_vm7, %v4230_v28, %v4229_v58  ;;  %v2459_v36 = vsel %vm1039_vm0, %v5709_v0, 0.0  ;;  %v2417_v58 = vsel %vm1039_vm0, %v5681_v1, 0.0  ;;  %v5752_v23 = vunpack.c.l.bf16 %v6032_v2 }
 0x50e   :  { %2553 = vadd.xlane.f32.xlu0 %v2552_v5  ;;  %v2519_v60 = vsel %vm1039_vm0, %v5749_v54, 0.0  ;;  %v2764_v54 = vld [vmem:[%s10185_s1 + $0x5e0] sm:$0xff]  ;;  %v5753_v1 = vunpack.c.h.bf16 %v6032_v2 }
 0x510   :  { %v2488_v34 = vpop.xlane.xlu2 %2487  ;;  %v2362_v42 = vpop.xlane.xlu1 %2361 }
 0x511   :  { %v4313_v10 = vperm.slane %v2488_v34, %v7411_v16  ;;  %v4232_v7 = vperm.slane %v2362_v42, %v7491_v12  ;;  %v2485_v48 = vpop.xlane.xlu0 %2484 }
 0x512   :  { %v4311_v20 = vperm.slane %v2485_v48, %v7390_v62 }
 0x513   :  { %v4233_v6 = vsel %vm10589_vm10, %v4232_v7, %v4231_v27  ;;  %v6015_v27 = vld [vmem:[%s10184_s0 + $0x730] sm:$0xff]   ;;  %vm10606_vm10 = vmmov %vm10600_vm8 }
 0x514   :  { %v4312_v43 = vsel %vm3353_vm1, %v4311_v20, %v4310_v39  ;;  %v5684_v51 = vunpack.c.l.bf16 %v6015_v27  ;;  %v5777_v39 = vunpack.c.h.bf16 %v6038_v56  ;;  %v2462_v20 = vsel %vm1039_vm0, %v5712_v52, 0.0  ;;  %v6039_v56 = vld [vmem:[%s10184_s0 + $0x7f0] sm:$0xff]  }
 0x515   :  { %2415 = vadd.xlane.f32.xlu2 %v2414_v19  ;;  %2556 = vadd.xlane.f32.xlu1 %v2555_v35  ;;  %v4314_v4 = vsel %vm3357_vm2, %v4313_v10, %v4312_v43  ;;  %v5685_v43 = vunpack.c.h.bf16 %v6015_v27  ;;  %v5780_v11 = vunpack.c.l.bf16 %v6039_v56  ;;  %v5781_v0 = vunpack.c.h.bf16 %v6039_v56  ;;  %v2758_v56 = vld [vmem:[%s10185_s1 + $0x5b0] sm:$0xff] }
 0x516   :  { %2514 = vadd.xlane.f32.xlu0 %v2513_v38  ;;  %v2420_v19 = vsel %vm1039_vm0, %v5684_v51, 0.0  ;;  %v2561_v38 = vsel %vm1039_vm0, %v5777_v39, 0.0  ;;  %v2525_v27 = vsel %vm1039_vm0, %v5753_v1, 0.0  ;;  %v6040_v51 = vld [vmem:[%s10184_s0 + $0x7f8] sm:$0xff]   ;;  %v6023_v39 = vld [vmem:[%s10184_s0 + $0x770] sm:$0xff]  }
 0x518   :  { %v2389_v53 = vpop.xlane.xlu2 %2388  ;;  %v2386_v13 = vpop.xlane.xlu1 %2385 }
 0x519   :  { %v4249_v31 = vperm.slane %v2389_v53, %v7390_v62  ;;  %v4248_v49 = vperm.slane %v2386_v13, %v7384_v30  ;;  %v2365_v18 = vpop.xlane.xlu0 %2364  ;;  %v2766_v53 = vld [vmem:[%s10185_s1 + $0x5f0] sm:$0xff] }
 0x51a   :  { %v4234_v41 = vperm.slane %v2365_v18, %v7498_v59  ;;  %v2423_v18 = vsel %vm1039_vm0, %v5685_v43, 0.0 }
 0x51b   :  { %v4250_v61 = vsel %vm3353_vm1, %v4249_v31, %v4248_v49 }
 0x51c   :  { %v9435_v44 = vsel %vm3385_vm9, %v4234_v41, %v4233_v6  ;;  %v2564_v41 = vsel %vm1039_vm0, %v5780_v11, 0.0 }
 0x51d   :  { %2559 = vadd.xlane.f32.xlu2 %v2558_v50  ;;  %2517 = vadd.xlane.f32.xlu1 %v2516_v57  ;;  %v2765_v50 = vld [vmem:[%s10185_s1 + $0x5e8] sm:$0xff] }
 0x51e   :  { %2457 = vadd.xlane.f32.xlu0 %v2456_v15 }
 0x520   :  { %v2533_v26 = vpop.xlane.xlu2 %2532  ;;  %v2530_v9 = vpop.xlane.xlu1 %2529 }
 0x521   :  { %v4342_v47 = vperm.slane %v2533_v26, %v7390_v62  ;;  %v4341_v28 = vperm.slane %v2530_v9, %v7384_v30  ;;  %v2491_v40 = vpop.xlane.xlu0 %2490  ;;  %v2763_v26 = vld [vmem:[%s10185_s1 + $0x5d8] sm:$0xff]  ;;  %v5713_v9 = vunpack.c.h.bf16 %v9447_v63  ;;  %v2761_v63 = vld [vmem:[%s10185_s1 + $0x5c8] sm:$0xff] }
 0x522   :  { %v4315_v37 = vperm.slane %v2491_v40, %v7419_v29  ;;  %v2762_v40 = vld [vmem:[%s10185_s1 + $0x5d0] sm:$0xff] }
 0x523   :  { %v4343_v5 = vsel %vm3353_vm1, %v4342_v47, %v4341_v28  ;;  %v2465_v52 = vsel %vm1039_vm0, %v5713_v9, 0.0 }
 0x524   :  { %v4316_v32 = vsel %vm3361_vm3, %v4315_v37, %v4314_v4  ;;  %v2767_v4 = vld [vmem:[%s10185_s1 + $0x5f8] sm:$0xff] }
 0x525   :  { %2520 = vadd.xlane.f32.xlu2 %v2519_v60  ;;  %2460 = vadd.xlane.f32.xlu1 %v2459_v36 }
 0x526   :  { %2418 = vadd.xlane.f32.xlu0 %v2417_v58  ;;  %4625 = vmatpush.msra.mxu3 %v2767_v4  ;;  %v2567_v58 = vsel %vm1039_vm0, %v5781_v0, 0.0  ;;  %v10592_v0 = vld [vmem:[#allocation143_spill] sm:$0xff] }
 0x527   :  { %v3724_v1 = vperm.slane %v10592_v0, %v7411_v16 }
 0x528   :  { %v2494_v34 = vpop.xlane.xlu2 %2493  ;;  %v2392_v42 = vpop.xlane.xlu1 %2391  ;;  %4626 = vmatpush.msra.mxu3 %v2766_v53  ;;  %v10590_v53 = vld [vmem:[#allocation139_spill] sm:$0xff] }
 0x529   :  { %v4317_v10 = vperm.slane %v2494_v34, %v7428_v55  ;;  %v4251_v7 = vperm.slane %v2392_v42, %v7411_v16  ;;  %v9456_v48 = vpop.xlane.xlu0 %2367  ;;  %v6016_v42 = vld [vmem:[%s10184_s0 + $0x738] sm:$0xff]  }
 0x52a   :  { %4627 = vmatpush.msra.mxu3 %v2765_v50  ;;  %v5689_v9 = vunpack.c.h.bf16 %v6016_v42 }
 0x52b   :  { %v4318_v35 = vsel %vm3365_vm4, %v4317_v10, %v4316_v32  ;;  %v4252_v6 = vsel %vm3357_vm2, %v4251_v7, %v4250_v61  ;;  %v2522_v61 = vsel %vm1039_vm0, %v5752_v23, 0.0  ;;  %v2760_v10 = vld [vmem:[%s10185_s1 + $0x5c0] sm:$0xff]  ;;  %v2759_v7 = vld [vmem:[%s10185_s1 + $0x5b8] sm:$0xff] }
 0x52c   :  { %4628 = vmatpush.msra.mxu3 %v2764_v54  ;;  %v2755_v54 = vld [vmem:[%s10185_s1 + $0x598] sm:$0xff] }
 0x52d   :  { %2463 = vadd.xlane.f32.xlu2 %v2462_v20  ;;  %2421 = vadd.xlane.f32.xlu1 %v2420_v19  ;;  %v5784_v20 = vunpack.c.l.bf16 %v6040_v51  ;;  %v5716_v19 = vunpack.c.l.bf16 %v6023_v39 }
 0x52e   :  { %2562 = vadd.xlane.f32.xlu0 %v2561_v38  ;;  %4629 = vmatpush.msra.mxu3 %v2763_v26  ;;  %v5717_v26 = vunpack.c.h.bf16 %v6023_v39  ;;  %v2753_v39 = vld [vmem:[%s10185_s1 + $0x588] sm:$0xff] }
 0x52f   :  { %v2570_v4 = vsel %vm1039_vm0, %v5784_v20, 0.0  ;;  %v2468_v23 = vsel %vm1039_vm0, %v5716_v19, 0.0  ;;  %v2429_v19 = vsel %vm1039_vm0, %v5689_v9, 0.0 }
 0x530   :  { %v2395_v21 = vpop.xlane.xlu2 %2394  ;;  %v9472_v8 = vpop.xlane.xlu1 %2370  ;;  %4630 = vmatpush.msra.mxu3 %v2762_v40  ;;  %v2754_v40 = vld [vmem:[%s10185_s1 + $0x590] sm:$0xff] }
 0x531   :  { %v4253_v13 = vperm.slane %v2395_v21, %v7419_v29  ;;  %v2536_v31 = vpop.xlane.xlu0 %2535  ;;  %v2757_v21 = vld [vmem:[%s10185_s1 + $0x5a8] sm:$0xff] }
 0x532   :  { %v4344_v49 = vperm.slane %v2536_v31, %v7411_v16  ;;  %4631 = vmatpush.msra.mxu3 %v2761_v63  ;;  %v10591_v31 = vld [vmem:[#allocation144_spill] sm:$0xff] }
 0x533   :  { %v4254_v57 = vsel %vm3361_vm3, %v4253_v13, %v4252_v6  ;;  %v3721_v13 = vperm.slane %v10590_v53, %v7384_v30 }
 0x534   :  { %v4345_v15 = vsel %vm3357_vm2, %v4344_v49, %v4343_v5  ;;  %4632 = vmatpush.msra.mxu3 %v2760_v10  ;;  %v3722_v49 = vperm.slane %v10591_v31, %v7390_v62 }
 0x535   :  { %2424 = vadd.xlane.f32.xlu2 %v2423_v18  ;;  %2565 = vadd.xlane.f32.xlu1 %v2564_v41 }
 0x536   :  { %2523 = vadd.xlane.f32.xlu0 %v2522_v61  ;;  %4633 = vmatpush.msra.mxu3 %v2759_v7  ;;  %v2756_v61 = vld [vmem:[%s10185_s1 + $0x5a0] sm:$0xff] }
 0x538   :  { %v2497_v47 = vpop.xlane.xlu2 %2496  ;;  %v2437_v28 = vpop.xlane.xlu1 %2436  ;;  %4634 = vmatpush.msra.mxu3 %v2758_v56  ;;  %v2752_v56 = vld [vmem:[%s10185_s1 + $0x580] sm:$0xff] }
 0x539   :  { %v4319_v37 = vperm.slane %v2497_v47, %v7459_v24  ;;  %v4280_v60 = vperm.slane %v2437_v28, %v7390_v62  ;;  %v2434_v36 = vpop.xlane.xlu0 %2433 }
 0x53a   :  { %v4279_v5 = vperm.slane %v2434_v36, %v7384_v30  ;;  %4635 = vmatpush.msra.mxu3 %v2757_v21 }
 0x53b   :  { %v4320_v32 = vsel %vm3369_vm5, %v4319_v37, %v4318_v35  ;;  %v5688_v35 = vunpack.c.l.bf16 %v6016_v42  ;;  %v10593_v37 = vld [vmem:[#allocation142_spill] sm:$0xff]  ;;  %v10594_v42 = vld [vmem:[#allocation147_spill] sm:$0xff] }
 0x53c   :  { %v4281_v34 = vsel %vm3353_vm1, %v4280_v60, %v4279_v5  ;;  %4636 = vmatpush.msra.mxu3 %v2756_v61  ;;  %v3726_v60 = vperm.slane %v10593_v37, %v7419_v29  ;;  %v3728_v10 = vperm.slane %v10594_v42, %v7428_v55  ;;  %v10602_v42 = vld [vmem:[#allocation152_spill] sm:$0xff] }
 0x53d   :  { %2568 = vadd.xlane.f32.xlu2 %v2567_v58  ;;  %2526 = vadd.xlane.f32.xlu1 %v2525_v27  ;;  %v2426_v41 = vsel %vm1039_vm0, %v5688_v35, 0.0  ;;  %v6024_v35 = vld [vmem:[%s10184_s0 + $0x778] sm:$0xff]  }
 0x53e   :  { %2466 = vadd.xlane.f32.xlu0 %v2465_v52  ;;  %4637 = vmatpush.msra.mxu3 %v2755_v54  ;;  %v10597_v54 = vld [vmem:[#allocation150_spill] sm:$0xff] }
 0x53f   :  { %v3734_v0 = vperm.slane %v10597_v54, %v7475_v14 }
 0x540   :  { %v2398_v6 = vpop.xlane.xlu2 %2397  ;;  %v9523_v38 = vpop.xlane.xlu1 %2373  ;;  %4638 = vmatpush.msra.mxu3 %v2754_v40 }
 0x541   :  { %v4255_v2 = vperm.slane %v2398_v6, %v7428_v55  ;;  %v2539_v43 = vpop.xlane.xlu0 %2538  ;;  %v4240_v54 = vperm.slane %v9523_v38, %v7542_v45 }
 0x542   :  { %v4346_v11 = vperm.slane %v2539_v43, %v7419_v29  ;;  %4639 = vmatpush.msra.mxu3 %v2753_v39 }
 0x543   :  { %v4256_v18 = vsel %vm3365_vm4, %v4255_v2, %v4254_v57  ;;  %v5785_v57 = vunpack.c.h.bf16 %v6040_v51  ;;  %v2471_v51 = vsel %vm1039_vm0, %v5717_v26, 0.0  ;;  %v10595_v2 = vld [vmem:[#allocation146_spill] sm:$0xff] }
 0x544   :  { %v4347_v50 = vsel %vm3361_vm3, %v4346_v11, %v4345_v15  ;;  %v3723_v15 = vsel %vm3353_vm1, %v3722_v49, %v3721_v13  ;;  %v3730_v43 = vperm.slane %v10595_v2, %v7459_v24  ;;  %v5721_v11 = vunpack.c.h.bf16 %v6024_v35  ;;  %4640 = vmatpush.msra.mxu3 %v2752_v56  ;;  %v10596_v49 = vld [vmem:[#allocation145_spill] sm:$0xff] }
 0x545   :  { %2571 = vadd.xlane.f32.xlu2 %v2570_v4  ;;  %2469 = vadd.xlane.f32.xlu1 %v2468_v23  ;;  %v3725_v27 = vsel %vm3357_vm2, %v3724_v1, %v3723_v15  ;;  %v2573_v52 = vsel %vm1039_vm0, %v5785_v57, 0.0  ;;  %v5720_v23 = vunpack.c.l.bf16 %v6024_v35  ;;  %v10598_v15 = vld [vmem:[#allocation149_spill] sm:$0xff] }
 0x546   :  { %2427 = vadd.xlane.f32.xlu0 %v2426_v41  ;;  %v3732_v41 = vperm.slane %v10596_v49, %v7463_v3  ;;  %v2477_v61 = vsel %vm1039_vm0, %v5721_v11, 0.0  ;;  %v3736_v9 = vperm.slane %v10598_v15, %v7491_v12  ;;  %v10605_v11 = vld [vmem:[#allocation156_spill] sm:$0xff] }
 0x547   :  { %v2474_v26 = vsel %vm1039_vm0, %v5720_v23, 0.0  ;;  %vm10603_vm0 = vcmask 720512  }
 0x548   :  { %v2542_v47 = vpop.xlane.xlu2 %2541  ;;  %v2500_v28 = vpop.xlane.xlu1 %2499 }
 0x549   :  { %v4348_v36 = vperm.slane %v2542_v47, %v7428_v55  ;;  %v4321_v5 = vperm.slane %v2500_v28, %v7463_v3  ;;  %v2440_v58 = vpop.xlane.xlu0 %2439 }
 0x54a   :  { %v4282_v63 = vperm.slane %v2440_v58, %v7411_v16 }
 0x54b   :  { %v4349_v7 = vsel %vm3365_vm4, %v4348_v36, %v4347_v50  ;;  %v4322_v20 = vsel %vm3373_vm6, %v4321_v5, %v4320_v32  ;;  %v3727_v32 = vsel %vm3361_vm3, %v3726_v60, %v3725_v27  ;;  %v10599_v60 = vld [vmem:[#allocation148_spill] sm:$0xff]  ;;  %v10601_v27 = vld [vmem:[#allocation153_spill] sm:$0xff] }
 0x54c   :  { %v4283_v6 = vsel %vm3357_vm2, %v4282_v63, %v4281_v34  ;;  %v3729_v4 = vsel %vm3365_vm4, %v3728_v10, %v3727_v32  ;;  %v3738_v36 = vperm.slane %v10599_v60, %v7498_v59  ;;  %v3740_v63 = vperm.slane %v10601_v27, %v7511_v46 }
 0x54d   :  { %2574 = vadd.xlane.f32.xlu2 %v2573_v52  ;;  %2472 = vadd.xlane.f32.xlu1 %v2471_v51  ;;  %v3731_v50 = vsel %vm3369_vm5, %v3730_v43, %v3729_v4  ;;  %v3742_v10 = vperm.slane %v10602_v42, %v7533_v17  ;;  %v3746_v4 = vperm.slane %v10605_v11, %v7560_v25 }
 0x54e   :  { %2430 = vadd.xlane.f32.xlu0 %v2429_v19  ;;  %v3733_v47 = vsel %vm3373_vm6, %v3732_v41, %v3731_v50  ;;  %v10607_v41 = vld [vmem:[#allocation155_spill] sm:$0xff] }
 0x54f   :  { %v3735_v28 = vsel %vm3377_vm7, %v3734_v0, %v3733_v47  ;;  %v3748_v50 = vperm.slane %v10607_v41, %v7576_v33 }
 0x550   :  { %v2443_v21 = vpop.xlane.xlu2 %2442  ;;  %v2401_v34 = vpop.xlane.xlu1 %2400 }
 0x551   :  { %v4284_v53 = vperm.slane %v2443_v21, %v7419_v29  ;;  %v4257_v13 = vperm.slane %v2401_v34, %v7459_v24  ;;  %v2377_v31 = vpop.xlane.xlu0 %2376  ;;  %v4236_v21 = vperm.slane %v9456_v48, %v7511_v46 }
 0x553   :  { %v4285_v1 = vsel %vm3361_vm3, %v4284_v53, %v4283_v6  ;;  %v4258_v57 = vsel %vm3369_vm5, %v4257_v13, %v4256_v18  ;;  %v3737_v18 = vsel %vm10600_vm8, %v3736_v9, %v3735_v28  ;;  %v10604_v6 = vld [vmem:[#allocation151_spill] sm:$0xff]  ;;  %v4238_v53 = vperm.slane %v9472_v8, %v7533_v17 }
 0x554   :  { %v3739_v19 = vsel %vm3385_vm9, %v3738_v36, %v3737_v18  ;;  %v3744_v56 = vperm.slane %v10604_v6, %v7542_v45  ;;  %vm10608_vm8 = vcmask 851712   ;;  %v4237_v8 = vsel %vm10603_vm0, %v4236_v21, %v9435_v44 }
 0x555   :  { %2478 = vadd.xlane.f32.xlu1 %v2477_v61  ;;  %v3741_v35 = vsel %vm10603_vm0, %v3740_v63, %v3739_v19  ;;  %v4239_v47 = vsel %vm3393_vm11, %v4238_v53, %v4237_v8  ;;  %v2811_v53 = vld [vmem:[%s10185_s1 + $0x758] sm:$0xff] }
 0x556   :  { %2475 = vadd.xlane.f32.xlu0 %v2474_v26  ;;  %v3743_v32 = vsel %vm3393_vm11, %v3742_v10, %v3741_v35  ;;  %v4242_v26 = vperm.slane %v2377_v31, %v7560_v25  ;;  %v2783_v8 = vld [vmem:[%s10185_s1 + $0x678] sm:$0xff] }
 0x557   :  { %v3745_v61 = vsel %vm10608_vm8, %v3744_v56, %v3743_v32  ;;  %v2814_v32 = vld [vmem:[%s10185_s1 + $0x770] sm:$0xff]  ;;  %4645 = vmatpush.msrb.mxu0 %v2783_v8  ;;  %v10617_v8 = vld [vmem:[#allocation157_spill] sm:$0xff] }
 0x558   :  { %v2380_v40 = vpop.xlane.xlu2 %2379  ;;  %v2545_v37 = vpop.xlane.xlu1 %2544  ;;  %v3747_v0 = vsel %vm3401_vm13, %v3746_v4, %v3745_v61 }
 0x559   :  { %v4350_v5 = vperm.slane %v2545_v37, %v7459_v24  ;;  %v2503_v58 = vpop.xlane.xlu0 %2502  ;;  %v4244_v15 = vperm.slane %v2380_v40, %v7576_v33 }
 0x55a   :  { %v4323_v52 = vperm.slane %v2503_v58, %v7475_v14 }
 0x55b   :  { %v4351_v51 = vsel %vm3369_vm5, %v4350_v5, %v4349_v7 }
 0x55c   :  { %v4324_v39 = vsel %vm3377_vm7, %v4323_v52, %v4322_v20 }
 0x560   :  { %v2506_v2 = vpop.xlane.xlu2 %2505  ;;  %v2446_v43 = vpop.xlane.xlu1 %2445 }
 0x561   :  { %v4325_v7 = vperm.slane %v2506_v2, %v7491_v12  ;;  %v4286_v20 = vperm.slane %v2446_v43, %v7428_v55  ;;  %v2404_v23 = vpop.xlane.xlu0 %2403 }
 0x562   :  { %v4259_v34 = vperm.slane %v2404_v23, %v7463_v3 }
 0x563   :  { %v9622_v13 = vsel %vm10606_vm10, %v4325_v7, %v4324_v39  ;;  %v4287_v49 = vsel %vm3365_vm4, %v4286_v20, %v4285_v1  ;;  %v10609_v1 = vld [vmem:[#allocation154_spill] sm:$0xff]  ;;  %vm10610_vm10 = vmmov %vm10608_vm8  ;;  %vm10611_vm8 = vcmask 589312  }
 0x564   :  { %v4260_v48 = vsel %vm3373_vm6, %v4259_v34, %v4258_v57  ;;  %v3750_v9 = vperm.slane %v10609_v1, %v7587_v22  ;;  %v4241_v28 = vsel %vm10610_vm10, %v4240_v54, %v4239_v47  ;;  %v3749_v57 = vsel %vm3405_vm14, %v3748_v50, %v3747_v0  ;;  %v2813_v20 = vld [vmem:[%s10185_s1 + $0x768] sm:$0xff]  ;;  %v2812_v34 = vld [vmem:[%s10185_s1 + $0x760] sm:$0xff]  ;;  %v2810_v50 = vld [vmem:[%s10185_s1 + $0x750] sm:$0xff] }
 0x565   :  { %v4243_v60 = vsel %vm3401_vm13, %v4242_v26, %v4241_v28  ;;  %v2808_v26 = vld [vmem:[%s10185_s1 + $0x740] sm:$0xff]  ;;  %v2831_v1 = vld [vmem:[%s10185_s1 + $0x7f8] sm:$0xff]  ;;  %v2782_v28 = vld [vmem:[%s10185_s1 + $0x670] sm:$0xff]  ;;  %vm10646_vm10 = vcmask 720512  }
 0x566   :  { %v4245_v40 = vsel %vm3405_vm14, %v4244_v15, %v4243_v60  ;;  %v3751_v27 = vsel %vm3409_vm15, %v3750_v9, %v3749_v57  ;;  %v2807_v15 = vld [vmem:[%s10185_s1 + $0x738] sm:$0xff]  ;;  %4705 = vmatpush.msrb.mxu3 %v2831_v1  ;;  %4646 = vmatpush.msrb.mxu0 %v2782_v28  ;;  %v2781_v60 = vld [vmem:[%s10185_s1 + $0x668] sm:$0xff]  ;;  %vm10638_vm0 = vmmov %vm10611_vm8 }
 0x567   :  { %v10618_v28 = vld [vmem:[#allocation190_spill] sm:$0xff] }
 0x568   :  { %v2407_v37 = vpop.xlane.xlu2 %2406  ;;  %v2383_v38 = vpop.xlane.xlu1 %2382  ;;  %4647 = vmatpush.msrb.mxu0 %v2781_v60  ;;  %v10619_v60 = vld [vmem:[#allocation162_spill] sm:$0xff] }
 0x569   :  { %v4261_v31 = vperm.slane %v2407_v37, %v7475_v14  ;;  %v4246_v36 = vperm.slane %v2383_v38, %v7587_v22  ;;  %v2548_v44 = vpop.xlane.xlu0 %2547  ;;  %v2806_v37 = vld [vmem:[%s10185_s1 + $0x730] sm:$0xff] }
 0x56a   :  { %v4352_v5 = vperm.slane %v2548_v44, %v7463_v3  ;;  %v2830_v38 = vld [vmem:[%s10185_s1 + $0x7f0] sm:$0xff]  ;;  %v2780_v44 = vld [vmem:[%s10185_s1 + $0x660] sm:$0xff] }
 0x56b   :  { %v4262_v58 = vsel %vm3377_vm7, %v4261_v31, %v4260_v48  ;;  %v4247_v18 = vsel %vm3409_vm15, %v4246_v36, %v4245_v40  ;;  %v2809_v48 = vld [vmem:[%s10185_s1 + $0x748] sm:$0xff]  ;;  %4706 = vmatpush.msrb.mxu3 %v2830_v38  ;;  %v2804_v40 = vld [vmem:[%s10185_s1 + $0x720] sm:$0xff]  ;;  %4648 = vmatpush.msrb.mxu0 %v2780_v44  ;;  %v10620_v44 = vld [vmem:[#allocation195_spill] sm:$0xff] }
 0x56c   :  { %v4353_v63 = vsel %vm3373_vm6, %v4352_v5, %v4351_v51  ;;  %v4384_v52 = vsel %vm4372_vm12, %v4247_v18, %v3751_v27  ;;  %v2815_v51 = vld [vmem:[%s10185_s1 + $0x778] sm:$0xff]  ;;  %v2805_v31 = vld [vmem:[%s10185_s1 + $0x728] sm:$0xff]  ;;  %v2828_v5 = vld [vmem:[%s10185_s1 + $0x7e0] sm:$0xff] }
 0x56d   :  { %4641 = vmatmul.f32.vlgmr.msra.gmra.mxu3 %v4384_v52  ;;  %4685 = vmatpush.msrb.mxu2 %v2815_v51  ;;  %v2829_v36 = vld [vmem:[%s10185_s1 + $0x7e8] sm:$0xff]  ;;  %v10613_v27 = vld [vmem:[#allocation192_spill] sm:$0xff]  ;;  %v10615_v51 = vld [vmem:[#allocation159_spill] sm:$0xff] }
 0x56e   :  { %4707 = vmatpush.msrb.mxu3 %v2829_v36  ;;  %v2779_v52 = vld [vmem:[%s10185_s1 + $0x658] sm:$0xff]  ;;  %v2797_v38 = vld [vmem:[%s10185_s1 + $0x6e8] sm:$0xff] }
 0x56f   :  { %4686 = vmatpush.msrb.mxu2 %v2814_v32  ;;  %4649 = vmatpush.msrb.mxu0 %v2779_v52  ;;  %v10616_v32 = vld [vmem:[#allocation191_spill] sm:$0xff] }
 0x570   :  { %v2551_v39 = vpop.xlane.xlu2 %2550  ;;  %v9651_v42 = vpop.xlane.xlu1 %2508  ;;  %4708 = vmatpush.msrb.mxu3 %v2828_v5  ;;  %v2776_v5 = vld [vmem:[%s10185_s1 + $0x640] sm:$0xff]  ;;  %v2823_v52 = vld [vmem:[%s10185_s1 + $0x7b8] sm:$0xff] }
 0x571   :  { %v4354_v10 = vperm.slane %v2551_v39, %v7475_v14  ;;  %v2449_v19 = vpop.xlane.xlu0 %2448  ;;  %4687 = vmatpush.msrb.mxu2 %v2813_v20  ;;  %v2803_v39 = vld [vmem:[%s10185_s1 + $0x718] sm:$0xff]  ;;  %v2778_v20 = vld [vmem:[%s10185_s1 + $0x650] sm:$0xff] }
 0x572   :  { %v4288_v35 = vperm.slane %v2449_v19, %v7459_v24  ;;  %v2799_v19 = vld [vmem:[%s10185_s1 + $0x6f8] sm:$0xff]  ;;  %4650 = vmatpush.msrb.mxu0 %v2778_v20 }
 0x573   :  { %v9656_v6 = vsel %vm3377_vm7, %v4354_v10, %v4353_v63  ;;  %4688 = vmatpush.msrb.mxu2 %v2812_v34  ;;  %v3815_v63 = vperm.slane %v10613_v27, %v7390_v62  ;;  %v2827_v10 = vld [vmem:[%s10185_s1 + $0x7d8] sm:$0xff]  ;;  %4665 = vmatpush.msrb.mxu1 %v2799_v19  ;;  %v2826_v34 = vld [vmem:[%s10185_s1 + $0x7d0] sm:$0xff]  ;;  %v2796_v27 = vld [vmem:[%s10185_s1 + $0x6e0] sm:$0xff] }
 0x574   :  { %v4289_v56 = vsel %vm3369_vm5, %v4288_v35, %v4287_v49  ;;  %v10614_v35 = vld [vmem:[#allocation158_spill] sm:$0xff]  ;;  %4709 = vmatpush.msrb.mxu3 %v2827_v10  ;;  %v10621_v10 = vld [vmem:[#allocation161_spill] sm:$0xff] }
 0x575   :  { %4689 = vmatpush.msrb.mxu2 %v2811_v53  ;;  %v3759_v19 = vperm.slane %v10621_v10, %v7428_v55  ;;  %v2771_v10 = vld [vmem:[%s10185_s1 + $0x618] sm:$0xff] }
 0x576   :  { %4710 = vmatpush.msrb.mxu3 %v2826_v34  ;;  %v2774_v34 = vld [vmem:[%s10185_s1 + $0x630] sm:$0xff] }
 0x577   :  { %4690 = vmatpush.msrb.mxu2 %v2810_v50  ;;  %v2798_v50 = vld [vmem:[%s10185_s1 + $0x6f0] sm:$0xff] }
 0x578   :  { %v9662_v2 = vpop.xlane.xlu2 %2511  ;;  %v2452_v43 = vpop.xlane.xlu1 %2451  ;;  %4666 = vmatpush.msrb.mxu1 %v2798_v50 }
 0x579   :  { %v4290_v11 = vperm.slane %v2452_v43, %v7463_v3  ;;  %v2410_v4 = vpop.xlane.xlu0 %2409  ;;  %4691 = vmatpush.msrb.mxu2 %v2809_v48  ;;  %v3752_v43 = vperm.slane %v10615_v51, %v7384_v30  ;;  %v2801_v48 = vld [vmem:[%s10185_s1 + $0x708] sm:$0xff] }
 0x57a   :  { %v4263_v7 = vperm.slane %v2410_v4, %v7491_v12  ;;  %4667 = vmatpush.msrb.mxu1 %v2797_v38 }
 0x57b   :  { %v4291_v23 = vsel %vm3373_vm6, %v4290_v11, %v4289_v56  ;;  %4692 = vmatpush.msrb.mxu2 %v2808_v26  ;;  %v3753_v56 = vperm.slane %v10614_v35, %v7390_v62  ;;  %v3817_v11 = vperm.slane %v10616_v32, %v7411_v16  ;;  %v2825_v26 = vld [vmem:[%s10185_s1 + $0x7c8] sm:$0xff] }
 0x57c   :  { %v9674_v21 = vsel %vm10611_vm8, %v4263_v7, %v4262_v58  ;;  %v10612_v58 = vld [vmem:[#allocation187_spill] sm:$0xff]  ;;  %4711 = vmatpush.msrb.mxu3 %v2825_v26  ;;  %4668 = vmatpush.msrb.mxu1 %v2796_v27  ;;  %v10627_v27 = vld [vmem:[#allocation206_spill] sm:$0xff]  ;;  %vm10669_vm8 = vmmov %vm10638_vm0 }
 0x57d   :  { %4693 = vmatpush.msrb.mxu2 %v2807_v15  ;;  %v3814_v18 = vperm.slane %v10612_v58, %v7384_v30  ;;  %v3755_v15 = vperm.slane %v10617_v8, %v7411_v16  ;;  %v3754_v1 = vsel %vm3353_vm1, %v3753_v56, %v3752_v43  ;;  %v2800_v58 = vld [vmem:[%s10185_s1 + $0x700] sm:$0xff]  ;;  %v10622_v56 = vld [vmem:[#allocation194_spill] sm:$0xff] }
 0x57e   :  { %v3823_v51 = vperm.slane %v10622_v56, %v7459_v24  ;;  %v10624_v8 = vld [vmem:[#allocation193_spill] sm:$0xff] }
 0x57f   :  { %4694 = vmatpush.msrb.mxu2 %v2806_v37  ;;  %v3816_v53 = vsel %vm3353_vm1, %v3815_v63, %v3814_v18  ;;  %v3819_v37 = vperm.slane %v10618_v28, %v7419_v29  ;;  %v2824_v18 = vld [vmem:[%s10185_s1 + $0x7c0] sm:$0xff]  ;;  %v2775_v63 = vld [vmem:[%s10185_s1 + $0x638] sm:$0xff]  ;;  %v3756_v35 = vsel %vm3357_vm2, %v3755_v15, %v3754_v1  ;;  %v3825_v15 = vperm.slane %v10624_v8, %v7463_v3  ;;  %v2773_v1 = vld [vmem:[%s10185_s1 + $0x628] sm:$0xff] }
 0x580   :  { %v2455_v49 = vpop.xlane.xlu2 %2454  ;;  %v9682_v41 = vpop.xlane.xlu1 %2412  ;;  %v3818_v36 = vsel %vm3357_vm2, %v3817_v11, %v3816_v53  ;;  %4712 = vmatpush.msrb.mxu3 %v2824_v18  ;;  %v2822_v53 = vld [vmem:[%s10185_s1 + $0x7b0] sm:$0xff]  ;;  %v2821_v28 = vld [vmem:[%s10185_s1 + $0x7a8] sm:$0xff]  ;;  %v2792_v18 = vld [vmem:[%s10185_s1 + $0x6c0] sm:$0xff] }
 0x581   :  { %v4292_v61 = vperm.slane %v2455_v49, %v7475_v14  ;;  %v9688_v54 = vpop.xlane.xlu0 %2553  ;;  %4695 = vmatpush.msrb.mxu2 %v2805_v31  ;;  %v3757_v31 = vperm.slane %v10619_v60, %v7419_v29  ;;  %v3820_v43 = vsel %vm3361_vm3, %v3819_v37, %v3818_v36  ;;  %v10625_v60 = vld [vmem:[#allocation198_spill] sm:$0xff] }
 0x582   :  { %4713 = vmatpush.msrb.mxu3 %v2823_v52  ;;  %v2793_v36 = vld [vmem:[%s10185_s1 + $0x6c8] sm:$0xff]  ;;  %v10628_v52 = vld [vmem:[#allocation207_spill] sm:$0xff] }
 0x583   :  { %v9694_v0 = vsel %vm3377_vm7, %v4292_v61, %v4291_v23  ;;  %4696 = vmatpush.msrb.mxu2 %v2804_v40  ;;  %v2802_v23 = vld [vmem:[%s10185_s1 + $0x710] sm:$0xff]  ;;  %v2777_v61 = vld [vmem:[%s10185_s1 + $0x648] sm:$0xff]  ;;  %v3821_v40 = vperm.slane %v10620_v44, %v7428_v55  ;;  %v3758_v32 = vsel %vm3361_vm3, %v3757_v31, %v3756_v35  ;;  %v3827_v31 = vperm.slane %v10625_v60, %v7475_v14  ;;  %v2791_v35 = vld [vmem:[%s10185_s1 + $0x6b8] sm:$0xff] }
 0x584   :  { %4651 = vmatpush.msrb.mxu0 %v2777_v61  ;;  %v2794_v61 = vld [vmem:[%s10185_s1 + $0x6d0] sm:$0xff]  ;;  %4714 = vmatpush.msrb.mxu3 %v2822_v53  ;;  %v3760_v37 = vsel %vm3365_vm4, %v3759_v19, %v3758_v32  ;;  %v10626_v44 = vld [vmem:[#allocation165_spill] sm:$0xff]  ;;  %v2819_v19 = vld [vmem:[%s10185_s1 + $0x798] sm:$0xff] }
 0x585   :  { %4697 = vmatpush.msrb.mxu2 %v2803_v39  ;;  %v2795_v39 = vld [vmem:[%s10185_s1 + $0x6d8] sm:$0xff]  ;;  %v3822_v11 = vsel %vm3365_vm4, %v3821_v40, %v3820_v43  ;;  %v3763_v40 = vperm.slane %v10626_v44, %v7463_v3  ;;  %v10634_v60 = vld [vmem:[#allocation177_spill] sm:$0xff] }
 0x586   :  { %4652 = vmatpush.msrb.mxu0 %v2776_v5  ;;  %4669 = vmatpush.msrb.mxu1 %v2795_v39  ;;  %v3824_v38 = vsel %vm3369_vm5, %v3823_v51, %v3822_v11  ;;  %v2772_v5 = vld [vmem:[%s10185_s1 + $0x620] sm:$0xff]  ;;  %v3845_v39 = vperm.slane %v10628_v52, %v7384_v30  ;;  %v10637_v52 = vld [vmem:[#allocation163_spill] sm:$0xff] }
 0x587   :  { %4698 = vmatpush.msrb.mxu2 %v2802_v23  ;;  %4715 = vmatpush.msrb.mxu3 %v2821_v28  ;;  %v10629_v51 = vld [vmem:[#allocation197_spill] sm:$0xff]  ;;  %v3826_v32 = vsel %vm3373_vm6, %v3825_v15, %v3824_v38  ;;  %v10630_v11 = vld [vmem:[#allocation164_spill] sm:$0xff] }
 0x588   :  { %v9708_v9 = vpop.xlane.xlu2 %2415  ;;  %v9710_v47 = vpop.xlane.xlu1 %2556  ;;  %4653 = vmatpush.msrb.mxu0 %v2775_v63  ;;  %4670 = vmatpush.msrb.mxu1 %v2794_v61  ;;  %v3846_v63 = vperm.slane %v10627_v27, %v7390_v62  ;;  %v3829_v43 = vperm.slane %v10629_v51, %v7491_v12  ;;  %v10631_v53 = vld [vmem:[#allocation172_spill] sm:$0xff]  ;;  %v10633_v28 = vld [vmem:[#allocation205_spill] sm:$0xff]  ;;  %v2790_v27 = vld [vmem:[%s10185_s1 + $0x6b0] sm:$0xff] }
 0x589   :  { %v9721_v57 = vpop.xlane.xlu0 %2514  ;;  %4699 = vmatpush.msrb.mxu2 %v2801_v48  ;;  %v10623_v48 = vld [vmem:[#allocation160_spill] sm:$0xff]  ;;  %v3784_v61 = vperm.slane %v10631_v53, %v7390_v62  ;;  %v2770_v62 = vld [vmem:[%s10185_s1 + $0x610] sm:$0xff] }
 0x58a   :  { %4654 = vmatpush.msrb.mxu0 %v2774_v34  ;;  %v3761_v26 = vperm.slane %v10623_v48, %v7459_v24  ;;  %4671 = vmatpush.msrb.mxu1 %v2793_v36  ;;  %v3765_v34 = vperm.slane %v10630_v11, %v7475_v14  ;;  %v10632_v48 = vld [vmem:[#allocation173_spill] sm:$0xff]  ;;  %v10635_v36 = vld [vmem:[#allocation196_spill] sm:$0xff] }
 0x58b   :  { %4700 = vmatpush.msrb.mxu2 %v2800_v58  ;;  %v2820_v58 = vld [vmem:[%s10185_s1 + $0x7a0] sm:$0xff]  ;;  %v3783_v8 = vperm.slane %v10632_v48, %v7384_v30  ;;  %v2818_v30 = vld [vmem:[%s10185_s1 + $0x790] sm:$0xff]  ;;  %v3831_v44 = vperm.slane %v10635_v36, %v7498_v59  ;;  %v2789_v11 = vld [vmem:[%s10185_s1 + $0x6a8] sm:$0xff] }
 0x58c   :  { %4655 = vmatpush.msrb.mxu0 %v2773_v1  ;;  %v3762_v56 = vsel %vm3369_vm5, %v3761_v26, %v3760_v37  ;;  %4716 = vmatpush.msrb.mxu3 %v2820_v58  ;;  %v3828_v1 = vsel %vm3377_vm7, %v3827_v31, %v3826_v32  ;;  %v3848_v37 = vperm.slane %v10633_v28, %v7411_v16  ;;  %v10640_v51 = vld [vmem:[#allocation168_spill] sm:$0xff]  ;;  %v10644_v36 = vld [vmem:[#allocation167_spill] sm:$0xff] }
 0x58d   :  { %4672 = vmatpush.msrb.mxu1 %v2792_v18  ;;  %v3764_v26 = vsel %vm3373_vm6, %v3763_v40, %v3762_v56  ;;  %v3786_v31 = vperm.slane %v10634_v60, %v7411_v16  ;;  %v3847_v40 = vsel %vm3353_vm1, %v3846_v63, %v3845_v39  ;;  %v3830_v16 = vsel %vm10638_vm0, %v3829_v43, %v3828_v1  ;;  %v2769_v63 = vld [vmem:[%s10185_s1 + $0x608] sm:$0xff]  ;;  %v10641_v53 = vld [vmem:[#allocation176_spill] sm:$0xff] }
 0x58e   :  { %4656 = vmatpush.msrb.mxu0 %v2772_v5  ;;  %4717 = vmatpush.msrb.mxu3 %v2819_v19  ;;  %v10636_v5 = vld [vmem:[#allocation210_spill] sm:$0xff]  ;;  %v10639_v19 = vld [vmem:[#allocation201_spill] sm:$0xff]  ;;  %v3766_v56 = vsel %vm3377_vm7, %v3765_v34, %v3764_v26  ;;  %v3769_v32 = vperm.slane %v10640_v51, %v7498_v59  ;;  %v3785_v43 = vsel %vm3353_vm1, %v3784_v61, %v3783_v8  ;;  %v10643_v26 = vld [vmem:[#allocation200_spill] sm:$0xff] }
 0x58f   :  { %4673 = vmatpush.msrb.mxu1 %v2791_v35  ;;  %v3850_v58 = vperm.slane %v10636_v5, %v7419_v29  ;;  %v3833_v35 = vperm.slane %v10639_v19, %v7511_v46  ;;  %v2817_v39 = vld [vmem:[%s10185_s1 + $0x788] sm:$0xff]  ;;  %v3788_v48 = vperm.slane %v10641_v53, %v7419_v29  ;;  %v2768_v34 = vld [vmem:[%s10185_s1 + $0x600] sm:$0xff]  ;;  %v3787_v8 = vsel %vm3357_vm2, %v3786_v31, %v3785_v43  ;;  %vm10645_vm1 = vmmov %vm10638_vm0 }
 0x590   :  { %v9763_v4 = vpop.xlane.xlu2 %2559  ;;  %v9765_v7 = vpop.xlane.xlu1 %2517  ;;  %4657 = vmatpush.msrb.mxu0 %v2771_v10  ;;  %v3767_v10 = vperm.slane %v10637_v52, %v7491_v12  ;;  %4718 = vmatpush.msrb.mxu3 %v2818_v30  ;;  %v10642_v1 = vld [vmem:[#allocation209_spill] sm:$0xff]  ;;  %v3835_v29 = vperm.slane %v10643_v26, %v7533_v17  ;;  %v3832_v30 = vsel %vm3385_vm9, %v3831_v44, %v3830_v16  ;;  %v2787_v31 = vld [vmem:[%s10185_s1 + $0x698] sm:$0xff] }
 0x591   :  { %v9777_v49 = vpop.xlane.xlu0 %2457  ;;  %4674 = vmatpush.msrb.mxu1 %v2790_v27  ;;  %v3852_v28 = vperm.slane %v10642_v1, %v7428_v55  ;;  %v2816_v61 = vld [vmem:[%s10185_s1 + $0x780] sm:$0xff]  ;;  %v3834_v27 = vsel %vm10646_vm10, %v3833_v35, %v3832_v30 }
 0x592   :  { %4658 = vmatpush.msrb.mxu0 %v2770_v62  ;;  %v3849_v62 = vsel %vm3357_vm2, %v3848_v37, %v3847_v40  ;;  %4719 = vmatpush.msrb.mxu3 %v2817_v39  ;;  %v2788_v37 = vld [vmem:[%s10185_s1 + $0x6a0] sm:$0xff]  ;;  %v3771_v40 = vperm.slane %v10644_v36, %v7511_v46  ;;  %v3768_v5 = vsel %vm10645_vm1, %v3767_v10, %v3766_v56  ;;  %v10649_v10 = vld [vmem:[#allocation199_spill] sm:$0xff]  ;;  %vm10653_vm2 = vmmov %vm10646_vm10 }
 0x593   :  { %4675 = vmatpush.msrb.mxu1 %v2789_v11  ;;  %v3851_v60 = vsel %vm3361_vm3, %v3850_v58, %v3849_v62  ;;  %v3770_v44 = vsel %vm3385_vm9, %v3769_v32, %v3768_v5  ;;  %v10647_v58 = vld [vmem:[#allocation175_spill] sm:$0xff]  ;;  %v10648_v16 = vld [vmem:[#allocation208_spill] sm:$0xff]  ;;  %v3837_v39 = vperm.slane %v10649_v10, %v7542_v45  ;;  %v10650_v56 = vld [vmem:[#allocation213_spill] sm:$0xff]  ;;  %v3836_v53 = vsel %vm3393_vm11, %v3835_v29, %v3834_v27 }
 0x594   :  { %4659 = vmatpush.msrb.mxu0 %v2769_v63  ;;  %4720 = vmatpush.msrb.mxu3 %v2816_v61  ;;  %v3790_v52 = vperm.slane %v10647_v58, %v7428_v55  ;;  %v3854_v19 = vperm.slane %v10648_v16, %v7459_v24  ;;  %v3789_v63 = vsel %vm3361_vm3, %v3788_v48, %v3787_v8  ;;  %v10651_v55 = vld [vmem:[#allocation166_spill] sm:$0xff]  ;;  %v10652_v48 = vld [vmem:[#allocation204_spill] sm:$0xff]  ;;  %v10654_v8 = vld [vmem:[#allocation171_spill] sm:$0xff]  ;;  %vm10658_vm3 = vcmask 851712  }
 0x595   :  { %4676 = vmatpush.msrb.mxu1 %v2788_v37  ;;  %v3853_v35 = vsel %vm3365_vm4, %v3852_v28, %v3851_v60  ;;  %v3856_v51 = vperm.slane %v10650_v56, %v7463_v3  ;;  %v3773_v32 = vperm.slane %v10651_v55, %v7533_v17  ;;  %v3839_v1 = vperm.slane %v10652_v48, %v7560_v25  ;;  %v10655_v30 = vld [vmem:[#allocation180_spill] sm:$0xff]  ;;  %v2785_v27 = vld [vmem:[%s10185_s1 + $0x688] sm:$0xff]  ;;  %vm10674_vm1 = vmmov %vm10653_vm2 }
 0x596   :  { %4660 = vmatpush.msrb.mxu0 %v2768_v34  ;;  %v4327_v62 = vperm.slane %v9651_v42, %v7498_v59  ;;  %v2786_v34 = vld [vmem:[%s10185_s1 + $0x690] sm:$0xff]  ;;  %v3772_v61 = vsel %vm10653_vm2, %v3771_v40, %v3770_v44  ;;  %v3775_v26 = vperm.slane %v10654_v8, %v7542_v45  ;;  %v3792_v60 = vperm.slane %v10655_v30, %v7459_v24  ;;  %v10656_v42 = vld [vmem:[#allocation212_spill] sm:$0xff]  ;;  %vm10680_vm10 = vmmov %vm10674_vm1 }
 0x597   :  { %4677 = vmatpush.msrb.mxu1 %v2787_v31  ;;  %v4329_v29 = vperm.slane %v9662_v2, %v7511_v46  ;;  %v3791_v37 = vsel %vm3365_vm4, %v3790_v52, %v3789_v63  ;;  %v3858_v36 = vperm.slane %v10656_v42, %v7475_v14  ;;  %v3855_v5 = vsel %vm3369_vm5, %v3854_v19, %v3853_v35  ;;  %v10657_v24 = vld [vmem:[#allocation203_spill] sm:$0xff]  ;;  %v2784_v10 = vld [vmem:[%s10185_s1 + $0x680] sm:$0xff]  ;;  %vm10661_vm4 = vmmov %vm10653_vm2 }
 0x598   :  { %v9833_v20 = vpop.xlane.xlu2 %2520  ;;  %v9835_v23 = vpop.xlane.xlu1 %2460  ;;  %v4331_v40 = vperm.slane %v9721_v57, %v7533_v17  ;;  %v3841_v31 = vperm.slane %v10657_v24, %v7576_v33  ;;  %v3838_v2 = vsel %vm10658_vm3, %v3837_v39, %v3836_v53  ;;  %v3857_v44 = vsel %vm3373_vm6, %v3856_v51, %v3855_v5  ;;  %v10659_v52 = vld [vmem:[#allocation179_spill] sm:$0xff]  ;;  %v10662_v51 = vld [vmem:[#allocation202_spill] sm:$0xff]  ;;  %vm10683_vm2 = vmmov %vm10638_vm0 }
 0x599   :  { %v9843_v50 = vpop.xlane.xlu0 %2418  ;;  %4678 = vmatpush.msrb.mxu1 %v2786_v34  ;;  %v4333_v58 = vperm.slane %v9765_v7, %v7542_v45  ;;  %v3794_v16 = vperm.slane %v10659_v52, %v7463_v3  ;;  %v3840_v57 = vsel %vm3401_vm13, %v3839_v1, %v3838_v2  ;;  %v4328_v19 = vsel %vm3385_vm9, %v4327_v62, %v9622_v13  ;;  %v10660_v7 = vld [vmem:[#allocation211_spill] sm:$0xff]  ;;  %v10664_v62 = vld [vmem:[#allocation178_spill] sm:$0xff] }
 0x59a   :  { %v4335_v63 = vperm.slane %v9833_v20, %v7560_v25  ;;  %v3793_v39 = vsel %vm3369_vm5, %v3792_v60, %v3791_v37  ;;  %v3860_v35 = vperm.slane %v10660_v7, %v7491_v12  ;;  %v4330_v56 = vsel %vm10661_vm4, %v4329_v29, %v4328_v19  ;;  %v10663_v20 = vld [vmem:[#allocation216_spill] sm:$0xff]  ;;  %vm10665_vm5 = vmmov %vm10658_vm3  ;;  %v10666_v37 = vld [vmem:[#allocation183_spill] sm:$0xff] }
 0x59b   :  { %4679 = vmatpush.msrb.mxu1 %v2785_v27  ;;  %v3843_v13 = vperm.slane %v10662_v51, %v7587_v22  ;;  %v3859_v55 = vsel %vm3377_vm7, %v3858_v36, %v3857_v44  ;;  %v3862_v53 = vperm.slane %v10663_v20, %v7498_v59  ;;  %v4332_v48 = vsel %vm3393_vm11, %v4331_v40, %v4330_v56  ;;  %v10668_v40 = vld [vmem:[#allocation215_spill] sm:$0xff]  ;;  %vm10686_vm4 = vmmov %vm10674_vm1 }
 0x59c   :  { %v3774_v1 = vsel %vm3393_vm11, %v3773_v32, %v3772_v61  ;;  %v3796_v34 = vperm.slane %v10664_v62, %v7475_v14  ;;  %v4334_v8 = vsel %vm10665_vm5, %v4333_v58, %v4332_v48  ;;  %v3842_v60 = vsel %vm3405_vm14, %v3841_v31, %v3840_v57  ;;  %v10667_v14 = vld [vmem:[#allocation170_spill] sm:$0xff]  ;;  %v10675_v51 = vld [vmem:[#allocation219_spill] sm:$0xff] }
 0x59d   :  { %4680 = vmatpush.msrb.mxu1 %v2784_v10  ;;  %v3795_v29 = vsel %vm3373_vm6, %v3794_v16, %v3793_v39  ;;  %v3798_v42 = vperm.slane %v10666_v37, %v7491_v12  ;;  %v4336_v36 = vsel %vm3401_vm13, %v4335_v63, %v4334_v8  ;;  %v3777_v61 = vperm.slane %v10667_v14, %v7560_v25  ;;  %vm10670_vm6 = vmmov %vm10658_vm3  ;;  %v10671_v16 = vld [vmem:[#allocation182_spill] sm:$0xff]  ;;  %v10672_v10 = vld [vmem:[#allocation169_spill] sm:$0xff] }
 0x59e   :  { %v3864_v27 = vperm.slane %v10668_v40, %v7511_v46  ;;  %v3861_v24 = vsel %vm10669_vm8, %v3860_v35, %v3859_v55  ;;  %v3776_v2 = vsel %vm10670_vm6, %v3775_v26, %v3774_v1  ;;  %v3844_v52 = vsel %vm3409_vm15, %v3843_v13, %v3842_v60  ;;  %v10673_v26 = vld [vmem:[#allocation214_spill] sm:$0xff]  ;;  %v10676_v55 = vld [vmem:[#allocation181_spill] sm:$0xff]  ;;  %vm10688_vm8 = vmmov %vm10665_vm5 }
 0x59f   :  { %v3863_v44 = vsel %vm3385_vm9, %v3862_v53, %v3861_v24  ;;  %v3800_v57 = vperm.slane %v10671_v16, %v7498_v59  ;;  %v3797_v19 = vsel %vm3377_vm7, %v3796_v34, %v3795_v29  ;;  %v3779_v39 = vperm.slane %v10672_v10, %v7576_v33  ;;  %v10677_v34 = vld [vmem:[#allocation218_spill] sm:$0xff]  ;;  %vm10679_vm7 = vmmov %vm10658_vm3 }
 0x5a0   :  { %v9903_v15 = vpop.xlane.xlu2 %2463  ;;  %v9905_v38 = vpop.xlane.xlu1 %2421  ;;  %v3799_v7 = vsel %vm10638_vm0, %v3798_v42, %v3797_v19  ;;  %v3866_v35 = vperm.slane %v10673_v26, %v7533_v17  ;;  %v3778_v56 = vsel %vm3401_vm13, %v3777_v61, %v3776_v2  ;;  %v3868_v13 = vperm.slane %v10675_v51, %v7542_v45  ;;  %v10678_v42 = vld [vmem:[#allocation174_spill] sm:$0xff]  ;;  %vm10684_vm3 = vmmov %vm10674_vm1 }
 0x5a1   :  { %v9920_v18 = vpop.xlane.xlu0 %2562  ;;  %v3802_v20 = vperm.slane %v10676_v55, %v7511_v46  ;;  %v3801_v53 = vsel %vm3385_vm9, %v3800_v57, %v3799_v7  ;;  %v4356_v48 = vperm.slane %v9688_v54, %v7491_v12  ;;  %v3870_v8 = vperm.slane %v10677_v34, %v7560_v25  ;;  %v10681_v40 = vld [vmem:[#allocation186_spill] sm:$0xff]  ;;  %v10685_v57 = vld [vmem:[#allocation220_spill] sm:$0xff]  ;;  %vm10690_vm6 = vmmov %vm10665_vm5 }
 0x5a2   :  { %v4358_v60 = vperm.slane %v9710_v47, %v7498_v59  ;;  %v3780_v37 = vsel %vm3405_vm14, %v3779_v39, %v3778_v56  ;;  %v4265_v54 = vperm.slane %v9682_v41, %v7498_v59  ;;  %v4360_v14 = vperm.slane %v9763_v4, %v7511_v46 }
 0x5a3   :  { %v3803_v61 = vsel %vm10680_vm10, %v3802_v20, %v3801_v53  ;;  %v4267_v47 = vperm.slane %v9708_v9, %v7511_v46  ;;  %v4362_v24 = vperm.slane %v9920_v18, %v7533_v17  ;;  %v4357_v41 = vsel %vm10683_vm2, %v4356_v48, %v9656_v6 }
 0x5a4   :  { %v4269_v4 = vperm.slane %v9843_v50, %v7533_v17  ;;  %v4271_v9 = vperm.slane %v9905_v38, %v7542_v45  ;;  %v4266_v16 = vsel %vm3385_vm9, %v4265_v54, %v9674_v21  ;;  %v3874_v19 = vperm.slane %v10685_v57, %v7587_v22 }
 0x5a5   :  { %v4294_v20 = vperm.slane %v9777_v49, %v7491_v12  ;;  %v4296_v34 = vperm.slane %v9835_v23, %v7498_v59 }
 0x5a8   :  { %v9980_v43 = vpop.xlane.xlu2 %2424  ;;  %v9982_v11 = vpop.xlane.xlu1 %2565 }
 0x5a9   :  { %v2524_v28 = vpop.xlane.xlu0 %2523  ;;  %v4273_v50 = vperm.slane %v9980_v43, %v7560_v25 }
 0x5aa   :  { %v4337_v3 = vperm.slane %v2524_v28, %v7576_v33 }
 0x5ac   :  { %v4338_v31 = vsel %vm3405_vm14, %v4337_v3, %v4336_v36  ;;  %v3865_v3 = vsel %vm10674_vm1, %v3864_v27, %v3863_v44  ;;  %v3781_v36 = vperm.slane %v10678_v42, %v7587_v22  ;;  %v3804_v27 = vperm.slane %v10681_v40, %v7533_v17 }
 0x5ad   :  { %v4364_v44 = vperm.slane %v9982_v11, %v7542_v45 }
 0x5ae   :  { %v3805_v21 = vsel %vm3393_vm11, %v3804_v27, %v3803_v61  ;;  %v3782_v49 = vsel %vm3409_vm15, %v3781_v36, %v3780_v37  ;;  %v10691_v61 = vld [vmem:[#allocation189_spill] sm:$0xff]  ;;  %v10692_v27 = vld [vmem:[#allocation188_spill] sm:$0xff] }
 0x5b0   :  { %v10041_v30 = vpop.xlane.xlu2 %2568  ;;  %v2527_v28 = vpop.xlane.xlu1 %2526 }
 0x5b1   :  { %v4339_v5 = vperm.slane %v2527_v28, %v7587_v22  ;;  %v10049_v32 = vpop.xlane.xlu0 %2466  ;;  %v3867_v28 = vsel %vm3393_vm11, %v3866_v35, %v3865_v3  ;;  %v4366_v18 = vperm.slane %v10041_v30, %v7560_v25  ;;  %v10687_v30 = vld [vmem:[#allocation185_spill] sm:$0xff] }
 0x5b2   :  { %v3806_v39 = vperm.slane %v10687_v30, %v7542_v45  ;;  %v4300_v59 = vperm.slane %v10049_v32, %v7533_v17 }
 0x5b3   :  { %v4340_v58 = vsel %vm3409_vm15, %v4339_v5, %v4338_v31  ;;  %v3869_v5 = vsel %vm10679_vm7, %v3868_v13, %v3867_v28  ;;  %v10682_v31 = vld [vmem:[#allocation217_spill] sm:$0xff]  ;;  %vm10693_vm7 = vmmov %vm10665_vm5 }
 0x5b4   :  { %v4387_v63 = vsel %vm4372_vm12, %v4340_v58, %v3844_v52  ;;  %v3872_v2 = vperm.slane %v10682_v31, %v7576_v33  ;;  %v3871_v58 = vsel %vm3401_vm13, %v3870_v8, %v3869_v5  ;;  %v4359_v52 = vsel %vm3385_vm9, %v4358_v60, %v4357_v41  ;;  %v10689_v5 = vld [vmem:[#allocation184_spill] sm:$0xff] }
 0x5b5   :  { %4701 = vmatmul.f32.vlgmr.msrb.gmra.mxu2 %v4387_v63  ;;  %v4361_v6 = vsel %vm10684_vm3, %v4360_v14, %v4359_v52  ;;  %v4268_v63 = vsel %vm10686_vm4, %v4267_v47, %v4266_v16  ;;  %v3808_v54 = vperm.slane %v10689_v5, %v7560_v25  ;;  %v3807_v14 = vsel %vm10690_vm6, %v3806_v39, %v3805_v21 }
 0x5b6   :  { %v4363_v38 = vsel %vm3393_vm11, %v4362_v24, %v4361_v6  ;;  %v4270_v7 = vsel %vm3393_vm11, %v4269_v4, %v4268_v63  ;;  %v3873_v55 = vsel %vm3405_vm14, %v3872_v2, %v3871_v58  ;;  %v3812_v47 = vperm.slane %v10692_v27, %v7587_v22  ;;  %v4462_v6 = vpop.f32.mrf.mxu2 }
 0x5b7   :  { %v4365_v43 = vsel %vm10665_vm5, %v4364_v44, %v4363_v38  ;;  %v4272_v56 = vsel %vm10688_vm8, %v4271_v9, %v4270_v7  ;;  %v3875_v60 = vsel %vm3409_vm15, %v3874_v19, %v3873_v55  ;;  %v3809_v24 = vsel %vm3401_vm13, %v3808_v54, %v3807_v14  ;;  %v4422_v9 = vpop.f32.mrf.mxu0 }
 0x5b8   :  { %v2572_v1 = vpop.xlane.xlu2 %2571  ;;  %v10079_v62 = vpop.xlane.xlu1 %2469  ;;  %v4367_v3 = vsel %vm3401_vm13, %v4366_v18, %v4365_v43  ;;  %v4274_v53 = vsel %vm3401_vm13, %v4273_v50, %v4272_v56 }
 0x5b9   :  { %v2428_v29 = vpop.xlane.xlu0 %2427  ;;  %v4368_v11 = vperm.slane %v2572_v1, %v7576_v33  ;;  %v4302_v37 = vperm.slane %v10079_v62, %v7542_v45  ;;  %v4442_v18 = vpop.f32.mrf.mxu1 }
 0x5ba   :  { %v4275_v10 = vperm.slane %v2428_v29, %v7576_v33  ;;  %v4298_v29 = vperm.slane %v9903_v15, %v7511_v46  ;;  %v3810_v46 = vperm.slane %v10691_v61, %v7576_v33  ;;  %v4295_v15 = vsel %vm10638_vm0, %v4294_v20, %v9694_v0  ;;  %v4482_v50 = vpop.f32.mrf.mxu3 }
 0x5bb   :  { %v4369_v48 = vsel %vm3405_vm14, %v4368_v11, %v4367_v3  ;;  %v4297_v36 = vsel %vm3385_vm9, %v4296_v34, %v4295_v15 }
 0x5bc   :  { %v4276_v8 = vsel %vm3405_vm14, %v4275_v10, %v4274_v53  ;;  %v4299_v17 = vsel %vm10674_vm1, %v4298_v29, %v4297_v36  ;;  %v3811_v45 = vsel %vm3405_vm14, %v3810_v46, %v3809_v24 }
 0x5bd   :  { %v4301_v31 = vsel %vm3393_vm11, %v4300_v59, %v4299_v17  ;;  %v3813_v58 = vsel %vm3409_vm15, %v3812_v47, %v3811_v45 }
 0x5be   :  { %v4303_v62 = vsel %vm10693_vm7, %v4302_v37, %v4301_v31  ;;  %v4542_v10 = vpop.f32.mrf.mxu2 }
 0x5bf   :  { %v4502_v57 = vpop.f32.mrf.mxu0 }
 0x5c0   :  { %v2575_v26 = vpop.xlane.xlu2 %2574  ;;  %v2473_v35 = vpop.xlane.xlu1 %2472 }
 0x5c1   :  { %v4370_v51 = vperm.slane %v2575_v26, %v7587_v22  ;;  %v2431_v13 = vpop.xlane.xlu0 %2430  ;;  %v4304_v40 = vperm.slane %v2473_v35, %v7560_v25  ;;  %v4522_v63 = vpop.f32.mrf.mxu1 }
 0x5c2   :  { %v4277_v1 = vperm.slane %v2431_v13, %v7587_v22  ;;  %v4562_v39 = vpop.f32.mrf.mxu3 }
 0x5c3   :  { %v4371_v28 = vsel %vm3409_vm15, %v4370_v51, %v4369_v48  ;;  %v4305_v25 = vsel %vm3401_vm13, %v4304_v40, %v4303_v62 }
 0x5c4   :  { %v4278_v12 = vsel %vm3409_vm15, %v4277_v1, %v4276_v8  ;;  %v4388_v42 = vsel %vm4372_vm12, %v4371_v28, %v3875_v60 }
 0x5c5   :  { %v4385_v23 = vsel %vm4372_vm12, %v4278_v12, %v3782_v49  ;;  %4721 = vmatmul.f32.vlgmr.msrb.gmra.mxu3 %v4388_v42 }
 0x5c6   :  { %4661 = vmatmul.f32.vlgmr.msrb.gmra.mxu0 %v4385_v23  ;;  %v4622_v56 = vpop.f32.mrf.mxu2 }
 0x5c7   :  { %v4582_v7 = vpop.f32.mrf.mxu0 }
 0x5c8   :  { %v2479_v32 = vpop.xlane.xlu1 %2478 }
 0x5c9   :  { %v2476_v2 = vpop.xlane.xlu0 %2475  ;;  %v4308_v0 = vperm.slane %v2479_v32, %v7587_v22  ;;  %v6042_v22 = vld [vmem:[%s10186_s2] ss:$0 sm:$0xff]  ;;  %v4602_v26 = vpop.f32.mrf.mxu1  ;;  %s6073_s2 = smov [#allocation2]  }
 0x5ca   :  { %v4306_v41 = vperm.slane %v2476_v2, %v7576_v33  ;;  %v4423_v16 = vadd.f32 %v6042_v22, %v4422_v9  ;;  %s4750_s6 = sshll.u32 %s6073_s2, 4  ;;  %s4751_s6 = int_to_ptr.vmem [resolvable:$true] %s4750_s6 }
 0x5cc   :  { %v4307_v4 = vsel %vm3405_vm14, %v4306_v41, %v4305_v25  ;;  %v4443_v33 = vadd.f32 %v4442_v18, %v4423_v16 }
 0x5cd   :  { %v4309_v44 = vsel %vm3409_vm15, %v4308_v0, %v4307_v4 }
 0x5ce   :  { %v4386_v52 = vsel %vm4372_vm12, %v4309_v44, %v3813_v58  ;;  %v4463_v11 = vadd.f32 %v4462_v6, %v4443_v33 }
 0x5cf   :  { %4681 = vmatmul.f32.vlgmr.msrb.gmra.mxu1 %v4386_v52 }
 0x5d0   :  { %v4483_v19 = vadd.f32 %v4482_v50, %v4463_v11 }
 0x5d2   :  { %v4503_v38 = vadd.f32 %v4502_v57, %v4483_v19 }
 0x5d4   :  { %v4523_v30 = vadd.f32 %v4522_v63, %v4503_v38 }
 0x5d6   :  { %v4543_v21 = vadd.f32 %v4542_v10, %v4523_v30 }
 0x5d8   :  { %v4563_v43 = vadd.f32 %v4562_v39, %v4543_v21 }
 0x5da   :  { %v4583_v35 = vadd.f32 %v4582_v7, %v4563_v43 }
 0x5dc   :  { %v4603_v3 = vadd.f32 %v4602_v26, %v4583_v35 }
 0x5de   :  { %v4623_v13 = vadd.f32 %v4622_v56, %v4603_v3 }
 0x5f0   :  { %v4642_v51 = vpop.f32.mrf.mxu3 }
 0x5f1   :  { %v4643_v20 = vadd.f32 %v4642_v51, %v4623_v13 }
 0x638   :  { %v4702_v34 = vpop.f32.mrf.mxu2 }
 0x643   :  { %v4662_v55 = vpop.f32.mrf.mxu0 }
 0x644   :  { %v4663_v53 = vadd.f32 %v4662_v55, %v4643_v20 }
 0x648   :  { %v4722_v28 = vpop.f32.mrf.mxu3 }
 0x64c   :  { %v4682_v48 = vpop.f32.mrf.mxu1 }
 0x64d   :  { %v4683_v1 = vadd.f32 %v4682_v48, %v4663_v53 }
 0x64f   :  { %v4703_v8 = vadd.f32 %v4702_v34, %v4683_v1 }
 0x651   :  { %v4723_v60 = vadd.f32 %v4722_v28, %v4703_v8 }
 0x653   :  { %v4761_v29 = vmul.f32 -1.442695, %v4723_v60 }
 0x655   :  { %6043 = vpow2.f32 %v4761_v29 }
 0x65b   :  { %v6044_v12 = vpop.eup %6043 }
 0x65c   :  { %v4728_v49 = vadd.f32 1.0, %v6044_v12 }
 0x65e   :  { %6045 = vrcp.f32 %v4728_v49  ;;  %v4740_v59 = vand.u32 2147483648, %v4728_v49  ;;  %v4738_v14 = vand.u32 2147483647, %v4728_v49  ;;  %vm4734_vm11 = vweird.f32 %v4728_v49 }
 0x660   :  { %v4741_v46 = vor.u32 1.1754944e-38, %v4740_v59  ;;  %vm4739_vm13 = vcmp.eq.f32.partialorder %v4738_v14, 8.507059e+37 }
 0x664   :  { %v6046_v42 = vpop.eup %6045 }
 0x665   :  { %v4730_v5 = vmul.f32 %v6046_v42, %v4728_v49  ;;  %vm4735_vm9 = vweird.f32 %v6046_v42 }
 0x666   :  { %vm4736_vm12 = vmor %vm4734_vm11, %vm4735_vm9 }
 0x667   :  { %v4731_v54 = vsub.f32 1.0, %v4730_v5 }
 0x669   :  { %v4732_v23 = vmul.f32 %v6046_v42, %v4731_v54 }
 0x66b   :  { %v4733_v61 = vadd.f32 %v6046_v42, %v4732_v23 }
 0x66d   :  { %v4737_v15 = vsel %vm4736_vm12, %v6046_v42, %v4733_v61 }
 0x66e   :  { %v4742_v37 = vsel %vm4739_vm13, %v4741_v46, %v4737_v15 }
 0x66f   :  { %4744 = vst [vmem:[#allocation2] sm:$0x3] %v4742_v37 }
 0x670   :  { %4755 = dma.vmem_to_hbm [thread:$0]  %s4751_s6, 32, %s4753_s9, [#allocation3]  }
 0x671   :  { %6071 = dma.done.wait [#allocation3], 32  }
 0x672   :  { %6072 = vsyncadd [#allocation3], 4294967264 }
 0x673   :  { %4760 = vsyncpa [#allocation3], 1 }

</bundles_post_ra>
